<compile_context>
chip_gen: v6e
topology: v6e:2x2x1
jax: 0.10.0
libtpu: 0.0.40
codegen_flags: <defaults>
</compile_context>

<pallas_src>
import functools

import jax
import jax.numpy as jnp
from jax.experimental import pallas as pl
from jax.experimental.pallas import tpu as pltpu


HIDDEN = 512          # matches the PyTorch module's hidden=512
EPS = 1e-5

_C1 = 0.7978845608028654          # sqrt(2/pi)
_C2 = 0.044715 * _C1              # folded cubic coefficient: c*(x+0.044715x^3)
                                  #   == x*(_C1 + _C2*x*x)


def _fast_gelu(x):
    # AIT "fast_gelu" == tanh-approximation GELU, computed in x.dtype.
    inner = x * (_C1 + _C2 * x * x)
    return 0.5 * x * (1.0 + jnp.tanh(inner))


def _mlp_ln_kernel(x_ref, w1_ref, b1_ref, w2_ref, b2_ref, g_ref, beta_ref,
                   o_ref, *, eps, gelu_dtype):
    x = x_ref[...]                                               # (TM, H) f32

    # dense1: bf16 MXU inputs, f32 accumulation -> (TM, 4H).
    h = jnp.dot(x.astype(jnp.bfloat16), w1_ref[...],
                preferred_element_type=jnp.float32)
    # bias + fast_gelu over the (TM, 4H) intermediate: bf16 on v6e/v7x (halves
    # VALU + ld/st traffic; h gets truncated to bf16 for the 2nd matmul anyway),
    # f32 on v5e (no bf16 VPU/EUP there).
    # TODO(synk): if a larger TM shows spill pressure on v7x, block the 4H dim
    # in 512-wide chunks (gelu + partial second dot per chunk).
    h = _fast_gelu((h + b1_ref[...]).astype(gelu_dtype))

    # dense2: bf16 MXU inputs, f32 accumulation -> (TM, H).
    y = jnp.dot(h.astype(jnp.bfloat16), w2_ref[...],
                preferred_element_type=jnp.float32)
    y = y + b2_ref[...] + x                                      # bias + residual (f32)

    # LayerNorm over H, f32 throughout.
    mean = jnp.mean(y, axis=-1, keepdims=True)
    centered = y - mean
    var = jnp.mean(centered * centered, axis=-1, keepdims=True)
    inv = jax.lax.rsqrt(var + eps)
    o_ref[...] = (centered * inv * g_ref[...] + beta_ref[...]).astype(o_ref.dtype)


def _round_up(a, b):
    return ((a + b - 1) // b) * b


def _device_kind():
    try:
        return jax.devices()[0].device_kind.lower()
    except Exception:
        return ""


def ait_simple_model(x, w1, b1, w2, b2, gamma, beta, *, eps=EPS, tm=1024):
    """x: (..., H).  w1: (H, 4H), b1: (4H,), w2: (4H, H), b2: (H,),
    gamma/beta: (H,).  Returns same shape/dtype as x."""
    orig_shape = x.shape
    H = orig_shape[-1]
    H4 = 4 * H
    assert H % 128 == 0, "hidden must be a multiple of 128 (lane dimension)"
    x2d = x.reshape(-1, H).astype(jnp.float32)
    M = x2d.shape[0]

    # Row tile: multiple of 8 (sublane granularity), no bigger than the padded
    # row count, and clamped so grid_m >= 2 whenever M allows it (keeps v7x's
    # 2nd TensorCore busy through the "parallel" grid axis; harmless on
    # single-TC v5e/v6e).
    tm = min(tm, _round_up(M, 8), _round_up(pl.cdiv(M, 2), 8))
    grid_m = pl.cdiv(M, tm)
    m_pad = grid_m * tm
    if m_pad != M:
        x2d = jnp.pad(x2d, ((0, m_pad - M), (0, 0)))

    kind = _device_kind()
    # v5e has no bf16 VPU/EUP -> keep the (TM,4H) elementwise pass in f32 there.
    gelu_dtype = jnp.float32 if "v5" in kind else jnp.bfloat16
    # v5e/v6e: 128 MiB physical VMEM -> 96 MiB cap; v7x (or unknown): 64 MiB
    # physical -> conservative 48 MiB cap.
    vmem_limit = (96 << 20) if ("v5" in kind or "v6" in kind) else (48 << 20)

    # bf16 weights feed the MXU; biases and LN params stay f32.
    w1_bf = w1.astype(jnp.bfloat16)
    w2_bf = w2.astype(jnp.bfloat16)
    b1_2d = b1.reshape(1, H4).astype(jnp.float32)
    b2_2d = b2.reshape(1, H).astype(jnp.float32)
    g_2d = gamma.reshape(1, H).astype(jnp.float32)
    beta_2d = beta.reshape(1, H).astype(jnp.float32)

    flops = 2 * m_pad * H * H4 * 2  # two (M,H)x(H,4H)-sized matmuls
    bytes_accessed = (x2d.size * 4
                      + w1_bf.size * 2 + w2_bf.size * 2
                      + (b1_2d.size + b2_2d.size + g_2d.size + beta_2d.size) * 4
                      + m_pad * H * 4)
    cost = pl.CostEstimate(flops=flops,
                           transcendentals=m_pad * H4 + m_pad,  # tanh + rsqrt
                           bytes_accessed=bytes_accessed)

    kernel = functools.partial(_mlp_ln_kernel, eps=eps, gelu_dtype=gelu_dtype)

    def run(resident_mode):
        row_spec = pl.BlockSpec((tm, H), lambda i: (i, 0))      # pipelined
        if resident_mode is None:
            resident = lambda shape: pl.BlockSpec(shape, lambda i: (0, 0))
        else:
            resident = lambda shape: pl.BlockSpec(
                shape, lambda i: (0, 0), pipeline_mode=resident_mode)
        return pl.pallas_call(
            kernel,
            out_shape=jax.ShapeDtypeStruct((m_pad, H), jnp.float32),
            grid=(grid_m,),
            in_specs=[
                row_spec,                 # x tile (double-buffered per step)
                resident((H, H4)),        # w1 (in, out), bf16, VMEM-resident
                resident((1, H4)),        # b1
                resident((H4, H)),        # w2 (in, out), bf16, VMEM-resident
                resident((1, H)),         # b2
                resident((1, H)),         # gamma
                resident((1, H)),         # beta
            ],
            out_specs=row_spec,
            compiler_params=pltpu.CompilerParams(
                dimension_semantics=("parallel",),   # independent row tiles
                vmem_limit_bytes=vmem_limit,
            ),
            cost_estimate=cost,
        )(x2d, w1_bf, b1_2d, w2_bf, b2_2d, g_2d, beta_2d)

    try:
        # Grid-invariant params never change across steps -> single buffer
        # (saves ~4 MiB VMEM; matters most on v7x's 64 MiB budget).
        out = jax.block_until_ready(run(pl.Buffered(1)))
    except Exception:
        # Older JAX / unsupported pipeline_mode: fall back to default buffering
        # (previously verified clean configuration).
        out = run(None)

    return out[:M].reshape(orig_shape).astype(x.dtype)


def _reference(x, w1, b1, w2, b2, gamma, beta, eps=EPS):
    h = _fast_gelu(x @ w1 + b1)
    y = h @ w2 + b2 + x
    mean = jnp.mean(y, axis=-1, keepdims=True)
    var = jnp.mean((y - mean) ** 2, axis=-1, keepdims=True)
    return (y - mean) * jax.lax.rsqrt(var + eps) * gamma + beta


if __name__ == "__main__":
    key = jax.random.PRNGKey(0)
    kx, k1, k2, k3, k4 = jax.random.split(key, 5)

    batch, seq, H = 2, 8, HIDDEN
    x = jax.random.normal(kx, (batch, seq, H), dtype=jnp.float32)

    # PyTorch Linear stores (out, in); we keep the math-equivalent (in, out)
    # layout so the kernel does x @ W + b.
    w1 = jax.random.normal(k1, (H, 4 * H), dtype=jnp.float32) * 0.02
    b1 = jax.random.normal(k2, (4 * H,), dtype=jnp.float32) * 0.02
    w2 = jax.random.normal(k3, (4 * H, H), dtype=jnp.float32) * 0.02
    b2 = jax.random.normal(k4, (H,), dtype=jnp.float32) * 0.02
    gamma = jnp.ones((H,), dtype=jnp.float32)
    beta = jnp.zeros((H,), dtype=jnp.float32)

    out = jax.block_until_ready(
        ait_simple_model(x, w1, b1, w2, b2, gamma, beta))

    ref = _reference(x, w1, b1, w2, b2, gamma, beta)
    assert out.shape == x.shape and out.dtype == x.dtype
    # bf16 MXU inputs / bf16 gelu (f32 accumulation + f32 residual/LayerNorm)
    # -> loosened tolerance vs the all-f32 reference.
    assert jnp.allclose(out, ref, atol=2e-2, rtol=2e-2)
    print("KERNEL_OK")
</pallas_src>

<mosaic_0001>
module attributes {stable_mosaic.version = 11 : i64} {
  func.func @_mlp_ln_kernel(%arg0: i32, %arg1: memref<8x512xf32, #tpu.memory_space<vmem>>, %arg2: memref<512x2048xbf16, #tpu.memory_space<vmem>>, %arg3: memref<1x2048xf32, #tpu.memory_space<vmem>>, %arg4: memref<2048x512xbf16, #tpu.memory_space<vmem>>, %arg5: memref<1x512xf32, #tpu.memory_space<vmem>>, %arg6: memref<1x512xf32, #tpu.memory_space<vmem>>, %arg7: memref<1x512xf32, #tpu.memory_space<vmem>>, %arg8: memref<8x512xf32, #tpu.memory_space<vmem>>) attributes {dimension_semantics = [#tpu.dimension_semantics<parallel>], iteration_bounds = array<i64: 2>, scalar_prefetch = 0 : i64, scratch_operands = 0 : i64, tpu.core_type = #tpu.core_type<tc>, window_params = [{transform_indices = @transform_0, window_bounds = array<i64: 8, 512>}, {pipeline_mode = #tpu.pipeline_mode<synchronous>, transform_indices = @transform_1, window_bounds = array<i64: 512, 2048>}, {pipeline_mode = #tpu.pipeline_mode<synchronous>, transform_indices = @transform_2, window_bounds = array<i64: 1, 2048>}, {pipeline_mode = #tpu.pipeline_mode<synchronous>, transform_indices = @transform_3, window_bounds = array<i64: 2048, 512>}, {pipeline_mode = #tpu.pipeline_mode<synchronous>, transform_indices = @transform_4, window_bounds = array<i64: 1, 512>}, {pipeline_mode = #tpu.pipeline_mode<synchronous>, transform_indices = @transform_5, window_bounds = array<i64: 1, 512>}, {pipeline_mode = #tpu.pipeline_mode<synchronous>, transform_indices = @transform_6, window_bounds = array<i64: 1, 512>}, {transform_indices = @transform_7, window_bounds = array<i64: 8, 512>}]} {
    %c0 = arith.constant 0 : index
    %c0_0 = arith.constant 0 : index
    %0 = vector.load %arg1[%c0, %c0_0] : memref<8x512xf32, #tpu.memory_space<vmem>>, vector<8x512xf32>
    %1 = arith.truncf %0 : vector<8x512xf32> to vector<8x512xbf16>
    %c0_1 = arith.constant 0 : index
    %c0_2 = arith.constant 0 : index
    %2 = vector.load %arg2[%c0_1, %c0_2] : memref<512x2048xbf16, #tpu.memory_space<vmem>>, vector<512x2048xbf16>
    %cst = arith.constant dense<0.000000e+00> : vector<8x2048xf32>
    %3 = tpu.matmul %1, %2, %cst {dimension_numbers = #tpu.dot_dimension_numbers<[1], [0], [0], [1], [0, 0, 1, 1], [], []>} : vector<8x512xbf16>, vector<512x2048xbf16>, vector<8x2048xf32> -> vector<8x2048xf32>
    %c0_3 = arith.constant 0 : index
    %c0_4 = arith.constant 0 : index
    %4 = vector.load %arg3[%c0_3, %c0_4] : memref<1x2048xf32, #tpu.memory_space<vmem>>, vector<1x2048xf32>
    %5 = vector.broadcast %4 : vector<1x2048xf32> to vector<8x2048xf32>
    %6 = arith.addf %3, %5 : vector<8x2048xf32>
    %7 = arith.truncf %6 : vector<8x2048xf32> to vector<8x2048xbf16>
    %cst_5 = arith.constant 3.564450e-02 : bf16
    %8 = vector.broadcast %cst_5 : bf16 to vector<8x2048xbf16>
    %9 = arith.mulf %8, %7 : vector<8x2048xbf16>
    %10 = arith.mulf %9, %7 : vector<8x2048xbf16>
    %cst_6 = arith.constant 7.968750e-01 : bf16
    %11 = vector.broadcast %cst_6 : bf16 to vector<8x2048xbf16>
    %12 = arith.addf %11, %10 : vector<8x2048xbf16>
    %13 = arith.mulf %7, %12 : vector<8x2048xbf16>
    %cst_7 = arith.constant 5.000000e-01 : bf16
    %14 = vector.broadcast %cst_7 : bf16 to vector<8x2048xbf16>
    %15 = arith.mulf %14, %7 : vector<8x2048xbf16>
    %16 = math.tanh %13 : vector<8x2048xbf16>
    %cst_8 = arith.constant 1.000000e+00 : bf16
    %17 = vector.broadcast %cst_8 : bf16 to vector<8x2048xbf16>
    %18 = arith.addf %17, %16 : vector<8x2048xbf16>
    %19 = arith.mulf %15, %18 : vector<8x2048xbf16>
    %c0_9 = arith.constant 0 : index
    %c0_10 = arith.constant 0 : index
    %20 = vector.load %arg4[%c0_9, %c0_10] : memref<2048x512xbf16, #tpu.memory_space<vmem>>, vector<2048x512xbf16>
    %cst_11 = arith.constant dense<0.000000e+00> : vector<8x512xf32>
    %21 = tpu.matmul %19, %20, %cst_11 {dimension_numbers = #tpu.dot_dimension_numbers<[1], [0], [0], [1], [0, 0, 1, 1], [], []>} : vector<8x2048xbf16>, vector<2048x512xbf16>, vector<8x512xf32> -> vector<8x512xf32>
    %c0_12 = arith.constant 0 : index
    %c0_13 = arith.constant 0 : index
    %22 = vector.load %arg5[%c0_12, %c0_13] : memref<1x512xf32, #tpu.memory_space<vmem>>, vector<1x512xf32>
    %23 = vector.broadcast %22 : vector<1x512xf32> to vector<8x512xf32>
    %24 = arith.addf %21, %23 : vector<8x512xf32>
    %25 = arith.addf %24, %0 : vector<8x512xf32>
    %cst_14 = arith.constant dense<0.000000e+00> : vector<8xf32>
    %26 = vector.multi_reduction <add>, %25, %cst_14 [1] : vector<8x512xf32> to vector<8xf32>
    %27 = vector.shape_cast %26 : vector<8xf32> to vector<8x1xf32>
    %cst_15 = arith.constant 5.120000e+02 : f32
    %28 = vector.broadcast %cst_15 : f32 to vector<8x1xf32>
    %29 = arith.divf %27, %28 : vector<8x1xf32>
    %30 = vector.broadcast %29 : vector<8x1xf32> to vector<8x512xf32>
    %31 = arith.subf %25, %30 : vector<8x512xf32>
    %32 = arith.mulf %31, %31 : vector<8x512xf32>
    %cst_16 = arith.constant dense<0.000000e+00> : vector<8xf32>
    %33 = vector.multi_reduction <add>, %32, %cst_16 [1] : vector<8x512xf32> to vector<8xf32>
    %34 = vector.shape_cast %33 : vector<8xf32> to vector<8x1xf32>
    %cst_17 = arith.constant 5.120000e+02 : f32
    %35 = vector.broadcast %cst_17 : f32 to vector<8x1xf32>
    %36 = arith.divf %34, %35 : vector<8x1xf32>
    %cst_18 = arith.constant 9.99999974E-6 : f32
    %37 = vector.broadcast %cst_18 : f32 to vector<8x1xf32>
    %38 = arith.addf %36, %37 : vector<8x1xf32>
    %39 = math.rsqrt %38 : vector<8x1xf32>
    %40 = vector.broadcast %39 : vector<8x1xf32> to vector<8x512xf32>
    %41 = arith.mulf %31, %40 : vector<8x512xf32>
    %c0_19 = arith.constant 0 : index
    %c0_20 = arith.constant 0 : index
    %42 = vector.load %arg6[%c0_19, %c0_20] : memref<1x512xf32, #tpu.memory_space<vmem>>, vector<1x512xf32>
    %43 = vector.broadcast %42 : vector<1x512xf32> to vector<8x512xf32>
    %44 = arith.mulf %41, %43 : vector<8x512xf32>
    %c0_21 = arith.constant 0 : index
    %c0_22 = arith.constant 0 : index
    %45 = vector.load %arg7[%c0_21, %c0_22] : memref<1x512xf32, #tpu.memory_space<vmem>>, vector<1x512xf32>
    %46 = vector.broadcast %45 : vector<1x512xf32> to vector<8x512xf32>
    %47 = arith.addf %44, %46 : vector<8x512xf32>
    %c0_23 = arith.constant 0 : index
    %c0_24 = arith.constant 0 : index
    %48 = vector.load %arg8[%c0_23, %c0_24] : memref<8x512xf32, #tpu.memory_space<vmem>>, vector<8x512xf32>
    tpu.vector_store %arg8[%c0_23, %c0_24], %47 {strides = array<i32>} : memref<8x512xf32, #tpu.memory_space<vmem>>, vector<8x512xf32>,
    return
  }
  func.func @transform_0(%arg0: i32) -> (i32, i32) {
    %c0_i32 = arith.constant 0 : i32
    %c0_i32_0 = arith.constant 0 : i32
    return %arg0, %c0_i32 : i32, i32
  }
  func.func @transform_1(%arg0: i32) -> (i32, i32) {
    %c0_i32 = arith.constant 0 : i32
    %c0_i32_0 = arith.constant 0 : i32
    %c0_i32_1 = arith.constant 0 : i32
    return %c0_i32, %c0_i32_0 : i32, i32
  }
  func.func @transform_2(%arg0: i32) -> (i32, i32) {
    %c0_i32 = arith.constant 0 : i32
    %c0_i32_0 = arith.constant 0 : i32
    %c0_i32_1 = arith.constant 0 : i32
    return %c0_i32, %c0_i32_0 : i32, i32
  }
  func.func @transform_3(%arg0: i32) -> (i32, i32) {
    %c0_i32 = arith.constant 0 : i32
    %c0_i32_0 = arith.constant 0 : i32
    %c0_i32_1 = arith.constant 0 : i32
    return %c0_i32, %c0_i32_0 : i32, i32
  }
  func.func @transform_4(%arg0: i32) -> (i32, i32) {
    %c0_i32 = arith.constant 0 : i32
    %c0_i32_0 = arith.constant 0 : i32
    %c0_i32_1 = arith.constant 0 : i32
    return %c0_i32, %c0_i32_0 : i32, i32
  }
  func.func @transform_5(%arg0: i32) -> (i32, i32) {
    %c0_i32 = arith.constant 0 : i32
    %c0_i32_0 = arith.constant 0 : i32
    %c0_i32_1 = arith.constant 0 : i32
    return %c0_i32, %c0_i32_0 : i32, i32
  }
  func.func @transform_6(%arg0: i32) -> (i32, i32) {
    %c0_i32 = arith.constant 0 : i32
    %c0_i32_0 = arith.constant 0 : i32
    %c0_i32_1 = arith.constant 0 : i32
    return %c0_i32, %c0_i32_0 : i32, i32
  }
  func.func @transform_7(%arg0: i32) -> (i32, i32) {
    %c0_i32 = arith.constant 0 : i32
    %c0_i32_0 = arith.constant 0 : i32
    return %arg0, %c0_i32 : i32, i32
  }
}

module attributes {stable_mosaic.version = 11 : i64} {
  func.func @_mlp_ln_kernel(%arg0: i32, %arg1: memref<8x512xf32, #tpu.memory_space<vmem>>, %arg2: memref<512x2048xbf16, #tpu.memory_space<vmem>>, %arg3: memref<1x2048xf32, #tpu.memory_space<vmem>>, %arg4: memref<2048x512xbf16, #tpu.memory_space<vmem>>, %arg5: memref<1x512xf32, #tpu.memory_space<vmem>>, %arg6: memref<1x512xf32, #tpu.memory_space<vmem>>, %arg7: memref<1x512xf32, #tpu.memory_space<vmem>>, %arg8: memref<8x512xf32, #tpu.memory_space<vmem>>) attributes {dimension_semantics = [#tpu.dimension_semantics<parallel>], iteration_bounds = array<i64: 2>, scalar_prefetch = 0 : i64, scratch_operands = 0 : i64, tpu.core_type = #tpu.core_type<tc>, window_params = [{transform_indices = @transform_0, window_bounds = array<i64: 8, 512>}, {pipeline_mode = #tpu.pipeline_mode<synchronous>, transform_indices = @transform_1, window_bounds = array<i64: 512, 2048>}, {pipeline_mode = #tpu.pipeline_mode<synchronous>, transform_indices = @transform_2, window_bounds = array<i64: 1, 2048>}, {pipeline_mode = #tpu.pipeline_mode<synchronous>, transform_indices = @transform_3, window_bounds = array<i64: 2048, 512>}, {pipeline_mode = #tpu.pipeline_mode<synchronous>, transform_indices = @transform_4, window_bounds = array<i64: 1, 512>}, {pipeline_mode = #tpu.pipeline_mode<synchronous>, transform_indices = @transform_5, window_bounds = array<i64: 1, 512>}, {pipeline_mode = #tpu.pipeline_mode<synchronous>, transform_indices = @transform_6, window_bounds = array<i64: 1, 512>}, {transform_indices = @transform_7, window_bounds = array<i64: 8, 512>}]} {
    %c0 = arith.constant 0 : index
    %c0_0 = arith.constant 0 : index
    %0 = vector.load %arg1[%c0, %c0_0] : memref<8x512xf32, #tpu.memory_space<vmem>>, vector<8x512xf32>
    %1 = arith.truncf %0 : vector<8x512xf32> to vector<8x512xbf16>
    %c0_1 = arith.constant 0 : index
    %c0_2 = arith.constant 0 : index
    %2 = vector.load %arg2[%c0_1, %c0_2] : memref<512x2048xbf16, #tpu.memory_space<vmem>>, vector<512x2048xbf16>
    %cst = arith.constant dense<0.000000e+00> : vector<8x2048xf32>
    %3 = tpu.matmul %1, %2, %cst {dimension_numbers = #tpu.dot_dimension_numbers<[1], [0], [0], [1], [0, 0, 1, 1], [], []>} : vector<8x512xbf16>, vector<512x2048xbf16>, vector<8x2048xf32> -> vector<8x2048xf32>
    %c0_3 = arith.constant 0 : index
    %c0_4 = arith.constant 0 : index
    %4 = vector.load %arg3[%c0_3, %c0_4] : memref<1x2048xf32, #tpu.memory_space<vmem>>, vector<1x2048xf32>
    %5 = vector.broadcast %4 : vector<1x2048xf32> to vector<8x2048xf32>
    %6 = arith.addf %3, %5 : vector<8x2048xf32>
    %7 = arith.truncf %6 : vector<8x2048xf32> to vector<8x2048xbf16>
    %cst_5 = arith.constant 3.564450e-02 : bf16
    %8 = vector.broadcast %cst_5 : bf16 to vector<8x2048xbf16>
    %9 = arith.mulf %8, %7 : vector<8x2048xbf16>
    %10 = arith.mulf %9, %7 : vector<8x2048xbf16>
    %cst_6 = arith.constant 7.968750e-01 : bf16
    %11 = vector.broadcast %cst_6 : bf16 to vector<8x2048xbf16>
    %12 = arith.addf %11, %10 : vector<8x2048xbf16>
    %13 = arith.mulf %7, %12 : vector<8x2048xbf16>
    %cst_7 = arith.constant 5.000000e-01 : bf16
    %14 = vector.broadcast %cst_7 : bf16 to vector<8x2048xbf16>
    %15 = arith.mulf %14, %7 : vector<8x2048xbf16>
    %16 = math.tanh %13 : vector<8x2048xbf16>
    %cst_8 = arith.constant 1.000000e+00 : bf16
    %17 = vector.broadcast %cst_8 : bf16 to vector<8x2048xbf16>
    %18 = arith.addf %17, %16 : vector<8x2048xbf16>
    %19 = arith.mulf %15, %18 : vector<8x2048xbf16>
    %c0_9 = arith.constant 0 : index
    %c0_10 = arith.constant 0 : index
    %20 = vector.load %arg4[%c0_9, %c0_10] : memref<2048x512xbf16, #tpu.memory_space<vmem>>, vector<2048x512xbf16>
    %cst_11 = arith.constant dense<0.000000e+00> : vector<8x512xf32>
    %21 = tpu.matmul %19, %20, %cst_11 {dimension_numbers = #tpu.dot_dimension_numbers<[1], [0], [0], [1], [0, 0, 1, 1], [], []>} : vector<8x2048xbf16>, vector<2048x512xbf16>, vector<8x512xf32> -> vector<8x512xf32>
    %c0_12 = arith.constant 0 : index
    %c0_13 = arith.constant 0 : index
    %22 = vector.load %arg5[%c0_12, %c0_13] : memref<1x512xf32, #tpu.memory_space<vmem>>, vector<1x512xf32>
    %23 = vector.broadcast %22 : vector<1x512xf32> to vector<8x512xf32>
    %24 = arith.addf %21, %23 : vector<8x512xf32>
    %25 = arith.addf %24, %0 : vector<8x512xf32>
    %cst_14 = arith.constant dense<0.000000e+00> : vector<8xf32>
    %26 = vector.multi_reduction <add>, %25, %cst_14 [1] : vector<8x512xf32> to vector<8xf32>
    %27 = vector.shape_cast %26 : vector<8xf32> to vector<8x1xf32>
    %cst_15 = arith.constant 5.120000e+02 : f32
    %28 = vector.broadcast %cst_15 : f32 to vector<8x1xf32>
    %29 = arith.divf %27, %28 : vector<8x1xf32>
    %30 = vector.broadcast %29 : vector<8x1xf32> to vector<8x512xf32>
    %31 = arith.subf %25, %30 : vector<8x512xf32>
    %32 = arith.mulf %31, %31 : vector<8x512xf32>
    %cst_16 = arith.constant dense<0.000000e+00> : vector<8xf32>
    %33 = vector.multi_reduction <add>, %32, %cst_16 [1] : vector<8x512xf32> to vector<8xf32>
    %34 = vector.shape_cast %33 : vector<8xf32> to vector<8x1xf32>
    %cst_17 = arith.constant 5.120000e+02 : f32
    %35 = vector.broadcast %cst_17 : f32 to vector<8x1xf32>
    %36 = arith.divf %34, %35 : vector<8x1xf32>
    %cst_18 = arith.constant 9.99999974E-6 : f32
    %37 = vector.broadcast %cst_18 : f32 to vector<8x1xf32>
    %38 = arith.addf %36, %37 : vector<8x1xf32>
    %39 = math.rsqrt %38 : vector<8x1xf32>
    %40 = vector.broadcast %39 : vector<8x1xf32> to vector<8x512xf32>
    %41 = arith.mulf %31, %40 : vector<8x512xf32>
    %c0_19 = arith.constant 0 : index
    %c0_20 = arith.constant 0 : index
    %42 = vector.load %arg6[%c0_19, %c0_20] : memref<1x512xf32, #tpu.memory_space<vmem>>, vector<1x512xf32>
    %43 = vector.broadcast %42 : vector<1x512xf32> to vector<8x512xf32>
    %44 = arith.mulf %41, %43 : vector<8x512xf32>
    %c0_21 = arith.constant 0 : index
    %c0_22 = arith.constant 0 : index
    %45 = vector.load %arg7[%c0_21, %c0_22] : memref<1x512xf32, #tpu.memory_space<vmem>>, vector<1x512xf32>
    %46 = vector.broadcast %45 : vector<1x512xf32> to vector<8x512xf32>
    %47 = arith.addf %44, %46 : vector<8x512xf32>
    %c0_23 = arith.constant 0 : index
    %c0_24 = arith.constant 0 : index
    %48 = vector.load %arg8[%c0_23, %c0_24] : memref<8x512xf32, #tpu.memory_space<vmem>>, vector<8x512xf32>
    tpu.vector_store %arg8[%c0_23, %c0_24], %47 {strides = array<i32>} : memref<8x512xf32, #tpu.memory_space<vmem>>, vector<8x512xf32>,
    return
  }
  func.func @transform_0(%arg0: i32) -> (i32, i32) {
    %c0_i32 = arith.constant 0 : i32
    %c0_i32_0 = arith.constant 0 : i32
    return %arg0, %c0_i32 : i32, i32
  }
  func.func @transform_1(%arg0: i32) -> (i32, i32) {
    %c0_i32 = arith.constant 0 : i32
    %c0_i32_0 = arith.constant 0 : i32
    %c0_i32_1 = arith.constant 0 : i32
    return %c0_i32, %c0_i32_0 : i32, i32
  }
  func.func @transform_2(%arg0: i32) -> (i32, i32) {
    %c0_i32 = arith.constant 0 : i32
    %c0_i32_0 = arith.constant 0 : i32
    %c0_i32_1 = arith.constant 0 : i32
    return %c0_i32, %c0_i32_0 : i32, i32
  }
  func.func @transform_3(%arg0: i32) -> (i32, i32) {
    %c0_i32 = arith.constant 0 : i32
    %c0_i32_0 = arith.constant 0 : i32
    %c0_i32_1 = arith.constant 0 : i32
    return %c0_i32, %c0_i32_0 : i32, i32
  }
  func.func @transform_4(%arg0: i32) -> (i32, i32) {
    %c0_i32 = arith.constant 0 : i32
    %c0_i32_0 = arith.constant 0 : i32
    %c0_i32_1 = arith.constant 0 : i32
    return %c0_i32, %c0_i32_0 : i32, i32
  }
  func.func @transform_5(%arg0: i32) -> (i32, i32) {
    %c0_i32 = arith.constant 0 : i32
    %c0_i32_0 = arith.constant 0 : i32
    %c0_i32_1 = arith.constant 0 : i32
    return %c0_i32, %c0_i32_0 : i32, i32
  }
  func.func @transform_6(%arg0: i32) -> (i32, i32) {
    %c0_i32 = arith.constant 0 : i32
    %c0_i32_0 = arith.constant 0 : i32
    %c0_i32_1 = arith.constant 0 : i32
    return %c0_i32, %c0_i32_0 : i32, i32
  }
  func.func @transform_7(%arg0: i32) -> (i32, i32) {
    %c0_i32 = arith.constant 0 : i32
    %c0_i32_0 = arith.constant 0 : i32
    return %arg0, %c0_i32 : i32, i32
  }
}

</mosaic_0001>

<bundles_post_ra>
// kernel: tpu_custom_call.1
= control target key start
LH: loop header
LB: loop body
LE: loop exit
PB: predicated region body
PF: predicated region fallthrough
CT: control target
= control target key end

     0   :  { %s11196_s0 = inlined_call_operand.hbm [shape: f32[16,512], index: 0, kind: input, shape index: {}]   ;;  %s11197_s1 = inlined_call_operand.hbm [shape: bf16[512,2048], index: 1, kind: input, shape index: {}]   ;;  %s11198_s2 = inlined_call_operand.hbm [shape: f32[1,2048], index: 2, kind: input, shape index: {}]   ;;  %s11199_s3 = inlined_call_operand.hbm [shape: bf16[2048,512], index: 3, kind: input, shape index: {}]   ;;  %s11200_s4 = inlined_call_operand.hbm [shape: f32[1,512], index: 4, kind: input, shape index: {}]   ;;  %s11201_s5 = inlined_call_operand.hbm [shape: f32[1,512], index: 5, kind: input, shape index: {}]   ;;  %s11202_s6 = inlined_call_operand.hbm [shape: f32[1,512], index: 6, kind: input, shape index: {}]   ;;  %s11203_s7 = inlined_call_operand.hbm [shape: f32[16,512], index: 7, kind: output, shape index: {}]  }
   0x1   :  { %11208 = sst [smem:[#allocation20_spill]] %s11197_s1 }
   0x2   :  { %11209 = sst [smem:[#allocation21_spill]] %s11198_s2 }
   0x3   :  { %12 = vsyncpa [#allocation3], 0 }
   0x4   :  { %14 = vsyncpa [#allocation3 + $0x1], 0 }
   0x5   :  { %15 = vsyncpa [#allocation6], 0 }
   0x6   :  { %16 = vsyncpa [#allocation9], 0 }
   0x7   :  { %17 = vsyncpa [#allocation12], 0 }
   0x8   :  { %18 = vsyncpa [#allocation4], 0 }
   0x9   :  { %20 = vsyncpa [#allocation4 + $0x1], 0  ;;  %s10607_s24 = smov 0   ;;  %s10609_s25 = smov 0  }
   0xa   :  { %s10611_s26 = smov 0   ;;  %s10613_s27 = smov 0  }
   0xb LB: > { %s10555_s28 = smov [#allocation5]   ;;  %s10628_s30 = sadd.s32 4294967295, %s10553_s27   ;;  %s10553_s27 = sphi %s10613_s27, %s11235_s27   ;;  %s10549_s26 = sphi %s10611_s26, %s11234_s26   ;;  %s10545_s25 = sphi %s10609_s25, %s11233_s25   ;;  %s10541_s24 = sphi %s10607_s24, %s11232_s24  }
   0xc   : > { %s221_s29 = sshll.u32 %s10555_s28, 4  ;;  %p8322_p0 = scmp.ge.s32.totalorder %s10553_s27, 1  ;;  %s222_s29 = int_to_ptr.vmem [resolvable:$true] %s221_s29 }
   0xd   : > { %p11204_p1 = scmp.eq.s32.totalorder %s10628_s30, 0  ;;  %p209_p2 = scmp.lt.s32.totalorder %s10553_s27, 3 }
   0xe   : > { %s10556_s9 = smov [#allocation8]   ;;  %s10557_s12 = smov [#allocation11]  }
   0xf   : > { %p10633_p3 = pnand %p8322_p0, %p209_p2  ;;  %s245_s10 = sshll.u32 %s10556_s9, 4  ;;  %s10646_s10 = int_to_ptr.vmem [resolvable:$true] %s245_s10 }
  0x10   : > { %s10648_s13 = sshll.u32 %s10557_s12, 4  ;;  %s10304_s15 = scalar_lea.vmem %s222_s29, 65536  ;;  %s271_s13 = int_to_ptr.vmem [resolvable:$true] %s10648_s13 }
  0x11   : > { %s11210_s8 = scalar_select %p10633_p3, 1, 0 }
  0x12   : > { %p9401_p5 = pneg %p10633_p3  ;;  %p10305_p8 = scmp.ne.s32.totalorder %s222_s29, %s10304_s15 }
  0x13   : > { %p10312_p11 = scmp.lt.s32.totalorder %s222_s29, %s222_s29  ;;  %p10313_p12 = scmp.lt.s32.totalorder %s10304_s15, %s10304_s15 }
  0x14   : > { %p10642_p6 = pnand %p9401_p5, %p11204_p1 }
  0x15   : > { %p10314_p13 = por %p10313_p12, %p10312_p11 }
  0x16   : > { %p10652_p7 = pneg %p10642_p6 }
  0x18   : > { %p10307_p9 = pnand %p10305_p8, %p10652_p7 }
  0x1a   : > { %p10308_p10 = pneg %p10307_p9 }
  0x1c   : > { %p10315_p0 = pnand %p10314_p13, %p10308_p10 }
  0x1e   : > { %10318 = shalt.err (!%p10315_p0)
}
  0x1f   : > { %s10558_s16 = smov 1024   ;;  %s10559_s17 = smov 64  }
  0x20   : > { %s11213_s1 = sld [smem:[#allocation20_spill]]  ;;  %s10330_s20 = scalar_lea.vmem %s10646_s10, 65536 }
  0x21   : > { %p10331_p2 = scmp.ne.s32.totalorder %s10646_s10, %s10330_s20  ;;  %p10338_p9 = scmp.lt.s32.totalorder %s10646_s10, %s10646_s10 }
  0x22   : > { %p10339_p10 = scmp.lt.s32.totalorder %s10330_s20, %s10330_s20 }
  0x23   : > { %p10333_p5 = pnand %p10331_p2, %p10652_p7 }
  0x24   : > { %p10340_p11 = por %p10339_p10, %p10338_p9 }
  0x25   : > { %p10334_p8 = pneg %p10333_p5 }
  0x26   : > { %9404 = dma.hbm_to_vmem [thread:$0]  (!%p10642_p6), %s11213_s1, 65536, %s222_s29, [#allocation6], %s10558_s16, %s10558_s16, %s10559_s17  }
  0x27   : > { %p10341_p12 = pnand %p10340_p11, %p10334_p8 }
  0x29   : > { %10344 = shalt.err (!%p10341_p12)
}
  0x2a   : > { %s10560_s21 = smov 256   ;;  %s10561_s22 = smov 16  }
  0x2b   : > { %9410 = dma.hbm_to_vmem [thread:$0]  (!%p10642_p6), %s11199_s3, 65536, %s10646_s10, [#allocation9], %s10560_s21, %s10560_s21, %s10561_s22  }
  0x2c   : > { %s10356_s29 = scalar_lea.vmem %s271_s13, 64  ;;  %p10364_p5 = scmp.lt.s32.totalorder %s271_s13, %s271_s13 }
  0x2d   : > { %p10357_p13 = scmp.ne.s32.totalorder %s271_s13, %s10356_s29  ;;  %p10365_p8 = scmp.lt.s32.totalorder %s10356_s29, %s10356_s29 }
  0x2f   : > { %p10359_p0 = pnand %p10357_p13, %p10652_p7  ;;  %p10366_p9 = por %p10365_p8, %p10364_p5 }
  0x31   : > { %p10360_p2 = pneg %p10359_p0 }
  0x33   : > { %p10367_p10 = pnand %p10366_p9, %p10360_p2 }
  0x35   : > { %10370 = shalt.err (!%p10367_p10)
}
  0x36   : > { %9416 = dma.hbm_to_vmem [thread:$0]  (!%p10642_p6), %s11201_s5, 64, %s271_s13, [#allocation12]  }
  0x37   : > { %s10562_s15 = smov [#allocation7]   ;;  %s10563_s16 = smov [#allocation10]  }
  0x38   : > { %s235_s10 = sshll.u32 %s10562_s15, 4  ;;  %s259_s17 = sshll.u32 %s10563_s16, 4  ;;  %s236_s10 = int_to_ptr.vmem [resolvable:$true] %s235_s10  ;;  %s260_s17 = int_to_ptr.vmem [resolvable:$true] %s259_s17 }
  0x39   : > { %s10382_s18 = scalar_lea.vmem %s236_s10, 256  ;;  %p10390_p0 = scmp.lt.s32.totalorder %s236_s10, %s236_s10 }
  0x3a   : > { %p10383_p11 = scmp.ne.s32.totalorder %s236_s10, %s10382_s18  ;;  %p10391_p2 = scmp.lt.s32.totalorder %s10382_s18, %s10382_s18 }
  0x3c   : > { %p10385_p12 = pnand %p10383_p11, %p10652_p7  ;;  %p10392_p5 = por %p10391_p2, %p10390_p0 }
  0x3e   : > { %p10386_p13 = pneg %p10385_p12 }
  0x40   : > { %p10393_p8 = pnand %p10392_p5, %p10386_p13 }
  0x42   : > { %10396 = shalt.err (!%p10393_p8)
}
  0x43   : > { %s11214_s2 = sld [smem:[#allocation21_spill]]  ;;  %s10408_s13 = scalar_lea.vmem %s260_s17, 64 }
  0x44   : > { %p10409_p9 = scmp.ne.s32.totalorder %s260_s17, %s10408_s13  ;;  %p10416_p11 = scmp.lt.s32.totalorder %s260_s17, %s260_s17 }
  0x45   : > { %p10417_p12 = scmp.lt.s32.totalorder %s10408_s13, %s10408_s13 }
  0x46   : > { %p10411_p10 = pnand %p10409_p9, %p10652_p7 }
  0x47   : > { %p10418_p1 = por %p10417_p12, %p10416_p11 }
  0x48   : > { %p10412_p4 = pneg %p10411_p10 }
  0x49   : > { %9407 = dma.hbm_to_vmem [thread:$0]  (!%p10642_p6), %s11214_s2, 256, %s236_s10, [#allocation6]  }
  0x4a   : > { %p10419_p3 = pnand %p10418_p1, %p10412_p4 }
  0x4c   : > { %10422 = shalt.err (!%p10419_p3)
}
  0x4d   : > { %9413 = dma.hbm_to_vmem [thread:$0]  (!%p10642_p6), %s11200_s4, 64, %s260_s17, [#allocation9]  }
  0x4e   : > { %s10564_s23 = smov [#allocation13]  }
  0x4f   : > { %s281_s28 = sshll.u32 %s10564_s23, 4  ;;  %s282_s28 = int_to_ptr.vmem [resolvable:$true] %s281_s28 }
  0x50   : > { %s10434_s29 = scalar_lea.vmem %s282_s28, 64  ;;  %p10442_p5 = scmp.lt.s32.totalorder %s282_s28, %s282_s28 }
  0x51   : > { %p10435_p13 = scmp.ne.s32.totalorder %s282_s28, %s10434_s29  ;;  %p10443_p8 = scmp.lt.s32.totalorder %s10434_s29, %s10434_s29 }
  0x53   : > { %p10437_p0 = pnand %p10435_p13, %p10652_p7  ;;  %p10444_p9 = por %p10443_p8, %p10442_p5 }
  0x55   : > { %p10438_p2 = pneg %p10437_p0 }
  0x57   : > { %p10445_p1 = pnand %p10444_p9, %p10438_p2 }
  0x59   : > { %10448 = shalt.err (!%p10445_p1)
}
  0x5a   : > { %9419 = dma.hbm_to_vmem [thread:$0]  (!%p10642_p6), %s11202_s6, 64, %s282_s28, [#allocation12]  }
  0x5b   : > { %s8321_s14 = sadd.s32 4294967294, %s10553_s27   ;;  %s10706_s11 = sadd.s32 1, %s10553_s27  }
  0x5c   : > { %s30_s15 = ssub.s32 %s10553_s27, %s10706_s11  ;;  %s33_s10 = sadd.s32 1, %s10549_s26 }
  0x5d   : > { %p31_p3 = scmp.eq.s32.totalorder %s30_s15, 0  ;;  %p40_p4 = scmp.ne.s32.totalorder %s10549_s26, %s10545_s25 }
  0x5e   : > { %p41_p7 = scmp.eq.s32.totalorder %s10553_s27, 0  ;;  %p46_p10 = scmp.ne.s32.totalorder %s10545_s25, %s10541_s24 }
  0x5f   : > { %s10717_s16 = scalar_select %p31_p3, %s10549_s26, %s33_s10  }
  0x60   : > { %p10719_p11 = por %p41_p7, %p40_p4  ;;  %p11216_p12 = scmp.eq.s32.totalorder %s10628_s30, 0 }
  0x61   : > { %p196_p13 = scmp.eq.s32.totalorder %s10628_s30, 1  ;;  %p202_p0 = scmp.eq.s32.totalorder %s8321_s14, 1 }
  0x62   : > { %p10725_p6 = por %p11216_p12, %p46_p10  ;;  %p9434_p2 = scmp.lt.s32.totalorder %s10553_s27, 2 }
  0x63   : > { %s292_s19 = sand.u32 1, %s10549_s26   ;;  %p10732_p5 = por %p196_p13, %p40_p4 }
  0x64   : > { %s11217_s18 = scalar_select %p10725_p6, 1, 0 }
  0x65   : > { %s11218_s20 = scalar_select %p10732_p5, 1, 0 }
  0x66   : > { %p10736_p8 = por %p202_p0, %p46_p10  ;;  %s8330_s21 = sshll.u32 %s292_s19, 5 }
  0x67   : > { %s9371_s22 = sshll.u32 %s10553_s27, 9  ;;  %s296_s9 = scalar_lea.vmem [#allocation2], %s8330_s21 }
  0x68   : > { %s11219_s13 = scalar_select %p10736_p8, 1, 0 }
  0x69   : > { %s10744_s29 = scalar_lea.hbm %s11196_s0, %s9371_s22  ;;  %s304_s12 = sshll.u32 %s296_s9, 4  ;;  %s305_s12 = int_to_ptr.vmem [resolvable:$true] %s304_s12 }
  0x6a   : > { %p10748_p9 = pnand %p9434_p2, %p10719_p11  ;;  %s293_s15 = scalar_lea.sflag [#allocation3], %s292_s19 }
  0x6b   : > { %s10449_s10 = scalar_lea.hbm %s10744_s29, 512  ;;  %s10454_s28 = scalar_lea.hbm %s11196_s0, 1024 }
  0x6c   : > { %p10450_p1 = scmp.ne.s32.totalorder %s10744_s29, %s10449_s10  ;;  %p10451_p3 = pneg %p10748_p9 }
  0x6d   : > { %p10455_p10 = scmp.lt.s32.totalorder %s10744_s29, %s11196_s0  ;;  %p10456_p11 = scmp.lt.s32.totalorder %s10454_s28, %s10449_s10 }
  0x6e   : > { %p10452_p4 = pnand %p10451_p3, %p10450_p1 }
  0x6f   : > { %p10457_p12 = por %p10456_p11, %p10455_p10 }
  0x70   : > { %p10453_p7 = pneg %p10452_p4 }
  0x72   : > { %p10458_p13 = pnand %p10457_p12, %p10453_p7 }
  0x74   : > { %10461 = shalt.err (!%p10458_p13)
}
  0x75   : > { %s10462_s17 = scalar_lea.vmem %s305_s12, 512  ;;  %s10565_s19 = smov [#allocation2]  }
  0x76   : > { %p10463_p0 = scmp.ne.s32.totalorder %s305_s12, %s10462_s17  ;;  %s10467_s1 = sshll.u32 %s10565_s19, 4  ;;  %s10468_s1 = int_to_ptr.vmem [resolvable:$false] %s10467_s1 }
  0x77   : > { %s10469_s2 = scalar_lea.vmem %s10468_s1, 1024  ;;  %p10470_p1 = scmp.lt.s32.totalorder %s305_s12, %s10468_s1 }
  0x78   : > { %p10465_p2 = pnand %p10463_p0, %p10451_p3  ;;  %p10471_p4 = scmp.lt.s32.totalorder %s10469_s2, %s10462_s17 }
  0x7a   : > { %p10466_p8 = pneg %p10465_p2  ;;  %p10472_p5 = por %p10471_p4, %p10470_p1 }
  0x7c   : > { %p10473_p6 = pnand %p10472_p5, %p10466_p8 }
  0x7e   : > { %10476 = shalt.err (!%p10473_p6)
}
  0x7f   : > { %9423 = dma.hbm_to_vmem [thread:$0]  (!%p10748_p9), %s10744_s29, 512, %s305_s12, %s293_s15  }
  0x80   : > { %p11221_p7 = scmp.ne.s32.totalorder %s11210_s8, 0 }
  0x81   : > { %s10769_s10 = sand.u32 (!%p11221_p7), 1, %s10545_s25   ;;  %p11222_p6 = scmp.ne.s32.totalorder (!%p11221_p7), %s11217_s18, 0 }
  0x82   : > { %313 = sbr.rel (%p11221_p7) target bundleno = 1703 (0x6a7), region = 48  ;;  %s8334_s22 = sshll.u32 (!%p11221_p7), %s10769_s10, 5 }
  0x83   : > { %s316_s1 = scalar_lea.sflag (!%p11221_p7), [#allocation3], %s10769_s10  ;;  %s10775_s2 = scalar_lea.vmem (!%p11221_p7), [#allocation2], %s8334_s22 }
  0x87   : > { %10520 = dma.done.wait (%p11222_p6), %s316_s1, 512  }
  0x88   : > { %10522 = vsyncadd (%p11222_p6), %s316_s1, 4294966784  ;;  %p11223_p5 = scmp.eq.s32.totalorder %s10628_s30, 0 }
  0x8a   : > { %10524 = dma.done.wait (%p11223_p5), [#allocation6], 65792   ;;  %p11224_p8 = pmov %p11223_p5 }
  0x8b   : > { %p11225_p9 = pmov %p11223_p5 }
  0x8c   : > { %10526 = vsyncadd (%p11224_p8), [#allocation6], 4294901504 }
  0x8d   : > { %10528 = dma.done.wait (%p11225_p9), [#allocation9], 65600   ;;  %p11226_p3 = pmov %p11223_p5 }
  0x8f   : > { %10530 = vsyncadd (%p11226_p3), [#allocation9], 4294901696  ;;  %p11227_p10 = pmov %p11226_p3 }
  0x90   : > { %p11228_p11 = pmov %p11226_p3 }
  0x91   : > { %10532 = dma.done.wait (%p11227_p10), [#allocation12], 128  }
  0x92   : > { %10534 = vsyncadd (%p11228_p11), [#allocation12], 4294967168  ;;  %v498_v0 = vld [vmem:[#allocation5 + $0x380] sm:$0xff]  ;;  %v379_v53 = vld [vmem:[%s10775_s2 + $0x8] sm:$0xff]  ;;  %s9372_s8 = sshll.u32 %s10628_s30, 9  ;;  %s373_s18 = scalar_lea.vmem [#allocation14], %s8334_s22 }
  0x93   : > { %v506_v1 = vld [vmem:[#allocation5 + $0x3c0] sm:$0xff]  ;;  %v381_v54 = vld [vmem:[%s10775_s2 + $0x18] sm:$0xff]  ;;  %v10795_v58 = vpack.c.bf16 %v379_v53, %v379_v53  ;;  %s8194_s29 = sshll.u32 %s373_s18, 4  ;;  %s11153_s15 = scalar_lea.hbm %s11203_s7, %s9372_s8  ;;  %s11155_s29 = int_to_ptr.vmem [resolvable:$true] %s8194_s29 }
  0x94   : > { %v754_v2 = vld [vmem:[#allocation5 + $0xb80] sm:$0xff]  ;;  %v8455_v3 = vcombine.high %v498_v0, %v506_v1  ;;  %v8454_v5 = vcombine.low %v498_v0, %v506_v1  ;;  %v10797_v59 = vpack.c.bf16 %v381_v54, %v381_v54  ;;  %s8180_s30 = scalar_lea.sflag [#allocation4], %s10769_s10  ;;  %s10477_s23 = scalar_lea.vmem %s11155_s29, 512 }
  0x95   : > { %v762_v4 = vld [vmem:[#allocation5 + $0xbc0] sm:$0xff]  ;;  %3574 = vmatprep.mubr.bf16.mxu0 %v10795_v58  ;;  %p10478_p12 = scmp.ne.s32.totalorder %s11155_s29, %s10477_s23  ;;  %p11229_p13 = scmp.ne.s32.totalorder %s11218_s20, 0 }
  0x96   : > { %v482_v6 = vld [vmem:[#allocation5 + $0x300] sm:$0xff]  ;;  %v8711_v8 = vcombine.high %v754_v2, %v762_v4  ;;  %v8710_v9 = vcombine.low %v754_v2, %v762_v4  ;;  %3542 = vmatprep.subr.bf16.mxu0 %v8455_v3  ;;  %3615 = vmatprep.mubr.bf16.mxu1 %v10797_v59  ;;  %s10566_s28 = smov [#allocation14]  }
  0x97   : > { %v490_v7 = vld [vmem:[#allocation5 + $0x340] sm:$0xff]  ;;  %3543 = vmatpush1.bf16.msra.mxu0 %v8454_v5  ;;  %p10479_p0 = pnand %p10478_p12, %p11229_p13  ;;  %s10481_s21 = sshll.u32 %s10566_s28, 4  ;;  %s10482_s21 = int_to_ptr.vmem [resolvable:$false] %s10481_s21 }
  0x98   : > { %v8439_v10 = vcombine.high %v482_v6, %v490_v7  ;;  %v738_v11 = vld [vmem:[#allocation5 + $0xb00] sm:$0xff]  ;;  %3583 = vmatprep.subr.bf16.mxu1 %v8711_v8  ;;  %v8438_v18 = vcombine.low %v482_v6, %v490_v7  ;;  %s10483_s9 = scalar_lea.vmem %s10482_s21, 1024  ;;  %p10484_p1 = scmp.lt.s32.totalorder %s11155_s29, %s10482_s21 }
  0x99   : > { %v746_v12 = vld [vmem:[#allocation5 + $0xb40] sm:$0xff]  ;;  %3584 = vmatpush1.bf16.msra.mxu1 %v8710_v9  ;;  %p10480_p2 = pneg %p10479_p0  ;;  %p10485_p4 = scmp.lt.s32.totalorder %s10483_s9, %s10477_s23 }
  0x9a   : > { %v466_v13 = vld [vmem:[#allocation5 + $0x280] sm:$0xff]  ;;  %v8695_v14 = vcombine.high %v738_v11, %v746_v12  ;;  %3544 = vmatprep.subr.bf16.mxu0 %v8439_v10  ;;  %v8694_v19 = vcombine.low %v738_v11, %v746_v12 }
  0x9b   : > { %v474_v15 = vld [vmem:[#allocation5 + $0x2c0] sm:$0xff]  ;;  %3545 = vmatpush1.bf16.msra.mxu0 %v8438_v18  ;;  %p10486_p7 = por %p10485_p4, %p10484_p1 }
  0x9c   : > { %v722_v16 = vld [vmem:[#allocation5 + $0xa80] sm:$0xff]  ;;  %v8423_v20 = vcombine.high %v466_v13, %v474_v15  ;;  %3585 = vmatprep.subr.bf16.mxu1 %v8695_v14  ;;  %v8422_v26 = vcombine.low %v466_v13, %v474_v15 }
  0x9d   : > { %v730_v17 = vld [vmem:[#allocation5 + $0xac0] sm:$0xff]  ;;  %3586 = vmatpush1.bf16.msra.mxu1 %v8694_v19  ;;  %p10487_p6 = pnand %p10486_p7, %p10480_p2 }
  0x9e   : > { %v8679_v21 = vcombine.high %v722_v16, %v730_v17  ;;  %v450_v22 = vld [vmem:[#allocation5 + $0x200] sm:$0xff]  ;;  %3546 = vmatprep.subr.bf16.mxu0 %v8423_v20  ;;  %v8678_v27 = vcombine.low %v722_v16, %v730_v17 }
  0x9f   : > { %v458_v23 = vld [vmem:[#allocation5 + $0x240] sm:$0xff]  ;;  %3547 = vmatpush1.bf16.msra.mxu0 %v8422_v26 }
  0xa0   : > { %v706_v24 = vld [vmem:[#allocation5 + $0xa00] sm:$0xff]  ;;  %v8407_v28 = vcombine.high %v450_v22, %v458_v23  ;;  %3587 = vmatprep.subr.bf16.mxu1 %v8679_v21  ;;  %v8406_v34 = vcombine.low %v450_v22, %v458_v23 }
  0xa1   : > { %v714_v25 = vld [vmem:[#allocation5 + $0xa40] sm:$0xff]  ;;  %3588 = vmatpush1.bf16.msra.mxu1 %v8678_v27 }
  0xa2   : > { %v8663_v29 = vcombine.high %v706_v24, %v714_v25  ;;  %v434_v30 = vld [vmem:[#allocation5 + $0x180] sm:$0xff]  ;;  %3548 = vmatprep.subr.bf16.mxu0 %v8407_v28  ;;  %v8662_v35 = vcombine.low %v706_v24, %v714_v25 }
  0xa3   : > { %v442_v31 = vld [vmem:[#allocation5 + $0x1c0] sm:$0xff]  ;;  %3549 = vmatpush1.bf16.msra.mxu0 %v8406_v34 }
  0xa4   : > { %v690_v32 = vld [vmem:[#allocation5 + $0x980] sm:$0xff]  ;;  %v8391_v36 = vcombine.high %v434_v30, %v442_v31  ;;  %3589 = vmatprep.subr.bf16.mxu1 %v8663_v29  ;;  %v8390_v42 = vcombine.low %v434_v30, %v442_v31 }
  0xa5   : > { %v698_v33 = vld [vmem:[#allocation5 + $0x9c0] sm:$0xff]  ;;  %3590 = vmatpush1.bf16.msra.mxu1 %v8662_v35 }
  0xa6   : > { %v8647_v37 = vcombine.high %v690_v32, %v698_v33  ;;  %v418_v38 = vld [vmem:[#allocation5 + $0x100] sm:$0xff]  ;;  %3550 = vmatprep.subr.bf16.mxu0 %v8391_v36  ;;  %v8646_v43 = vcombine.low %v690_v32, %v698_v33 }
  0xa7   : > { %v426_v39 = vld [vmem:[#allocation5 + $0x140] sm:$0xff]  ;;  %3551 = vmatpush1.bf16.msra.mxu0 %v8390_v42 }
  0xa8   : > { %v674_v40 = vld [vmem:[#allocation5 + $0x900] sm:$0xff]  ;;  %v8375_v44 = vcombine.high %v418_v38, %v426_v39  ;;  %3591 = vmatprep.subr.bf16.mxu1 %v8647_v37  ;;  %v8374_v50 = vcombine.low %v418_v38, %v426_v39 }
  0xa9   : > { %v682_v41 = vld [vmem:[#allocation5 + $0x940] sm:$0xff]  ;;  %3592 = vmatpush1.bf16.msra.mxu1 %v8646_v43 }
  0xaa   : > { %v8631_v45 = vcombine.high %v674_v40, %v682_v41  ;;  %v402_v46 = vld [vmem:[#allocation5 + $0x80] sm:$0xff]  ;;  %3552 = vmatprep.subr.bf16.mxu0 %v8375_v44  ;;  %v8630_v51 = vcombine.low %v674_v40, %v682_v41 }
  0xab   : > { %v410_v47 = vld [vmem:[#allocation5 + $0xc0] sm:$0xff]  ;;  %3553 = vmatpush1.bf16.msra.mxu0 %v8374_v50 }
  0xac   : > { %v658_v48 = vld [vmem:[#allocation5 + $0x880] sm:$0xff]  ;;  %v8359_v52 = vcombine.high %v402_v46, %v410_v47  ;;  %3593 = vmatprep.subr.bf16.mxu1 %v8631_v45  ;;  %v8358_v62 = vcombine.low %v402_v46, %v410_v47 }
  0xad   : > { %v666_v49 = vld [vmem:[#allocation5 + $0x8c0] sm:$0xff]  ;;  %3594 = vmatpush1.bf16.msra.mxu1 %v8630_v51 }
  0xae   : > { %v8615_v55 = vcombine.high %v658_v48, %v666_v49  ;;  %v386_v56 = vld [vmem:[#allocation5] sm:$0xff]  ;;  %3554 = vmatprep.subr.bf16.mxu0 %v8359_v52  ;;  %v8614_v63 = vcombine.low %v658_v48, %v666_v49 }
  0xaf   : > { %v394_v57 = vld [vmem:[#allocation5 + $0x40] sm:$0xff]  ;;  %3555 = vmatpush1.bf16.msra.mxu0 %v8358_v62 }
  0xb0   : > { %v642_v60 = vld [vmem:[#allocation5 + $0x800] sm:$0xff]  ;;  %v8343_v0 = vcombine.high %v386_v56, %v394_v57  ;;  %3595 = vmatprep.subr.bf16.mxu1 %v8615_v55  ;;  %v8342_v6 = vcombine.low %v386_v56, %v394_v57 }
  0xb1   : > { %v650_v61 = vld [vmem:[#allocation5 + $0x840] sm:$0xff]  ;;  %3596 = vmatpush1.bf16.msra.mxu1 %v8614_v63 }
  0xb2   : > { %v8599_v1 = vcombine.high %v642_v60, %v650_v61  ;;  %v626_v2 = vld [vmem:[#allocation5 + $0x780] sm:$0xff]  ;;  %3556 = vmatprep.subr.bf16.mxu0 %v8343_v0  ;;  %v8598_v7 = vcombine.low %v642_v60, %v650_v61 }
  0xb3   : > { %v634_v3 = vld [vmem:[#allocation5 + $0x7c0] sm:$0xff]  ;;  %3557 = vmatpush1.bf16.msra.mxu0 %v8342_v6  ;;  %v755_v6 = vld [vmem:[#allocation5 + $0xb88] sm:$0xff] }
  0xb4   : > { %v882_v4 = vld [vmem:[#allocation5 + $0xf80] sm:$0xff]  ;;  %v8583_v8 = vcombine.high %v626_v2, %v634_v3  ;;  %3597 = vmatprep.subr.bf16.mxu1 %v8599_v1  ;;  %v8582_v14 = vcombine.low %v626_v2, %v634_v3 }
  0xb5   : > { %v890_v5 = vld [vmem:[#allocation5 + $0xfc0] sm:$0xff]  ;;  %3598 = vmatpush1.bf16.msra.mxu1 %v8598_v7  ;;  %v763_v7 = vld [vmem:[#allocation5 + $0xbc8] sm:$0xff] }
  0xb6   : > { %v8839_v9 = vcombine.high %v882_v4, %v890_v5  ;;  %v610_v10 = vld [vmem:[#allocation5 + $0x700] sm:$0xff]  ;;  %3558 = vmatprep.subr.bf16.mxu0 %v8583_v8  ;;  %v8838_v15 = vcombine.low %v882_v4, %v890_v5  ;;  %v499_v4 = vld [vmem:[#allocation5 + $0x388] sm:$0xff] }
  0xb7   : > { %v618_v11 = vld [vmem:[#allocation5 + $0x740] sm:$0xff]  ;;  %3559 = vmatpush2.bf16.msra.mxu0 %v8582_v14  ;;  %v507_v5 = vld [vmem:[#allocation5 + $0x3c8] sm:$0xff] }
  0xb8   : > { %v866_v12 = vld [vmem:[#allocation5 + $0xf00] sm:$0xff]  ;;  %v8567_v16 = vcombine.high %v610_v10, %v618_v11  ;;  %3599 = vmatprep.subr.bf16.mxu1 %v8839_v9  ;;  %v8566_v22 = vcombine.low %v610_v10, %v618_v11  ;;  %v380_v11 = vld [vmem:[%s10775_s2 + $0x10] sm:$0xff]  ;;  %v483_v14 = vld [vmem:[#allocation5 + $0x308] sm:$0xff] }
  0xb9   : > { %v874_v13 = vld [vmem:[#allocation5 + $0xf40] sm:$0xff]  ;;  %3600 = vmatpush2.bf16.msra.mxu1 %v8838_v15  ;;  %v491_v15 = vld [vmem:[#allocation5 + $0x348] sm:$0xff] }
  0xba   : > { %v8823_v17 = vcombine.high %v866_v12, %v874_v13  ;;  %v594_v18 = vld [vmem:[#allocation5 + $0x680] sm:$0xff]  ;;  %3560 = vmatprep.subr.bf16.mxu0 %v8567_v16  ;;  %v8822_v23 = vcombine.low %v866_v12, %v874_v13  ;;  %v8457_v12 = vcombine.high %v499_v4, %v507_v5  ;;  %v8713_v13 = vcombine.high %v755_v6, %v763_v7 }
  0xbb   : > { %v602_v19 = vld [vmem:[#allocation5 + $0x6c0] sm:$0xff]  ;;  %3561 = vmatpush2.bf16.msra.mxu0 %v8566_v22  ;;  %v8441_v22 = vcombine.high %v483_v14, %v491_v15 }
  0xbc   : > { %v850_v20 = vld [vmem:[#allocation5 + $0xe80] sm:$0xff]  ;;  %v8551_v24 = vcombine.high %v594_v18, %v602_v19  ;;  %3601 = vmatprep.subr.bf16.mxu1 %v8823_v17  ;;  %v8550_v30 = vcombine.low %v594_v18, %v602_v19  ;;  %v739_v17 = vld [vmem:[#allocation5 + $0xb08] sm:$0xff]  ;;  %v10805_v19 = vpack.c.bf16 %v380_v11, %v380_v11 }
  0xbd   : > { %v858_v21 = vld [vmem:[#allocation5 + $0xec0] sm:$0xff]  ;;  %3602 = vmatpush2.bf16.msra.mxu1 %v8822_v23  ;;  %v747_v18 = vld [vmem:[#allocation5 + $0xb48] sm:$0xff] }
  0xbe   : > { %v8807_v25 = vcombine.high %v850_v20, %v858_v21  ;;  %v578_v26 = vld [vmem:[#allocation5 + $0x600] sm:$0xff]  ;;  %3562 = vmatprep.subr.bf16.mxu0 %v8551_v24  ;;  %v8806_v31 = vcombine.low %v850_v20, %v858_v21  ;;  %v8456_v20 = vcombine.low %v499_v4, %v507_v5  ;;  %v8712_v21 = vcombine.low %v755_v6, %v763_v7  ;;  %v467_v23 = vld [vmem:[#allocation5 + $0x288] sm:$0xff] }
  0xbf   : > { %v586_v27 = vld [vmem:[#allocation5 + $0x640] sm:$0xff]  ;;  %3563 = vmatpush2.bf16.msra.mxu0 %v8550_v30  ;;  %v475_v24 = vld [vmem:[#allocation5 + $0x2c8] sm:$0xff] }
  0xc0   : > { %v834_v28 = vld [vmem:[#allocation5 + $0xe00] sm:$0xff]  ;;  %v8535_v32 = vcombine.high %v578_v26, %v586_v27  ;;  %3603 = vmatprep.subr.bf16.mxu1 %v8807_v25  ;;  %v8534_v38 = vcombine.low %v578_v26, %v586_v27  ;;  %v8697_v25 = vcombine.high %v739_v17, %v747_v18  ;;  %v723_v26 = vld [vmem:[#allocation5 + $0xa88] sm:$0xff]  ;;  %v8425_v30 = vcombine.high %v467_v23, %v475_v24 }
  0xc1   : > { %v842_v29 = vld [vmem:[#allocation5 + $0xe40] sm:$0xff]  ;;  %3604 = vmatpush2.bf16.msra.mxu1 %v8806_v31  ;;  %v731_v27 = vld [vmem:[#allocation5 + $0xac8] sm:$0xff] }
  0xc2   : > { %v8791_v33 = vcombine.high %v834_v28, %v842_v29  ;;  %v562_v34 = vld [vmem:[#allocation5 + $0x580] sm:$0xff]  ;;  %3564 = vmatprep.subr.bf16.mxu0 %v8535_v32  ;;  %v8790_v39 = vcombine.low %v834_v28, %v842_v29  ;;  %v8440_v28 = vcombine.low %v483_v14, %v491_v15  ;;  %v8696_v29 = vcombine.low %v739_v17, %v747_v18  ;;  %v451_v31 = vld [vmem:[#allocation5 + $0x208] sm:$0xff] }
  0xc3   : > { %v570_v35 = vld [vmem:[#allocation5 + $0x5c0] sm:$0xff]  ;;  %3565 = vmatpush2.bf16.msra.mxu0 %v8534_v38  ;;  %v459_v32 = vld [vmem:[#allocation5 + $0x248] sm:$0xff] }
  0xc4   : > { %v818_v36 = vld [vmem:[#allocation5 + $0xd80] sm:$0xff]  ;;  %v8519_v40 = vcombine.high %v562_v34, %v570_v35  ;;  %3605 = vmatprep.subr.bf16.mxu1 %v8791_v33  ;;  %v8518_v46 = vcombine.low %v562_v34, %v570_v35  ;;  %v707_v33 = vld [vmem:[#allocation5 + $0xa08] sm:$0xff]  ;;  %v8681_v34 = vcombine.high %v723_v26, %v731_v27  ;;  %v8409_v38 = vcombine.high %v451_v31, %v459_v32 }
  0xc5   : > { %v826_v37 = vld [vmem:[#allocation5 + $0xdc0] sm:$0xff]  ;;  %3606 = vmatpush2.bf16.msra.mxu1 %v8790_v39  ;;  %v715_v35 = vld [vmem:[#allocation5 + $0xa48] sm:$0xff] }
  0xc6   : > { %v8775_v41 = vcombine.high %v818_v36, %v826_v37  ;;  %v546_v42 = vld [vmem:[#allocation5 + $0x500] sm:$0xff]  ;;  %3566 = vmatprep.subr.bf16.mxu0 %v8519_v40  ;;  %v8774_v47 = vcombine.low %v818_v36, %v826_v37  ;;  %v8424_v36 = vcombine.low %v467_v23, %v475_v24  ;;  %v8680_v37 = vcombine.low %v723_v26, %v731_v27  ;;  %v435_v39 = vld [vmem:[#allocation5 + $0x188] sm:$0xff] }
  0xc7   : > { %v554_v43 = vld [vmem:[#allocation5 + $0x540] sm:$0xff]  ;;  %3567 = vmatpush2.bf16.msra.mxu0 %v8518_v46  ;;  %v443_v40 = vld [vmem:[#allocation5 + $0x1c8] sm:$0xff] }
  0xc8   : > { %v802_v44 = vld [vmem:[#allocation5 + $0xd00] sm:$0xff]  ;;  %v8503_v48 = vcombine.high %v546_v42, %v554_v43  ;;  %3607 = vmatprep.subr.bf16.mxu1 %v8775_v41  ;;  %v8502_v54 = vcombine.low %v546_v42, %v554_v43  ;;  %v691_v41 = vld [vmem:[#allocation5 + $0x988] sm:$0xff]  ;;  %v8665_v42 = vcombine.high %v707_v33, %v715_v35  ;;  %v8393_v46 = vcombine.high %v435_v39, %v443_v40 }
  0xc9   : > { %v810_v45 = vld [vmem:[#allocation5 + $0xd40] sm:$0xff]  ;;  %3608 = vmatpush2.bf16.msra.mxu1 %v8774_v47  ;;  %v699_v43 = vld [vmem:[#allocation5 + $0x9c8] sm:$0xff] }
  0xca   : > { %v8759_v49 = vcombine.high %v802_v44, %v810_v45  ;;  %v530_v50 = vld [vmem:[#allocation5 + $0x480] sm:$0xff]  ;;  %3568 = vmatprep.subr.bf16.mxu0 %v8503_v48  ;;  %v8758_v55 = vcombine.low %v802_v44, %v810_v45  ;;  %v8408_v44 = vcombine.low %v451_v31, %v459_v32  ;;  %v8664_v45 = vcombine.low %v707_v33, %v715_v35  ;;  %v419_v47 = vld [vmem:[#allocation5 + $0x108] sm:$0xff] }
  0xcb   : > { %v538_v51 = vld [vmem:[#allocation5 + $0x4c0] sm:$0xff]  ;;  %3569 = vmatpush2.bf16.msra.mxu0 %v8502_v54  ;;  %v427_v48 = vld [vmem:[#allocation5 + $0x148] sm:$0xff] }
  0xcc   : > { %v786_v52 = vld [vmem:[#allocation5 + $0xc80] sm:$0xff]  ;;  %v8487_v56 = vcombine.high %v530_v50, %v538_v51  ;;  %3609 = vmatprep.subr.bf16.mxu1 %v8759_v49  ;;  %v8486_v0 = vcombine.low %v530_v50, %v538_v51  ;;  %v675_v49 = vld [vmem:[#allocation5 + $0x908] sm:$0xff]  ;;  %v8649_v50 = vcombine.high %v691_v41, %v699_v43  ;;  %v8377_v54 = vcombine.high %v419_v47, %v427_v48 }
  0xcd   : > { %v794_v53 = vld [vmem:[#allocation5 + $0xcc0] sm:$0xff]  ;;  %3610 = vmatpush2.bf16.msra.mxu1 %v8758_v55  ;;  %v683_v51 = vld [vmem:[#allocation5 + $0x948] sm:$0xff] }
  0xce   : > { %v8743_v57 = vcombine.high %v786_v52, %v794_v53  ;;  %v514_v60 = vld [vmem:[#allocation5 + $0x400] sm:$0xff]  ;;  %3570 = vmatprep.subr.bf16.mxu0 %v8487_v56  ;;  %v8742_v1 = vcombine.low %v786_v52, %v794_v53  ;;  %v8392_v52 = vcombine.low %v435_v39, %v443_v40  ;;  %v8648_v53 = vcombine.low %v691_v41, %v699_v43  ;;  %v403_v55 = vld [vmem:[#allocation5 + $0x88] sm:$0xff] }
  0xcf   : > { %v522_v61 = vld [vmem:[#allocation5 + $0x440] sm:$0xff]  ;;  %3571 = vmatpush2.bf16.msra.mxu0 %v8486_v0  ;;  %v411_v56 = vld [vmem:[#allocation5 + $0xc8] sm:$0xff] }
  0xd0   : > { %v770_v62 = vld [vmem:[#allocation5 + $0xc00] sm:$0xff]  ;;  %v8471_v2 = vcombine.high %v514_v60, %v522_v61  ;;  %3611 = vmatprep.subr.bf16.mxu1 %v8743_v57  ;;  %v8470_v8 = vcombine.low %v514_v60, %v522_v61  ;;  %v659_v57 = vld [vmem:[#allocation5 + $0x888] sm:$0xff]  ;;  %v8633_v60 = vcombine.high %v675_v49, %v683_v51  ;;  %v8361_v0 = vcombine.high %v403_v55, %v411_v56 }
  0xd1   : > { %v778_v63 = vld [vmem:[#allocation5 + $0xc40] sm:$0xff]  ;;  %3612 = vmatpush2.bf16.msra.mxu1 %v8742_v1  ;;  %v667_v61 = vld [vmem:[#allocation5 + $0x8c8] sm:$0xff]  ;;  %v8360_v6 = vcombine.low %v403_v55, %v411_v56 }
  0xd2   : > { %v8727_v3 = vcombine.high %v770_v62, %v778_v63  ;;  %v378_v9 = vld [vmem:[%s10775_s2] sm:$0xff]  ;;  %3572 = vmatprep.subr.bf16.mxu0 %v8471_v2  ;;  %v8726_v10 = vcombine.low %v770_v62, %v778_v63  ;;  %v8376_v62 = vcombine.low %v419_v47, %v427_v48  ;;  %v8632_v63 = vcombine.low %v675_v49, %v683_v51  ;;  %v387_v1 = vld [vmem:[#allocation5 + $0x8] sm:$0xff] }
  0xd3   : > { %v10803_v16 = vpack.c.bf16 %v378_v9, %v378_v9  ;;  %3573 = vmatpush2.bf16.msra.mxu0 %v8470_v8  ;;  %v395_v2 = vld [vmem:[#allocation5 + $0x48] sm:$0xff]  ;;  %v8617_v4 = vcombine.high %v659_v57, %v667_v61  ;;  %v8616_v7 = vcombine.low %v659_v57, %v667_v61 }
  0xd4   : > { %3613 = vmatprep.subr.bf16.mxu1 %v8727_v3  ;;  %3624 = vmatprep.subr.bf16.mxu0 %v8457_v12  ;;  %v643_v3 = vld [vmem:[#allocation5 + $0x808] sm:$0xff]  ;;  %v8345_v8 = vcombine.high %v387_v1, %v395_v2  ;;  %v8344_v14 = vcombine.low %v387_v1, %v395_v2 }
  0xd5   : > { %3614 = vmatpush2.bf16.msra.mxu1 %v8726_v10  ;;  %v651_v5 = vld [vmem:[#allocation5 + $0x848] sm:$0xff] }
  0xd6   : > { %3665 = vmatprep.subr.bf16.mxu1 %v8713_v13  ;;  %3575 = vmatmul.mubr.bf16.vlgmr.msra.gmra.mxu0 %v10803_v16  ;;  %v627_v9 = vld [vmem:[#allocation5 + $0x788] sm:$0xff]  ;;  %v8601_v12 = vcombine.high %v643_v3, %v651_v5  ;;  %v8600_v15 = vcombine.low %v643_v3, %v651_v5 }
  0xd7   : > { %3625 = vmatpush1.bf16.msra.mxu0 %v8456_v20  ;;  %3656 = vmatprep.mubr.bf16.mxu0 %v10795_v58  ;;  %v635_v10 = vld [vmem:[#allocation5 + $0x7c8] sm:$0xff] }
  0xd8   : > { %3616 = vmatmul.mubr.bf16.vlgmr.msra.gmra.mxu1 %v10805_v19  ;;  %3626 = vmatprep.subr.bf16.mxu0 %v8441_v22  ;;  %v883_v11 = vld [vmem:[#allocation5 + $0xf88] sm:$0xff]  ;;  %v8585_v17 = vcombine.high %v627_v9, %v635_v10  ;;  %v8584_v24 = vcombine.low %v627_v9, %v635_v10 }
  0xd9   : > { %3666 = vmatpush1.bf16.msra.mxu1 %v8712_v21  ;;  %3697 = vmatprep.mubr.bf16.mxu1 %v10797_v59  ;;  %v891_v13 = vld [vmem:[#allocation5 + $0xfc8] sm:$0xff] }
  0xda   : > { %3667 = vmatprep.subr.bf16.mxu1 %v8697_v25  ;;  %v611_v18 = vld [vmem:[#allocation5 + $0x708] sm:$0xff]  ;;  %v8841_v22 = vcombine.high %v883_v11, %v891_v13  ;;  %v8840_v25 = vcombine.low %v883_v11, %v891_v13  ;;  %v500_v13 = vld [vmem:[#allocation5 + $0x390] sm:$0xff] }
  0xdb   : > { %3627 = vmatpush1.bf16.msra.mxu0 %v8440_v28  ;;  %v619_v20 = vld [vmem:[#allocation5 + $0x748] sm:$0xff] }
  0xdc   : > { %3628 = vmatprep.subr.bf16.mxu0 %v8425_v30  ;;  %v867_v21 = vld [vmem:[#allocation5 + $0xf08] sm:$0xff]  ;;  %v8569_v26 = vcombine.high %v611_v18, %v619_v20  ;;  %v8568_v32 = vcombine.low %v611_v18, %v619_v20  ;;  %v764_v18 = vld [vmem:[#allocation5 + $0xbd0] sm:$0xff] }
  0xdd   : > { %3668 = vmatpush1.bf16.msra.mxu1 %v8696_v29  ;;  %v875_v23 = vld [vmem:[#allocation5 + $0xf48] sm:$0xff] }
  0xde   : > { %3669 = vmatprep.subr.bf16.mxu1 %v8681_v34  ;;  %v595_v27 = vld [vmem:[#allocation5 + $0x688] sm:$0xff]  ;;  %v8825_v30 = vcombine.high %v867_v21, %v875_v23  ;;  %v8824_v33 = vcombine.low %v867_v21, %v875_v23  ;;  %v484_v23 = vld [vmem:[#allocation5 + $0x310] sm:$0xff] }
  0xdf   : > { %3629 = vmatpush1.bf16.msra.mxu0 %v8424_v36  ;;  %v603_v28 = vld [vmem:[#allocation5 + $0x6c8] sm:$0xff] }
  0xe0   : > { %3630 = vmatprep.subr.bf16.mxu0 %v8409_v38  ;;  %v851_v29 = vld [vmem:[#allocation5 + $0xe88] sm:$0xff]  ;;  %v8553_v34 = vcombine.high %v595_v27, %v603_v28  ;;  %v8552_v40 = vcombine.low %v595_v27, %v603_v28  ;;  %v748_v27 = vld [vmem:[#allocation5 + $0xb50] sm:$0xff] }
  0xe1   : > { %3670 = vmatpush1.bf16.msra.mxu1 %v8680_v37  ;;  %v859_v31 = vld [vmem:[#allocation5 + $0xec8] sm:$0xff] }
  0xe2   : > { %3671 = vmatprep.subr.bf16.mxu1 %v8665_v42  ;;  %v579_v35 = vld [vmem:[#allocation5 + $0x608] sm:$0xff]  ;;  %v8809_v38 = vcombine.high %v851_v29, %v859_v31  ;;  %v8808_v41 = vcombine.low %v851_v29, %v859_v31  ;;  %v468_v31 = vld [vmem:[#allocation5 + $0x290] sm:$0xff] }
  0xe3   : > { %3631 = vmatpush1.bf16.msra.mxu0 %v8408_v44  ;;  %v587_v36 = vld [vmem:[#allocation5 + $0x648] sm:$0xff] }
  0xe4   : > { %3632 = vmatprep.subr.bf16.mxu0 %v8393_v46  ;;  %v835_v37 = vld [vmem:[#allocation5 + $0xe08] sm:$0xff]  ;;  %v8537_v42 = vcombine.high %v579_v35, %v587_v36  ;;  %v8536_v48 = vcombine.low %v579_v35, %v587_v36  ;;  %v732_v35 = vld [vmem:[#allocation5 + $0xad0] sm:$0xff] }
  0xe5   : > { %3672 = vmatpush1.bf16.msra.mxu1 %v8664_v45  ;;  %v843_v39 = vld [vmem:[#allocation5 + $0xe48] sm:$0xff] }
  0xe6   : > { %3673 = vmatprep.subr.bf16.mxu1 %v8649_v50  ;;  %v563_v43 = vld [vmem:[#allocation5 + $0x588] sm:$0xff]  ;;  %v8793_v46 = vcombine.high %v835_v37, %v843_v39  ;;  %v8792_v49 = vcombine.low %v835_v37, %v843_v39  ;;  %v452_v39 = vld [vmem:[#allocation5 + $0x210] sm:$0xff] }
  0xe7   : > { %3633 = vmatpush1.bf16.msra.mxu0 %v8392_v52  ;;  %v571_v44 = vld [vmem:[#allocation5 + $0x5c8] sm:$0xff] }
  0xe8   : > { %3634 = vmatprep.subr.bf16.mxu0 %v8377_v54  ;;  %v819_v45 = vld [vmem:[#allocation5 + $0xd88] sm:$0xff]  ;;  %v8521_v50 = vcombine.high %v563_v43, %v571_v44  ;;  %v8520_v56 = vcombine.low %v563_v43, %v571_v44  ;;  %v716_v43 = vld [vmem:[#allocation5 + $0xa50] sm:$0xff] }
  0xe9   : > { %3674 = vmatpush1.bf16.msra.mxu1 %v8648_v53  ;;  %v827_v47 = vld [vmem:[#allocation5 + $0xdc8] sm:$0xff] }
  0xea   : > { %3675 = vmatprep.subr.bf16.mxu1 %v8633_v60  ;;  %v547_v51 = vld [vmem:[#allocation5 + $0x508] sm:$0xff]  ;;  %v8777_v54 = vcombine.high %v819_v45, %v827_v47  ;;  %v8776_v57 = vcombine.low %v819_v45, %v827_v47  ;;  %v436_v47 = vld [vmem:[#allocation5 + $0x190] sm:$0xff] }
  0xeb   : > { %3635 = vmatpush1.bf16.msra.mxu0 %v8376_v62  ;;  %v555_v52 = vld [vmem:[#allocation5 + $0x548] sm:$0xff] }
  0xec   : > { %3636 = vmatprep.subr.bf16.mxu0 %v8361_v0  ;;  %v803_v53 = vld [vmem:[#allocation5 + $0xd08] sm:$0xff]  ;;  %v8505_v60 = vcombine.high %v547_v51, %v555_v52  ;;  %v8504_v2 = vcombine.low %v547_v51, %v555_v52  ;;  %v700_v51 = vld [vmem:[#allocation5 + $0x9d0] sm:$0xff] }
  0xed   : > { %3676 = vmatpush1.bf16.msra.mxu1 %v8632_v63  ;;  %v811_v55 = vld [vmem:[#allocation5 + $0xd48] sm:$0xff] }
  0xee   : > { %3677 = vmatprep.subr.bf16.mxu1 %v8617_v4  ;;  %v531_v61 = vld [vmem:[#allocation5 + $0x488] sm:$0xff]  ;;  %v8761_v0 = vcombine.high %v803_v53, %v811_v55  ;;  %v8760_v3 = vcombine.low %v803_v53, %v811_v55  ;;  %v420_v55 = vld [vmem:[#allocation5 + $0x110] sm:$0xff] }
  0xef   : > { %3637 = vmatpush1.bf16.msra.mxu0 %v8360_v6  ;;  %v539_v62 = vld [vmem:[#allocation5 + $0x4c8] sm:$0xff] }
  0xf0   : > { %3638 = vmatprep.subr.bf16.mxu0 %v8345_v8  ;;  %v787_v63 = vld [vmem:[#allocation5 + $0xc88] sm:$0xff]  ;;  %v8489_v4 = vcombine.high %v531_v61, %v539_v62  ;;  %v8488_v10 = vcombine.low %v531_v61, %v539_v62  ;;  %v684_v61 = vld [vmem:[#allocation5 + $0x950] sm:$0xff] }
  0xf1   : > { %3678 = vmatpush1.bf16.msra.mxu1 %v8616_v7  ;;  %v795_v1 = vld [vmem:[#allocation5 + $0xcc8] sm:$0xff] }
  0xf2   : > { %3679 = vmatprep.subr.bf16.mxu1 %v8601_v12  ;;  %v515_v5 = vld [vmem:[#allocation5 + $0x408] sm:$0xff]  ;;  %v8745_v8 = vcombine.high %v787_v63, %v795_v1  ;;  %v8744_v11 = vcombine.low %v787_v63, %v795_v1  ;;  %v404_v1 = vld [vmem:[#allocation5 + $0x90] sm:$0xff] }
  0xf3   : > { %3639 = vmatpush1.bf16.msra.mxu0 %v8344_v14  ;;  %v523_v6 = vld [vmem:[#allocation5 + $0x448] sm:$0xff]  ;;  %v508_v14 = vld [vmem:[#allocation5 + $0x3d0] sm:$0xff] }
  0xf4   : > { %3640 = vmatprep.subr.bf16.mxu0 %v8585_v17  ;;  %v771_v7 = vld [vmem:[#allocation5 + $0xc08] sm:$0xff]  ;;  %v8473_v12 = vcombine.high %v515_v5, %v523_v6  ;;  %v8472_v20 = vcombine.low %v515_v5, %v523_v6  ;;  %v8458_v28 = vcombine.low %v500_v13, %v508_v14  ;;  %v668_v5 = vld [vmem:[#allocation5 + $0x8d0] sm:$0xff] }
  0xf5   : > { %3680 = vmatpush1.bf16.msra.mxu1 %v8600_v15  ;;  %v779_v9 = vld [vmem:[#allocation5 + $0xc48] sm:$0xff]  ;;  %v756_v15 = vld [vmem:[#allocation5 + $0xb90] sm:$0xff] }
  0xf6   : > { %3681 = vmatprep.subr.bf16.mxu1 %v8841_v22  ;;  %v8729_v17 = vcombine.high %v771_v7, %v779_v9  ;;  %v8728_v21 = vcombine.low %v771_v7, %v779_v9  ;;  %v8459_v22 = vcombine.high %v500_v13, %v508_v14  ;;  %v8714_v29 = vcombine.low %v756_v15, %v764_v18  ;;  %v388_v9 = vld [vmem:[#allocation5 + $0x10] sm:$0xff] }
  0xf7   : > { %3641 = vmatpush2.bf16.msra.mxu0 %v8584_v24  ;;  %v492_v24 = vld [vmem:[#allocation5 + $0x350] sm:$0xff] }
  0xf8   : > { %3642 = vmatprep.subr.bf16.mxu0 %v8569_v26  ;;  %v8715_v26 = vcombine.high %v756_v15, %v764_v18  ;;  %v8442_v36 = vcombine.low %v484_v23, %v492_v24  ;;  %v652_v13 = vld [vmem:[#allocation5 + $0x850] sm:$0xff] }
  0xf9   : > { %3682 = vmatpush2.bf16.msra.mxu1 %v8840_v25  ;;  %v740_v25 = vld [vmem:[#allocation5 + $0xb10] sm:$0xff] }
  0xfa   : > { %3683 = vmatprep.subr.bf16.mxu1 %v8825_v30  ;;  %v8443_v30 = vcombine.high %v484_v23, %v492_v24  ;;  %v8698_v37 = vcombine.low %v740_v25, %v748_v27  ;;  %v628_v18 = vld [vmem:[#allocation5 + $0x790] sm:$0xff] }
  0xfb   : > { %3643 = vmatpush2.bf16.msra.mxu0 %v8568_v32  ;;  %v476_v32 = vld [vmem:[#allocation5 + $0x2d0] sm:$0xff] }
  0xfc   : > { %3644 = vmatprep.subr.bf16.mxu0 %v8553_v34  ;;  %v724_v34 = vld [vmem:[#allocation5 + $0xa90] sm:$0xff]  ;;  %v8426_v44 = vcombine.low %v468_v31, %v476_v32 }
  0xfd   : > { %3684 = vmatpush2.bf16.msra.mxu1 %v8824_v33  ;;  %v8699_v33 = vcombine.high %v740_v25, %v748_v27  ;;  %v8682_v45 = vcombine.low %v724_v34, %v732_v35  ;;  %v892_v23 = vld [vmem:[#allocation5 + $0xfd0] sm:$0xff] }
  0xfe   : > { %3685 = vmatprep.subr.bf16.mxu1 %v8809_v38  ;;  %v8427_v38 = vcombine.high %v468_v31, %v476_v32  ;;  %v612_v27 = vld [vmem:[#allocation5 + $0x710] sm:$0xff] }
  0xff   : > { %3645 = vmatpush2.bf16.msra.mxu0 %v8552_v40  ;;  %v460_v40 = vld [vmem:[#allocation5 + $0x250] sm:$0xff] }
 0x100   : > { %3646 = vmatprep.subr.bf16.mxu0 %v8537_v42  ;;  %v8683_v42 = vcombine.high %v724_v34, %v732_v35  ;;  %v8410_v52 = vcombine.low %v452_v39, %v460_v40  ;;  %v876_v31 = vld [vmem:[#allocation5 + $0xf50] sm:$0xff] }
 0x101   : > { %3686 = vmatpush2.bf16.msra.mxu1 %v8808_v41  ;;  %v708_v41 = vld [vmem:[#allocation5 + $0xa10] sm:$0xff] }
 0x102   : > { %3687 = vmatprep.subr.bf16.mxu1 %v8793_v46  ;;  %v8411_v46 = vcombine.high %v452_v39, %v460_v40  ;;  %v8666_v53 = vcombine.low %v708_v41, %v716_v43  ;;  %v596_v35 = vld [vmem:[#allocation5 + $0x690] sm:$0xff] }
 0x103   : > { %3647 = vmatpush2.bf16.msra.mxu0 %v8536_v48  ;;  %v444_v48 = vld [vmem:[#allocation5 + $0x1d0] sm:$0xff] }
 0x104   : > { %3648 = vmatprep.subr.bf16.mxu0 %v8521_v50  ;;  %v8667_v50 = vcombine.high %v708_v41, %v716_v43  ;;  %v8394_v62 = vcombine.low %v436_v47, %v444_v48  ;;  %v860_v39 = vld [vmem:[#allocation5 + $0xed0] sm:$0xff] }
 0x105   : > { %3688 = vmatpush2.bf16.msra.mxu1 %v8792_v49  ;;  %v692_v49 = vld [vmem:[#allocation5 + $0x990] sm:$0xff] }
 0x106   : > { %3689 = vmatprep.subr.bf16.mxu1 %v8777_v54  ;;  %v8395_v54 = vcombine.high %v436_v47, %v444_v48  ;;  %v8650_v63 = vcombine.low %v692_v49, %v700_v51  ;;  %v580_v43 = vld [vmem:[#allocation5 + $0x610] sm:$0xff] }
 0x107   : > { %3649 = vmatpush2.bf16.msra.mxu0 %v8520_v56  ;;  %v428_v56 = vld [vmem:[#allocation5 + $0x150] sm:$0xff] }
 0x108   : > { %3650 = vmatprep.subr.bf16.mxu0 %v8505_v60  ;;  %v8651_v60 = vcombine.high %v692_v49, %v700_v51  ;;  %v8378_v6 = vcombine.low %v420_v55, %v428_v56  ;;  %v844_v47 = vld [vmem:[#allocation5 + $0xe50] sm:$0xff] }
 0x109   : > { %3690 = vmatpush2.bf16.msra.mxu1 %v8776_v57  ;;  %v676_v57 = vld [vmem:[#allocation5 + $0x910] sm:$0xff] }
 0x10a   : > { %3691 = vmatprep.subr.bf16.mxu1 %v8761_v0  ;;  %v8379_v0 = vcombine.high %v420_v55, %v428_v56  ;;  %v8634_v7 = vcombine.low %v676_v57, %v684_v61  ;;  %v564_v51 = vld [vmem:[#allocation5 + $0x590] sm:$0xff] }
 0x10b   : > { %3651 = vmatpush2.bf16.msra.mxu0 %v8504_v2  ;;  %v412_v2 = vld [vmem:[#allocation5 + $0xd0] sm:$0xff] }
 0x10c   : > { %3652 = vmatprep.subr.bf16.mxu0 %v8489_v4  ;;  %v8635_v4 = vcombine.high %v676_v57, %v684_v61  ;;  %v8362_v14 = vcombine.low %v404_v1, %v412_v2  ;;  %v828_v55 = vld [vmem:[#allocation5 + $0xdd0] sm:$0xff] }
 0x10d   : > { %3692 = vmatpush2.bf16.msra.mxu1 %v8760_v3  ;;  %v660_v3 = vld [vmem:[#allocation5 + $0x890] sm:$0xff] }
 0x10e   : > { %3693 = vmatprep.subr.bf16.mxu1 %v8745_v8  ;;  %v8363_v8 = vcombine.high %v404_v1, %v412_v2  ;;  %v8618_v15 = vcombine.low %v660_v3, %v668_v5  ;;  %v548_v61 = vld [vmem:[#allocation5 + $0x510] sm:$0xff] }
 0x10f   : > { %3653 = vmatpush2.bf16.msra.mxu0 %v8488_v10  ;;  %v396_v10 = vld [vmem:[#allocation5 + $0x50] sm:$0xff] }
 0x110   : > { %3654 = vmatprep.subr.bf16.mxu0 %v8473_v12  ;;  %v8619_v12 = vcombine.high %v660_v3, %v668_v5  ;;  %v8346_v24 = vcombine.low %v388_v9, %v396_v10  ;;  %v812_v1 = vld [vmem:[#allocation5 + $0xd50] sm:$0xff] }
 0x111   : > { %3694 = vmatpush2.bf16.msra.mxu1 %v8744_v11  ;;  %v644_v11 = vld [vmem:[#allocation5 + $0x810] sm:$0xff] }
 0x112   : > { %3695 = vmatprep.subr.bf16.mxu1 %v8729_v17  ;;  %v8347_v17 = vcombine.high %v388_v9, %v396_v10  ;;  %v8602_v25 = vcombine.low %v644_v11, %v652_v13  ;;  %v532_v5 = vld [vmem:[#allocation5 + $0x490] sm:$0xff] }
 0x113   : > { %3655 = vmatpush2.bf16.msra.mxu0 %v8472_v20  ;;  %v636_v20 = vld [vmem:[#allocation5 + $0x7d0] sm:$0xff] }
 0x114   : > { %3706 = vmatprep.subr.bf16.mxu0 %v8459_v22  ;;  %v8603_v22 = vcombine.high %v644_v11, %v652_v13  ;;  %v8586_v32 = vcombine.low %v628_v18, %v636_v20  ;;  %v796_v9 = vld [vmem:[#allocation5 + $0xcd0] sm:$0xff] }
 0x115   : > { %3696 = vmatpush2.bf16.msra.mxu1 %v8728_v21  ;;  %v884_v21 = vld [vmem:[#allocation5 + $0xf90] sm:$0xff] }
 0x116   : > { %3747 = vmatprep.subr.bf16.mxu1 %v8715_v26  ;;  %3657 = vmatmul.mubr.bf16.vlgmr.msra.gmra.mxu0 %v10803_v16  ;;  %v8587_v26 = vcombine.high %v628_v18, %v636_v20  ;;  %v516_v13 = vld [vmem:[#allocation5 + $0x410] sm:$0xff] }
 0x117   : > { %3707 = vmatpush1.bf16.msra.mxu0 %v8458_v28  ;;  %3738 = vmatprep.mubr.bf16.mxu0 %v10795_v58  ;;  %v620_v28 = vld [vmem:[#allocation5 + $0x750] sm:$0xff] }
 0x118   : > { %3698 = vmatmul.mubr.bf16.vlgmr.msra.gmra.mxu1 %v10805_v19  ;;  %3708 = vmatprep.subr.bf16.mxu0 %v8443_v30  ;;  %v8843_v30 = vcombine.high %v884_v21, %v892_v23  ;;  %v8571_v34 = vcombine.high %v612_v27, %v620_v28  ;;  %v8570_v40 = vcombine.low %v612_v27, %v620_v28  ;;  %v780_v18 = vld [vmem:[#allocation5 + $0xc50] sm:$0xff]  ;;  %v765_v27 = vld [vmem:[#allocation5 + $0xbd8] sm:$0xff] }
 0x119   : > { %3748 = vmatpush1.bf16.msra.mxu1 %v8714_v29  ;;  %3779 = vmatprep.mubr.bf16.mxu1 %v10797_v59  ;;  %v868_v29 = vld [vmem:[#allocation5 + $0xf10] sm:$0xff] }
 0x11a   : > { %3749 = vmatprep.subr.bf16.mxu1 %v8699_v33  ;;  %v8842_v33 = vcombine.low %v884_v21, %v892_v23  ;;  %v8826_v41 = vcombine.low %v868_v29, %v876_v31  ;;  %v501_v23 = vld [vmem:[#allocation5 + $0x398] sm:$0xff] }
 0x11b   : > { %3709 = vmatpush1.bf16.msra.mxu0 %v8442_v36  ;;  %v604_v36 = vld [vmem:[#allocation5 + $0x6d0] sm:$0xff] }
 0x11c   : > { %3710 = vmatprep.subr.bf16.mxu0 %v8427_v38  ;;  %v8827_v38 = vcombine.high %v868_v29, %v876_v31  ;;  %v8554_v48 = vcombine.low %v596_v35, %v604_v36  ;;  %v485_v31 = vld [vmem:[#allocation5 + $0x318] sm:$0xff] }
 0x11d   : > { %3750 = vmatpush1.bf16.msra.mxu1 %v8698_v37  ;;  %v852_v37 = vld [vmem:[#allocation5 + $0xe90] sm:$0xff] }
 0x11e   : > { %3751 = vmatprep.subr.bf16.mxu1 %v8683_v42  ;;  %v8555_v42 = vcombine.high %v596_v35, %v604_v36  ;;  %v8810_v49 = vcombine.low %v852_v37, %v860_v39  ;;  %v749_v35 = vld [vmem:[#allocation5 + $0xb58] sm:$0xff] }
 0x11f   : > { %3711 = vmatpush1.bf16.msra.mxu0 %v8426_v44  ;;  %v588_v44 = vld [vmem:[#allocation5 + $0x650] sm:$0xff] }
 0x120   : > { %3712 = vmatprep.subr.bf16.mxu0 %v8411_v46  ;;  %v8811_v46 = vcombine.high %v852_v37, %v860_v39  ;;  %v8538_v56 = vcombine.low %v580_v43, %v588_v44  ;;  %v469_v39 = vld [vmem:[#allocation5 + $0x298] sm:$0xff] }
 0x121   : > { %3752 = vmatpush1.bf16.msra.mxu1 %v8682_v45  ;;  %v836_v45 = vld [vmem:[#allocation5 + $0xe10] sm:$0xff] }
 0x122   : > { %3753 = vmatprep.subr.bf16.mxu1 %v8667_v50  ;;  %v8539_v50 = vcombine.high %v580_v43, %v588_v44  ;;  %v8794_v57 = vcombine.low %v836_v45, %v844_v47  ;;  %v733_v43 = vld [vmem:[#allocation5 + $0xad8] sm:$0xff] }
 0x123   : > { %3713 = vmatpush1.bf16.msra.mxu0 %v8410_v52  ;;  %v572_v52 = vld [vmem:[#allocation5 + $0x5d0] sm:$0xff] }
 0x124   : > { %3714 = vmatprep.subr.bf16.mxu0 %v8395_v54  ;;  %v8795_v54 = vcombine.high %v836_v45, %v844_v47  ;;  %v8522_v2 = vcombine.low %v564_v51, %v572_v52  ;;  %v453_v47 = vld [vmem:[#allocation5 + $0x218] sm:$0xff] }
 0x125   : > { %3754 = vmatpush1.bf16.msra.mxu1 %v8666_v53  ;;  %v820_v53 = vld [vmem:[#allocation5 + $0xd90] sm:$0xff] }
 0x126   : > { %3755 = vmatprep.subr.bf16.mxu1 %v8651_v60  ;;  %v8523_v60 = vcombine.high %v564_v51, %v572_v52  ;;  %v8778_v3 = vcombine.low %v820_v53, %v828_v55  ;;  %v717_v51 = vld [vmem:[#allocation5 + $0xa58] sm:$0xff] }
 0x127   : > { %3715 = vmatpush1.bf16.msra.mxu0 %v8394_v62  ;;  %v556_v62 = vld [vmem:[#allocation5 + $0x550] sm:$0xff] }
 0x128   : > { %3716 = vmatprep.subr.bf16.mxu0 %v8379_v0  ;;  %v8779_v0 = vcombine.high %v820_v53, %v828_v55  ;;  %v8506_v10 = vcombine.low %v548_v61, %v556_v62  ;;  %v437_v55 = vld [vmem:[#allocation5 + $0x198] sm:$0xff] }
 0x129   : > { %3756 = vmatpush1.bf16.msra.mxu1 %v8650_v63  ;;  %v804_v63 = vld [vmem:[#allocation5 + $0xd10] sm:$0xff] }
 0x12a   : > { %3757 = vmatprep.subr.bf16.mxu1 %v8635_v4  ;;  %v8507_v4 = vcombine.high %v548_v61, %v556_v62  ;;  %v8762_v11 = vcombine.low %v804_v63, %v812_v1  ;;  %v701_v61 = vld [vmem:[#allocation5 + $0x9d8] sm:$0xff] }
 0x12b   : > { %3717 = vmatpush1.bf16.msra.mxu0 %v8378_v6  ;;  %v540_v6 = vld [vmem:[#allocation5 + $0x4d0] sm:$0xff] }
 0x12c   : > { %3718 = vmatprep.subr.bf16.mxu0 %v8363_v8  ;;  %v8763_v8 = vcombine.high %v804_v63, %v812_v1  ;;  %v8490_v20 = vcombine.low %v532_v5, %v540_v6  ;;  %v421_v1 = vld [vmem:[#allocation5 + $0x118] sm:$0xff] }
 0x12d   : > { %3758 = vmatpush1.bf16.msra.mxu1 %v8634_v7  ;;  %v788_v7 = vld [vmem:[#allocation5 + $0xc90] sm:$0xff] }
 0x12e   : > { %3759 = vmatprep.subr.bf16.mxu1 %v8619_v12  ;;  %v8491_v12 = vcombine.high %v532_v5, %v540_v6  ;;  %v8746_v21 = vcombine.low %v788_v7, %v796_v9  ;;  %v685_v5 = vld [vmem:[#allocation5 + $0x958] sm:$0xff] }
 0x12f   : > { %3719 = vmatpush1.bf16.msra.mxu0 %v8362_v14  ;;  %v524_v14 = vld [vmem:[#allocation5 + $0x450] sm:$0xff] }
 0x130   : > { %3720 = vmatprep.subr.bf16.mxu0 %v8347_v17  ;;  %v8747_v17 = vcombine.high %v788_v7, %v796_v9  ;;  %v8474_v28 = vcombine.low %v516_v13, %v524_v14  ;;  %v405_v9 = vld [vmem:[#allocation5 + $0x98] sm:$0xff] }
 0x131   : > { %3760 = vmatpush1.bf16.msra.mxu1 %v8618_v15  ;;  %v772_v15 = vld [vmem:[#allocation5 + $0xc10] sm:$0xff] }
 0x132   : > { %3761 = vmatprep.subr.bf16.mxu1 %v8603_v22  ;;  %v8475_v22 = vcombine.high %v516_v13, %v524_v14  ;;  %v8730_v29 = vcombine.low %v772_v15, %v780_v18  ;;  %v669_v13 = vld [vmem:[#allocation5 + $0x8d8] sm:$0xff] }
 0x133   : > { %3721 = vmatpush1.bf16.msra.mxu0 %v8346_v24  ;;  %v509_v24 = vld [vmem:[#allocation5 + $0x3d8] sm:$0xff] }
 0x134   : > { %3722 = vmatprep.subr.bf16.mxu0 %v8587_v26  ;;  %v8731_v26 = vcombine.high %v772_v15, %v780_v18  ;;  %v8460_v36 = vcombine.low %v501_v23, %v509_v24  ;;  %v389_v18 = vld [vmem:[#allocation5 + $0x18] sm:$0xff] }
 0x135   : > { %3762 = vmatpush1.bf16.msra.mxu1 %v8602_v25  ;;  %v757_v25 = vld [vmem:[#allocation5 + $0xb98] sm:$0xff] }
 0x136   : > { %3763 = vmatprep.subr.bf16.mxu1 %v8843_v30  ;;  %v8461_v30 = vcombine.high %v501_v23, %v509_v24  ;;  %v8716_v37 = vcombine.low %v757_v25, %v765_v27  ;;  %v653_v23 = vld [vmem:[#allocation5 + $0x858] sm:$0xff] }
 0x137   : > { %3723 = vmatpush2.bf16.msra.mxu0 %v8586_v32  ;;  %v493_v32 = vld [vmem:[#allocation5 + $0x358] sm:$0xff] }
 0x138   : > { %3724 = vmatprep.subr.bf16.mxu0 %v8571_v34  ;;  %v8717_v34 = vcombine.high %v757_v25, %v765_v27  ;;  %v8444_v44 = vcombine.low %v485_v31, %v493_v32  ;;  %v629_v27 = vld [vmem:[#allocation5 + $0x798] sm:$0xff] }
 0x139   : > { %3764 = vmatpush2.bf16.msra.mxu1 %v8842_v33  ;;  %v741_v33 = vld [vmem:[#allocation5 + $0xb18] sm:$0xff] }
 0x13a   : > { %3765 = vmatprep.subr.bf16.mxu1 %v8827_v38  ;;  %v8445_v38 = vcombine.high %v485_v31, %v493_v32  ;;  %v8700_v45 = vcombine.low %v741_v33, %v749_v35  ;;  %v893_v31 = vld [vmem:[#allocation5 + $0xfd8] sm:$0xff] }
 0x13b   : > { %3725 = vmatpush2.bf16.msra.mxu0 %v8570_v40  ;;  %v477_v40 = vld [vmem:[#allocation5 + $0x2d8] sm:$0xff] }
 0x13c   : > { %3726 = vmatprep.subr.bf16.mxu0 %v8555_v42  ;;  %v8701_v42 = vcombine.high %v741_v33, %v749_v35  ;;  %v8428_v52 = vcombine.low %v469_v39, %v477_v40  ;;  %v613_v35 = vld [vmem:[#allocation5 + $0x718] sm:$0xff] }
 0x13d   : > { %3766 = vmatpush2.bf16.msra.mxu1 %v8826_v41  ;;  %v725_v41 = vld [vmem:[#allocation5 + $0xa98] sm:$0xff] }
 0x13e   : > { %3767 = vmatprep.subr.bf16.mxu1 %v8811_v46  ;;  %v8429_v46 = vcombine.high %v469_v39, %v477_v40  ;;  %v8684_v53 = vcombine.low %v725_v41, %v733_v43  ;;  %v877_v39 = vld [vmem:[#allocation5 + $0xf58] sm:$0xff] }
 0x13f   : > { %3727 = vmatpush2.bf16.msra.mxu0 %v8554_v48  ;;  %v461_v48 = vld [vmem:[#allocation5 + $0x258] sm:$0xff] }
 0x140   : > { %3728 = vmatprep.subr.bf16.mxu0 %v8539_v50  ;;  %v8685_v50 = vcombine.high %v725_v41, %v733_v43  ;;  %v8412_v62 = vcombine.low %v453_v47, %v461_v48  ;;  %v597_v43 = vld [vmem:[#allocation5 + $0x698] sm:$0xff] }
 0x141   : > { %3768 = vmatpush2.bf16.msra.mxu1 %v8810_v49  ;;  %v709_v49 = vld [vmem:[#allocation5 + $0xa18] sm:$0xff] }
 0x142   : > { %3769 = vmatprep.subr.bf16.mxu1 %v8795_v54  ;;  %v8413_v54 = vcombine.high %v453_v47, %v461_v48  ;;  %v8668_v63 = vcombine.low %v709_v49, %v717_v51  ;;  %v861_v47 = vld [vmem:[#allocation5 + $0xed8] sm:$0xff] }
 0x143   : > { %3729 = vmatpush2.bf16.msra.mxu0 %v8538_v56  ;;  %v445_v56 = vld [vmem:[#allocation5 + $0x1d8] sm:$0xff] }
 0x144   : > { %3730 = vmatprep.subr.bf16.mxu0 %v8523_v60  ;;  %v8669_v60 = vcombine.high %v709_v49, %v717_v51  ;;  %v8396_v6 = vcombine.low %v437_v55, %v445_v56  ;;  %v581_v51 = vld [vmem:[#allocation5 + $0x618] sm:$0xff] }
 0x145   : > { %3770 = vmatpush2.bf16.msra.mxu1 %v8794_v57  ;;  %v693_v57 = vld [vmem:[#allocation5 + $0x998] sm:$0xff] }
 0x146   : > { %3771 = vmatprep.subr.bf16.mxu1 %v8779_v0  ;;  %v8397_v0 = vcombine.high %v437_v55, %v445_v56  ;;  %v8652_v7 = vcombine.low %v693_v57, %v701_v61  ;;  %v845_v55 = vld [vmem:[#allocation5 + $0xe58] sm:$0xff] }
 0x147   : > { %3731 = vmatpush2.bf16.msra.mxu0 %v8522_v2  ;;  %v429_v2 = vld [vmem:[#allocation5 + $0x158] sm:$0xff] }
 0x148   : > { %3732 = vmatprep.subr.bf16.mxu0 %v8507_v4  ;;  %v8653_v4 = vcombine.high %v693_v57, %v701_v61  ;;  %v8380_v14 = vcombine.low %v421_v1, %v429_v2  ;;  %v565_v61 = vld [vmem:[#allocation5 + $0x598] sm:$0xff] }
 0x149   : > { %3772 = vmatpush2.bf16.msra.mxu1 %v8778_v3  ;;  %v677_v3 = vld [vmem:[#allocation5 + $0x918] sm:$0xff] }
 0x14a   : > { %3773 = vmatprep.subr.bf16.mxu1 %v8763_v8  ;;  %v8381_v8 = vcombine.high %v421_v1, %v429_v2  ;;  %v8636_v15 = vcombine.low %v677_v3, %v685_v5  ;;  %v829_v1 = vld [vmem:[#allocation5 + $0xdd8] sm:$0xff] }
 0x14b   : > { %3733 = vmatpush2.bf16.msra.mxu0 %v8506_v10  ;;  %v413_v10 = vld [vmem:[#allocation5 + $0xd8] sm:$0xff] }
 0x14c   : > { %3734 = vmatprep.subr.bf16.mxu0 %v8491_v12  ;;  %v8637_v12 = vcombine.high %v677_v3, %v685_v5  ;;  %v8364_v24 = vcombine.low %v405_v9, %v413_v10  ;;  %v549_v5 = vld [vmem:[#allocation5 + $0x518] sm:$0xff] }
 0x14d   : > { %3774 = vmatpush2.bf16.msra.mxu1 %v8762_v11  ;;  %v661_v11 = vld [vmem:[#allocation5 + $0x898] sm:$0xff] }
 0x14e   : > { %3775 = vmatprep.subr.bf16.mxu1 %v8747_v17  ;;  %v8365_v17 = vcombine.high %v405_v9, %v413_v10  ;;  %v8620_v25 = vcombine.low %v661_v11, %v669_v13  ;;  %v813_v9 = vld [vmem:[#allocation5 + $0xd58] sm:$0xff] }
 0x14f   : > { %3735 = vmatpush2.bf16.msra.mxu0 %v8490_v20  ;;  %v397_v20 = vld [vmem:[#allocation5 + $0x58] sm:$0xff] }
 0x150   : > { %3736 = vmatprep.subr.bf16.mxu0 %v8475_v22  ;;  %v8621_v22 = vcombine.high %v661_v11, %v669_v13  ;;  %v8348_v32 = vcombine.low %v389_v18, %v397_v20  ;;  %v533_v13 = vld [vmem:[#allocation5 + $0x498] sm:$0xff] }
 0x151   : > { %3776 = vmatpush2.bf16.msra.mxu1 %v8746_v21  ;;  %v645_v21 = vld [vmem:[#allocation5 + $0x818] sm:$0xff] }
 0x152   : > { %3777 = vmatprep.subr.bf16.mxu1 %v8731_v26  ;;  %v8349_v26 = vcombine.high %v389_v18, %v397_v20  ;;  %v8604_v33 = vcombine.low %v645_v21, %v653_v23  ;;  %v797_v18 = vld [vmem:[#allocation5 + $0xcd8] sm:$0xff] }
 0x153   : > { %3737 = vmatpush2.bf16.msra.mxu0 %v8474_v28  ;;  %v637_v28 = vld [vmem:[#allocation5 + $0x7d8] sm:$0xff] }
 0x154   : > { %3788 = vmatprep.subr.bf16.mxu0 %v8461_v30  ;;  %v8605_v30 = vcombine.high %v645_v21, %v653_v23  ;;  %v8588_v40 = vcombine.low %v629_v27, %v637_v28  ;;  %v902_v21 = vlaneseq }
 0x155   : > { %3778 = vmatpush2.bf16.msra.mxu1 %v8730_v29  ;;  %v885_v29 = vld [vmem:[#allocation5 + $0xf98] sm:$0xff] }
 0x156   : > { %3829 = vmatprep.subr.bf16.mxu1 %v8717_v34  ;;  %3739 = vmatmul.mubr.bf16.vlgmr.msra.gmra.mxu0 %v10803_v16  ;;  %v8589_v34 = vcombine.high %v629_v27, %v637_v28  ;;  %v8844_v41 = vcombine.low %v885_v29, %v893_v31  ;;  %v781_v28 = vld [vmem:[#allocation5 + $0xc58] sm:$0xff] }
 0x157   : > { %3789 = vmatpush1.bf16.msra.mxu0 %v8460_v36  ;;  %3820 = vmatprep.mubr.bf16.mxu0 %v10795_v58  ;;  %v621_v36 = vld [vmem:[#allocation5 + $0x758] sm:$0xff] }
 0x158   : > { %3780 = vmatmul.mubr.bf16.vlgmr.msra.gmra.mxu1 %v10805_v19  ;;  %3790 = vmatprep.subr.bf16.mxu0 %v8445_v38  ;;  %v8845_v38 = vcombine.high %v885_v29, %v893_v31  ;;  %v8572_v48 = vcombine.low %v613_v35, %v621_v36 }
 0x159   : > { %3830 = vmatpush1.bf16.msra.mxu1 %v8716_v37  ;;  %3861 = vmatprep.mubr.bf16.mxu1 %v10797_v59  ;;  %v869_v37 = vld [vmem:[#allocation5 + $0xf18] sm:$0xff] }
 0x15a   : > { %3831 = vmatprep.subr.bf16.mxu1 %v8701_v42  ;;  %v8573_v42 = vcombine.high %v613_v35, %v621_v36  ;;  %v8828_v49 = vcombine.low %v869_v37, %v877_v39  ;;  %v758_v35 = vld [vmem:[#allocation5 + $0xba0] sm:$0xff] }
 0x15b   : > { %3791 = vmatpush1.bf16.msra.mxu0 %v8444_v44  ;;  %v605_v44 = vld [vmem:[#allocation5 + $0x6d8] sm:$0xff] }
 0x15c   : > { %3792 = vmatprep.subr.bf16.mxu0 %v8429_v46  ;;  %v8829_v46 = vcombine.high %v869_v37, %v877_v39  ;;  %v8556_v56 = vcombine.low %v597_v43, %v605_v44  ;;  %v766_v37 = vld [vmem:[#allocation5 + $0xbe0] sm:$0xff] }
 0x15d   : > { %3832 = vmatpush1.bf16.msra.mxu1 %v8700_v45  ;;  %v853_v45 = vld [vmem:[#allocation5 + $0xe98] sm:$0xff] }
 0x15e   : > { %3833 = vmatprep.subr.bf16.mxu1 %v8685_v50  ;;  %v8557_v50 = vcombine.high %v597_v43, %v605_v44  ;;  %v8812_v57 = vcombine.low %v853_v45, %v861_v47  ;;  %v486_v43 = vld [vmem:[#allocation5 + $0x320] sm:$0xff] }
 0x15f   : > { %3793 = vmatpush1.bf16.msra.mxu0 %v8428_v52  ;;  %v589_v52 = vld [vmem:[#allocation5 + $0x658] sm:$0xff]  ;;  %v494_v44 = vld [vmem:[#allocation5 + $0x360] sm:$0xff] }
 0x160   : > { %3794 = vmatprep.subr.bf16.mxu0 %v8413_v54  ;;  %v8813_v54 = vcombine.high %v853_v45, %v861_v47  ;;  %v8540_v2 = vcombine.low %v581_v51, %v589_v52  ;;  %v742_v45 = vld [vmem:[#allocation5 + $0xb20] sm:$0xff] }
 0x161   : > { %3834 = vmatpush1.bf16.msra.mxu1 %v8684_v53  ;;  %v837_v53 = vld [vmem:[#allocation5 + $0xe18] sm:$0xff] }
 0x162   : > { %3835 = vmatprep.subr.bf16.mxu1 %v8669_v60  ;;  %v8541_v60 = vcombine.high %v581_v51, %v589_v52  ;;  %v8796_v3 = vcombine.low %v837_v53, %v845_v55  ;;  %v8718_v51 = vcombine.low %v758_v35, %v766_v37  ;;  %v8447_v52 = vcombine.high %v486_v43, %v494_v44 }
 0x163   : > { %3795 = vmatpush1.bf16.msra.mxu0 %v8412_v62  ;;  %v573_v62 = vld [vmem:[#allocation5 + $0x5d8] sm:$0xff] }
 0x164   : > { %3796 = vmatprep.subr.bf16.mxu0 %v8397_v0  ;;  %v8797_v0 = vcombine.high %v837_v53, %v845_v55  ;;  %v8524_v10 = vcombine.low %v565_v61, %v573_v62  ;;  %v470_v53 = vld [vmem:[#allocation5 + $0x2a0] sm:$0xff] }
 0x165   : > { %3836 = vmatpush1.bf16.msra.mxu1 %v8668_v63  ;;  %v821_v63 = vld [vmem:[#allocation5 + $0xd98] sm:$0xff]  ;;  %v726_v55 = vld [vmem:[#allocation5 + $0xaa0] sm:$0xff] }
 0x166   : > { %3837 = vmatprep.subr.bf16.mxu1 %v8653_v4  ;;  %v8525_v4 = vcombine.high %v565_v61, %v573_v62  ;;  %v8780_v11 = vcombine.low %v821_v63, %v829_v1 }
 0x167   : > { %3797 = vmatpush1.bf16.msra.mxu0 %v8396_v6  ;;  %v557_v6 = vld [vmem:[#allocation5 + $0x558] sm:$0xff] }
 0x168   : > { %3798 = vmatprep.subr.bf16.mxu0 %v8381_v8  ;;  %v8781_v8 = vcombine.high %v821_v63, %v829_v1  ;;  %v8508_v20 = vcombine.low %v549_v5, %v557_v6 }
 0x169   : > { %3838 = vmatpush1.bf16.msra.mxu1 %v8652_v7  ;;  %v805_v7 = vld [vmem:[#allocation5 + $0xd18] sm:$0xff] }
 0x16a   : > { %3839 = vmatprep.subr.bf16.mxu1 %v8637_v12  ;;  %v8509_v12 = vcombine.high %v549_v5, %v557_v6  ;;  %v462_v5 = vld [vmem:[#allocation5 + $0x260] sm:$0xff] }
 0x16b   : > { %3799 = vmatpush1.bf16.msra.mxu0 %v8380_v14  ;;  %v541_v14 = vld [vmem:[#allocation5 + $0x4d8] sm:$0xff]  ;;  %v710_v6 = vld [vmem:[#allocation5 + $0xa20] sm:$0xff] }
 0x16c   : > { %3800 = vmatprep.subr.bf16.mxu0 %v8365_v17  ;;  %v8765_v17 = vcombine.high %v805_v7, %v813_v9  ;;  %v8493_v23 = vcombine.high %v533_v13, %v541_v14  ;;  %v8492_v29 = vcombine.low %v533_v13, %v541_v14 }
 0x16d   : > { %3840 = vmatpush1.bf16.msra.mxu1 %v8636_v15  ;;  %v789_v15 = vld [vmem:[#allocation5 + $0xc98] sm:$0xff] }
 0x16e   : > { %3841 = vmatprep.subr.bf16.mxu1 %v8621_v22  ;;  %v8764_v22 = vcombine.low %v805_v7, %v813_v9  ;;  %v8749_v27 = vcombine.high %v789_v15, %v797_v18  ;;  %v8748_v31 = vcombine.low %v789_v15, %v797_v18 }
 0x16f   : > { %3801 = vmatpush1.bf16.msra.mxu0 %v8364_v24  ;;  %v517_v24 = vld [vmem:[#allocation5 + $0x418] sm:$0xff] }
 0x170   : > { %3802 = vmatprep.subr.bf16.mxu0 %v8349_v26  ;;  %v773_v26 = vld [vmem:[#allocation5 + $0xc18] sm:$0xff] }
 0x171   : > { %3842 = vmatpush1.bf16.msra.mxu1 %v8620_v25  ;;  %v525_v25 = vld [vmem:[#allocation5 + $0x458] sm:$0xff]  ;;  %v8733_v36 = vcombine.high %v773_v26, %v781_v28 }
 0x172   : > { %3843 = vmatprep.subr.bf16.mxu1 %v8605_v30  ;;  %v10819_v30 = vshrl.u32 %v902_v21, 7  ;;  %v8476_v39 = vcombine.low %v517_v24, %v525_v25  ;;  %v438_v21 = vld [vmem:[#allocation5 + $0x1a0] sm:$0xff] }
 0x173   : > { %3803 = vmatpush1.bf16.msra.mxu0 %v8348_v32  ;;  %v8477_v32 = vcombine.high %v517_v24, %v525_v25  ;;  %v694_v25 = vld [vmem:[#allocation5 + $0x9a0] sm:$0xff] }
 0x174   : > { %3804 = vmatprep.subr.bf16.mxu0 %v8589_v34  ;;  %v510_v34 = vld [vmem:[#allocation5 + $0x3e0] sm:$0xff]  ;;  %v10827_v47 = vsub.s32 1, %v10819_v30 }
 0x175   : > { %3844 = vmatpush1.bf16.msra.mxu1 %v8604_v33  ;;  %v502_v33 = vld [vmem:[#allocation5 + $0x3a0] sm:$0xff] }
 0x176   : > { %3845 = vmatprep.subr.bf16.mxu1 %v8845_v38  ;;  %v10821_v38 = vld [vmem:[#allocation7] sm:$0xff] }
 0x177   : > { %3805 = vmatpush2.bf16.msra.mxu0 %v8588_v40  ;;  %v10824_v40 = vsub.s32 0, %v10819_v30 }
 0x178   : > { %3806 = vmatprep.subr.bf16.mxu0 %v8573_v42  ;;  %v8463_v42 = vcombine.high %v502_v33, %v510_v34 }
 0x179   : > { %3846 = vmatpush2.bf16.msra.mxu1 %v8844_v41  ;;  %v8732_v41 = vcombine.low %v773_v26, %v781_v28  ;;  %v702_v26 = vld [vmem:[#allocation5 + $0x9e0] sm:$0xff] }
 0x17a   : > { %3847 = vmatprep.subr.bf16.mxu1 %v8829_v46  ;;  %v8719_v46 = vcombine.high %v758_v35, %v766_v37  ;;  %v686_v35 = vld [vmem:[#allocation5 + $0x960] sm:$0xff]  ;;  %v8654_v37 = vcombine.low %v694_v25, %v702_v26 }
 0x17b   : > { %3807 = vmatpush2.bf16.msra.mxu0 %v8572_v48  ;;  %v750_v48 = vld [vmem:[#allocation5 + $0xb60] sm:$0xff] }
 0x17c   : > { %3808 = vmatprep.subr.bf16.mxu0 %v8557_v50  ;;  %v8462_v50 = vcombine.low %v502_v33, %v510_v34  ;;  %v678_v33 = vld [vmem:[#allocation5 + $0x920] sm:$0xff]  ;;  %v8655_v34 = vcombine.high %v694_v25, %v702_v26 }
 0x17d   : > { %3848 = vmatpush2.bf16.msra.mxu1 %v8828_v49  ;;  %v905_v49 = vrot.slane %v10821_v38, %v10824_v40  ;;  %v590_v25 = vld [vmem:[#allocation5 + $0x660] sm:$0xff] }
 0x17e   : > { %3849 = vmatprep.subr.bf16.mxu1 %v8813_v54  ;;  %v478_v54 = vld [vmem:[#allocation5 + $0x2e0] sm:$0xff] }
 0x17f   : > { %3809 = vmatpush2.bf16.msra.mxu0 %v8556_v56  ;;  %v909_v56 = vrot.slane %v10821_v38, %v10827_v47  ;;  %v8430_v15 = vcombine.low %v470_v53, %v478_v54  ;;  %v838_v26 = vld [vmem:[#allocation5 + $0xe20] sm:$0xff] }
 0x180   : > { %3810 = vmatprep.subr.bf16.mxu0 %v8541_v60  ;;  %v734_v60 = vld [vmem:[#allocation5 + $0xae0] sm:$0xff] }
 0x181   : > { %3850 = vmatpush2.bf16.msra.mxu1 %v8812_v57  ;;  %v8703_v57 = vcombine.high %v742_v45, %v750_v48  ;;  %v8686_v18 = vcombine.low %v726_v55, %v734_v60 }
 0x182   : > { %3851 = vmatprep.subr.bf16.mxu1 %v8797_v0  ;;  %v8446_v0 = vcombine.low %v486_v43, %v494_v44  ;;  %v662_v43 = vld [vmem:[#allocation5 + $0x8a0] sm:$0xff]  ;;  %v8639_v44 = vcombine.high %v678_v33, %v686_v35 }
 0x183   : > { %3811 = vmatpush2.bf16.msra.mxu0 %v8540_v2  ;;  %v8702_v2 = vcombine.low %v742_v45, %v750_v48  ;;  %v670_v45 = vld [vmem:[#allocation5 + $0x8e0] sm:$0xff]  ;;  %v8638_v48 = vcombine.low %v678_v33, %v686_v35 }
 0x184   : > { %3812 = vmatprep.subr.bf16.mxu0 %v8525_v4  ;;  %v454_v4 = vld [vmem:[#allocation5 + $0x220] sm:$0xff] }
 0x185   : > { %3852 = vmatpush2.bf16.msra.mxu1 %v8796_v3  ;;  %v8431_v3 = vcombine.high %v470_v53, %v478_v54  ;;  %v8623_v53 = vcombine.high %v662_v43, %v670_v45  ;;  %v654_v54 = vld [vmem:[#allocation5 + $0x860] sm:$0xff] }
 0x186   : > { %3853 = vmatprep.subr.bf16.mxu1 %v8781_v8  ;;  %v566_v33 = vld [vmem:[#allocation5 + $0x5a0] sm:$0xff] }
 0x187   : > { %3813 = vmatpush2.bf16.msra.mxu0 %v8524_v10  ;;  %v8687_v10 = vcombine.high %v726_v55, %v734_v60  ;;  %v630_v60 = vld [vmem:[#allocation5 + $0x7a0] sm:$0xff] }
 0x188   : > { %3814 = vmatprep.subr.bf16.mxu0 %v8509_v12  ;;  %v822_v35 = vld [vmem:[#allocation5 + $0xda0] sm:$0xff] }
 0x189   : > { %3854 = vmatpush2.bf16.msra.mxu1 %v8780_v11  ;;  %v718_v11 = vld [vmem:[#allocation5 + $0xa60] sm:$0xff] }
 0x18a   : > { %3855 = vmatprep.subr.bf16.mxu1 %v8765_v17  ;;  %v8671_v24 = vcombine.high %v710_v6, %v718_v11  ;;  %v8670_v28 = vcombine.low %v710_v6, %v718_v11  ;;  %v870_v6 = vld [vmem:[#allocation5 + $0xf20] sm:$0xff] }
 0x18b   : > { %3815 = vmatpush2.bf16.msra.mxu0 %v8508_v20  ;;  %v8415_v20 = vcombine.high %v454_v4, %v462_v5 }
 0x18c   : > { %3816 = vmatprep.subr.bf16.mxu0 %v8493_v23 }
 0x18d   : > { %3856 = vmatpush2.bf16.msra.mxu1 %v8764_v22  ;;  %v446_v22 = vld [vmem:[#allocation5 + $0x1e0] sm:$0xff] }
 0x18e   : > { %3857 = vmatprep.subr.bf16.mxu1 %v8749_v27  ;;  %v8414_v27 = vcombine.low %v454_v4, %v462_v5  ;;  %v614_v4 = vld [vmem:[#allocation5 + $0x720] sm:$0xff] }
 0x18f   : > { %3817 = vmatpush2.bf16.msra.mxu0 %v8492_v29  ;;  %v8399_v29 = vcombine.high %v438_v21, %v446_v22  ;;  %v622_v5 = vld [vmem:[#allocation5 + $0x760] sm:$0xff] }
 0x190   : > { %3818 = vmatprep.subr.bf16.mxu0 %v8477_v32  ;;  %v430_v32 = vld [vmem:[#allocation5 + $0x160] sm:$0xff] }
 0x191   : > { %3858 = vmatpush2.bf16.msra.mxu1 %v8748_v31  ;;  %v422_v31 = vld [vmem:[#allocation5 + $0x120] sm:$0xff] }
 0x192   : > { %3859 = vmatprep.subr.bf16.mxu1 %v8733_v36  ;;  %v8398_v36 = vcombine.low %v438_v21, %v446_v22  ;;  %v8574_v21 = vcombine.low %v614_v4, %v622_v5 }
 0x193   : > { %3819 = vmatpush2.bf16.msra.mxu0 %v8476_v39  ;;  %v8383_v39 = vcombine.high %v422_v31, %v430_v32 }
 0x194   : > { %3870 = vmatprep.subr.bf16.mxu0 %v8463_v42  ;;  %v414_v42 = vld [vmem:[#allocation5 + $0xe0] sm:$0xff] }
 0x195   : > { %3860 = vmatpush2.bf16.msra.mxu1 %v8732_v41  ;;  %v406_v41 = vld [vmem:[#allocation5 + $0xa0] sm:$0xff] }
 0x196   : > { %3911 = vmatprep.subr.bf16.mxu1 %v8719_v46  ;;  %v3576_v61 = vpop.f32.mrf.mxu0  ;;  %3821 = vmatmul.mubr.bf16.vlgmr.msra.gmra.mxu0 %v10803_v16  ;;  %v8382_v46 = vcombine.low %v422_v31, %v430_v32  ;;  %v8366_v55 = vcombine.low %v406_v41, %v414_v42 }
 0x197   : > { %v3577_v62 = vadd.f32 %v3576_v61, %v905_v49  ;;  %3871 = vmatpush1.bf16.msra.mxu0 %v8462_v50  ;;  %3902 = vmatprep.mubr.bf16.mxu0 %v10795_v58  ;;  %v8367_v49 = vcombine.high %v406_v41, %v414_v42  ;;  %v390_v50 = vld [vmem:[#allocation5 + $0x20] sm:$0xff] }
 0x198   : > { %v3617_v63 = vpop.f32.mrf.mxu1  ;;  %3862 = vmatmul.mubr.bf16.vlgmr.msra.gmra.mxu1 %v10805_v19  ;;  %v3578_v1 = vpop.f32.mrf.mxu0  ;;  %3872 = vmatprep.subr.bf16.mxu0 %v8447_v52  ;;  %v646_v52 = vld [vmem:[#allocation5 + $0x820] sm:$0xff] }
 0x199   : > { %3912 = vmatpush1.bf16.msra.mxu1 %v8718_v51  ;;  %v10835_v7 = vadd.f32 %v3617_v63, %v3577_v62  ;;  %v3579_v8 = vadd.f32 %v3578_v1, %v909_v56  ;;  %3943 = vmatprep.mubr.bf16.mxu1 %v10797_v59  ;;  %v398_v51 = vld [vmem:[#allocation5 + $0x60] sm:$0xff]  ;;  %v8622_v56 = vcombine.low %v662_v43, %v670_v45 }
 0x19a   : > { %v3619_v9 = vpop.f32.mrf.mxu1  ;;  %3913 = vmatprep.subr.bf16.mxu1 %v8703_v57  ;;  %v3580_v12 = vpop.f32.mrf.mxu0  ;;  %v8351_v57 = vcombine.high %v390_v50, %v398_v51  ;;  %v638_v61 = vld [vmem:[#allocation5 + $0x7e0] sm:$0xff]  ;;  %v8607_v63 = vcombine.high %v646_v52, %v654_v54  ;;  %v8350_v1 = vcombine.low %v390_v50, %v398_v51 }
 0x19b   : > { %v10839_v13 = vadd.f32 %v3619_v9, %v3579_v8  ;;  %3873 = vmatpush1.bf16.msra.mxu0 %v8446_v0  ;;  %v886_v62 = vld [vmem:[#allocation5 + $0xfa0] sm:$0xff]  ;;  %v8575_v12 = vcombine.high %v614_v4, %v622_v5 }
 0x19c   : > { %v3621_v14 = vpop.f32.mrf.mxu1  ;;  %v3581_v17 = vpop.f32.mrf.mxu0  ;;  %3874 = vmatprep.subr.bf16.mxu0 %v8431_v3  ;;  %v894_v0 = vld [vmem:[#allocation5 + $0xfe0] sm:$0xff]  ;;  %v8591_v3 = vcombine.high %v630_v60, %v638_v61 }
 0x19d   : > { %3914 = vmatpush1.bf16.msra.mxu1 %v8702_v2  ;;  %v8606_v2 = vcombine.low %v646_v52, %v654_v54  ;;  %v8847_v8 = vcombine.high %v886_v62, %v894_v0  ;;  %v878_v9 = vld [vmem:[#allocation5 + $0xf60] sm:$0xff]  ;;  %v8846_v11 = vcombine.low %v886_v62, %v894_v0 }
 0x19e   : > { %v3622_v23 = vpop.f32.mrf.mxu1  ;;  %3915 = vmatprep.subr.bf16.mxu1 %v8687_v10  ;;  %v8590_v10 = vcombine.low %v630_v60, %v638_v61  ;;  %v598_v14 = vld [vmem:[#allocation5 + $0x6a0] sm:$0xff]  ;;  %v8830_v22 = vcombine.low %v870_v6, %v878_v9 }
 0x19f   : > { %3875 = vmatpush1.bf16.msra.mxu0 %v8430_v15  ;;  %v606_v15 = vld [vmem:[#allocation5 + $0x6e0] sm:$0xff] }
 0x1a0   : > { %3876 = vmatprep.subr.bf16.mxu0 %v8415_v20  ;;  %v854_v17 = vld [vmem:[#allocation5 + $0xea0] sm:$0xff]  ;;  %v8559_v23 = vcombine.high %v598_v14, %v606_v15 }
 0x1a1   : > { %3916 = vmatpush1.bf16.msra.mxu1 %v8686_v18  ;;  %v8831_v18 = vcombine.high %v870_v6, %v878_v9  ;;  %v862_v20 = vld [vmem:[#allocation5 + $0xee0] sm:$0xff]  ;;  %v503_v6 = vld [vmem:[#allocation5 + $0x3a8] sm:$0xff] }
 0x1a2   : > { %3917 = vmatprep.subr.bf16.mxu1 %v8671_v24  ;;  %v582_v24 = vld [vmem:[#allocation5 + $0x620] sm:$0xff]  ;;  %v8814_v31 = vcombine.low %v854_v17, %v862_v20  ;;  %v759_v9 = vld [vmem:[#allocation5 + $0xba8] sm:$0xff] }
 0x1a3   : > { %3877 = vmatpush1.bf16.msra.mxu0 %v8414_v27  ;;  %v8815_v27 = vcombine.high %v854_v17, %v862_v20  ;;  %v8543_v32 = vcombine.high %v582_v24, %v590_v25  ;;  %v550_v43 = vld [vmem:[#allocation5 + $0x520] sm:$0xff]  ;;  %v495_v20 = vld [vmem:[#allocation5 + $0x368] sm:$0xff] }
 0x1a4   : > { %3878 = vmatprep.subr.bf16.mxu0 %v8399_v29  ;;  %v8558_v29 = vcombine.low %v598_v14, %v606_v15  ;;  %v806_v45 = vld [vmem:[#allocation5 + $0xd20] sm:$0xff]  ;;  %v10842_v14 = vsub.s32 2, %v10819_v30 }
 0x1a5   : > { %3918 = vmatpush1.bf16.msra.mxu1 %v8670_v28  ;;  %v846_v28 = vld [vmem:[#allocation5 + $0xe60] sm:$0xff] }
 0x1a6   : > { %3919 = vmatprep.subr.bf16.mxu1 %v8655_v34  ;;  %v574_v34 = vld [vmem:[#allocation5 + $0x5e0] sm:$0xff]  ;;  %v8798_v41 = vcombine.low %v838_v26, %v846_v28 }
 0x1a7   : > { %3879 = vmatpush1.bf16.msra.mxu0 %v8398_v36  ;;  %v8799_v36 = vcombine.high %v838_v26, %v846_v28  ;;  %v8527_v42 = vcombine.high %v566_v33, %v574_v34  ;;  %v534_v52 = vld [vmem:[#allocation5 + $0x4a0] sm:$0xff] }
 0x1a8   : > { %3880 = vmatprep.subr.bf16.mxu0 %v8383_v39  ;;  %v8542_v39 = vcombine.low %v582_v24, %v590_v25  ;;  %v790_v54 = vld [vmem:[#allocation5 + $0xca0] sm:$0xff]  ;;  %v751_v24 = vld [vmem:[#allocation5 + $0xb68] sm:$0xff]  ;;  %v913_v25 = vrot.slane %v10821_v38, %v10842_v14 }
 0x1a9   : > { %3920 = vmatpush1.bf16.msra.mxu1 %v8654_v37  ;;  %v830_v37 = vld [vmem:[#allocation5 + $0xde0] sm:$0xff] }
 0x1aa   : > { %3921 = vmatprep.subr.bf16.mxu1 %v8639_v44  ;;  %v558_v44 = vld [vmem:[#allocation5 + $0x560] sm:$0xff]  ;;  %v8782_v50 = vcombine.low %v822_v35, %v830_v37 }
 0x1ab   : > { %3881 = vmatpush1.bf16.msra.mxu0 %v8382_v46  ;;  %v8783_v46 = vcombine.high %v822_v35, %v830_v37  ;;  %v8511_v51 = vcombine.high %v550_v43, %v558_v44  ;;  %v518_v62 = vld [vmem:[#allocation5 + $0x420] sm:$0xff] }
 0x1ac   : > { %3882 = vmatprep.subr.bf16.mxu0 %v8367_v49  ;;  %v8526_v49 = vcombine.low %v566_v33, %v574_v34  ;;  %v774_v0 = vld [vmem:[#allocation5 + $0xc20] sm:$0xff]  ;;  %v727_v34 = vld [vmem:[#allocation5 + $0xaa8] sm:$0xff] }
 0x1ad   : > { %3922 = vmatpush1.bf16.msra.mxu1 %v8638_v48  ;;  %v814_v48 = vld [vmem:[#allocation5 + $0xd60] sm:$0xff] }
 0x1ae   : > { %3923 = vmatprep.subr.bf16.mxu1 %v8623_v53  ;;  %v542_v53 = vld [vmem:[#allocation5 + $0x4e0] sm:$0xff]  ;;  %v8766_v60 = vcombine.low %v806_v45, %v814_v48 }
 0x1af   : > { %3883 = vmatpush1.bf16.msra.mxu0 %v8366_v55  ;;  %v8767_v55 = vcombine.high %v806_v45, %v814_v48  ;;  %v8495_v61 = vcombine.high %v534_v52, %v542_v53 }
 0x1b0   : > { %3884 = vmatprep.subr.bf16.mxu0 %v8351_v57  ;;  %v8510_v57 = vcombine.low %v550_v43, %v558_v44 }
 0x1b1   : > { %3924 = vmatpush1.bf16.msra.mxu1 %v8622_v56  ;;  %v798_v56 = vld [vmem:[#allocation5 + $0xce0] sm:$0xff] }
 0x1b2   : > { %3925 = vmatprep.subr.bf16.mxu1 %v8607_v63  ;;  %v526_v63 = vld [vmem:[#allocation5 + $0x460] sm:$0xff]  ;;  %v8750_v4 = vcombine.low %v790_v54, %v798_v56 }
 0x1b3   : > { %3885 = vmatpush1.bf16.msra.mxu0 %v8350_v1  ;;  %v8751_v1 = vcombine.high %v790_v54, %v798_v56  ;;  %v8479_v5 = vcombine.high %v518_v62, %v526_v63 }
 0x1b4   : > { %3886 = vmatprep.subr.bf16.mxu0 %v8591_v3  ;;  %v8494_v3 = vcombine.low %v534_v52, %v542_v53  ;;  %v711_v52 = vld [vmem:[#allocation5 + $0xa28] sm:$0xff] }
 0x1b5   : > { %3926 = vmatpush1.bf16.msra.mxu1 %v8606_v2  ;;  %v782_v2 = vld [vmem:[#allocation5 + $0xc60] sm:$0xff]  ;;  %v719_v53 = vld [vmem:[#allocation5 + $0xa68] sm:$0xff] }
 0x1b6   : > { %3927 = vmatprep.subr.bf16.mxu1 %v8847_v8  ;;  %v511_v8 = vld [vmem:[#allocation5 + $0x3e8] sm:$0xff]  ;;  %v8734_v15 = vcombine.low %v774_v0, %v782_v2 }
 0x1b7   : > { %3887 = vmatpush2.bf16.msra.mxu0 %v8590_v10  ;;  %v8735_v10 = vcombine.high %v774_v0, %v782_v2  ;;  %v8465_v17 = vcombine.high %v503_v6, %v511_v8  ;;  %v8464_v26 = vcombine.low %v503_v6, %v511_v8  ;;  %v439_v0 = vld [vmem:[#allocation5 + $0x1a8] sm:$0xff] }
 0x1b8   : > { %3888 = vmatprep.subr.bf16.mxu0 %v8575_v12  ;;  %v8478_v12 = vcombine.low %v518_v62, %v526_v63  ;;  %v8673_v63 = vcombine.high %v711_v52, %v719_v53  ;;  %v695_v2 = vld [vmem:[#allocation5 + $0x9a8] sm:$0xff] }
 0x1b9   : > { %3928 = vmatpush2.bf16.msra.mxu1 %v8846_v11  ;;  %v767_v11 = vld [vmem:[#allocation5 + $0xbe8] sm:$0xff] }
 0x1ba   : > { %3929 = vmatprep.subr.bf16.mxu1 %v8831_v18  ;;  %v487_v18 = vld [vmem:[#allocation5 + $0x328] sm:$0xff] }
 0x1bb   : > { %3889 = vmatpush2.bf16.msra.mxu0 %v8574_v21  ;;  %v743_v21 = vld [vmem:[#allocation5 + $0xb28] sm:$0xff]  ;;  %v8449_v28 = vcombine.high %v487_v18, %v495_v20 }
 0x1bc   : > { %3890 = vmatprep.subr.bf16.mxu0 %v8559_v23  ;;  %v10845_v23 = vsub.s32 3, %v10819_v30  ;;  %v8705_v33 = vcombine.high %v743_v21, %v751_v24  ;;  %v8704_v43 = vcombine.low %v743_v21, %v751_v24  ;;  %v407_v21 = vld [vmem:[#allocation5 + $0xa8] sm:$0xff] }
 0x1bd   : > { %3930 = vmatpush2.bf16.msra.mxu1 %v8830_v22  ;;  %v8721_v22 = vcombine.high %v759_v9, %v767_v11  ;;  %v663_v24 = vld [vmem:[#allocation5 + $0x8a8] sm:$0xff] }
 0x1be   : > { %3931 = vmatprep.subr.bf16.mxu1 %v8815_v27  ;;  %v8720_v27 = vcombine.low %v759_v9, %v767_v11  ;;  %v423_v9 = vld [vmem:[#allocation5 + $0x128] sm:$0xff] }
 0x1bf   : > { %3891 = vmatpush2.bf16.msra.mxu0 %v8558_v29  ;;  %v471_v29 = vld [vmem:[#allocation5 + $0x2a8] sm:$0xff] }
 0x1c0   : > { %3892 = vmatprep.subr.bf16.mxu0 %v8543_v32  ;;  %v917_v32 = vrot.slane %v10821_v38, %v10845_v23  ;;  %v679_v11 = vld [vmem:[#allocation5 + $0x928] sm:$0xff] }
 0x1c1   : > { %3932 = vmatpush2.bf16.msra.mxu1 %v8814_v31  ;;  %v479_v31 = vld [vmem:[#allocation5 + $0x2e8] sm:$0xff] }
 0x1c2   : > { %3933 = vmatprep.subr.bf16.mxu1 %v8799_v36  ;;  %v735_v36 = vld [vmem:[#allocation5 + $0xae8] sm:$0xff]  ;;  %v8433_v44 = vcombine.high %v471_v29, %v479_v31  ;;  %v8432_v56 = vcombine.low %v471_v29, %v479_v31 }
 0x1c3   : > { %3893 = vmatpush2.bf16.msra.mxu0 %v8542_v39  ;;  %v8689_v48 = vcombine.high %v727_v34, %v735_v36  ;;  %v391_v31 = vld [vmem:[#allocation5 + $0x28] sm:$0xff] }
 0x1c4   : > { %3894 = vmatprep.subr.bf16.mxu0 %v8527_v42 }
 0x1c5   : > { %3934 = vmatpush2.bf16.msra.mxu1 %v8798_v41  ;;  %v8448_v41 = vcombine.low %v487_v18, %v495_v20 }
 0x1c6   : > { %3935 = vmatprep.subr.bf16.mxu1 %v8783_v46 }
 0x1c7   : > { %3895 = vmatpush2.bf16.msra.mxu0 %v8526_v49  ;;  %v455_v49 = vld [vmem:[#allocation5 + $0x228] sm:$0xff] }
 0x1c8   : > { %3896 = vmatprep.subr.bf16.mxu0 %v8511_v51 }
 0x1c9   : > { %3936 = vmatpush2.bf16.msra.mxu1 %v8782_v50  ;;  %v463_v50 = vld [vmem:[#allocation5 + $0x268] sm:$0xff] }
 0x1ca   : > { %3937 = vmatprep.subr.bf16.mxu1 %v8767_v55 }
 0x1cb   : > { %3897 = vmatpush2.bf16.msra.mxu0 %v8510_v57 }
 0x1cc   : > { %3898 = vmatprep.subr.bf16.mxu0 %v8495_v61  ;;  %v8417_v61 = vcombine.high %v455_v49, %v463_v50 }
 0x1cd   : > { %3938 = vmatpush2.bf16.msra.mxu1 %v8766_v60  ;;  %v8688_v60 = vcombine.low %v727_v34, %v735_v36  ;;  %v655_v34 = vld [vmem:[#allocation5 + $0x868] sm:$0xff] }
 0x1ce   : > { %3939 = vmatprep.subr.bf16.mxu1 %v8751_v1  ;;  %v447_v1 = vld [vmem:[#allocation5 + $0x1e8] sm:$0xff] }
 0x1cf   : > { %3899 = vmatpush2.bf16.msra.mxu0 %v8494_v3  ;;  %v703_v3 = vld [vmem:[#allocation5 + $0x9e8] sm:$0xff]  ;;  %v8401_v6 = vcombine.high %v439_v0, %v447_v1 }
 0x1d0   : > { %3900 = vmatprep.subr.bf16.mxu0 %v8479_v5  ;;  %v8672_v5 = vcombine.low %v711_v52, %v719_v53  ;;  %v8657_v8 = vcombine.high %v695_v2, %v703_v3  ;;  %v871_v52 = vld [vmem:[#allocation5 + $0xf28] sm:$0xff] }
 0x1d1   : > { %3940 = vmatpush2.bf16.msra.mxu1 %v8750_v4  ;;  %v8416_v4 = vcombine.low %v455_v49, %v463_v50  ;;  %v615_v50 = vld [vmem:[#allocation5 + $0x728] sm:$0xff] }
 0x1d2   : > { %3941 = vmatprep.subr.bf16.mxu1 %v8735_v10  ;;  %v431_v10 = vld [vmem:[#allocation5 + $0x168] sm:$0xff] }
 0x1d3   : > { %3901 = vmatpush2.bf16.msra.mxu0 %v8478_v12  ;;  %v687_v12 = vld [vmem:[#allocation5 + $0x968] sm:$0xff]  ;;  %v8385_v18 = vcombine.high %v423_v9, %v431_v10 }
 0x1d4   : > { %3952 = vmatprep.subr.bf16.mxu0 %v8465_v17  ;;  %v8656_v17 = vcombine.low %v695_v2, %v703_v3  ;;  %v8641_v20 = vcombine.high %v679_v11, %v687_v12  ;;  %v879_v53 = vld [vmem:[#allocation5 + $0xf68] sm:$0xff] }
 0x1d5   : > { %3942 = vmatpush2.bf16.msra.mxu1 %v8734_v15  ;;  %v8400_v15 = vcombine.low %v439_v0, %v447_v1  ;;  %v863_v0 = vld [vmem:[#allocation5 + $0xee8] sm:$0xff]  ;;  %v8832_v2 = vcombine.low %v871_v52, %v879_v53 }
 0x1d6   : > { %3993 = vmatprep.subr.bf16.mxu1 %v8721_v22  ;;  %v3658_v35 = vpop.f32.mrf.mxu0  ;;  %3903 = vmatmul.mubr.bf16.vlgmr.msra.gmra.mxu0 %v10803_v16  ;;  %v415_v22 = vld [vmem:[#allocation5 + $0xe8] sm:$0xff] }
 0x1d7   : > { %v3659_v37 = vadd.f32 %v3658_v35, %v913_v25  ;;  %3953 = vmatpush1.bf16.msra.mxu0 %v8464_v26  ;;  %3984 = vmatprep.mubr.bf16.mxu0 %v10795_v58  ;;  %v671_v25 = vld [vmem:[#allocation5 + $0x8e8] sm:$0xff]  ;;  %v8384_v26 = vcombine.low %v423_v9, %v431_v10  ;;  %v8368_v35 = vcombine.low %v407_v21, %v415_v22 }
 0x1d8   : > { %v3699_v39 = vpop.f32.mrf.mxu1  ;;  %3944 = vmatmul.mubr.bf16.vlgmr.msra.gmra.mxu1 %v10805_v19  ;;  %v3660_v42 = vpop.f32.mrf.mxu0  ;;  %3954 = vmatprep.subr.bf16.mxu0 %v8449_v28  ;;  %v8369_v28 = vcombine.high %v407_v21, %v415_v22  ;;  %v8625_v29 = vcombine.high %v663_v24, %v671_v25  ;;  %v8624_v36 = vcombine.low %v663_v24, %v671_v25  ;;  %v847_v9 = vld [vmem:[#allocation5 + $0xe68] sm:$0xff] }
 0x1d9   : > { %3994 = vmatpush1.bf16.msra.mxu1 %v8720_v27  ;;  %v10853_v45 = vadd.f32 %v3699_v39, %v3659_v37  ;;  %v3661_v38 = vadd.f32 %v3660_v42, %v917_v32  ;;  %4025 = vmatprep.mubr.bf16.mxu1 %v10797_v59  ;;  %v8640_v27 = vcombine.low %v679_v11, %v687_v12  ;;  %v399_v32 = vld [vmem:[#allocation5 + $0x68] sm:$0xff] }
 0x1da   : > { %v3701_v46 = vpop.f32.mrf.mxu1  ;;  %3995 = vmatprep.subr.bf16.mxu1 %v8705_v33  ;;  %v3662_v51 = vpop.f32.mrf.mxu0  ;;  %v647_v33 = vld [vmem:[#allocation5 + $0x828] sm:$0xff]  ;;  %v8353_v37 = vcombine.high %v391_v31, %v399_v32 }
 0x1db   : > { %v10857_v54 = vadd.f32 %v3701_v46, %v3661_v38  ;;  %3955 = vmatpush1.bf16.msra.mxu0 %v8448_v41  ;;  %v8609_v39 = vcombine.high %v647_v33, %v655_v34  ;;  %v631_v41 = vld [vmem:[#allocation5 + $0x7a8] sm:$0xff]  ;;  %v8352_v38 = vcombine.low %v391_v31, %v399_v32  ;;  %v8608_v46 = vcombine.low %v647_v33, %v655_v34 }
 0x1dc   : > { %v3703_v55 = vpop.f32.mrf.mxu1  ;;  %v3663_v57 = vpop.f32.mrf.mxu0  ;;  %3956 = vmatprep.subr.bf16.mxu0 %v8433_v44  ;;  %v639_v42 = vld [vmem:[#allocation5 + $0x7e8] sm:$0xff] }
 0x1dd   : > { %3996 = vmatpush1.bf16.msra.mxu1 %v8704_v43  ;;  %v887_v43 = vld [vmem:[#allocation5 + $0xfa8] sm:$0xff]  ;;  %v8592_v55 = vcombine.low %v631_v41, %v639_v42 }
 0x1de   : > { %v3704_v62 = vpop.f32.mrf.mxu1  ;;  %3997 = vmatprep.subr.bf16.mxu1 %v8689_v48  ;;  %v895_v44 = vld [vmem:[#allocation5 + $0xfe8] sm:$0xff]  ;;  %v8593_v48 = vcombine.high %v631_v41, %v639_v42 }
 0x1df   : > { %3957 = vmatpush1.bf16.msra.mxu0 %v8432_v56  ;;  %v8849_v49 = vcombine.high %v887_v43, %v895_v44  ;;  %v623_v51 = vld [vmem:[#allocation5 + $0x768] sm:$0xff]  ;;  %v8848_v56 = vcombine.low %v887_v43, %v895_v44 }
 0x1e0   : > { %3958 = vmatprep.subr.bf16.mxu0 %v8417_v61  ;;  %v8577_v57 = vcombine.high %v615_v50, %v623_v51  ;;  %v599_v61 = vld [vmem:[#allocation5 + $0x6a8] sm:$0xff]  ;;  %v8576_v1 = vcombine.low %v615_v50, %v623_v51 }
 0x1e1   : > { %3998 = vmatpush1.bf16.msra.mxu1 %v8688_v60  ;;  %v8833_v60 = vcombine.high %v871_v52, %v879_v53  ;;  %v607_v62 = vld [vmem:[#allocation5 + $0x6e8] sm:$0xff] }
 0x1e2   : > { %3999 = vmatprep.subr.bf16.mxu1 %v8673_v63  ;;  %v855_v63 = vld [vmem:[#allocation5 + $0xea8] sm:$0xff]  ;;  %v8561_v3 = vcombine.high %v599_v61, %v607_v62  ;;  %v8560_v10 = vcombine.low %v599_v61, %v607_v62  ;;  %v768_v61 = vld [vmem:[#allocation5 + $0xbf0] sm:$0xff] }
 0x1e3   : > { %3959 = vmatpush1.bf16.msra.mxu0 %v8416_v4  ;;  %v8817_v4 = vcombine.high %v855_v63, %v863_v0  ;;  %v8816_v11 = vcombine.low %v855_v63, %v863_v0  ;;  %v831_v21 = vld [vmem:[#allocation5 + $0xde8] sm:$0xff]  ;;  %v920_v63 = vsub.s32 4, %v10819_v30 }
 0x1e4   : > { %3960 = vmatprep.subr.bf16.mxu0 %v8401_v6  ;;  %v591_v6 = vld [vmem:[#allocation5 + $0x668] sm:$0xff] }
 0x1e5   : > { %4000 = vmatpush1.bf16.msra.mxu1 %v8672_v5  ;;  %v583_v5 = vld [vmem:[#allocation5 + $0x628] sm:$0xff] }
 0x1e6   : > { %4001 = vmatprep.subr.bf16.mxu1 %v8657_v8  ;;  %v839_v8 = vld [vmem:[#allocation5 + $0xe28] sm:$0xff]  ;;  %v8545_v12 = vcombine.high %v583_v5, %v591_v6  ;;  %v8544_v22 = vcombine.low %v583_v5, %v591_v6  ;;  %v496_v5 = vld [vmem:[#allocation5 + $0x370] sm:$0xff] }
 0x1e7   : > { %3961 = vmatpush1.bf16.msra.mxu0 %v8400_v15  ;;  %v8801_v15 = vcombine.high %v839_v8, %v847_v9  ;;  %v8800_v24 = vcombine.low %v839_v8, %v847_v9  ;;  %v815_v31 = vld [vmem:[#allocation5 + $0xd68] sm:$0xff]  ;;  %v744_v6 = vld [vmem:[#allocation5 + $0xb30] sm:$0xff]  ;;  %v10861_v9 = vld [vmem:[#allocation7] sm:$0xff] }
 0x1e8   : > { %3962 = vmatprep.subr.bf16.mxu0 %v8385_v18  ;;  %v575_v18 = vld [vmem:[#allocation5 + $0x5e8] sm:$0xff]  ;;  %v752_v8 = vld [vmem:[#allocation5 + $0xb70] sm:$0xff] }
 0x1e9   : > { %4002 = vmatpush1.bf16.msra.mxu1 %v8656_v17  ;;  %v567_v17 = vld [vmem:[#allocation5 + $0x5a8] sm:$0xff] }
 0x1ea   : > { %4003 = vmatprep.subr.bf16.mxu1 %v8641_v20  ;;  %v823_v20 = vld [vmem:[#allocation5 + $0xda8] sm:$0xff]  ;;  %v8529_v25 = vcombine.high %v567_v17, %v575_v18  ;;  %v8528_v32 = vcombine.low %v567_v17, %v575_v18  ;;  %v8707_v18 = vcombine.high %v744_v6, %v752_v8 }
 0x1eb   : > { %3963 = vmatpush1.bf16.msra.mxu0 %v8384_v26  ;;  %v8785_v26 = vcombine.high %v823_v20, %v831_v21  ;;  %v8784_v33 = vcombine.low %v823_v20, %v831_v21  ;;  %v799_v41 = vld [vmem:[#allocation5 + $0xce8] sm:$0xff]  ;;  %v472_v20 = vld [vmem:[#allocation5 + $0x2b0] sm:$0xff] }
 0x1ec   : > { %3964 = vmatprep.subr.bf16.mxu0 %v8369_v28  ;;  %v559_v28 = vld [vmem:[#allocation5 + $0x568] sm:$0xff]  ;;  %v480_v21 = vld [vmem:[#allocation5 + $0x2f0] sm:$0xff] }
 0x1ed   : > { %4004 = vmatpush1.bf16.msra.mxu1 %v8640_v27  ;;  %v551_v27 = vld [vmem:[#allocation5 + $0x528] sm:$0xff] }
 0x1ee   : > { %4005 = vmatprep.subr.bf16.mxu1 %v8625_v29  ;;  %v807_v29 = vld [vmem:[#allocation5 + $0xd28] sm:$0xff]  ;;  %v8513_v34 = vcombine.high %v551_v27, %v559_v28  ;;  %v8512_v42 = vcombine.low %v551_v27, %v559_v28 }
 0x1ef   : > { %3965 = vmatpush1.bf16.msra.mxu0 %v8368_v35  ;;  %v8769_v35 = vcombine.high %v807_v29, %v815_v31  ;;  %v8768_v43 = vcombine.low %v807_v29, %v815_v31  ;;  %v783_v50 = vld [vmem:[#allocation5 + $0xc68] sm:$0xff]  ;;  %v8706_v31 = vcombine.low %v744_v6, %v752_v8 }
 0x1f0   : > { %3966 = vmatprep.subr.bf16.mxu0 %v8353_v37  ;;  %v543_v37 = vld [vmem:[#allocation5 + $0x4e8] sm:$0xff] }
 0x1f1   : > { %4006 = vmatpush1.bf16.msra.mxu1 %v8624_v36  ;;  %v535_v36 = vld [vmem:[#allocation5 + $0x4a8] sm:$0xff] }
 0x1f2   : > { %4007 = vmatprep.subr.bf16.mxu1 %v8609_v39  ;;  %v791_v39 = vld [vmem:[#allocation5 + $0xca8] sm:$0xff]  ;;  %v8497_v44 = vcombine.high %v535_v36, %v543_v37  ;;  %v8496_v51 = vcombine.low %v535_v36, %v543_v37  ;;  %v456_v37 = vld [vmem:[#allocation5 + $0x230] sm:$0xff] }
 0x1f3   : > { %3967 = vmatpush1.bf16.msra.mxu0 %v8352_v38  ;;  %v8753_v38 = vcombine.high %v791_v39, %v799_v41  ;;  %v8752_v52 = vcombine.low %v791_v39, %v799_v41  ;;  %v464_v39 = vld [vmem:[#allocation5 + $0x270] sm:$0xff] }
 0x1f4   : > { %3968 = vmatprep.subr.bf16.mxu0 %v8593_v48  ;;  %v527_v48 = vld [vmem:[#allocation5 + $0x468] sm:$0xff] }
 0x1f5   : > { %4008 = vmatpush1.bf16.msra.mxu1 %v8608_v46  ;;  %v519_v46 = vld [vmem:[#allocation5 + $0x428] sm:$0xff] }
 0x1f6   : > { %4009 = vmatprep.subr.bf16.mxu1 %v8849_v49  ;;  %v775_v49 = vld [vmem:[#allocation5 + $0xc28] sm:$0xff]  ;;  %v8481_v53 = vcombine.high %v519_v46, %v527_v48  ;;  %v8480_v62 = vcombine.low %v519_v46, %v527_v48  ;;  %v8434_v46 = vcombine.low %v472_v20, %v480_v21 }
 0x1f7   : > { %3969 = vmatpush2.bf16.msra.mxu0 %v8592_v55  ;;  %v8737_v55 = vcombine.high %v775_v49, %v783_v50  ;;  %v8736_v0 = vcombine.low %v775_v49, %v783_v50  ;;  %v8419_v50 = vcombine.high %v456_v37, %v464_v39 }
 0x1f8   : > { %3970 = vmatprep.subr.bf16.mxu0 %v8577_v57  ;;  %v512_v57 = vld [vmem:[#allocation5 + $0x3f0] sm:$0xff] }
 0x1f9   : > { %4010 = vmatpush2.bf16.msra.mxu1 %v8848_v56  ;;  %v504_v56 = vld [vmem:[#allocation5 + $0x3b0] sm:$0xff] }
 0x1fa   : > { %4011 = vmatprep.subr.bf16.mxu1 %v8833_v60  ;;  %v760_v60 = vld [vmem:[#allocation5 + $0xbb0] sm:$0xff] }
 0x1fb   : > { %3971 = vmatpush2.bf16.msra.mxu0 %v8576_v1  ;;  %v8467_v1 = vcombine.high %v504_v56, %v512_v57 }
 0x1fc   : > { %3972 = vmatprep.subr.bf16.mxu0 %v8561_v3  ;;  %v924_v3 = vsub.s32 5, %v10819_v30 }
 0x1fd   : > { %4012 = vmatpush2.bf16.msra.mxu1 %v8832_v2  ;;  %v8723_v2 = vcombine.high %v760_v60, %v768_v61 }
 0x1fe   : > { %4013 = vmatprep.subr.bf16.mxu1 %v8817_v4  ;;  %v488_v4 = vld [vmem:[#allocation5 + $0x330] sm:$0xff]  ;;  %v925_v17 = vrot.slane %v10861_v9, %v924_v3 }
 0x1ff   : > { %3973 = vmatpush2.bf16.msra.mxu0 %v8560_v10  ;;  %v921_v10 = vrot.slane %v10861_v9, %v920_v63  ;;  %v8450_v28 = vcombine.low %v488_v4, %v496_v5 }
 0x200   : > { %3974 = vmatprep.subr.bf16.mxu0 %v8545_v12  ;;  %v8722_v12 = vcombine.low %v760_v60, %v768_v61  ;;  %v8418_v60 = vcombine.low %v456_v37, %v464_v39  ;;  %v888_v37 = vld [vmem:[#allocation5 + $0xfb0] sm:$0xff] }
 0x201   : > { %4014 = vmatpush2.bf16.msra.mxu1 %v8816_v11  ;;  %v8466_v11 = vcombine.low %v504_v56, %v512_v57  ;;  %v696_v56 = vld [vmem:[#allocation5 + $0x9b0] sm:$0xff] }
 0x202   : > { %4015 = vmatprep.subr.bf16.mxu1 %v8801_v15  ;;  %v8451_v15 = vcombine.high %v488_v4, %v496_v5  ;;  %v704_v57 = vld [vmem:[#allocation5 + $0x9f0] sm:$0xff] }
 0x203   : > { %3975 = vmatpush2.bf16.msra.mxu0 %v8544_v22  ;;  %v680_v4 = vld [vmem:[#allocation5 + $0x930] sm:$0xff]  ;;  %v8658_v8 = vcombine.low %v696_v56, %v704_v57 }
 0x204   : > { %3976 = vmatprep.subr.bf16.mxu0 %v8529_v25  ;;  %v736_v25 = vld [vmem:[#allocation5 + $0xaf0] sm:$0xff] }
 0x205   : > { %4016 = vmatpush2.bf16.msra.mxu1 %v8800_v24  ;;  %v728_v24 = vld [vmem:[#allocation5 + $0xab0] sm:$0xff] }
 0x206   : > { %4017 = vmatprep.subr.bf16.mxu1 %v8785_v26  ;;  %v8691_v36 = vcombine.high %v728_v24, %v736_v25  ;;  %v8690_v49 = vcombine.low %v728_v24, %v736_v25  ;;  %v688_v5 = vld [vmem:[#allocation5 + $0x970] sm:$0xff] }
 0x207   : > { %3977 = vmatpush2.bf16.msra.mxu0 %v8528_v32  ;;  %v8435_v32 = vcombine.high %v472_v20, %v480_v21  ;;  %v8642_v21 = vcombine.low %v680_v4, %v688_v5  ;;  %v392_v25 = vld [vmem:[#allocation5 + $0x30] sm:$0xff] }
 0x208   : > { %3978 = vmatprep.subr.bf16.mxu0 %v8513_v34  ;;  %v896_v39 = vld [vmem:[#allocation5 + $0xff0] sm:$0xff] }
 0x209   : > { %4018 = vmatpush2.bf16.msra.mxu1 %v8784_v33 }
 0x20a   : > { %4019 = vmatprep.subr.bf16.mxu1 %v8769_v35 }
 0x20b   : > { %3979 = vmatpush2.bf16.msra.mxu0 %v8512_v42  ;;  %v712_v42 = vld [vmem:[#allocation5 + $0xa30] sm:$0xff] }
 0x20c   : > { %3980 = vmatprep.subr.bf16.mxu0 %v8497_v44 }
 0x20d   : > { %4020 = vmatpush2.bf16.msra.mxu1 %v8768_v43  ;;  %v720_v43 = vld [vmem:[#allocation5 + $0xa70] sm:$0xff] }
 0x20e   : > { %4021 = vmatprep.subr.bf16.mxu1 %v8753_v38  ;;  %v8674_v61 = vcombine.low %v712_v42, %v720_v43 }
 0x20f   : > { %3981 = vmatpush2.bf16.msra.mxu0 %v8496_v51 }
 0x210   : > { %3982 = vmatprep.subr.bf16.mxu0 %v8481_v53  ;;  %v440_v53 = vld [vmem:[#allocation5 + $0x1b0] sm:$0xff] }
 0x211   : > { %4022 = vmatpush2.bf16.msra.mxu1 %v8752_v52  ;;  %v8675_v52 = vcombine.high %v712_v42, %v720_v43 }
 0x212   : > { %4023 = vmatprep.subr.bf16.mxu1 %v8737_v55  ;;  %v448_v55 = vld [vmem:[#allocation5 + $0x1f0] sm:$0xff] }
 0x213   : > { %3983 = vmatpush2.bf16.msra.mxu0 %v8480_v62  ;;  %v8403_v62 = vcombine.high %v440_v53, %v448_v55  ;;  %v8402_v6 = vcombine.low %v440_v53, %v448_v55 }
 0x214   : > { %4034 = vmatprep.subr.bf16.mxu0 %v8467_v1  ;;  %v424_v1 = vld [vmem:[#allocation5 + $0x130] sm:$0xff] }
 0x215   : > { %4024 = vmatpush2.bf16.msra.mxu1 %v8736_v0  ;;  %v8659_v0 = vcombine.high %v696_v56, %v704_v57  ;;  %v600_v56 = vld [vmem:[#allocation5 + $0x6b0] sm:$0xff] }
 0x216   : > { %4075 = vmatprep.subr.bf16.mxu1 %v8723_v2  ;;  %v3740_v22 = vpop.f32.mrf.mxu0  ;;  %3985 = vmatmul.mubr.bf16.vlgmr.msra.gmra.mxu0 %v10803_v16  ;;  %v432_v2 = vld [vmem:[#allocation5 + $0x170] sm:$0xff] }
 0x217   : > { %v3741_v26 = vadd.f32 %v3740_v22, %v921_v10  ;;  %4035 = vmatpush1.bf16.msra.mxu0 %v8466_v11  ;;  %4066 = vmatprep.mubr.bf16.mxu0 %v10795_v58  ;;  %v8387_v10 = vcombine.high %v424_v1, %v432_v2  ;;  %v8643_v11 = vcombine.high %v680_v4, %v688_v5  ;;  %v608_v57 = vld [vmem:[#allocation5 + $0x6f0] sm:$0xff] }
 0x218   : > { %v3781_v27 = vpop.f32.mrf.mxu1  ;;  %4026 = vmatmul.mubr.bf16.vlgmr.msra.gmra.mxu1 %v10805_v19  ;;  %v3742_v29 = vpop.f32.mrf.mxu0  ;;  %4036 = vmatprep.subr.bf16.mxu0 %v8451_v15  ;;  %v416_v15 = vld [vmem:[#allocation5 + $0xf0] sm:$0xff]  ;;  %v8386_v20 = vcombine.low %v424_v1, %v432_v2  ;;  %v8563_v1 = vcombine.high %v600_v56, %v608_v57 }
 0x219   : > { %4076 = vmatpush1.bf16.msra.mxu1 %v8722_v12  ;;  %v10871_v33 = vadd.f32 %v3781_v27, %v3741_v26  ;;  %v3743_v34 = vadd.f32 %v3742_v29, %v925_v17  ;;  %4107 = vmatprep.mubr.bf16.mxu1 %v10797_v59  ;;  %v408_v12 = vld [vmem:[#allocation5 + $0xb0] sm:$0xff] }
 0x21a   : > { %v3783_v35 = vpop.f32.mrf.mxu1  ;;  %4077 = vmatprep.subr.bf16.mxu1 %v8707_v18  ;;  %v3744_v41 = vpop.f32.mrf.mxu0  ;;  %v664_v17 = vld [vmem:[#allocation5 + $0x8b0] sm:$0xff]  ;;  %v8371_v22 = vcombine.high %v408_v12, %v416_v15  ;;  %v8370_v29 = vcombine.low %v408_v12, %v416_v15 }
 0x21b   : > { %v10875_v44 = vadd.f32 %v3783_v35, %v3743_v34  ;;  %4037 = vmatpush1.bf16.msra.mxu0 %v8450_v28  ;;  %v672_v18 = vld [vmem:[#allocation5 + $0x8f0] sm:$0xff] }
 0x21c   : > { %v3785_v38 = vpop.f32.mrf.mxu1  ;;  %v3745_v48 = vpop.f32.mrf.mxu0  ;;  %4038 = vmatprep.subr.bf16.mxu0 %v8435_v32  ;;  %v8627_v24 = vcombine.high %v664_v17, %v672_v18  ;;  %v400_v26 = vld [vmem:[#allocation5 + $0x70] sm:$0xff] }
 0x21d   : > { %4078 = vmatpush1.bf16.msra.mxu1 %v8706_v31  ;;  %v648_v27 = vld [vmem:[#allocation5 + $0x830] sm:$0xff]  ;;  %v8626_v31 = vcombine.low %v664_v17, %v672_v18  ;;  %v8355_v32 = vcombine.high %v392_v25, %v400_v26  ;;  %v8354_v41 = vcombine.low %v392_v25, %v400_v26  ;;  %v8851_v38 = vcombine.high %v888_v37, %v896_v39 }
 0x21e   : > { %v3786_v51 = vpop.f32.mrf.mxu1  ;;  %4079 = vmatprep.subr.bf16.mxu1 %v8691_v36  ;;  %v656_v28 = vld [vmem:[#allocation5 + $0x870] sm:$0xff] }
 0x21f   : > { %4039 = vmatpush1.bf16.msra.mxu0 %v8434_v46  ;;  %v8611_v34 = vcombine.high %v648_v27, %v656_v28  ;;  %v632_v35 = vld [vmem:[#allocation5 + $0x7b0] sm:$0xff]  ;;  %v8610_v42 = vcombine.low %v648_v27, %v656_v28 }
 0x220   : > { %4040 = vmatprep.subr.bf16.mxu0 %v8419_v50  ;;  %v640_v36 = vld [vmem:[#allocation5 + $0x7f0] sm:$0xff] }
 0x221   : > { %4080 = vmatpush1.bf16.msra.mxu1 %v8690_v49  ;;  %v8595_v43 = vcombine.high %v632_v35, %v640_v36  ;;  %v616_v46 = vld [vmem:[#allocation5 + $0x730] sm:$0xff]  ;;  %v8594_v51 = vcombine.low %v632_v35, %v640_v36 }
 0x222   : > { %4081 = vmatprep.subr.bf16.mxu1 %v8675_v52  ;;  %v624_v48 = vld [vmem:[#allocation5 + $0x770] sm:$0xff]  ;;  %v8850_v52 = vcombine.low %v888_v37, %v896_v39 }
 0x223   : > { %4041 = vmatpush1.bf16.msra.mxu0 %v8418_v60  ;;  %v872_v49 = vld [vmem:[#allocation5 + $0xf30] sm:$0xff]  ;;  %v8579_v53 = vcombine.high %v616_v46, %v624_v48 }
 0x224   : > { %4042 = vmatprep.subr.bf16.mxu0 %v8403_v62  ;;  %v880_v50 = vld [vmem:[#allocation5 + $0xf70] sm:$0xff]  ;;  %v8578_v62 = vcombine.low %v616_v46, %v624_v48 }
 0x225   : > { %4082 = vmatpush1.bf16.msra.mxu1 %v8674_v61  ;;  %v8835_v55 = vcombine.high %v872_v49, %v880_v50  ;;  %v856_v60 = vld [vmem:[#allocation5 + $0xeb0] sm:$0xff] }
 0x226   : > { %4083 = vmatprep.subr.bf16.mxu1 %v8659_v0  ;;  %v864_v61 = vld [vmem:[#allocation5 + $0xef0] sm:$0xff]  ;;  %v8834_v0 = vcombine.low %v872_v49, %v880_v50 }
 0x227   : > { %4043 = vmatpush1.bf16.msra.mxu0 %v8402_v6  ;;  %v8819_v2 = vcombine.high %v856_v60, %v864_v61  ;;  %v584_v4 = vld [vmem:[#allocation5 + $0x630] sm:$0xff] }
 0x228   : > { %4044 = vmatprep.subr.bf16.mxu0 %v8387_v10  ;;  %v592_v5 = vld [vmem:[#allocation5 + $0x670] sm:$0xff]  ;;  %v8562_v10 = vcombine.low %v600_v56, %v608_v57 }
 0x229   : > { %4084 = vmatpush1.bf16.msra.mxu1 %v8658_v8  ;;  %v840_v6 = vld [vmem:[#allocation5 + $0xe30] sm:$0xff]  ;;  %v8547_v12 = vcombine.high %v584_v4, %v592_v5 }
 0x22a   : > { %4085 = vmatprep.subr.bf16.mxu1 %v8643_v11  ;;  %v848_v8 = vld [vmem:[#allocation5 + $0xe70] sm:$0xff]  ;;  %v8818_v11 = vcombine.low %v856_v60, %v864_v61  ;;  %v505_v60 = vld [vmem:[#allocation5 + $0x3b8] sm:$0xff] }
 0x22b   : > { %4045 = vmatpush1.bf16.msra.mxu0 %v8386_v20  ;;  %v8803_v15 = vcombine.high %v840_v6, %v848_v8  ;;  %v568_v17 = vld [vmem:[#allocation5 + $0x5b0] sm:$0xff]  ;;  %v513_v61 = vld [vmem:[#allocation5 + $0x3f8] sm:$0xff] }
 0x22c   : > { %4046 = vmatprep.subr.bf16.mxu0 %v8371_v22  ;;  %v576_v18 = vld [vmem:[#allocation5 + $0x5f0] sm:$0xff]  ;;  %v8546_v22 = vcombine.low %v584_v4, %v592_v5  ;;  %v8469_v5 = vcombine.high %v505_v60, %v513_v61 }
 0x22d   : > { %4086 = vmatpush1.bf16.msra.mxu1 %v8642_v21  ;;  %v824_v20 = vld [vmem:[#allocation5 + $0xdb0] sm:$0xff]  ;;  %v8531_v25 = vcombine.high %v568_v17, %v576_v18 }
 0x22e   : > { %4087 = vmatprep.subr.bf16.mxu1 %v8627_v24  ;;  %v832_v21 = vld [vmem:[#allocation5 + $0xdf0] sm:$0xff]  ;;  %v8802_v24 = vcombine.low %v840_v6, %v848_v8  ;;  %v932_v8 = vsub.s32 7, %v10819_v30 }
 0x22f   : > { %4047 = vmatpush1.bf16.msra.mxu0 %v8370_v29  ;;  %v8787_v26 = vcombine.high %v824_v20, %v832_v21  ;;  %v552_v27 = vld [vmem:[#allocation5 + $0x530] sm:$0xff] }
 0x230   : > { %4048 = vmatprep.subr.bf16.mxu0 %v8355_v32  ;;  %v560_v28 = vld [vmem:[#allocation5 + $0x570] sm:$0xff]  ;;  %v8530_v32 = vcombine.low %v568_v17, %v576_v18  ;;  %v8468_v18 = vcombine.low %v505_v60, %v513_v61  ;;  %v441_v61 = vld [vmem:[#allocation5 + $0x1b8] sm:$0xff] }
 0x231   : > { %4088 = vmatpush1.bf16.msra.mxu1 %v8626_v31  ;;  %v808_v29 = vld [vmem:[#allocation5 + $0xd30] sm:$0xff]  ;;  %v8515_v35 = vcombine.high %v552_v27, %v560_v28 }
 0x232   : > { %4089 = vmatprep.subr.bf16.mxu1 %v8611_v34  ;;  %v816_v31 = vld [vmem:[#allocation5 + $0xd70] sm:$0xff]  ;;  %v8786_v34 = vcombine.low %v824_v20, %v832_v21 }
 0x233   : > { %4049 = vmatpush1.bf16.msra.mxu0 %v8354_v41  ;;  %v8771_v36 = vcombine.high %v808_v29, %v816_v31  ;;  %v536_v37 = vld [vmem:[#allocation5 + $0x4b0] sm:$0xff] }
 0x234   : > { %4050 = vmatprep.subr.bf16.mxu0 %v8595_v43  ;;  %v544_v39 = vld [vmem:[#allocation5 + $0x4f0] sm:$0xff]  ;;  %v8514_v43 = vcombine.low %v552_v27, %v560_v28  ;;  %v729_v28 = vld [vmem:[#allocation5 + $0xab8] sm:$0xff] }
 0x235   : > { %4090 = vmatpush1.bf16.msra.mxu1 %v8610_v42  ;;  %v792_v41 = vld [vmem:[#allocation5 + $0xcb0] sm:$0xff]  ;;  %v8499_v46 = vcombine.high %v536_v37, %v544_v39 }
 0x236   : > { %4091 = vmatprep.subr.bf16.mxu1 %v8851_v38  ;;  %v800_v42 = vld [vmem:[#allocation5 + $0xcf0] sm:$0xff]  ;;  %v8770_v38 = vcombine.low %v808_v29, %v816_v31  ;;  %v737_v29 = vld [vmem:[#allocation5 + $0xaf8] sm:$0xff] }
 0x237   : > { %4051 = vmatpush2.bf16.msra.mxu0 %v8594_v51  ;;  %v8755_v48 = vcombine.high %v792_v41, %v800_v42  ;;  %v520_v49 = vld [vmem:[#allocation5 + $0x430] sm:$0xff] }
 0x238   : > { %4052 = vmatprep.subr.bf16.mxu0 %v8579_v53  ;;  %v528_v50 = vld [vmem:[#allocation5 + $0x470] sm:$0xff]  ;;  %v8498_v53 = vcombine.low %v536_v37, %v544_v39 }
 0x239   : > { %4092 = vmatpush2.bf16.msra.mxu1 %v8850_v52  ;;  %v776_v51 = vld [vmem:[#allocation5 + $0xc30] sm:$0xff]  ;;  %v8483_v56 = vcombine.high %v520_v49, %v528_v50 }
 0x23a   : > { %4093 = vmatprep.subr.bf16.mxu1 %v8835_v55  ;;  %v784_v52 = vld [vmem:[#allocation5 + $0xc70] sm:$0xff]  ;;  %v8754_v55 = vcombine.low %v792_v41, %v800_v42  ;;  %v8693_v42 = vcombine.high %v729_v28, %v737_v29 }
 0x23b   : > { %4053 = vmatpush2.bf16.msra.mxu0 %v8578_v62  ;;  %v8739_v57 = vcombine.high %v776_v51, %v784_v52  ;;  %v761_v62 = vld [vmem:[#allocation5 + $0xbb8] sm:$0xff]  ;;  %v8738_v4 = vcombine.low %v776_v51, %v784_v52 }
 0x23c   : > { %4054 = vmatprep.subr.bf16.mxu0 %v8563_v1  ;;  %v8482_v1 = vcombine.low %v520_v49, %v528_v50  ;;  %v721_v49 = vld [vmem:[#allocation5 + $0xa78] sm:$0xff] }
 0x23d   : > { %4094 = vmatpush2.bf16.msra.mxu1 %v8834_v0  ;;  %v769_v0 = vld [vmem:[#allocation5 + $0xbf8] sm:$0xff] }
 0x23e   : > { %4095 = vmatprep.subr.bf16.mxu1 %v8819_v2  ;;  %v928_v2 = vsub.s32 6, %v10819_v30  ;;  %v8725_v6 = vcombine.high %v761_v62, %v769_v0  ;;  %v8724_v20 = vcombine.low %v761_v62, %v769_v0  ;;  %v697_v62 = vld [vmem:[#allocation5 + $0x9b8] sm:$0xff]  ;;  %v9807_v30 = vld [vmem:[#allocation8 + $0xe44] ss:$16 sps:$4 sm:$0xff]  }
 0x23f   : > { %4055 = vmatpush2.bf16.msra.mxu0 %v8562_v10  ;;  %v489_v10 = vld [vmem:[#allocation5 + $0x338] sm:$0xff] }
 0x240   : > { %4056 = vmatprep.subr.bf16.mxu0 %v8547_v12  ;;  %v745_v12 = vld [vmem:[#allocation5 + $0xb38] sm:$0xff]  ;;  %v929_v17 = vrot.slane %v10861_v9, %v928_v2 }
 0x241   : > { %4096 = vmatpush2.bf16.msra.mxu1 %v8818_v11  ;;  %v497_v11 = vld [vmem:[#allocation5 + $0x378] sm:$0xff] }
 0x242   : > { %4097 = vmatprep.subr.bf16.mxu1 %v8803_v15  ;;  %v753_v15 = vld [vmem:[#allocation5 + $0xb78] sm:$0xff]  ;;  %v8453_v21 = vcombine.high %v489_v10, %v497_v11 }
 0x243   : > { %4057 = vmatpush2.bf16.msra.mxu0 %v8546_v22  ;;  %v933_v22 = vrot.slane %v10861_v9, %v932_v8  ;;  %v705_v0 = vld [vmem:[#allocation5 + $0x9f8] sm:$0xff] }
 0x244   : > { %4058 = vmatprep.subr.bf16.mxu0 %v8531_v25  ;;  %v473_v25 = vld [vmem:[#allocation5 + $0x2b8] sm:$0xff] }
 0x245   : > { %4098 = vmatpush2.bf16.msra.mxu1 %v8802_v24  ;;  %v8709_v24 = vcombine.high %v745_v12, %v753_v15 }
 0x246   : > { %4099 = vmatprep.subr.bf16.mxu1 %v8787_v26  ;;  %v481_v26 = vld [vmem:[#allocation5 + $0x2f8] sm:$0xff] }
 0x247   : > { %4059 = vmatpush2.bf16.msra.mxu0 %v8530_v32  ;;  %v8437_v37 = vcombine.high %v473_v25, %v481_v26  ;;  %v8436_v52 = vcombine.low %v473_v25, %v481_v26  ;;  %v673_v25 = vld [vmem:[#allocation5 + $0x8f8] sm:$0xff] }
 0x248   : > { %4060 = vmatprep.subr.bf16.mxu0 %v8515_v35 }
 0x249   : > { %4100 = vmatpush2.bf16.msra.mxu1 %v8786_v34  ;;  %v8452_v34 = vcombine.low %v489_v10, %v497_v11  ;;  %v433_v10 = vld [vmem:[#allocation5 + $0x178] sm:$0xff] }
 0x24a   : > { %4101 = vmatprep.subr.bf16.mxu1 %v8771_v36  ;;  %v8708_v36 = vcombine.low %v745_v12, %v753_v15  ;;  %v681_v11 = vld [vmem:[#allocation5 + $0x938] sm:$0xff] }
 0x24b   : > { %4061 = vmatpush2.bf16.msra.mxu0 %v8514_v43  ;;  %v457_v43 = vld [vmem:[#allocation5 + $0x238] sm:$0xff] }
 0x24c   : > { %4062 = vmatprep.subr.bf16.mxu0 %v8499_v46  ;;  %v689_v12 = vld [vmem:[#allocation5 + $0x978] sm:$0xff] }
 0x24d   : > { %4102 = vmatpush2.bf16.msra.mxu1 %v8770_v38  ;;  %v465_v38 = vld [vmem:[#allocation5 + $0x278] sm:$0xff] }
 0x24e   : > { %4103 = vmatprep.subr.bf16.mxu1 %v8755_v48  ;;  %v713_v48 = vld [vmem:[#allocation5 + $0xa38] sm:$0xff] }
 0x24f   : > { %4063 = vmatpush2.bf16.msra.mxu0 %v8498_v53  ;;  %v8677_v60 = vcombine.high %v713_v48, %v721_v49 }
 0x250   : > { %4064 = vmatprep.subr.bf16.mxu0 %v8483_v56  ;;  %v8421_v56 = vcombine.high %v457_v43, %v465_v38 }
 0x251   : > { %4104 = vmatpush2.bf16.msra.mxu1 %v8754_v55  ;;  %v8692_v55 = vcombine.low %v729_v28, %v737_v29 }
 0x252   : > { %4105 = vmatprep.subr.bf16.mxu1 %v8739_v57 }
 0x253   : > { %4065 = vmatpush2.bf16.msra.mxu0 %v8482_v1  ;;  %v8420_v1 = vcombine.low %v457_v43, %v465_v38  ;;  %v633_v43 = vld [vmem:[#allocation5 + $0x7b8] sm:$0xff] }
 0x254   : > { %4116 = vmatprep.subr.bf16.mxu0 %v8469_v5  ;;  %v8661_v5 = vcombine.high %v697_v62, %v705_v0  ;;  %v641_v38 = vld [vmem:[#allocation5 + $0x7f8] sm:$0xff] }
 0x255   : > { %4106 = vmatpush2.bf16.msra.mxu1 %v8738_v4 }
 0x256   : > { %4157 = vmatprep.subr.bf16.mxu1 %v8725_v6  ;;  %v3822_v27 = vpop.f32.mrf.mxu0  ;;  %4067 = vmatmul.mubr.bf16.vlgmr.msra.gmra.mxu0 %v10803_v16  ;;  %v425_v6 = vld [vmem:[#allocation5 + $0x138] sm:$0xff] }
 0x257   : > { %v3823_v31 = vadd.f32 %v3822_v27, %v929_v17  ;;  %4117 = vmatpush1.bf16.msra.mxu0 %v8468_v18  ;;  %4148 = vmatprep.mubr.bf16.mxu0 %v10795_v58  ;;  %v449_v58 = vld [vmem:[#allocation5 + $0x1f8] sm:$0xff]  ;;  %v8660_v17 = vcombine.low %v697_v62, %v705_v0  ;;  %v8389_v18 = vcombine.high %v425_v6, %v433_v10 }
 0x258   : > { %v3863_v32 = vpop.f32.mrf.mxu1  ;;  %4108 = vmatmul.mubr.bf16.vlgmr.msra.gmra.mxu1 %v10805_v19  ;;  %v3824_v35 = vpop.f32.mrf.mxu0  ;;  %4118 = vmatprep.subr.bf16.mxu0 %v8453_v21  ;;  %v8405_v4 = vcombine.high %v441_v61, %v449_v58  ;;  %v8404_v15 = vcombine.low %v441_v61, %v449_v58  ;;  %v409_v21 = vld [vmem:[#allocation5 + $0xb8] sm:$0xff]  ;;  %v8388_v26 = vcombine.low %v425_v6, %v433_v10 }
 0x259   : > { %4158 = vmatpush1.bf16.msra.mxu1 %v8724_v20  ;;  %v10887_v9 = vadd.f32 %v3863_v32, %v3823_v31  ;;  %v3825_v39 = vadd.f32 %v3824_v35, %v933_v22  ;;  %4189 = vmatprep.mubr.bf16.mxu1 %v10797_v59  ;;  %v8676_v59 = vcombine.low %v713_v48, %v721_v49  ;;  %v417_v22 = vld [vmem:[#allocation5 + $0xf8] sm:$0xff] }
 0x25a   : > { %v3865_v41 = vpop.f32.mrf.mxu1  ;;  %4159 = vmatprep.subr.bf16.mxu1 %v8709_v24  ;;  %v3826_v46 = vpop.f32.mrf.mxu0  ;;  %v8645_v20 = vcombine.high %v681_v11, %v689_v12  ;;  %v665_v24 = vld [vmem:[#allocation5 + $0x8b8] sm:$0xff]  ;;  %v8644_v27 = vcombine.low %v681_v11, %v689_v12  ;;  %v8373_v28 = vcombine.high %v409_v21, %v417_v22 }
 0x25b   : > { %v10891_v50 = vadd.f32 %v3865_v41, %v3825_v39  ;;  %4119 = vmatpush1.bf16.msra.mxu0 %v8452_v34  ;;  %v8629_v29 = vcombine.high %v665_v24, %v673_v25  ;;  %v393_v31 = vld [vmem:[#allocation5 + $0x38] sm:$0xff]  ;;  %v10895_v41 = vpack.c.bf16 %v10839_v13, %v10839_v13  ;;  %v10899_v46 = vpack.c.bf16 %v10857_v54, %v10857_v54 }
 0x25c   : > { %v3867_v51 = vpop.f32.mrf.mxu1  ;;  %v3827_v53 = vpop.f32.mrf.mxu0  ;;  %4120 = vmatprep.subr.bf16.mxu0 %v8437_v37  ;;  %v401_v32 = vld [vmem:[#allocation5 + $0x78] sm:$0xff]  ;;  %v8628_v37 = vcombine.low %v665_v24, %v673_v25  ;;  %v8596_v54 = vcombine.low %v633_v43, %v641_v38 }
 0x25d   : > { %4160 = vmatpush1.bf16.msra.mxu1 %v8708_v36  ;;  %v649_v34 = vld [vmem:[#allocation5 + $0x838] sm:$0xff]  ;;  %v8372_v36 = vcombine.low %v409_v21, %v417_v22  ;;  %v8357_v39 = vcombine.high %v393_v31, %v401_v32  ;;  %v8356_v51 = vcombine.low %v393_v31, %v401_v32  ;;  %v8597_v53 = vcombine.high %v633_v43, %v641_v38 }
 0x25e   : > { %v3868_v57 = vpop.f32.mrf.mxu1  ;;  %4161 = vmatprep.subr.bf16.mxu1 %v8693_v42  ;;  %v657_v35 = vld [vmem:[#allocation5 + $0x878] sm:$0xff] }
 0x25f   : > { %4121 = vmatpush1.bf16.msra.mxu0 %v8436_v52  ;;  %v8613_v42 = vcombine.high %v649_v34, %v657_v35  ;;  %v889_v48 = vld [vmem:[#allocation5 + $0xfb8] sm:$0xff]  ;;  %v8612_v52 = vcombine.low %v649_v34, %v657_v35 }
 0x260   : > { %4122 = vmatprep.subr.bf16.mxu0 %v8421_v56  ;;  %v897_v49 = vld [vmem:[#allocation5 + $0xff8] sm:$0xff] }
 0x261   : > { %4162 = vmatpush1.bf16.msra.mxu1 %v8692_v55  ;;  %v4215_v55 = vmul.bf16 1024605458, %v10895_v41  ;;  %v8853_v13 = vcombine.high %v889_v48, %v897_v49  ;;  %v617_v56 = vld [vmem:[#allocation5 + $0x738] sm:$0xff]  ;;  %v8852_v62 = vcombine.low %v889_v48, %v897_v49 }
 0x262   : > { %4163 = vmatprep.subr.bf16.mxu1 %v8677_v60  ;;  %v625_v57 = vld [vmem:[#allocation5 + $0x778] sm:$0xff]  ;;  %v4217_v60 = vmul.bf16 1024605458, %v10899_v46 }
 0x263   : > { %4123 = vmatpush1.bf16.msra.mxu0 %v8420_v1  ;;  %v873_v61 = vld [vmem:[#allocation5 + $0xf38] sm:$0xff]  ;;  %v8581_v0 = vcombine.high %v617_v56, %v625_v57  ;;  %v4231_v1 = vmul.bf16 %v4215_v55, %v10895_v41  ;;  %v8580_v12 = vcombine.low %v617_v56, %v625_v57 }
 0x264   : > { %4124 = vmatprep.subr.bf16.mxu0 %v8405_v4  ;;  %v881_v58 = vld [vmem:[#allocation5 + $0xf78] sm:$0xff]  ;;  %v4233_v6 = vmul.bf16 %v4217_v60, %v10899_v46 }
 0x265   : > { %4164 = vmatpush1.bf16.msra.mxu1 %v8676_v59  ;;  %v8837_v59 = vcombine.high %v873_v61, %v881_v58  ;;  %v601_v4 = vld [vmem:[#allocation5 + $0x6b8] sm:$0xff] }
 0x266   : > { %4165 = vmatprep.subr.bf16.mxu1 %v8661_v5  ;;  %v609_v5 = vld [vmem:[#allocation5 + $0x6f8] sm:$0xff]  ;;  %v4249_v24 = vadd.bf16 1061961548, %v4233_v6 }
 0x267   : > { %4125 = vmatpush1.bf16.msra.mxu0 %v8404_v15  ;;  %v857_v10 = vld [vmem:[#allocation5 + $0xeb8] sm:$0xff]  ;;  %v8836_v15 = vcombine.low %v873_v61, %v881_v58 }
 0x268   : > { %4126 = vmatprep.subr.bf16.mxu0 %v8389_v18  ;;  %v865_v11 = vld [vmem:[#allocation5 + $0xef8] sm:$0xff]  ;;  %v4247_v18 = vadd.bf16 1061961548, %v4231_v1 }
 0x269   : > { %4166 = vmatpush1.bf16.msra.mxu1 %v8660_v17  ;;  %v8565_v17 = vcombine.high %v601_v4, %v609_v5  ;;  %v585_v21 = vld [vmem:[#allocation5 + $0x638] sm:$0xff] }
 0x26a   : > { %4167 = vmatprep.subr.bf16.mxu1 %v8645_v20  ;;  %v8821_v20 = vcombine.high %v857_v10, %v865_v11  ;;  %v593_v22 = vld [vmem:[#allocation5 + $0x678] sm:$0xff]  ;;  %v4263_v31 = vmul.bf16 %v4247_v18, %v10895_v41 }
 0x26b   : > { %4127 = vmatpush1.bf16.msra.mxu0 %v8388_v26  ;;  %v841_v25 = vld [vmem:[#allocation5 + $0xe38] sm:$0xff] }
 0x26c   : > { %4128 = vmatprep.subr.bf16.mxu0 %v8373_v28  ;;  %v849_v26 = vld [vmem:[#allocation5 + $0xe78] sm:$0xff]  ;;  %v8820_v28 = vcombine.low %v857_v10, %v865_v11  ;;  %10252 = vtanh.bf16 %v4263_v31 }
 0x26d   : > { %4168 = vmatpush1.bf16.msra.mxu1 %v8644_v27  ;;  %v8564_v27 = vcombine.low %v601_v4, %v609_v5  ;;  %v8805_v32 = vcombine.high %v841_v25, %v849_v26  ;;  %v569_v34 = vld [vmem:[#allocation5 + $0x5b8] sm:$0xff]  ;;  %v8804_v43 = vcombine.low %v841_v25, %v849_v26  ;;  %v9486_v25 = vld [vmem:[#allocation8 + $0xe4] ss:$16 sps:$4 sm:$0xff]  }
 0x26e   : > { %4169 = vmatprep.subr.bf16.mxu1 %v8629_v29  ;;  %v8549_v29 = vcombine.high %v585_v21, %v593_v22  ;;  %v577_v35 = vld [vmem:[#allocation5 + $0x5f8] sm:$0xff]  ;;  %v9489_v26 = vld [vmem:[#allocation8 + $0x2e4] ss:$16 sps:$4 sm:$0xff]  }
 0x26f   : > { %4129 = vmatpush1.bf16.msra.mxu0 %v8372_v36  ;;  %v4265_v36 = vmul.bf16 %v4249_v24, %v10899_v46  ;;  %v8533_v38 = vcombine.high %v569_v34, %v577_v35  ;;  %v553_v49 = vld [vmem:[#allocation5 + $0x538] sm:$0xff]  ;;  %v8532_v55 = vcombine.low %v569_v34, %v577_v35  ;;  %v10907_v24 = vld [vmem:[#allocation7 + $0x8] sm:$0xff]  ;;  %v4279_v34 = vmul.bf16 1056980736, %v10895_v41  ;;  %v9490_v41 = vld [vmem:[#allocation8 + $0xc0] ss:$16 sps:$4 sm:$0xff]  }
 0x270   : > { %4130 = vmatprep.subr.bf16.mxu0 %v8357_v39  ;;  %v833_v39 = vld [vmem:[#allocation5 + $0xdf8] sm:$0xff]  ;;  %v4281_v35 = vmul.bf16 1056980736, %v10899_v46 }
 0x271   : > { %4170 = vmatpush1.bf16.msra.mxu1 %v8628_v37  ;;  %v825_v37 = vld [vmem:[#allocation5 + $0xdb8] sm:$0xff]  ;;  %10254 = vtanh.bf16 %v4265_v36  ;;  %v941_v36 = vrot.slane %v10907_v24, %v10827_v47 }
 0x272   : > { %4171 = vmatprep.subr.bf16.mxu1 %v8613_v42  ;;  %v8548_v42 = vcombine.low %v585_v21, %v593_v22  ;;  %v8789_v48 = vcombine.high %v825_v37, %v833_v39  ;;  %v537_v60 = vld [vmem:[#allocation5 + $0x4b8] sm:$0xff] }
 0x273   : > { %4131 = vmatpush1.bf16.msra.mxu0 %v8356_v51  ;;  %v561_v51 = vld [vmem:[#allocation5 + $0x578] sm:$0xff] }
 0x274   : > { %4132 = vmatprep.subr.bf16.mxu0 %v8597_v53  ;;  %v817_v53 = vld [vmem:[#allocation5 + $0xd78] sm:$0xff]  ;;  %v8517_v56 = vcombine.high %v553_v49, %v561_v51 }
 0x275   : > { %4172 = vmatpush1.bf16.msra.mxu1 %v8612_v52  ;;  %v809_v52 = vld [vmem:[#allocation5 + $0xd38] sm:$0xff] }
 0x276   : > { %4173 = vmatprep.subr.bf16.mxu1 %v8853_v13  ;;  %v8788_v13 = vcombine.low %v825_v37, %v833_v39  ;;  %v8773_v57 = vcombine.high %v809_v52, %v817_v53  ;;  %v545_v61 = vld [vmem:[#allocation5 + $0x4f8] sm:$0xff]  ;;  %v9492_v37 = vld [vmem:[#allocation8 + $0xc4] ss:$16 sps:$4 sm:$0xff]  }
 0x277   : > { %4133 = vmatpush2.bf16.msra.mxu0 %v8596_v54  ;;  %v793_v58 = vld [vmem:[#allocation5 + $0xcb8] sm:$0xff]  ;;  %v8501_v1 = vcombine.high %v537_v60, %v545_v61  ;;  %v8500_v11 = vcombine.low %v537_v60, %v545_v61  ;;  %v9496_v60 = vld [vmem:[#allocation8 + $0xa0] ss:$16 sps:$4 sm:$0xff]  }
 0x278   : > { %4134 = vmatprep.subr.bf16.mxu0 %v8581_v0  ;;  %v801_v54 = vld [vmem:[#allocation5 + $0xcf8] sm:$0xff]  ;;  %v8772_v0 = vcombine.low %v809_v52, %v817_v53  ;;  %v9498_v52 = vld [vmem:[#allocation8 + $0xa4] ss:$16 sps:$4 sm:$0xff]  }
 0x279   : > { %4174 = vmatpush2.bf16.msra.mxu1 %v8852_v62  ;;  %v8516_v62 = vcombine.low %v553_v49, %v561_v51  ;;  %v521_v4 = vld [vmem:[#allocation5 + $0x438] sm:$0xff]  ;;  %v9493_v51 = vld [vmem:[#allocation8 + $0x2c0] ss:$16 sps:$4 sm:$0xff]  }
 0x27a   : > { %4175 = vmatprep.subr.bf16.mxu1 %v8837_v59  ;;  %v8757_v59 = vcombine.high %v793_v58, %v801_v54  ;;  %v529_v5 = vld [vmem:[#allocation5 + $0x478] sm:$0xff]  ;;  %v10253_v18 = vpop.eup %10252 }
 0x27b   : > { %4135 = vmatpush2.bf16.msra.mxu0 %v8580_v12  ;;  %v777_v6 = vld [vmem:[#allocation5 + $0xc38] sm:$0xff]  ;;  %v8756_v12 = vcombine.low %v793_v58, %v801_v54  ;;  %v9499_v58 = vld [vmem:[#allocation8 + $0x2a0] ss:$16 sps:$4 sm:$0xff]   ;;  %v9504_v54 = vld [vmem:[#allocation8 + $0x84] ss:$16 sps:$4 sm:$0xff]  }
 0x27c   : > { %4136 = vmatprep.subr.bf16.mxu0 %v8565_v17  ;;  %v785_v10 = vld [vmem:[#allocation5 + $0xc78] sm:$0xff] }
 0x27d   : > { %4176 = vmatpush2.bf16.msra.mxu1 %v8836_v15  ;;  %v8485_v15 = vcombine.high %v521_v4, %v529_v5  ;;  %v8741_v17 = vcombine.high %v777_v6, %v785_v10  ;;  %v8740_v22 = vcombine.low %v777_v6, %v785_v10  ;;  %v9508_v6 = vld [vmem:[#allocation8 + $0x60] ss:$16 sps:$4 sm:$0xff]  }
 0x27e   : > { %4177 = vmatprep.subr.bf16.mxu1 %v8821_v20  ;;  %v8484_v20 = vcombine.low %v521_v4, %v529_v5  ;;  %v9510_v4 = vld [vmem:[#allocation8 + $0x64] ss:$16 sps:$4 sm:$0xff]   ;;  %v9511_v10 = vld [vmem:[#allocation8 + $0x260] ss:$16 sps:$4 sm:$0xff]  }
 0x27f   : > { %4137 = vmatpush2.bf16.msra.mxu0 %v8564_v27  ;;  %v10255_v21 = vpop.eup %10254  ;;  %v4311_v27 = vadd.bf16 1065369472, %v10253_v18  ;;  %v9513_v5 = vld [vmem:[#allocation8 + $0x264] ss:$16 sps:$4 sm:$0xff]  }
 0x280   : > { %4138 = vmatprep.subr.bf16.mxu0 %v8549_v29  ;;  %v9484_v29 = vld [vmem:[#allocation8 + $0xe0] ss:$16 sps:$4 sm:$0xff]   ;;  %v4313_v31 = vadd.bf16 1065369472, %v10255_v21  ;;  %v9522_v18 = vld [vmem:[#allocation8 + $0x24] ss:$16 sps:$4 sm:$0xff]   ;;  %v10929_v21 = vpack.c.bf16 %v10835_v7, %v10835_v7  ;;  %v10941_v7 = vpack.c.bf16 %v10891_v50, %v10891_v50 }
 0x281   : > { %4178 = vmatpush2.bf16.msra.mxu1 %v8820_v28  ;;  %v937_v28 = vrot.slane %v10907_v24, %v10824_v40  ;;  %v9532_v50 = vld [vmem:[#allocation8 + $0x1e0] ss:$16 sps:$4 sm:$0xff]  }
 0x282   : > { %4179 = vmatprep.subr.bf16.mxu1 %v8805_v32  ;;  %v9487_v32 = vld [vmem:[#allocation8 + $0x2e0] ss:$16 sps:$4 sm:$0xff]   ;;  %v10919_v49 = vmul.bf16 %v4313_v31, %v4281_v35  ;;  %v4214_v31 = vmul.bf16 1024605458, %v10929_v21  ;;  %v9534_v35 = vld [vmem:[#allocation8 + $0x1e4] ss:$16 sps:$4 sm:$0xff]  }
 0x283   : > { %4139 = vmatpush2.bf16.msra.mxu0 %v8548_v42  ;;  %v10916_v42 = vmul.bf16 %v4311_v27, %v4279_v34  ;;  %v9528_v27 = vld [vmem:[#allocation8 + $0x4] ss:$16 sps:$4 sm:$0xff]   ;;  %v9529_v34 = vld [vmem:[#allocation8 + $0x200] ss:$16 sps:$4 sm:$0xff]  }
 0x284   : > { %4140 = vmatprep.subr.bf16.mxu0 %v8533_v38 }
 0x285   : > { %4180 = vmatpush2.bf16.msra.mxu1 %v8804_v43  ;;  %v9495_v43 = vld [vmem:[#allocation8 + $0x2c4] ss:$16 sps:$4 sm:$0xff]  }
 0x286   : > { %4181 = vmatprep.subr.bf16.mxu1 %v8789_v48 }
 0x287   : > { %4141 = vmatpush2.bf16.msra.mxu0 %v8532_v55 }
 0x288   : > { %4142 = vmatprep.subr.bf16.mxu0 %v8517_v56 }
 0x289   : > { %4182 = vmatpush2.bf16.msra.mxu1 %v8788_v13  ;;  %v9501_v13 = vld [vmem:[#allocation8 + $0x2a4] ss:$16 sps:$4 sm:$0xff]  }
 0x28a   : > { %4183 = vmatprep.subr.bf16.mxu1 %v8773_v57 }
 0x28b   : > { %4143 = vmatpush2.bf16.msra.mxu0 %v8516_v62 }
 0x28c   : > { %4144 = vmatprep.subr.bf16.mxu0 %v8501_v1  ;;  %v9502_v1 = vld [vmem:[#allocation8 + $0x80] ss:$16 sps:$4 sm:$0xff]  }
 0x28d   : > { %4184 = vmatpush2.bf16.msra.mxu1 %v8772_v0  ;;  %v9507_v0 = vld [vmem:[#allocation8 + $0x284] ss:$16 sps:$4 sm:$0xff]  }
 0x28e   : > { %4185 = vmatprep.subr.bf16.mxu1 %v8757_v59  ;;  %v9505_v59 = vld [vmem:[#allocation8 + $0x280] ss:$16 sps:$4 sm:$0xff]  }
 0x28f   : > { %4145 = vmatpush2.bf16.msra.mxu0 %v8500_v11  ;;  %v9516_v11 = vld [vmem:[#allocation8 + $0x44] ss:$16 sps:$4 sm:$0xff]  }
 0x290   : > { %4146 = vmatprep.subr.bf16.mxu0 %v8485_v15  ;;  %v9514_v15 = vld [vmem:[#allocation8 + $0x40] ss:$16 sps:$4 sm:$0xff]  }
 0x291   : > { %4186 = vmatpush2.bf16.msra.mxu1 %v8756_v12  ;;  %v9519_v12 = vld [vmem:[#allocation8 + $0x244] ss:$16 sps:$4 sm:$0xff]  }
 0x292   : > { %4187 = vmatprep.subr.bf16.mxu1 %v8741_v17  ;;  %v9517_v17 = vld [vmem:[#allocation8 + $0x240] ss:$16 sps:$4 sm:$0xff]  }
 0x293   : > { %4147 = vmatpush2.bf16.msra.mxu0 %v8484_v20  ;;  %v9525_v20 = vld [vmem:[#allocation8 + $0x224] ss:$16 sps:$4 sm:$0xff]  }
 0x294   : > { %7436 = vmatprep.subr.bf16.mxu0 %v9486_v25  ;;  %v10933_v25 = vpack.c.bf16 %v10853_v45, %v10853_v45 }
 0x295   : > { %4188 = vmatpush2.bf16.msra.mxu1 %v8740_v22  ;;  %v9520_v22 = vld [vmem:[#allocation8 + $0x20] ss:$16 sps:$4 sm:$0xff]  }
 0x296   : > { %7477 = vmatprep.subr.bf16.mxu1 %v9489_v26  ;;  %v3904_v39 = vpop.f32.mrf.mxu0  ;;  %4149 = vmatmul.mubr.bf16.vlgmr.msra.gmra.mxu0 %v10803_v16  ;;  %v9523_v26 = vld [vmem:[#allocation8 + $0x220] ss:$16 sps:$4 sm:$0xff]   ;;  %v4216_v45 = vmul.bf16 1024605458, %v10933_v25 }
 0x297   : > { %v3905_v38 = vadd.f32 %v3904_v39, %v937_v28  ;;  %7437 = vmatpush1.bf16.msra.mxu0 %v9484_v29  ;;  %7468 = vmatprep.mubr.bf16.mxu0 %v10916_v42  ;;  %v10937_v28 = vpack.c.bf16 %v10875_v44, %v10875_v44  ;;  %v9531_v29 = vld [vmem:[#allocation8 + $0x204] ss:$16 sps:$4 sm:$0xff]   ;;  %v4230_v39 = vmul.bf16 %v4214_v31, %v10929_v21  ;;  %v9568_v31 = vld [vmem:[#allocation8 + $0x120] ss:$16 sps:$4 sm:$0xff]  }
 0x298   : > { %v3945_v48 = vpop.f32.mrf.mxu1  ;;  %4190 = vmatmul.mubr.bf16.vlgmr.msra.gmra.mxu1 %v10805_v19  ;;  %v3906_v46 = vpop.f32.mrf.mxu0  ;;  %7438 = vmatprep.subr.bf16.mxu0 %v9492_v37  ;;  %v9537_v44 = vld [vmem:[#allocation8 + $0x3e4] ss:$16 sps:$4 sm:$0xff]   ;;  %v4221_v37 = vmul.bf16 1024605458, %v10941_v7 }
 0x299   : > { %7478 = vmatpush1.bf16.msra.mxu1 %v9487_v32  ;;  %v10922_v53 = vadd.f32 %v3945_v48, %v3905_v38  ;;  %7509 = vmatprep.mubr.bf16.mxu1 %v10919_v49  ;;  %v3907_v16 = vadd.f32 %v3906_v46, %v941_v36  ;;  %v9526_v32 = vld [vmem:[#allocation8] ss:$16 sps:$4 sm:$0xff]   ;;  %v4219_v36 = vmul.bf16 1024605458, %v10937_v28  ;;  %v9540_v48 = vld [vmem:[#allocation8 + $0x1c4] ss:$16 sps:$4 sm:$0xff]  }
 0x29a   : > { %v3947_v55 = vpop.f32.mrf.mxu1  ;;  %v3908_v56 = vpop.f32.mrf.mxu0  ;;  %7479 = vmatprep.subr.bf16.mxu1 %v9495_v43  ;;  %v4232_v43 = vmul.bf16 %v4216_v45, %v10933_v25  ;;  %v9535_v38 = vld [vmem:[#allocation8 + $0x3e0] ss:$16 sps:$4 sm:$0xff]   ;;  %v9543_v46 = vld [vmem:[#allocation8 + $0x3c4] ss:$16 sps:$4 sm:$0xff]  }
 0x29b   : > { %v10925_v19 = vadd.f32 %v3947_v55, %v3907_v16  ;;  %7439 = vmatpush1.bf16.msra.mxu0 %v9490_v41  ;;  %v4235_v41 = vmul.bf16 %v4219_v36, %v10937_v28  ;;  %v9538_v16 = vld [vmem:[#allocation8 + $0x1c0] ss:$16 sps:$4 sm:$0xff]   ;;  %v9546_v56 = vld [vmem:[#allocation8 + $0x1a4] ss:$16 sps:$4 sm:$0xff]  }
 0x29c   : > { %v3949_v57 = vpop.f32.mrf.mxu1  ;;  %v3909_v61 = vpop.f32.mrf.mxu0  ;;  %7440 = vmatprep.subr.bf16.mxu0 %v9498_v52  ;;  %v4246_v52 = vadd.bf16 1061961548, %v4230_v39  ;;  %v4248_v55 = vadd.bf16 1061961548, %v4232_v43  ;;  %v9576_v45 = vld [vmem:[#allocation8 + $0x104] ss:$16 sps:$4 sm:$0xff]  }
 0x29d   : > { %7480 = vmatpush1.bf16.msra.mxu1 %v9493_v51  ;;  %v4237_v51 = vmul.bf16 %v4221_v37, %v10941_v7  ;;  %v4251_v57 = vadd.bf16 1061961548, %v4235_v41  ;;  %v9574_v37 = vld [vmem:[#allocation8 + $0x100] ss:$16 sps:$4 sm:$0xff]   ;;  %v9585_v41 = vld [vmem:[#allocation8 + $0x6e4] ss:$16 sps:$4 sm:$0xff]  }
 0x29e   : > { %v3950_v62 = vpop.f32.mrf.mxu1  ;;  %7481 = vmatprep.subr.bf16.mxu1 %v9501_v13  ;;  %v9541_v13 = vld [vmem:[#allocation8 + $0x3c0] ss:$16 sps:$4 sm:$0xff]  }
 0x29f   : > { %7441 = vmatpush1.bf16.msra.mxu0 %v9496_v60  ;;  %v9549_v60 = vld [vmem:[#allocation8 + $0x3a4] ss:$16 sps:$4 sm:$0xff]   ;;  %v4253_v61 = vadd.bf16 1061961548, %v4237_v51  ;;  %v4264_v62 = vmul.bf16 %v4248_v55, %v10933_v25  ;;  %v9580_v55 = vld [vmem:[#allocation8 + $0x4e0] ss:$16 sps:$4 sm:$0xff]  }
 0x2a0   : > { %7442 = vmatprep.subr.bf16.mxu0 %v9504_v54  ;;  %v9544_v54 = vld [vmem:[#allocation8 + $0x1a0] ss:$16 sps:$4 sm:$0xff]  }
 0x2a1   : > { %7482 = vmatpush1.bf16.msra.mxu1 %v9499_v58  ;;  %v4262_v58 = vmul.bf16 %v4246_v52, %v10929_v21  ;;  %v4280_v52 = vmul.bf16 1056980736, %v10933_v25 }
 0x2a2   : > { %7483 = vmatprep.subr.bf16.mxu1 %v9507_v0  ;;  %v9547_v0 = vld [vmem:[#allocation8 + $0x3a0] ss:$16 sps:$4 sm:$0xff]  }
 0x2a3   : > { %7443 = vmatpush1.bf16.msra.mxu0 %v9502_v1  ;;  %v9552_v1 = vld [vmem:[#allocation8 + $0x184] ss:$16 sps:$4 sm:$0xff]   ;;  %10256 = vtanh.bf16 %v4262_v58 }
 0x2a4   : > { %7444 = vmatprep.subr.bf16.mxu0 %v9510_v4  ;;  %v9555_v4 = vld [vmem:[#allocation8 + $0x384] ss:$16 sps:$4 sm:$0xff]   ;;  %10258 = vtanh.bf16 %v4264_v62 }
 0x2a5   : > { %7484 = vmatpush1.bf16.msra.mxu1 %v9505_v59  ;;  %v4267_v59 = vmul.bf16 %v4251_v57, %v10937_v28  ;;  %v9583_v57 = vld [vmem:[#allocation8 + $0x6e0] ss:$16 sps:$4 sm:$0xff]   ;;  %v9588_v58 = vld [vmem:[#allocation8 + $0x4c4] ss:$16 sps:$4 sm:$0xff]  }
 0x2a6   : > { %7485 = vmatprep.subr.bf16.mxu1 %v9513_v5  ;;  %v4269_v5 = vmul.bf16 %v4253_v61, %v10941_v7  ;;  %v9591_v62 = vld [vmem:[#allocation8 + $0x6c4] ss:$16 sps:$4 sm:$0xff]  }
 0x2a7   : > { %7445 = vmatpush1.bf16.msra.mxu0 %v9508_v6  ;;  %v9550_v6 = vld [vmem:[#allocation8 + $0x180] ss:$16 sps:$4 sm:$0xff]   ;;  %10260 = vtanh.bf16 %v4267_v59 }
 0x2a8   : > { %7446 = vmatprep.subr.bf16.mxu0 %v9516_v11  ;;  %v9558_v11 = vld [vmem:[#allocation8 + $0x164] ss:$16 sps:$4 sm:$0xff]   ;;  %10262 = vtanh.bf16 %v4269_v5 }
 0x2a9   : > { %7486 = vmatpush1.bf16.msra.mxu1 %v9511_v10  ;;  %v9553_v10 = vld [vmem:[#allocation8 + $0x380] ss:$16 sps:$4 sm:$0xff]   ;;  %v9594_v5 = vld [vmem:[#allocation8 + $0x4a4] ss:$16 sps:$4 sm:$0xff]  }
 0x2aa   : > { %7487 = vmatprep.subr.bf16.mxu1 %v9519_v12  ;;  %v9561_v12 = vld [vmem:[#allocation8 + $0x364] ss:$16 sps:$4 sm:$0xff]  }
 0x2ab   : > { %7447 = vmatpush1.bf16.msra.mxu0 %v9514_v15  ;;  %v9556_v15 = vld [vmem:[#allocation8 + $0x160] ss:$16 sps:$4 sm:$0xff]  }
 0x2ac   : > { %7448 = vmatprep.subr.bf16.mxu0 %v9522_v18  ;;  %v9564_v18 = vld [vmem:[#allocation8 + $0x144] ss:$16 sps:$4 sm:$0xff]  }
 0x2ad   : > { %7488 = vmatpush1.bf16.msra.mxu1 %v9517_v17  ;;  %v9559_v17 = vld [vmem:[#allocation8 + $0x360] ss:$16 sps:$4 sm:$0xff]  }
 0x2ae   : > { %7489 = vmatprep.subr.bf16.mxu1 %v9525_v20  ;;  %v9567_v20 = vld [vmem:[#allocation8 + $0x344] ss:$16 sps:$4 sm:$0xff]  }
 0x2af   : > { %7449 = vmatpush1.bf16.msra.mxu0 %v9520_v22  ;;  %v9562_v22 = vld [vmem:[#allocation8 + $0x140] ss:$16 sps:$4 sm:$0xff]  }
 0x2b0   : > { %7450 = vmatprep.subr.bf16.mxu0 %v9528_v27  ;;  %v9570_v27 = vld [vmem:[#allocation8 + $0x124] ss:$16 sps:$4 sm:$0xff]  }
 0x2b1   : > { %7490 = vmatpush1.bf16.msra.mxu1 %v9523_v26  ;;  %v9565_v26 = vld [vmem:[#allocation8 + $0x340] ss:$16 sps:$4 sm:$0xff]  }
 0x2b2   : > { %7491 = vmatprep.subr.bf16.mxu1 %v9531_v29  ;;  %v9573_v29 = vld [vmem:[#allocation8 + $0x324] ss:$16 sps:$4 sm:$0xff]  }
 0x2b3   : > { %7451 = vmatpush1.bf16.msra.mxu0 %v9526_v32  ;;  %v9571_v32 = vld [vmem:[#allocation8 + $0x320] ss:$16 sps:$4 sm:$0xff]  }
 0x2b4   : > { %7452 = vmatprep.subr.bf16.mxu0 %v9534_v35  ;;  %v9579_v35 = vld [vmem:[#allocation8 + $0x304] ss:$16 sps:$4 sm:$0xff]  }
 0x2b5   : > { %7492 = vmatpush1.bf16.msra.mxu1 %v9529_v34  ;;  %v10257_v34 = vpop.eup %10256 }
 0x2b6   : > { %7493 = vmatprep.subr.bf16.mxu1 %v9537_v44  ;;  %v10259_v36 = vpop.eup %10258  ;;  %v4310_v43 = vadd.bf16 1065369472, %v10257_v34  ;;  %v949_v34 = vrot.slane %v10907_v24, %v10845_v23 }
 0x2b7   : > { %7453 = vmatpush2.bf16.msra.mxu0 %v9532_v50  ;;  %v10261_v44 = vpop.eup %10260  ;;  %v9577_v50 = vld [vmem:[#allocation8 + $0x300] ss:$16 sps:$4 sm:$0xff]  }
 0x2b8   : > { %7454 = vmatprep.subr.bf16.mxu0 %v9540_v48  ;;  %v10263_v39 = vpop.eup %10262  ;;  %v4312_v48 = vadd.bf16 1065369472, %v10259_v36  ;;  %v4315_v51 = vadd.bf16 1065369472, %v10261_v44  ;;  %v9607_v36 = vld [vmem:[#allocation8 + $0x660] ss:$16 sps:$4 sm:$0xff]  }
 0x2b9   : > { %7494 = vmatpush2.bf16.msra.mxu1 %v9535_v38  ;;  %v9582_v38 = vld [vmem:[#allocation8 + $0x4e4] ss:$16 sps:$4 sm:$0xff]  }
 0x2ba   : > { %7495 = vmatprep.subr.bf16.mxu1 %v9543_v46  ;;  %v4278_v46 = vmul.bf16 1056980736, %v10929_v21  ;;  %v10962_v61 = vmul.bf16 %v4312_v48, %v4280_v52  ;;  %v4285_v21 = vmul.bf16 1056980736, %v10941_v7  ;;  %v9589_v7 = vld [vmem:[#allocation8 + $0x6c0] ss:$16 sps:$4 sm:$0xff]   ;;  %v10983_v52 = vpack.c.bf16 %v10887_v9, %v10887_v9 }
 0x2bb   : > { %7455 = vmatpush2.bf16.msra.mxu0 %v9538_v16  ;;  %v945_v16 = vrot.slane %v10907_v24, %v10842_v14  ;;  %v9612_v44 = vld [vmem:[#allocation8 + $0x444] ss:$16 sps:$4 sm:$0xff]   ;;  %v9625_v9 = vld [vmem:[#allocation8 + $0x600] ss:$16 sps:$4 sm:$0xff]  }
 0x2bc   : > { %7456 = vmatprep.subr.bf16.mxu0 %v9546_v56  ;;  %v10959_v56 = vmul.bf16 %v4310_v43, %v4278_v46  ;;  %v9613_v43 = vld [vmem:[#allocation8 + $0x640] ss:$16 sps:$4 sm:$0xff]   ;;  %v9621_v48 = vld [vmem:[#allocation8 + $0x624] ss:$16 sps:$4 sm:$0xff]   ;;  %v10979_v46 = vpack.c.bf16 %v10871_v33, %v10871_v33 }
 0x2bd   : > { %7496 = vmatpush2.bf16.msra.mxu1 %v9541_v13  ;;  %v4317_v13 = vadd.bf16 1065369472, %v10263_v39 }
 0x2be   : > { %7497 = vmatprep.subr.bf16.mxu1 %v9549_v60  ;;  %v4283_v60 = vmul.bf16 1056980736, %v10937_v28  ;;  %v9586_v28 = vld [vmem:[#allocation8 + $0x4c0] ss:$16 sps:$4 sm:$0xff]   ;;  %v4218_v33 = vmul.bf16 1024605458, %v10979_v46 }
 0x2bf   : > { %7457 = vmatpush2.bf16.msra.mxu0 %v9544_v54  ;;  %v10969_v59 = vmul.bf16 %v4317_v13, %v4285_v21  ;;  %v10987_v13 = vpack.c.bf16 %v10925_v19, %v10925_v19  ;;  %v9622_v21 = vld [vmem:[#allocation8 + $0x400] ss:$16 sps:$4 sm:$0xff]  }
 0x2c0   : > { %7458 = vmatprep.subr.bf16.mxu0 %v9552_v1  ;;  %v10966_v54 = vmul.bf16 %v4315_v51, %v4283_v60  ;;  %v9616_v51 = vld [vmem:[#allocation8 + $0x420] ss:$16 sps:$4 sm:$0xff]  }
 0x2c1   : > { %7498 = vmatpush2.bf16.msra.mxu1 %v9547_v0 }
 0x2c2   : > { %7499 = vmatprep.subr.bf16.mxu1 %v9555_v4 }
 0x2c3   : > { %7459 = vmatpush2.bf16.msra.mxu0 %v9550_v6 }
 0x2c4   : > { %7460 = vmatprep.subr.bf16.mxu0 %v9558_v11  ;;  %v9597_v11 = vld [vmem:[#allocation8 + $0x6a4] ss:$16 sps:$4 sm:$0xff]  }
 0x2c5   : > { %7500 = vmatpush2.bf16.msra.mxu1 %v9553_v10 }
 0x2c6   : > { %7501 = vmatprep.subr.bf16.mxu1 %v9561_v12 }
 0x2c7   : > { %7461 = vmatpush2.bf16.msra.mxu0 %v9556_v15 }
 0x2c8   : > { %7462 = vmatprep.subr.bf16.mxu0 %v9564_v18 }
 0x2c9   : > { %7502 = vmatpush2.bf16.msra.mxu1 %v9559_v17  ;;  %v9592_v17 = vld [vmem:[#allocation8 + $0x4a0] ss:$16 sps:$4 sm:$0xff]  }
 0x2ca   : > { %7503 = vmatprep.subr.bf16.mxu1 %v9567_v20  ;;  %v9595_v20 = vld [vmem:[#allocation8 + $0x6a0] ss:$16 sps:$4 sm:$0xff]  }
 0x2cb   : > { %7463 = vmatpush2.bf16.msra.mxu0 %v9562_v22  ;;  %v9600_v22 = vld [vmem:[#allocation8 + $0x484] ss:$16 sps:$4 sm:$0xff]  }
 0x2cc   : > { %7464 = vmatprep.subr.bf16.mxu0 %v9570_v27  ;;  %v9603_v27 = vld [vmem:[#allocation8 + $0x684] ss:$16 sps:$4 sm:$0xff]  }
 0x2cd   : > { %7504 = vmatpush2.bf16.msra.mxu1 %v9565_v26 }
 0x2ce   : > { %7505 = vmatprep.subr.bf16.mxu1 %v9573_v29  ;;  %v9598_v29 = vld [vmem:[#allocation8 + $0x480] ss:$16 sps:$4 sm:$0xff]  }
 0x2cf   : > { %7465 = vmatpush2.bf16.msra.mxu0 %v9568_v31  ;;  %v9601_v31 = vld [vmem:[#allocation8 + $0x680] ss:$16 sps:$4 sm:$0xff]  }
 0x2d0   : > { %7466 = vmatprep.subr.bf16.mxu0 %v9576_v45  ;;  %v9609_v45 = vld [vmem:[#allocation8 + $0x664] ss:$16 sps:$4 sm:$0xff]  }
 0x2d1   : > { %7506 = vmatpush2.bf16.msra.mxu1 %v9571_v32  ;;  %v9606_v32 = vld [vmem:[#allocation8 + $0x464] ss:$16 sps:$4 sm:$0xff]  }
 0x2d2   : > { %7507 = vmatprep.subr.bf16.mxu1 %v9579_v35  ;;  %v9604_v35 = vld [vmem:[#allocation8 + $0x460] ss:$16 sps:$4 sm:$0xff]  }
 0x2d3   : > { %7467 = vmatpush2.bf16.msra.mxu0 %v9574_v37  ;;  %v9615_v37 = vld [vmem:[#allocation8 + $0x644] ss:$16 sps:$4 sm:$0xff]  }
 0x2d4   : > { %7518 = vmatprep.subr.bf16.mxu0 %v9582_v38  ;;  %v9618_v38 = vld [vmem:[#allocation8 + $0x424] ss:$16 sps:$4 sm:$0xff]  }
 0x2d5   : > { %7508 = vmatpush2.bf16.msra.mxu1 %v9577_v50  ;;  %v9610_v50 = vld [vmem:[#allocation8 + $0x440] ss:$16 sps:$4 sm:$0xff]  }
 0x2d6   : > { %7559 = vmatprep.subr.bf16.mxu1 %v9585_v41  ;;  %v3986_v25 = vpop.f32.mrf.mxu0  ;;  %7469 = vmatmul.mubr.bf16.vlgmr.msra.gmra.mxu0 %v10959_v56 }
 0x2d7   : > { %v3987_v0 = vadd.f32 %v3986_v25, %v945_v16  ;;  %7519 = vmatpush1.bf16.msra.mxu0 %v9580_v55  ;;  %7550 = vmatprep.mubr.bf16.mxu0 %v10966_v54  ;;  %v9619_v16 = vld [vmem:[#allocation8 + $0x620] ss:$16 sps:$4 sm:$0xff]   ;;  %v9624_v55 = vld [vmem:[#allocation8 + $0x404] ss:$16 sps:$4 sm:$0xff]  }
 0x2d8   : > { %v4027_v1 = vpop.f32.mrf.mxu1  ;;  %7510 = vmatmul.mubr.bf16.vlgmr.msra.gmra.mxu1 %v10962_v61  ;;  %v3988_v4 = vpop.f32.mrf.mxu0  ;;  %7520 = vmatprep.subr.bf16.mxu0 %v9588_v58  ;;  %v4220_v58 = vmul.bf16 1024605458, %v10983_v52  ;;  %v9630_v25 = vld [vmem:[#allocation8 + $0x5e4] ss:$16 sps:$4 sm:$0xff]  }
 0x2d9   : > { %7560 = vmatpush1.bf16.msra.mxu1 %v9583_v57  ;;  %v10972_v6 = vadd.f32 %v4027_v1, %v3987_v0  ;;  %7591 = vmatprep.mubr.bf16.mxu1 %v10969_v59  ;;  %v3989_v39 = vadd.f32 %v3988_v4, %v949_v34  ;;  %v9627_v57 = vld [vmem:[#allocation8 + $0x604] ss:$16 sps:$4 sm:$0xff]   ;;  %v4234_v1 = vmul.bf16 %v4218_v33, %v10979_v46  ;;  %v9643_v34 = vld [vmem:[#allocation8 + $0x7a0] ss:$16 sps:$4 sm:$0xff]  }
 0x2da   : > { %v4029_v10 = vpop.f32.mrf.mxu1  ;;  %v3990_v12 = vpop.f32.mrf.mxu0  ;;  %7561 = vmatprep.subr.bf16.mxu1 %v9591_v62  ;;  %v4223_v62 = vmul.bf16 1024605458, %v10987_v13  ;;  %v9633_v0 = vld [vmem:[#allocation8 + $0x7e4] ss:$16 sps:$4 sm:$0xff]   ;;  %v4236_v4 = vmul.bf16 %v4220_v58, %v10983_v52  ;;  %v9664_v58 = vld [vmem:[#allocation8 + $0x520] ss:$16 sps:$4 sm:$0xff]  }
 0x2db   : > { %7521 = vmatpush1.bf16.msra.mxu0 %v9586_v28  ;;  %v4030_v41 = vadd.f32 %v4029_v10, %v3989_v39  ;;  %v9628_v28 = vld [vmem:[#allocation8 + $0x5e0] ss:$16 sps:$4 sm:$0xff]   ;;  %v9666_v33 = vld [vmem:[#allocation8 + $0x524] ss:$16 sps:$4 sm:$0xff]  }
 0x2dc   : > { %v4031_v15 = vpop.f32.mrf.mxu1  ;;  %v3991_v18 = vpop.f32.mrf.mxu0  ;;  %7522 = vmatprep.subr.bf16.mxu0 %v9594_v5  ;;  %v9636_v5 = vld [vmem:[#allocation8 + $0x5c4] ss:$16 sps:$4 sm:$0xff]   ;;  %v4239_v10 = vmul.bf16 %v4223_v62, %v10987_v13  ;;  %v9646_v39 = vld [vmem:[#allocation8 + $0x580] ss:$16 sps:$4 sm:$0xff]  }
 0x2dd   : > { %7562 = vmatpush1.bf16.msra.mxu1 %v9589_v7  ;;  %v10989_v60 = vpack.c.bf16 %v4030_v41, %v4030_v41  ;;  %v9631_v7 = vld [vmem:[#allocation8 + $0x7e0] ss:$16 sps:$4 sm:$0xff]   ;;  %v4250_v15 = vadd.bf16 1061961548, %v4234_v1  ;;  %v4252_v18 = vadd.bf16 1061961548, %v4236_v4 }
 0x2de   : > { %v4032_v26 = vpop.f32.mrf.mxu1  ;;  %7563 = vmatprep.subr.bf16.mxu1 %v9597_v11  ;;  %v9639_v11 = vld [vmem:[#allocation8 + $0x7c4] ss:$16 sps:$4 sm:$0xff]   ;;  %v9655_v41 = vld [vmem:[#allocation8 + $0x760] ss:$16 sps:$4 sm:$0xff]  }
 0x2df   : > { %7523 = vmatpush1.bf16.msra.mxu0 %v9592_v17  ;;  %v4225_v19 = vmul.bf16 1024605458, %v10989_v60  ;;  %v9634_v17 = vld [vmem:[#allocation8 + $0x5c0] ss:$16 sps:$4 sm:$0xff]   ;;  %v4255_v26 = vadd.bf16 1061961548, %v4239_v10 }
 0x2e0   : > { %7524 = vmatprep.subr.bf16.mxu0 %v9600_v22  ;;  %v9642_v22 = vld [vmem:[#allocation8 + $0x5a4] ss:$16 sps:$4 sm:$0xff]  }
 0x2e1   : > { %7564 = vmatpush1.bf16.msra.mxu1 %v9595_v20  ;;  %v4241_v12 = vmul.bf16 %v4225_v19, %v10989_v60  ;;  %v9637_v20 = vld [vmem:[#allocation8 + $0x7c0] ss:$16 sps:$4 sm:$0xff]   ;;  %v9678_v10 = vld [vmem:[#allocation8 + $0x8e4] ss:$16 sps:$4 sm:$0xff]  }
 0x2e2   : > { %7565 = vmatprep.subr.bf16.mxu1 %v9603_v27  ;;  %v9645_v27 = vld [vmem:[#allocation8 + $0x7a4] ss:$16 sps:$4 sm:$0xff]  }
 0x2e3   : > { %7525 = vmatpush1.bf16.msra.mxu0 %v9598_v29  ;;  %v4257_v29 = vadd.bf16 1061961548, %v4241_v12  ;;  %v9681_v12 = vld [vmem:[#allocation8 + $0xae4] ss:$16 sps:$4 sm:$0xff]  }
 0x2e4   : > { %7526 = vmatprep.subr.bf16.mxu0 %v9606_v32  ;;  %v9640_v32 = vld [vmem:[#allocation8 + $0x5a0] ss:$16 sps:$4 sm:$0xff]  }
 0x2e5   : > { %7566 = vmatpush1.bf16.msra.mxu1 %v9601_v31  ;;  %v4266_v31 = vmul.bf16 %v4250_v15, %v10979_v46  ;;  %v4282_v15 = vmul.bf16 1056980736, %v10979_v46  ;;  %v4289_v46 = vmul.bf16 1056980736, %v10989_v60 }
 0x2e6   : > { %7567 = vmatprep.subr.bf16.mxu1 %v9609_v45  ;;  %v4268_v45 = vmul.bf16 %v4252_v18, %v10983_v52  ;;  %v4284_v18 = vmul.bf16 1056980736, %v10983_v52  ;;  %v9684_v52 = vld [vmem:[#allocation8 + $0x8c4] ss:$16 sps:$4 sm:$0xff]  }
 0x2e7   : > { %7527 = vmatpush1.bf16.msra.mxu0 %v9604_v35  ;;  %v9648_v35 = vld [vmem:[#allocation8 + $0x584] ss:$16 sps:$4 sm:$0xff]   ;;  %10264 = vtanh.bf16 %v4266_v31  ;;  %v4287_v31 = vmul.bf16 1056980736, %v10987_v13 }
 0x2e8   : > { %7528 = vmatprep.subr.bf16.mxu0 %v9612_v44  ;;  %v9651_v44 = vld [vmem:[#allocation8 + $0x784] ss:$16 sps:$4 sm:$0xff]   ;;  %10266 = vtanh.bf16 %v4268_v45 }
 0x2e9   : > { %7568 = vmatpush1.bf16.msra.mxu1 %v9607_v36  ;;  %v4271_v36 = vmul.bf16 %v4255_v26, %v10987_v13  ;;  %v9682_v13 = vld [vmem:[#allocation8 + $0x8c0] ss:$16 sps:$4 sm:$0xff]  }
 0x2ea   : > { %7569 = vmatprep.subr.bf16.mxu1 %v9615_v37  ;;  %v4273_v37 = vmul.bf16 %v4257_v29, %v10989_v60  ;;  %v9679_v29 = vld [vmem:[#allocation8 + $0xae0] ss:$16 sps:$4 sm:$0xff]  }
 0x2eb   : > { %7529 = vmatpush1.bf16.msra.mxu0 %v9610_v50  ;;  %v9649_v50 = vld [vmem:[#allocation8 + $0x780] ss:$16 sps:$4 sm:$0xff]   ;;  %10268 = vtanh.bf16 %v4271_v36 }
 0x2ec   : > { %7530 = vmatprep.subr.bf16.mxu0 %v9618_v38  ;;  %v9657_v38 = vld [vmem:[#allocation8 + $0x764] ss:$16 sps:$4 sm:$0xff]   ;;  %10270 = vtanh.bf16 %v4273_v37  ;;  %v9685_v60 = vld [vmem:[#allocation8 + $0xac0] ss:$16 sps:$4 sm:$0xff]  }
 0x2ed   : > { %7570 = vmatpush1.bf16.msra.mxu1 %v9613_v43  ;;  %v9654_v43 = vld [vmem:[#allocation8 + $0x564] ss:$16 sps:$4 sm:$0xff]  }
 0x2ee   : > { %7571 = vmatprep.subr.bf16.mxu1 %v9621_v48  ;;  %v9652_v48 = vld [vmem:[#allocation8 + $0x560] ss:$16 sps:$4 sm:$0xff]  }
 0x2ef   : > { %7531 = vmatpush1.bf16.msra.mxu0 %v9616_v51  ;;  %v9660_v51 = vld [vmem:[#allocation8 + $0x544] ss:$16 sps:$4 sm:$0xff]  }
 0x2f0   : > { %7532 = vmatprep.subr.bf16.mxu0 %v9624_v55  ;;  %v9658_v55 = vld [vmem:[#allocation8 + $0x540] ss:$16 sps:$4 sm:$0xff]  }
 0x2f1   : > { %7572 = vmatpush1.bf16.msra.mxu1 %v9619_v16  ;;  %v9663_v16 = vld [vmem:[#allocation8 + $0x744] ss:$16 sps:$4 sm:$0xff]  }
 0x2f2   : > { %7573 = vmatprep.subr.bf16.mxu1 %v9627_v57  ;;  %v9661_v57 = vld [vmem:[#allocation8 + $0x740] ss:$16 sps:$4 sm:$0xff]  }
 0x2f3   : > { %7533 = vmatpush1.bf16.msra.mxu0 %v9622_v21  ;;  %v9669_v21 = vld [vmem:[#allocation8 + $0x724] ss:$16 sps:$4 sm:$0xff]  }
 0x2f4   : > { %7534 = vmatprep.subr.bf16.mxu0 %v9630_v25  ;;  %v9672_v25 = vld [vmem:[#allocation8 + $0x504] ss:$16 sps:$4 sm:$0xff]  }
 0x2f5   : > { %7574 = vmatpush1.bf16.msra.mxu1 %v9625_v9  ;;  %v9667_v9 = vld [vmem:[#allocation8 + $0x720] ss:$16 sps:$4 sm:$0xff]   ;;  %v10265_v62 = vpop.eup %10264 }
 0x2f6   : > { %7575 = vmatprep.subr.bf16.mxu1 %v9633_v0  ;;  %v9675_v0 = vld [vmem:[#allocation8 + $0x704] ss:$16 sps:$4 sm:$0xff]   ;;  %v10267_v19 = vpop.eup %10266 }
 0x2f7   : > { %7535 = vmatpush2.bf16.msra.mxu0 %v9628_v28  ;;  %v9670_v28 = vld [vmem:[#allocation8 + $0x500] ss:$16 sps:$4 sm:$0xff]  }
 0x2f8   : > { %7536 = vmatprep.subr.bf16.mxu0 %v9636_v5  ;;  %v4314_v5 = vadd.bf16 1065369472, %v10265_v62  ;;  %v957_v62 = vrot.slane %v10907_v24, %v924_v3  ;;  %v9717_v3 = vld [vmem:[#allocation8 + $0xa24] ss:$16 sps:$4 sm:$0xff]  }
 0x2f9   : > { %7576 = vmatpush2.bf16.msra.mxu1 %v9631_v7  ;;  %v10269_v1 = vpop.eup %10268  ;;  %v9673_v7 = vld [vmem:[#allocation8 + $0x700] ss:$16 sps:$4 sm:$0xff]  }
 0x2fa   : > { %7577 = vmatprep.subr.bf16.mxu1 %v9639_v11  ;;  %v10271_v4 = vpop.eup %10270  ;;  %v4316_v11 = vadd.bf16 1065369472, %v10267_v19  ;;  %v9700_v19 = vld [vmem:[#allocation8 + $0x860] ss:$16 sps:$4 sm:$0xff]  }
 0x2fb   : > { %7537 = vmatpush2.bf16.msra.mxu0 %v9634_v17  ;;  %v4319_v17 = vadd.bf16 1065369472, %v10269_v1  ;;  %v4321_v26 = vadd.bf16 1065369472, %v10271_v4  ;;  %v9703_v1 = vld [vmem:[#allocation8 + $0xa60] ss:$16 sps:$4 sm:$0xff]  }
 0x2fc   : > { %7538 = vmatprep.subr.bf16.mxu0 %v9642_v22  ;;  %v9676_v22 = vld [vmem:[#allocation8 + $0x8e0] ss:$16 sps:$4 sm:$0xff]  }
 0x2fd   : > { %7578 = vmatpush2.bf16.msra.mxu1 %v9637_v20  ;;  %v953_v20 = vrot.slane %v10907_v24, %v920_v63  ;;  %v9687_v63 = vld [vmem:[#allocation8 + $0xac4] ss:$16 sps:$4 sm:$0xff]   ;;  %v11029_v24 = vpack.c.bf16 %v10922_v53, %v10922_v53 }
 0x2fe   : > { %7579 = vmatprep.subr.bf16.mxu1 %v9645_v27  ;;  %v11008_v27 = vmul.bf16 %v4314_v5, %v4282_v15  ;;  %v9706_v5 = vld [vmem:[#allocation8 + $0x840] ss:$16 sps:$4 sm:$0xff]  }
 0x2ff   : > { %7539 = vmatpush2.bf16.msra.mxu0 %v9640_v32  ;;  %v11011_v32 = vmul.bf16 %v4316_v11, %v4284_v18  ;;  %v9714_v11 = vld [vmem:[#allocation8 + $0x824] ss:$16 sps:$4 sm:$0xff]   ;;  %v9712_v15 = vld [vmem:[#allocation8 + $0x820] ss:$16 sps:$4 sm:$0xff]  }
 0x300   : > { %7540 = vmatprep.subr.bf16.mxu0 %v9648_v35  ;;  %v9715_v18 = vld [vmem:[#allocation8 + $0xa20] ss:$16 sps:$4 sm:$0xff]  }
 0x301   : > { %7580 = vmatpush2.bf16.msra.mxu1 %v9643_v34  ;;  %v11015_v34 = vmul.bf16 %v4319_v17, %v4287_v31  ;;  %v11033_v17 = vpack.c.bf16 %v10972_v6, %v10972_v6  ;;  %v9718_v31 = vld [vmem:[#allocation8 + $0x800] ss:$16 sps:$4 sm:$0xff]  }
 0x302   : > { %7581 = vmatprep.subr.bf16.mxu1 %v9651_v44  ;;  %v11018_v44 = vmul.bf16 %v4321_v26, %v4289_v46  ;;  %v9723_v26 = vld [vmem:[#allocation8 + $0xa04] ss:$16 sps:$4 sm:$0xff]   ;;  %v9721_v46 = vld [vmem:[#allocation8 + $0xa00] ss:$16 sps:$4 sm:$0xff]  }
 0x303   : > { %7541 = vmatpush2.bf16.msra.mxu0 %v9646_v39  ;;  %v9690_v39 = vld [vmem:[#allocation8 + $0x8a4] ss:$16 sps:$4 sm:$0xff]   ;;  %v4224_v53 = vmul.bf16 1024605458, %v11033_v17 }
 0x304   : > { %7542 = vmatprep.subr.bf16.mxu0 %v9654_v43 }
 0x305   : > { %7582 = vmatpush2.bf16.msra.mxu1 %v9649_v50 }
 0x306   : > { %7583 = vmatprep.subr.bf16.mxu1 %v9657_v38  ;;  %v9693_v38 = vld [vmem:[#allocation8 + $0xaa4] ss:$16 sps:$4 sm:$0xff]  }
 0x307   : > { %7543 = vmatpush2.bf16.msra.mxu0 %v9652_v48 }
 0x308   : > { %7544 = vmatprep.subr.bf16.mxu0 %v9660_v51  ;;  %v9688_v51 = vld [vmem:[#allocation8 + $0x8a0] ss:$16 sps:$4 sm:$0xff]  }
 0x309   : > { %7584 = vmatpush2.bf16.msra.mxu1 %v9655_v41 }
 0x30a   : > { %7585 = vmatprep.subr.bf16.mxu1 %v9663_v16 }
 0x30b   : > { %7545 = vmatpush2.bf16.msra.mxu0 %v9658_v55  ;;  %v9691_v55 = vld [vmem:[#allocation8 + $0xaa0] ss:$16 sps:$4 sm:$0xff]  }
 0x30c   : > { %7546 = vmatprep.subr.bf16.mxu0 %v9666_v33 }
 0x30d   : > { %7586 = vmatpush2.bf16.msra.mxu1 %v9661_v57  ;;  %v9696_v57 = vld [vmem:[#allocation8 + $0x884] ss:$16 sps:$4 sm:$0xff]  }
 0x30e   : > { %7587 = vmatprep.subr.bf16.mxu1 %v9669_v21  ;;  %v9699_v21 = vld [vmem:[#allocation8 + $0xa84] ss:$16 sps:$4 sm:$0xff]  }
 0x30f   : > { %7547 = vmatpush2.bf16.msra.mxu0 %v9664_v58  ;;  %v9694_v58 = vld [vmem:[#allocation8 + $0x880] ss:$16 sps:$4 sm:$0xff]  }
 0x310   : > { %7548 = vmatprep.subr.bf16.mxu0 %v9672_v25  ;;  %v9702_v25 = vld [vmem:[#allocation8 + $0x864] ss:$16 sps:$4 sm:$0xff]  }
 0x311   : > { %7588 = vmatpush2.bf16.msra.mxu1 %v9667_v9  ;;  %v9697_v9 = vld [vmem:[#allocation8 + $0xa80] ss:$16 sps:$4 sm:$0xff]  }
 0x312   : > { %7589 = vmatprep.subr.bf16.mxu1 %v9675_v0  ;;  %v9705_v0 = vld [vmem:[#allocation8 + $0xa64] ss:$16 sps:$4 sm:$0xff]  }
 0x313   : > { %7549 = vmatpush2.bf16.msra.mxu0 %v9670_v28  ;;  %v9708_v28 = vld [vmem:[#allocation8 + $0x844] ss:$16 sps:$4 sm:$0xff]  }
 0x314   : > { %7600 = vmatprep.subr.bf16.mxu0 %v9678_v10  ;;  %v9709_v10 = vld [vmem:[#allocation8 + $0xa40] ss:$16 sps:$4 sm:$0xff]  }
 0x315   : > { %7590 = vmatpush2.bf16.msra.mxu1 %v9673_v7  ;;  %v9711_v7 = vld [vmem:[#allocation8 + $0xa44] ss:$16 sps:$4 sm:$0xff]  }
 0x316   : > { %7641 = vmatprep.subr.bf16.mxu1 %v9681_v12  ;;  %v4068_v45 = vpop.f32.mrf.mxu0  ;;  %7551 = vmatmul.mubr.bf16.vlgmr.msra.gmra.mxu0 %v11008_v27 }
 0x317   : > { %v4069_v35 = vadd.f32 %v4068_v45, %v953_v20  ;;  %7601 = vmatpush1.bf16.msra.mxu0 %v9676_v22  ;;  %7632 = vmatprep.mubr.bf16.mxu0 %v11015_v34  ;;  %v9720_v20 = vld [vmem:[#allocation8 + $0x804] ss:$16 sps:$4 sm:$0xff]  }
 0x318   : > { %v4109_v36 = vpop.f32.mrf.mxu1  ;;  %7592 = vmatmul.mubr.bf16.vlgmr.msra.gmra.mxu1 %v11011_v32  ;;  %v4070_v37 = vpop.f32.mrf.mxu0  ;;  %7602 = vmatprep.subr.bf16.mxu0 %v9684_v52  ;;  %v9726_v52 = vld [vmem:[#allocation8 + $0x9e4] ss:$16 sps:$4 sm:$0xff]  }
 0x319   : > { %7642 = vmatpush1.bf16.msra.mxu1 %v9679_v29  ;;  %v11021_v50 = vadd.f32 %v4109_v36, %v4069_v35  ;;  %7673 = vmatprep.mubr.bf16.mxu1 %v11018_v44  ;;  %v4071_v4 = vadd.f32 %v4070_v37, %v957_v62  ;;  %v4222_v29 = vmul.bf16 1024605458, %v11029_v24  ;;  %v9729_v45 = vld [vmem:[#allocation8 + $0xbe4] ss:$16 sps:$4 sm:$0xff]   ;;  %v9724_v35 = vld [vmem:[#allocation8 + $0x9e0] ss:$16 sps:$4 sm:$0xff]   ;;  %v4240_v36 = vmul.bf16 %v4224_v53, %v11033_v17 }
 0x31a   : > { %v4111_v43 = vpop.f32.mrf.mxu1  ;;  %v4072_v48 = vpop.f32.mrf.mxu0  ;;  %7643 = vmatprep.subr.bf16.mxu1 %v9687_v63  ;;  %v9732_v37 = vld [vmem:[#allocation8 + $0x9c4] ss:$16 sps:$4 sm:$0xff]  }
 0x31b   : > { %7603 = vmatpush1.bf16.msra.mxu0 %v9682_v13  ;;  %v4112_v12 = vadd.f32 %v4111_v43, %v4071_v4  ;;  %v4238_v63 = vmul.bf16 %v4222_v29, %v11029_v24  ;;  %v9727_v13 = vld [vmem:[#allocation8 + $0xbe0] ss:$16 sps:$4 sm:$0xff]   ;;  %v4256_v48 = vadd.bf16 1061961548, %v4240_v36  ;;  %v9747_v62 = vld [vmem:[#allocation8 + $0xb84] ss:$16 sps:$4 sm:$0xff]  }
 0x31c   : > { %v4113_v41 = vpop.f32.mrf.mxu1  ;;  %v4073_v16 = vpop.f32.mrf.mxu0  ;;  %7604 = vmatprep.subr.bf16.mxu0 %v9690_v39  ;;  %v9735_v39 = vld [vmem:[#allocation8 + $0xbc4] ss:$16 sps:$4 sm:$0xff]   ;;  %v9748_v4 = vld [vmem:[#allocation8 + $0x960] ss:$16 sps:$4 sm:$0xff]  }
 0x31d   : > { %7644 = vmatpush1.bf16.msra.mxu1 %v9685_v60  ;;  %v11035_v22 = vpack.c.bf16 %v4112_v12, %v4112_v12  ;;  %v4254_v43 = vadd.bf16 1061961548, %v4238_v63  ;;  %v9733_v41 = vld [vmem:[#allocation8 + $0xbc0] ss:$16 sps:$4 sm:$0xff]   ;;  %v9774_v63 = vld [vmem:[#allocation8 + $0xce4] ss:$16 sps:$4 sm:$0xff]  }
 0x31e   : > { %v4114_v33 = vpop.f32.mrf.mxu1  ;;  %7645 = vmatprep.subr.bf16.mxu1 %v9693_v38  ;;  %v9730_v38 = vld [vmem:[#allocation8 + $0x9c0] ss:$16 sps:$4 sm:$0xff]   ;;  %v9777_v36 = vld [vmem:[#allocation8 + $0xee4] ss:$16 sps:$4 sm:$0xff]  }
 0x31f   : > { %7605 = vmatpush1.bf16.msra.mxu0 %v9688_v51  ;;  %v4227_v6 = vmul.bf16 1024605458, %v11035_v22  ;;  %v9738_v51 = vld [vmem:[#allocation8 + $0x9a4] ss:$16 sps:$4 sm:$0xff]   ;;  %v9736_v33 = vld [vmem:[#allocation8 + $0x9a0] ss:$16 sps:$4 sm:$0xff]  }
 0x320   : > { %7606 = vmatprep.subr.bf16.mxu0 %v9696_v57  ;;  %v4270_v57 = vmul.bf16 %v4254_v43, %v11029_v24  ;;  %v9757_v12 = vld [vmem:[#allocation8 + $0xb40] ss:$16 sps:$4 sm:$0xff]  }
 0x321   : > { %7646 = vmatpush1.bf16.msra.mxu1 %v9691_v55  ;;  %v4243_v60 = vmul.bf16 %v4227_v6, %v11035_v22  ;;  %v9741_v55 = vld [vmem:[#allocation8 + $0xba4] ss:$16 sps:$4 sm:$0xff]   ;;  %v9769_v6 = vld [vmem:[#allocation8 + $0xb00] ss:$16 sps:$4 sm:$0xff]  }
 0x322   : > { %7647 = vmatprep.subr.bf16.mxu1 %v9699_v21  ;;  %v4272_v21 = vmul.bf16 %v4256_v48, %v11033_v17  ;;  %10272 = vtanh.bf16 %v4270_v57  ;;  %v4291_v48 = vmul.bf16 1056980736, %v11035_v22 }
 0x323   : > { %7607 = vmatpush1.bf16.msra.mxu0 %v9694_v58  ;;  %v4259_v16 = vadd.bf16 1061961548, %v4243_v60  ;;  %v9739_v58 = vld [vmem:[#allocation8 + $0xba0] ss:$16 sps:$4 sm:$0xff]   ;;  %v4288_v60 = vmul.bf16 1056980736, %v11033_v17 }
 0x324   : > { %7608 = vmatprep.subr.bf16.mxu0 %v9702_v25  ;;  %10274 = vtanh.bf16 %v4272_v21  ;;  %v9778_v21 = vld [vmem:[#allocation8 + $0xcc0] ss:$16 sps:$4 sm:$0xff]  }
 0x325   : > { %7648 = vmatpush1.bf16.msra.mxu1 %v9697_v9  ;;  %v9744_v9 = vld [vmem:[#allocation8 + $0x984] ss:$16 sps:$4 sm:$0xff]   ;;  %v4275_v25 = vmul.bf16 %v4259_v16, %v11035_v22 }
 0x326   : > { %7649 = vmatprep.subr.bf16.mxu1 %v9705_v0  ;;  %v9742_v0 = vld [vmem:[#allocation8 + $0x980] ss:$16 sps:$4 sm:$0xff]  }
 0x327   : > { %7609 = vmatpush1.bf16.msra.mxu0 %v9700_v19  ;;  %v9745_v19 = vld [vmem:[#allocation8 + $0xb80] ss:$16 sps:$4 sm:$0xff]   ;;  %10276 = vtanh.bf16 %v4275_v25 }
 0x328   : > { %7610 = vmatprep.subr.bf16.mxu0 %v9708_v28  ;;  %v9753_v28 = vld [vmem:[#allocation8 + $0xb64] ss:$16 sps:$4 sm:$0xff]  }
 0x329   : > { %7650 = vmatpush1.bf16.msra.mxu1 %v9703_v1  ;;  %v9750_v1 = vld [vmem:[#allocation8 + $0x964] ss:$16 sps:$4 sm:$0xff]  }
 0x32a   : > { %7651 = vmatprep.subr.bf16.mxu1 %v9711_v7  ;;  %v9751_v7 = vld [vmem:[#allocation8 + $0xb60] ss:$16 sps:$4 sm:$0xff]  }
 0x32b   : > { %7611 = vmatpush1.bf16.msra.mxu0 %v9706_v5  ;;  %v9756_v5 = vld [vmem:[#allocation8 + $0x944] ss:$16 sps:$4 sm:$0xff]  }
 0x32c   : > { %7612 = vmatprep.subr.bf16.mxu0 %v9714_v11  ;;  %v9754_v11 = vld [vmem:[#allocation8 + $0x940] ss:$16 sps:$4 sm:$0xff]  }
 0x32d   : > { %7652 = vmatpush1.bf16.msra.mxu1 %v9709_v10  ;;  %v9759_v10 = vld [vmem:[#allocation8 + $0xb44] ss:$16 sps:$4 sm:$0xff]  }
 0x32e   : > { %7653 = vmatprep.subr.bf16.mxu1 %v9717_v3  ;;  %v9762_v3 = vld [vmem:[#allocation8 + $0x924] ss:$16 sps:$4 sm:$0xff]  }
 0x32f   : > { %7613 = vmatpush1.bf16.msra.mxu0 %v9712_v15  ;;  %v9765_v15 = vld [vmem:[#allocation8 + $0xb24] ss:$16 sps:$4 sm:$0xff]  }
 0x330   : > { %7614 = vmatprep.subr.bf16.mxu0 %v9720_v20  ;;  %v9763_v20 = vld [vmem:[#allocation8 + $0xb20] ss:$16 sps:$4 sm:$0xff]   ;;  %v10273_v29 = vpop.eup %10272 }
 0x331   : > { %7654 = vmatpush1.bf16.msra.mxu1 %v9715_v18  ;;  %v9760_v18 = vld [vmem:[#allocation8 + $0x920] ss:$16 sps:$4 sm:$0xff]  }
 0x332   : > { %7655 = vmatprep.subr.bf16.mxu1 %v9723_v26  ;;  %v9768_v26 = vld [vmem:[#allocation8 + $0x904] ss:$16 sps:$4 sm:$0xff]   ;;  %v10275_v53 = vpop.eup %10274 }
 0x333   : > { %7615 = vmatpush1.bf16.msra.mxu0 %v9718_v31  ;;  %v9771_v31 = vld [vmem:[#allocation8 + $0xb04] ss:$16 sps:$4 sm:$0xff]  }
 0x334   : > { %7616 = vmatprep.subr.bf16.mxu0 %v9726_v52  ;;  %v9766_v52 = vld [vmem:[#allocation8 + $0x900] ss:$16 sps:$4 sm:$0xff]  }
 0x335   : > { %7656 = vmatpush1.bf16.msra.mxu1 %v9721_v46  ;;  %v10277_v46 = vpop.eup %10276 }
 0x336   : > { %7657 = vmatprep.subr.bf16.mxu1 %v9729_v45  ;;  %v4318_v45 = vadd.bf16 1065369472, %v10273_v29 }
 0x337   : > { %7617 = vmatpush2.bf16.msra.mxu0 %v9724_v35  ;;  %v4320_v35 = vadd.bf16 1065369472, %v10275_v53 }
 0x338   : > { %7618 = vmatprep.subr.bf16.mxu0 %v9732_v37  ;;  %v4323_v37 = vadd.bf16 1065369472, %v10277_v46  ;;  %v9796_v46 = vld [vmem:[#allocation8 + $0xc60] ss:$16 sps:$4 sm:$0xff]  }
 0x339   : > { %7658 = vmatpush2.bf16.msra.mxu1 %v9727_v13  ;;  %v4286_v13 = vmul.bf16 1056980736, %v11029_v24  ;;  %v9780_v24 = vld [vmem:[#allocation8 + $0xcc4] ss:$16 sps:$4 sm:$0xff]  }
 0x33a   : > { %7659 = vmatprep.subr.bf16.mxu1 %v9735_v39  ;;  %v9772_v39 = vld [vmem:[#allocation8 + $0xce0] ss:$16 sps:$4 sm:$0xff]   ;;  %v11056_v17 = vmul.bf16 %v4323_v37, %v4291_v48  ;;  %v9813_v37 = vld [vmem:[#allocation8 + $0xe24] ss:$16 sps:$4 sm:$0xff]  }
 0x33b   : > { %7619 = vmatpush2.bf16.msra.mxu0 %v9730_v38  ;;  %v11048_v43 = vmul.bf16 %v4318_v45, %v4286_v13  ;;  %v9775_v38 = vld [vmem:[#allocation8 + $0xee0] ss:$16 sps:$4 sm:$0xff]   ;;  %v9804_v45 = vld [vmem:[#allocation8 + $0xc44] ss:$16 sps:$4 sm:$0xff]  }
 0x33c   : > { %7620 = vmatprep.subr.bf16.mxu0 %v9738_v51  ;;  %v10287_v51 = vld [vmem:[#allocation7 + $0x8] sm:$0xff]  ;;  %v9810_v13 = vld [vmem:[#allocation8 + $0xc24] ss:$16 sps:$4 sm:$0xff]   ;;  %v9811_v48 = vld [vmem:[#allocation8 + $0xe20] ss:$16 sps:$4 sm:$0xff]  }
 0x33d   : > { %7660 = vmatpush2.bf16.msra.mxu1 %v9733_v41  ;;  %v11051_v41 = vmul.bf16 %v4320_v35, %v4288_v60  ;;  %v965_v16 = vrot.slane %v10287_v51, %v932_v8  ;;  %v11069_v60 = vpack.c.bf16 %v11021_v50, %v11021_v50  ;;  %v9817_v50 = vld [vmem:[#allocation8 + $0xe00] ss:$16 sps:$4 sm:$0xff]  }
 0x33e   : > { %7661 = vmatprep.subr.bf16.mxu1 %v9741_v55  ;;  %v9783_v55 = vld [vmem:[#allocation8 + $0xec4] ss:$16 sps:$4 sm:$0xff]  }
 0x33f   : > { %7621 = vmatpush2.bf16.msra.mxu0 %v9736_v33 }
 0x340   : > { %7622 = vmatprep.subr.bf16.mxu0 %v9744_v9  ;;  %v9786_v9 = vld [vmem:[#allocation8 + $0xca4] ss:$16 sps:$4 sm:$0xff]  }
 0x341   : > { %7662 = vmatpush2.bf16.msra.mxu1 %v9739_v58  ;;  %v9781_v58 = vld [vmem:[#allocation8 + $0xec0] ss:$16 sps:$4 sm:$0xff]  }
 0x342   : > { %7663 = vmatprep.subr.bf16.mxu1 %v9747_v62  ;;  %v9789_v62 = vld [vmem:[#allocation8 + $0xea4] ss:$16 sps:$4 sm:$0xff]  }
 0x343   : > { %7623 = vmatpush2.bf16.msra.mxu0 %v9742_v0 }
 0x344   : > { %7624 = vmatprep.subr.bf16.mxu0 %v9750_v1 }
 0x345   : > { %7664 = vmatpush2.bf16.msra.mxu1 %v9745_v19 }
 0x346   : > { %7665 = vmatprep.subr.bf16.mxu1 %v9753_v28  ;;  %v9784_v28 = vld [vmem:[#allocation8 + $0xca0] ss:$16 sps:$4 sm:$0xff]  }
 0x347   : > { %7625 = vmatpush2.bf16.msra.mxu0 %v9748_v4 }
 0x348   : > { %7626 = vmatprep.subr.bf16.mxu0 %v9756_v5  ;;  %v9792_v5 = vld [vmem:[#allocation8 + $0xc84] ss:$16 sps:$4 sm:$0xff]  }
 0x349   : > { %7666 = vmatpush2.bf16.msra.mxu1 %v9751_v7  ;;  %v9787_v7 = vld [vmem:[#allocation8 + $0xea0] ss:$16 sps:$4 sm:$0xff]  }
 0x34a   : > { %7667 = vmatprep.subr.bf16.mxu1 %v9759_v10 }
 0x34b   : > { %7627 = vmatpush2.bf16.msra.mxu0 %v9754_v11 }
 0x34c   : > { %7628 = vmatprep.subr.bf16.mxu0 %v9762_v3 }
 0x34d   : > { %7668 = vmatpush2.bf16.msra.mxu1 %v9757_v12  ;;  %v9795_v12 = vld [vmem:[#allocation8 + $0xe84] ss:$16 sps:$4 sm:$0xff]  }
 0x34e   : > { %7669 = vmatprep.subr.bf16.mxu1 %v9765_v15  ;;  %v9790_v15 = vld [vmem:[#allocation8 + $0xc80] ss:$16 sps:$4 sm:$0xff]  }
 0x34f   : > { %7629 = vmatpush2.bf16.msra.mxu0 %v9760_v18  ;;  %v961_v18 = vrot.slane %v10287_v51, %v928_v2  ;;  %v9802_v2 = vld [vmem:[#allocation8 + $0xc40] ss:$16 sps:$4 sm:$0xff]   ;;  %v9816_v51 = vld [vmem:[#allocation8 + $0xc04] ss:$16 sps:$4 sm:$0xff]  }
 0x350   : > { %7630 = vmatprep.subr.bf16.mxu0 %v9768_v26  ;;  %v9798_v26 = vld [vmem:[#allocation8 + $0xc64] ss:$16 sps:$4 sm:$0xff]  }
 0x351   : > { %7670 = vmatpush2.bf16.msra.mxu1 %v9763_v20  ;;  %v9793_v20 = vld [vmem:[#allocation8 + $0xe80] ss:$16 sps:$4 sm:$0xff]  }
 0x352   : > { %7671 = vmatprep.subr.bf16.mxu1 %v9771_v31  ;;  %v9801_v31 = vld [vmem:[#allocation8 + $0xe64] ss:$16 sps:$4 sm:$0xff]  }
 0x353   : > { %7631 = vmatpush2.bf16.msra.mxu0 %v9766_v52 }
 0x354   : > { %7682 = vmatprep.subr.bf16.mxu0 %v9774_v63 }
 0x355   : > { %7672 = vmatpush2.bf16.msra.mxu1 %v9769_v6  ;;  %v9799_v6 = vld [vmem:[#allocation8 + $0xe60] ss:$16 sps:$4 sm:$0xff]  }
 0x356   : > { %7723 = vmatprep.subr.bf16.mxu1 %v9777_v36  ;;  %v4150_v57 = vpop.f32.mrf.mxu0  ;;  %7633 = vmatmul.mubr.bf16.vlgmr.msra.gmra.mxu0 %v11048_v43  ;;  %v9805_v36 = vld [vmem:[#allocation8 + $0xe40] ss:$16 sps:$4 sm:$0xff]  }
 0x357   : > { %7683 = vmatpush1.bf16.msra.mxu0 %v9772_v39  ;;  %7714 = vmatprep.mubr.bf16.mxu0 %v11056_v17  ;;  %v4151_v52 = vadd.f32 %v4150_v57, %v961_v18  ;;  %v9808_v39 = vld [vmem:[#allocation8 + $0xc20] ss:$16 sps:$4 sm:$0xff]  }
 0x358   : > { %v4191_v33 = vpop.f32.mrf.mxu1  ;;  %7674 = vmatmul.mubr.bf16.vlgmr.msra.gmra.mxu1 %v11051_v41  ;;  %v4152_v22 = vpop.f32.mrf.mxu0  ;;  %7684 = vmatprep.subr.bf16.mxu0 %v9780_v24  ;;  %v4226_v24 = vmul.bf16 1024605458, %v11069_v60  ;;  %v9832_v18 = vld [vmem:[#allocation8 + $0xda0] ss:$16 sps:$4 sm:$0xff]  }
 0x359   : > { %7724 = vmatpush1.bf16.msra.mxu1 %v9775_v38  ;;  %v4153_v25 = vadd.f32 %v4152_v22, %v965_v16  ;;  %v4192_v35 = vadd.f32 %v4191_v33, %v4151_v52  ;;  %v9819_v16 = vld [vmem:[#allocation8 + $0xe04] ss:$16 sps:$4 sm:$0xff]  }
 0x35a   : > { %v4193_v8 = vpop.f32.mrf.mxu1  ;;  %7725 = vmatprep.subr.bf16.mxu1 %v9783_v55  ;;  %v4154_v0 = vpop.f32.mrf.mxu0  ;;  %v9814_v55 = vld [vmem:[#allocation8 + $0xc00] ss:$16 sps:$4 sm:$0xff]   ;;  %v9822_v33 = vld [vmem:[#allocation8 + $0xde4] ss:$16 sps:$4 sm:$0xff]   ;;  %v4242_v22 = vmul.bf16 %v4226_v24, %v11069_v60 }
 0x35b   : > { %v4194_v19 = vadd.f32 %v4193_v8, %v4153_v25  ;;  %7685 = vmatpush1.bf16.msra.mxu0 %v9778_v21  ;;  %v11071_v38 = vpack.c.bf16 %v4192_v35, %v4192_v35  ;;  %v9825_v21 = vld [vmem:[#allocation8 + $0xfe4] ss:$16 sps:$4 sm:$0xff]   ;;  %v9823_v25 = vld [vmem:[#allocation8 + $0xfe0] ss:$16 sps:$4 sm:$0xff]  }
 0x35c   : > { %v4195_v1 = vpop.f32.mrf.mxu1  ;;  %v4155_v4 = vpop.f32.mrf.mxu0  ;;  %7686 = vmatprep.subr.bf16.mxu0 %v9786_v9  ;;  %v9828_v8 = vld [vmem:[#allocation8 + $0xdc4] ss:$16 sps:$4 sm:$0xff]   ;;  %v9853_v35 = vld [vmem:[#allocation8 + $0xf40] ss:$16 sps:$4 sm:$0xff]  }
 0x35d   : > { %7726 = vmatpush1.bf16.msra.mxu1 %v9781_v58  ;;  %v11060_v10 = vpack.c.bf16 %v4194_v19, %v4194_v19  ;;  %v4228_v57 = vmul.bf16 1024605458, %v11071_v38  ;;  %v9820_v58 = vld [vmem:[#allocation8 + $0xde0] ss:$16 sps:$4 sm:$0xff]   ;;  %v9831_v0 = vld [vmem:[#allocation8 + $0xfc4] ss:$16 sps:$4 sm:$0xff]  }
 0x35e   : > { %v4196_v11 = vpop.f32.mrf.mxu1  ;;  %7727 = vmatprep.subr.bf16.mxu1 %v9789_v62  ;;  %v9826_v4 = vld [vmem:[#allocation8 + $0xdc0] ss:$16 sps:$4 sm:$0xff]   ;;  %v9849_v52 = vld [vmem:[#allocation8 + $0xf64] ss:$16 sps:$4 sm:$0xff]  }
 0x35f   : > { %v4229_v3 = vmul.bf16 1024605458, %v11060_v10  ;;  %7687 = vmatpush1.bf16.msra.mxu0 %v9784_v28  ;;  %v4244_v9 = vmul.bf16 %v4228_v57, %v11071_v38  ;;  %v4293_v19 = vmul.bf16 1056980736, %v11060_v10  ;;  %v4258_v28 = vadd.bf16 1061961548, %v4242_v22 }
 0x360   : > { %7688 = vmatprep.subr.bf16.mxu0 %v9792_v5  ;;  %v9829_v5 = vld [vmem:[#allocation8 + $0xfc0] ss:$16 sps:$4 sm:$0xff]  }
 0x361   : > { %7728 = vmatpush1.bf16.msra.mxu1 %v9787_v7  ;;  %v4245_v29 = vmul.bf16 %v4229_v3, %v11060_v10  ;;  %v4260_v7 = vadd.bf16 1061961548, %v4244_v9  ;;  %v9837_v3 = vld [vmem:[#allocation8 + $0xfa4] ss:$16 sps:$4 sm:$0xff]   ;;  %v9865_v57 = vld [vmem:[#allocation8 + $0xf00] ss:$16 sps:$4 sm:$0xff]  }
 0x362   : > { %7729 = vmatprep.subr.bf16.mxu1 %v9795_v12  ;;  %v9834_v12 = vld [vmem:[#allocation8 + $0xda4] ss:$16 sps:$4 sm:$0xff]   ;;  %v4290_v9 = vmul.bf16 1056980736, %v11069_v60 }
 0x363   : > { %v4261_v53 = vadd.bf16 1061961548, %v4245_v29  ;;  %7689 = vmatpush1.bf16.msra.mxu0 %v9790_v15  ;;  %v4274_v15 = vmul.bf16 %v4258_v28, %v11069_v60  ;;  %v9843_v29 = vld [vmem:[#allocation8 + $0xf84] ss:$16 sps:$4 sm:$0xff]   ;;  %v9879_v60 = vld [vmem:[#allocation8 + $0x2cc] ss:$16 sps:$4 sm:$0xff]  }
 0x364   : > { %7690 = vmatprep.subr.bf16.mxu0 %v9798_v26  ;;  %v9840_v26 = vld [vmem:[#allocation8 + $0xd84] ss:$16 sps:$4 sm:$0xff]  }
 0x365   : > { %7730 = vmatpush1.bf16.msra.mxu1 %v9793_v20  ;;  %v4277_v63 = vmul.bf16 %v4261_v53, %v11060_v10  ;;  %v4276_v10 = vmul.bf16 %v4260_v7, %v11071_v38  ;;  %v9835_v20 = vld [vmem:[#allocation8 + $0xfa0] ss:$16 sps:$4 sm:$0xff]  }
 0x366   : > { %7731 = vmatprep.subr.bf16.mxu1 %v9801_v31  ;;  %v9838_v31 = vld [vmem:[#allocation8 + $0xd80] ss:$16 sps:$4 sm:$0xff]  }
 0x367   : > { %10278 = vtanh.bf16 %v4277_v63  ;;  %7691 = vmatpush1.bf16.msra.mxu0 %v9796_v46  ;;  %v9841_v53 = vld [vmem:[#allocation8 + $0xf80] ss:$16 sps:$4 sm:$0xff]   ;;  %v9846_v46 = vld [vmem:[#allocation8 + $0xd64] ss:$16 sps:$4 sm:$0xff]  }
 0x368   : > { %7692 = vmatprep.subr.bf16.mxu0 %v9804_v45  ;;  %10280 = vtanh.bf16 %v4274_v15  ;;  %v9847_v45 = vld [vmem:[#allocation8 + $0xf60] ss:$16 sps:$4 sm:$0xff]   ;;  %v9852_v63 = vld [vmem:[#allocation8 + $0xd44] ss:$16 sps:$4 sm:$0xff]   ;;  %v9877_v15 = vld [vmem:[#allocation8 + $0x2c8] ss:$16 sps:$4 sm:$0xff]  }
 0x369   : > { %7732 = vmatpush1.bf16.msra.mxu1 %v9799_v6  ;;  %10282 = vtanh.bf16 %v4276_v10  ;;  %v9844_v6 = vld [vmem:[#allocation8 + $0xd60] ss:$16 sps:$4 sm:$0xff]  }
 0x36a   : > { %7733 = vmatprep.subr.bf16.mxu1 %v9807_v30  ;;  %v9855_v30 = vld [vmem:[#allocation8 + $0xf44] ss:$16 sps:$4 sm:$0xff]  }
 0x36b   : > { %7693 = vmatpush1.bf16.msra.mxu0 %v9802_v2  ;;  %v9850_v2 = vld [vmem:[#allocation8 + $0xd40] ss:$16 sps:$4 sm:$0xff]  }
 0x36c   : > { %7694 = vmatprep.subr.bf16.mxu0 %v9810_v13  ;;  %v9861_v13 = vld [vmem:[#allocation8 + $0xf24] ss:$16 sps:$4 sm:$0xff]  }
 0x36d   : > { %7734 = vmatpush1.bf16.msra.mxu1 %v9805_v36  ;;  %v9858_v36 = vld [vmem:[#allocation8 + $0xd24] ss:$16 sps:$4 sm:$0xff]  }
 0x36e   : > { %7735 = vmatprep.subr.bf16.mxu1 %v9813_v37  ;;  %v9856_v37 = vld [vmem:[#allocation8 + $0xd20] ss:$16 sps:$4 sm:$0xff]  }
 0x36f   : > { %7695 = vmatpush1.bf16.msra.mxu0 %v9808_v39  ;;  %v9859_v39 = vld [vmem:[#allocation8 + $0xf20] ss:$16 sps:$4 sm:$0xff]  }
 0x370   : > { %7696 = vmatprep.subr.bf16.mxu0 %v9816_v51 }
 0x371   : > { %7736 = vmatpush1.bf16.msra.mxu1 %v9811_v48  ;;  %v9864_v48 = vld [vmem:[#allocation8 + $0xd04] ss:$16 sps:$4 sm:$0xff]  }
 0x372   : > { %7737 = vmatprep.subr.bf16.mxu1 %v9819_v16  ;;  %v9867_v16 = vld [vmem:[#allocation8 + $0xf04] ss:$16 sps:$4 sm:$0xff]  }
 0x373   : > { %7697 = vmatpush1.bf16.msra.mxu0 %v9814_v55  ;;  %v9862_v55 = vld [vmem:[#allocation8 + $0xd00] ss:$16 sps:$4 sm:$0xff]  }
 0x374   : > { %7698 = vmatprep.subr.bf16.mxu0 %v9822_v33 }
 0x375   : > { %7738 = vmatpush1.bf16.msra.mxu1 %v9817_v50  ;;  %v10279_v62 = vpop.eup %10278  ;;  %v4854_v50 = vld [vmem:[#allocation10] sm:$0xf] }
 0x376   : > { %7739 = vmatprep.subr.bf16.mxu1 %v9825_v21  ;;  %v4325_v1 = vadd.bf16 1065369472, %v10279_v62  ;;  %v10281_v51 = vpop.eup %10280  ;;  %v9870_v21 = vld [vmem:[#allocation8 + $0xec] ss:$16 sps:$4 sm:$0xff]   ;;  %v9868_v62 = vld [vmem:[#allocation8 + $0xe8] ss:$16 sps:$4 sm:$0xff]   ;;  %v4863_v28 = vrot.slane %v4854_v50, %v10827_v47 }
 0x377   : > { %7699 = vmatpush2.bf16.msra.mxu0 %v9820_v58  ;;  %v10283_v24 = vpop.eup %10282  ;;  %v4322_v33 = vadd.bf16 1065369472, %v10281_v51  ;;  %v9873_v58 = vld [vmem:[#allocation8 + $0x2ec] ss:$16 sps:$4 sm:$0xff]   ;;  %v9898_v51 = vld [vmem:[#allocation8 + $0x48] ss:$16 sps:$4 sm:$0xff]  }
 0x378   : > { %7700 = vmatprep.subr.bf16.mxu0 %v9828_v8  ;;  %v11078_v11 = vmul.bf16 %v4325_v1, %v4293_v19  ;;  %v4324_v22 = vadd.bf16 1065369472, %v10283_v24  ;;  %v4859_v8 = vrot.slane %v4854_v50, %v10824_v40  ;;  %v9871_v19 = vld [vmem:[#allocation8 + $0x2e8] ss:$16 sps:$4 sm:$0xff]   ;;  %v9906_v24 = vld [vmem:[#allocation8 + $0x2c] ss:$16 sps:$4 sm:$0xff]  }
 0x379   : > { %7740 = vmatpush2.bf16.msra.mxu1 %v9823_v25  ;;  %v4292_v25 = vmul.bf16 1056980736, %v11071_v38  ;;  %v9907_v50 = vld [vmem:[#allocation8 + $0x228] ss:$16 sps:$4 sm:$0xff]  }
 0x37a   : > { %7741 = vmatprep.subr.bf16.mxu1 %v9831_v0  ;;  %7755 = vmatprep.mubr.bf16.mxu1 %v11078_v11  ;;  %v11086_v0 = vmul.bf16 %v4322_v33, %v4290_v9  ;;  %v9912_v33 = vld [vmem:[#allocation8 + $0xc] ss:$16 sps:$4 sm:$0xff]  }
 0x37b   : > { %7701 = vmatpush2.bf16.msra.mxu0 %v9826_v4  ;;  %v11088_v1 = vmul.bf16 %v4324_v22, %v4292_v25  ;;  %v9876_v4 = vld [vmem:[#allocation8 + $0xcc] ss:$16 sps:$4 sm:$0xff]   ;;  %v9910_v22 = vld [vmem:[#allocation8 + $0x8] ss:$16 sps:$4 sm:$0xff]  }
 0x37c   : > { %7702 = vmatprep.subr.bf16.mxu0 %v9834_v12  ;;  %v9874_v12 = vld [vmem:[#allocation8 + $0xc8] ss:$16 sps:$4 sm:$0xff]   ;;  %v9918_v9 = vld [vmem:[#allocation8 + $0x1ec] ss:$16 sps:$4 sm:$0xff]  }
 0x37d   : > { %7742 = vmatpush2.bf16.msra.mxu1 %v9829_v5  ;;  %v9921_v25 = vld [vmem:[#allocation8 + $0x3ec] ss:$16 sps:$4 sm:$0xff]  }
 0x37e   : > { %7743 = vmatprep.subr.bf16.mxu1 %v9837_v3 }
 0x37f   : > { %7703 = vmatpush2.bf16.msra.mxu0 %v9832_v18  ;;  %v9882_v18 = vld [vmem:[#allocation8 + $0xac] ss:$16 sps:$4 sm:$0xff]  }
 0x380   : > { %7704 = vmatprep.subr.bf16.mxu0 %v9840_v26 }
 0x381   : > { %7744 = vmatpush2.bf16.msra.mxu1 %v9835_v20 }
 0x382   : > { %7745 = vmatprep.subr.bf16.mxu1 %v9843_v29  ;;  %v9885_v29 = vld [vmem:[#allocation8 + $0x2ac] ss:$16 sps:$4 sm:$0xff]  }
 0x383   : > { %7705 = vmatpush2.bf16.msra.mxu0 %v9838_v31 }
 0x384   : > { %7706 = vmatprep.subr.bf16.mxu0 %v9846_v46 }
 0x385   : > { %7746 = vmatpush2.bf16.msra.mxu1 %v9841_v53 }
 0x386   : > { %7747 = vmatprep.subr.bf16.mxu1 %v9849_v52  ;;  %v9880_v52 = vld [vmem:[#allocation8 + $0xa8] ss:$16 sps:$4 sm:$0xff]  }
 0x387   : > { %7707 = vmatpush2.bf16.msra.mxu0 %v9844_v6  ;;  %v9883_v6 = vld [vmem:[#allocation8 + $0x2a8] ss:$16 sps:$4 sm:$0xff]  }
 0x388   : > { %7708 = vmatprep.subr.bf16.mxu0 %v9852_v63 }
 0x389   : > { %7748 = vmatpush2.bf16.msra.mxu1 %v9847_v45  ;;  %v9888_v45 = vld [vmem:[#allocation8 + $0x8c] ss:$16 sps:$4 sm:$0xff]  }
 0x38a   : > { %7749 = vmatprep.subr.bf16.mxu1 %v9855_v30  ;;  %v9891_v30 = vld [vmem:[#allocation8 + $0x28c] ss:$16 sps:$4 sm:$0xff]  }
 0x38b   : > { %7709 = vmatpush2.bf16.msra.mxu0 %v9850_v2  ;;  %v9889_v2 = vld [vmem:[#allocation8 + $0x288] ss:$16 sps:$4 sm:$0xff]  }
 0x38c   : > { %7710 = vmatprep.subr.bf16.mxu0 %v9858_v36  ;;  %v9897_v36 = vld [vmem:[#allocation8 + $0x26c] ss:$16 sps:$4 sm:$0xff]  }
 0x38d   : > { %7750 = vmatpush2.bf16.msra.mxu1 %v9853_v35  ;;  %v9894_v35 = vld [vmem:[#allocation8 + $0x6c] ss:$16 sps:$4 sm:$0xff]  }
 0x38e   : > { %7751 = vmatprep.subr.bf16.mxu1 %v9861_v13  ;;  %v9892_v13 = vld [vmem:[#allocation8 + $0x68] ss:$16 sps:$4 sm:$0xff]  }
 0x38f   : > { %7711 = vmatpush2.bf16.msra.mxu0 %v9856_v37  ;;  %v9895_v37 = vld [vmem:[#allocation8 + $0x268] ss:$16 sps:$4 sm:$0xff]  }
 0x390   : > { %7712 = vmatprep.subr.bf16.mxu0 %v9864_v48  ;;  %v9903_v48 = vld [vmem:[#allocation8 + $0x24c] ss:$16 sps:$4 sm:$0xff]  }
 0x391   : > { %7752 = vmatpush2.bf16.msra.mxu1 %v9859_v39  ;;  %v9900_v39 = vld [vmem:[#allocation8 + $0x4c] ss:$16 sps:$4 sm:$0xff]  }
 0x392   : > { %7753 = vmatprep.subr.bf16.mxu1 %v9867_v16  ;;  %v9901_v16 = vld [vmem:[#allocation8 + $0x248] ss:$16 sps:$4 sm:$0xff]  }
 0x393   : > { %7713 = vmatpush2.bf16.msra.mxu0 %v9862_v55  ;;  %v9909_v55 = vld [vmem:[#allocation8 + $0x22c] ss:$16 sps:$4 sm:$0xff]  }
 0x394   : > { %7764 = vmatprep.subr.bf16.mxu0 %v9870_v21  ;;  %v9915_v21 = vld [vmem:[#allocation8 + $0x20c] ss:$16 sps:$4 sm:$0xff]  }
 0x395   : > { %7754 = vmatpush2.bf16.msra.mxu1 %v9865_v57  ;;  %v9904_v57 = vld [vmem:[#allocation8 + $0x28] ss:$16 sps:$4 sm:$0xff]  }
 0x396   : > { %7805 = vmatprep.subr.bf16.mxu1 %v9873_v58  ;;  %v7470_v7 = vpop.f32.mrf.mxu0  ;;  %7715 = vmatmul.mubr.bf16.vlgmr.msra.gmra.mxu0 %v11086_v0  ;;  %v9913_v58 = vld [vmem:[#allocation8 + $0x208] ss:$16 sps:$4 sm:$0xff]  }
 0x397   : > { %v7471_v38 = vadd.f32 %v7470_v7, %v4859_v8  ;;  %7765 = vmatpush1.bf16.msra.mxu0 %v9868_v62  ;;  %7796 = vmatprep.mubr.bf16.mxu0 %v10916_v42  ;;  %v9916_v8 = vld [vmem:[#allocation8 + $0x1e8] ss:$16 sps:$4 sm:$0xff]  }
 0x398   : > { %v7511_v5 = vpop.f32.mrf.mxu1  ;;  %7756 = vmatmul.mubr.bf16.vlgmr.msra.gmra.mxu1 %v11088_v1  ;;  %v7472_v3 = vpop.f32.mrf.mxu0  ;;  %7766 = vmatprep.subr.bf16.mxu0 %v9876_v4  ;;  %v9919_v62 = vld [vmem:[#allocation8 + $0x3e8] ss:$16 sps:$4 sm:$0xff]  }
 0x399   : > { %7806 = vmatpush1.bf16.msra.mxu1 %v9871_v19  ;;  %v11094_v10 = vadd.f32 %v7511_v5, %v7471_v38  ;;  %7837 = vmatprep.mubr.bf16.mxu1 %v10919_v49  ;;  %v7473_v20 = vadd.f32 %v7472_v3, %v4863_v28  ;;  %v9886_v49 = vld [vmem:[#allocation8 + $0x88] ss:$16 sps:$4 sm:$0xff]   ;;  %v9924_v19 = vld [vmem:[#allocation8 + $0x1cc] ss:$16 sps:$4 sm:$0xff]  }
 0x39a   : > { %v7513_v26 = vpop.f32.mrf.mxu1  ;;  %v7474_v31 = vpop.f32.mrf.mxu0  ;;  %7807 = vmatprep.subr.bf16.mxu1 %v9879_v60  ;;  %v9927_v28 = vld [vmem:[#allocation8 + $0x3cc] ss:$16 sps:$4 sm:$0xff]   ;;  %v9922_v4 = vld [vmem:[#allocation8 + $0x1c8] ss:$16 sps:$4 sm:$0xff]  }
 0x39b   : > { %v11097_v53 = vadd.f32 %v7513_v26, %v7473_v20  ;;  %7767 = vmatpush1.bf16.msra.mxu0 %v9874_v12  ;;  %v9925_v7 = vld [vmem:[#allocation8 + $0x3c8] ss:$16 sps:$4 sm:$0xff]   ;;  %v9930_v60 = vld [vmem:[#allocation8 + $0x1ac] ss:$16 sps:$4 sm:$0xff]  }
 0x39c   : > { %v7515_v46 = vpop.f32.mrf.mxu1  ;;  %v7475_v42 = vpop.f32.mrf.mxu0  ;;  %7768 = vmatprep.subr.bf16.mxu0 %v9882_v18  ;;  %v9933_v38 = vld [vmem:[#allocation8 + $0x3ac] ss:$16 sps:$4 sm:$0xff]   ;;  %v9928_v5 = vld [vmem:[#allocation8 + $0x1a8] ss:$16 sps:$4 sm:$0xff]  }
 0x39d   : > { %7808 = vmatpush1.bf16.msra.mxu1 %v9877_v15  ;;  %v9931_v12 = vld [vmem:[#allocation8 + $0x3a8] ss:$16 sps:$4 sm:$0xff]   ;;  %v9936_v3 = vld [vmem:[#allocation8 + $0x18c] ss:$16 sps:$4 sm:$0xff]  }
 0x39e   : > { %v7516_v63 = vpop.f32.mrf.mxu1  ;;  %7809 = vmatprep.subr.bf16.mxu1 %v9885_v29  ;;  %v9939_v15 = vld [vmem:[#allocation8 + $0x38c] ss:$16 sps:$4 sm:$0xff]   ;;  %v9934_v18 = vld [vmem:[#allocation8 + $0x188] ss:$16 sps:$4 sm:$0xff]  }
 0x39f   : > { %7769 = vmatpush1.bf16.msra.mxu0 %v9880_v52  ;;  %v9937_v20 = vld [vmem:[#allocation8 + $0x388] ss:$16 sps:$4 sm:$0xff]   ;;  %v9942_v26 = vld [vmem:[#allocation8 + $0x16c] ss:$16 sps:$4 sm:$0xff]  }
 0x3a0   : > { %7770 = vmatprep.subr.bf16.mxu0 %v9888_v45  ;;  %v9945_v29 = vld [vmem:[#allocation8 + $0x36c] ss:$16 sps:$4 sm:$0xff]   ;;  %v9940_v31 = vld [vmem:[#allocation8 + $0x168] ss:$16 sps:$4 sm:$0xff]  }
 0x3a1   : > { %7810 = vmatpush1.bf16.msra.mxu1 %v9883_v6  ;;  %v9943_v46 = vld [vmem:[#allocation8 + $0x368] ss:$16 sps:$4 sm:$0xff]   ;;  %v9948_v52 = vld [vmem:[#allocation8 + $0x14c] ss:$16 sps:$4 sm:$0xff]  }
 0x3a2   : > { %7811 = vmatprep.subr.bf16.mxu1 %v9891_v30  ;;  %v9951_v42 = vld [vmem:[#allocation8 + $0x34c] ss:$16 sps:$4 sm:$0xff]   ;;  %v9946_v6 = vld [vmem:[#allocation8 + $0x148] ss:$16 sps:$4 sm:$0xff]  }
 0x3a3   : > { %7771 = vmatpush1.bf16.msra.mxu0 %v9886_v49  ;;  %v9949_v45 = vld [vmem:[#allocation8 + $0x348] ss:$16 sps:$4 sm:$0xff]   ;;  %v9954_v63 = vld [vmem:[#allocation8 + $0x12c] ss:$16 sps:$4 sm:$0xff]  }
 0x3a4   : > { %7772 = vmatprep.subr.bf16.mxu0 %v9894_v35  ;;  %v9957_v30 = vld [vmem:[#allocation8 + $0x32c] ss:$16 sps:$4 sm:$0xff]   ;;  %v9952_v49 = vld [vmem:[#allocation8 + $0x128] ss:$16 sps:$4 sm:$0xff]  }
 0x3a5   : > { %7812 = vmatpush1.bf16.msra.mxu1 %v9889_v2  ;;  %v9955_v2 = vld [vmem:[#allocation8 + $0x328] ss:$16 sps:$4 sm:$0xff]   ;;  %v9960_v35 = vld [vmem:[#allocation8 + $0x10c] ss:$16 sps:$4 sm:$0xff]  }
 0x3a6   : > { %7813 = vmatprep.subr.bf16.mxu1 %v9897_v36  ;;  %v9963_v36 = vld [vmem:[#allocation8 + $0x30c] ss:$16 sps:$4 sm:$0xff]  }
 0x3a7   : > { %7773 = vmatpush1.bf16.msra.mxu0 %v9892_v13  ;;  %v9958_v13 = vld [vmem:[#allocation8 + $0x108] ss:$16 sps:$4 sm:$0xff]  }
 0x3a8   : > { %7774 = vmatprep.subr.bf16.mxu0 %v9900_v39  ;;  %v9966_v39 = vld [vmem:[#allocation8 + $0x4ec] ss:$16 sps:$4 sm:$0xff]  }
 0x3a9   : > { %7814 = vmatpush1.bf16.msra.mxu1 %v9895_v37  ;;  %v9961_v37 = vld [vmem:[#allocation8 + $0x308] ss:$16 sps:$4 sm:$0xff]  }
 0x3aa   : > { %7815 = vmatprep.subr.bf16.mxu1 %v9903_v48  ;;  %v9969_v48 = vld [vmem:[#allocation8 + $0x6ec] ss:$16 sps:$4 sm:$0xff]  }
 0x3ab   : > { %7775 = vmatpush1.bf16.msra.mxu0 %v9898_v51  ;;  %v9964_v51 = vld [vmem:[#allocation8 + $0x4e8] ss:$16 sps:$4 sm:$0xff]  }
 0x3ac   : > { %7776 = vmatprep.subr.bf16.mxu0 %v9906_v24  ;;  %v9972_v24 = vld [vmem:[#allocation8 + $0x4cc] ss:$16 sps:$4 sm:$0xff]  }
 0x3ad   : > { %7816 = vmatpush1.bf16.msra.mxu1 %v9901_v16  ;;  %v9967_v16 = vld [vmem:[#allocation8 + $0x6e8] ss:$16 sps:$4 sm:$0xff]  }
 0x3ae   : > { %7817 = vmatprep.subr.bf16.mxu1 %v9909_v55 }
 0x3af   : > { %7777 = vmatpush1.bf16.msra.mxu0 %v9904_v57  ;;  %v9975_v57 = vld [vmem:[#allocation8 + $0x6cc] ss:$16 sps:$4 sm:$0xff]  }
 0x3b0   : > { %7778 = vmatprep.subr.bf16.mxu0 %v9912_v33 }
 0x3b1   : > { %7818 = vmatpush1.bf16.msra.mxu1 %v9907_v50 }
 0x3b2   : > { %7819 = vmatprep.subr.bf16.mxu1 %v9915_v21  ;;  %v9970_v21 = vld [vmem:[#allocation8 + $0x4c8] ss:$16 sps:$4 sm:$0xff]  }
 0x3b3   : > { %7779 = vmatpush1.bf16.msra.mxu0 %v9910_v22 }
 0x3b4   : > { %7780 = vmatprep.subr.bf16.mxu0 %v9918_v9  ;;  %v9978_v9 = vld [vmem:[#allocation8 + $0x4ac] ss:$16 sps:$4 sm:$0xff]  }
 0x3b5   : > { %7820 = vmatpush1.bf16.msra.mxu1 %v9913_v58  ;;  %v9973_v58 = vld [vmem:[#allocation8 + $0x6c8] ss:$16 sps:$4 sm:$0xff]  }
 0x3b6   : > { %7821 = vmatprep.subr.bf16.mxu1 %v9921_v25 }
 0x3b7   : > { %7781 = vmatpush2.bf16.msra.mxu0 %v9916_v8 }
 0x3b8   : > { %7782 = vmatprep.subr.bf16.mxu0 %v9924_v19 }
 0x3b9   : > { %7822 = vmatpush2.bf16.msra.mxu1 %v9919_v62 }
 0x3ba   : > { %7823 = vmatprep.subr.bf16.mxu1 %v9927_v28 }
 0x3bb   : > { %7783 = vmatpush2.bf16.msra.mxu0 %v9922_v4  ;;  %v9979_v4 = vld [vmem:[#allocation8 + $0x6a8] ss:$16 sps:$4 sm:$0xff]  }
 0x3bc   : > { %7784 = vmatprep.subr.bf16.mxu0 %v9930_v60 }
 0x3bd   : > { %7824 = vmatpush2.bf16.msra.mxu1 %v9925_v7  ;;  %v9984_v7 = vld [vmem:[#allocation8 + $0x48c] ss:$16 sps:$4 sm:$0xff]  }
 0x3be   : > { %7825 = vmatprep.subr.bf16.mxu1 %v9933_v38  ;;  %v9985_v38 = vld [vmem:[#allocation8 + $0x688] ss:$16 sps:$4 sm:$0xff]  }
 0x3bf   : > { %7785 = vmatpush2.bf16.msra.mxu0 %v9928_v5  ;;  %v9990_v5 = vld [vmem:[#allocation8 + $0x46c] ss:$16 sps:$4 sm:$0xff]  }
 0x3c0   : > { %7786 = vmatprep.subr.bf16.mxu0 %v9936_v3  ;;  %v9988_v3 = vld [vmem:[#allocation8 + $0x468] ss:$16 sps:$4 sm:$0xff]  }
 0x3c1   : > { %7826 = vmatpush2.bf16.msra.mxu1 %v9931_v12  ;;  %v9993_v12 = vld [vmem:[#allocation8 + $0x66c] ss:$16 sps:$4 sm:$0xff]  }
 0x3c2   : > { %7827 = vmatprep.subr.bf16.mxu1 %v9939_v15  ;;  %v9991_v15 = vld [vmem:[#allocation8 + $0x668] ss:$16 sps:$4 sm:$0xff]  }
 0x3c3   : > { %7787 = vmatpush2.bf16.msra.mxu0 %v9934_v18  ;;  %v9996_v18 = vld [vmem:[#allocation8 + $0x44c] ss:$16 sps:$4 sm:$0xff]  }
 0x3c4   : > { %7788 = vmatprep.subr.bf16.mxu0 %v9942_v26  ;;  %v9994_v26 = vld [vmem:[#allocation8 + $0x448] ss:$16 sps:$4 sm:$0xff]  }
 0x3c5   : > { %7828 = vmatpush2.bf16.msra.mxu1 %v9937_v20  ;;  %v9999_v20 = vld [vmem:[#allocation8 + $0x64c] ss:$16 sps:$4 sm:$0xff]  }
 0x3c6   : > { %7829 = vmatprep.subr.bf16.mxu1 %v9945_v29  ;;  %v9997_v29 = vld [vmem:[#allocation8 + $0x648] ss:$16 sps:$4 sm:$0xff]  }
 0x3c7   : > { %7789 = vmatpush2.bf16.msra.mxu0 %v9940_v31  ;;  %v10002_v31 = vld [vmem:[#allocation8 + $0x42c] ss:$16 sps:$4 sm:$0xff]  }
 0x3c8   : > { %7790 = vmatprep.subr.bf16.mxu0 %v9948_v52  ;;  %v10000_v52 = vld [vmem:[#allocation8 + $0x428] ss:$16 sps:$4 sm:$0xff]  }
 0x3c9   : > { %7830 = vmatpush2.bf16.msra.mxu1 %v9943_v46  ;;  %v10005_v46 = vld [vmem:[#allocation8 + $0x62c] ss:$16 sps:$4 sm:$0xff]  }
 0x3ca   : > { %7831 = vmatprep.subr.bf16.mxu1 %v9951_v42  ;;  %v10003_v42 = vld [vmem:[#allocation8 + $0x628] ss:$16 sps:$4 sm:$0xff]  }
 0x3cb   : > { %7791 = vmatpush2.bf16.msra.mxu0 %v9946_v6  ;;  %v10008_v6 = vld [vmem:[#allocation8 + $0x40c] ss:$16 sps:$4 sm:$0xff]  }
 0x3cc   : > { %7792 = vmatprep.subr.bf16.mxu0 %v9954_v63  ;;  %v10006_v63 = vld [vmem:[#allocation8 + $0x408] ss:$16 sps:$4 sm:$0xff]  }
 0x3cd   : > { %7832 = vmatpush2.bf16.msra.mxu1 %v9949_v45  ;;  %v10011_v45 = vld [vmem:[#allocation8 + $0x60c] ss:$16 sps:$4 sm:$0xff]  }
 0x3ce   : > { %7833 = vmatprep.subr.bf16.mxu1 %v9957_v30  ;;  %v10009_v30 = vld [vmem:[#allocation8 + $0x608] ss:$16 sps:$4 sm:$0xff]  }
 0x3cf   : > { %7793 = vmatpush2.bf16.msra.mxu0 %v9952_v49  ;;  %v10014_v49 = vld [vmem:[#allocation8 + $0x5ec] ss:$16 sps:$4 sm:$0xff]  }
 0x3d0   : > { %7794 = vmatprep.subr.bf16.mxu0 %v9960_v35  ;;  %v10012_v35 = vld [vmem:[#allocation8 + $0x5e8] ss:$16 sps:$4 sm:$0xff]  }
 0x3d1   : > { %7834 = vmatpush2.bf16.msra.mxu1 %v9955_v2  ;;  %v10017_v2 = vld [vmem:[#allocation8 + $0x7ec] ss:$16 sps:$4 sm:$0xff]  }
 0x3d2   : > { %7835 = vmatprep.subr.bf16.mxu1 %v9963_v36  ;;  %v10015_v36 = vld [vmem:[#allocation8 + $0x7e8] ss:$16 sps:$4 sm:$0xff]  }
 0x3d3   : > { %7795 = vmatpush2.bf16.msra.mxu0 %v9958_v13  ;;  %v10020_v13 = vld [vmem:[#allocation8 + $0x5cc] ss:$16 sps:$4 sm:$0xff]  }
 0x3d4   : > { %7846 = vmatprep.subr.bf16.mxu0 %v9966_v39  ;;  %v10018_v39 = vld [vmem:[#allocation8 + $0x5c8] ss:$16 sps:$4 sm:$0xff]  }
 0x3d5   : > { %7836 = vmatpush2.bf16.msra.mxu1 %v9961_v37  ;;  %v10023_v37 = vld [vmem:[#allocation8 + $0x7cc] ss:$16 sps:$4 sm:$0xff]  }
 0x3d6   : > { %7887 = vmatprep.subr.bf16.mxu1 %v9969_v48  ;;  %v7552_v55 = vpop.f32.mrf.mxu0  ;;  %7797 = vmatmul.mubr.bf16.vlgmr.msra.gmra.mxu0 %v10959_v56  ;;  %v10021_v48 = vld [vmem:[#allocation8 + $0x7c8] ss:$16 sps:$4 sm:$0xff]  }
 0x3d7   : > { %v7553_v50 = vadd.f32 %v7552_v55, %v11094_v10  ;;  %7847 = vmatpush1.bf16.msra.mxu0 %v9964_v51  ;;  %7878 = vmatprep.mubr.bf16.mxu0 %v10966_v54  ;;  %v9981_v10 = vld [vmem:[#allocation8 + $0x6ac] ss:$16 sps:$4 sm:$0xff]   ;;  %v9976_v54 = vld [vmem:[#allocation8 + $0x4a8] ss:$16 sps:$4 sm:$0xff]  }
 0x3d8   : > { %v7593_v33 = vpop.f32.mrf.mxu1  ;;  %7838 = vmatmul.mubr.bf16.vlgmr.msra.gmra.mxu1 %v10962_v61  ;;  %v7554_v22 = vpop.f32.mrf.mxu0  ;;  %7848 = vmatprep.subr.bf16.mxu0 %v9972_v24  ;;  %v10026_v51 = vld [vmem:[#allocation8 + $0x5ac] ss:$16 sps:$4 sm:$0xff]   ;;  %v10024_v24 = vld [vmem:[#allocation8 + $0x5a8] ss:$16 sps:$4 sm:$0xff]  }
 0x3d9   : > { %7888 = vmatpush1.bf16.msra.mxu1 %v9967_v16  ;;  %v11103_v25 = vadd.f32 %v7593_v33, %v7553_v50  ;;  %7919 = vmatprep.mubr.bf16.mxu1 %v10969_v59  ;;  %v7555_v56 = vadd.f32 %v7554_v22, %v11097_v53  ;;  %v9987_v59 = vld [vmem:[#allocation8 + $0x68c] ss:$16 sps:$4 sm:$0xff]   ;;  %v9982_v53 = vld [vmem:[#allocation8 + $0x488] ss:$16 sps:$4 sm:$0xff]  }
 0x3da   : > { %v7595_v8 = vpop.f32.mrf.mxu1  ;;  %v7556_v62 = vpop.f32.mrf.mxu0  ;;  %7889 = vmatprep.subr.bf16.mxu1 %v9975_v57  ;;  %v10029_v16 = vld [vmem:[#allocation8 + $0x7ac] ss:$16 sps:$4 sm:$0xff]   ;;  %v10027_v55 = vld [vmem:[#allocation8 + $0x7a8] ss:$16 sps:$4 sm:$0xff]  }
 0x3db   : > { %v11107_v61 = vadd.f32 %v7595_v8, %v7555_v56  ;;  %7849 = vmatpush1.bf16.msra.mxu0 %v9970_v21  ;;  %v10032_v57 = vld [vmem:[#allocation8 + $0x58c] ss:$16 sps:$4 sm:$0xff]   ;;  %v10030_v33 = vld [vmem:[#allocation8 + $0x588] ss:$16 sps:$4 sm:$0xff]  }
 0x3dc   : > { %v7597_v19 = vpop.f32.mrf.mxu1  ;;  %v7557_v28 = vpop.f32.mrf.mxu0  ;;  %7850 = vmatprep.subr.bf16.mxu0 %v9978_v9  ;;  %v10035_v50 = vld [vmem:[#allocation8 + $0x78c] ss:$16 sps:$4 sm:$0xff]   ;;  %v10033_v21 = vld [vmem:[#allocation8 + $0x788] ss:$16 sps:$4 sm:$0xff]  }
 0x3dd   : > { %7890 = vmatpush1.bf16.msra.mxu1 %v9973_v58  ;;  %v10038_v22 = vld [vmem:[#allocation8 + $0x56c] ss:$16 sps:$4 sm:$0xff]   ;;  %v10036_v9 = vld [vmem:[#allocation8 + $0x568] ss:$16 sps:$4 sm:$0xff]  }
 0x3de   : > { %v7598_v60 = vpop.f32.mrf.mxu1  ;;  %7891 = vmatprep.subr.bf16.mxu1 %v9981_v10  ;;  %v10041_v58 = vld [vmem:[#allocation8 + $0x76c] ss:$16 sps:$4 sm:$0xff]   ;;  %v10039_v56 = vld [vmem:[#allocation8 + $0x768] ss:$16 sps:$4 sm:$0xff]  }
 0x3df   : > { %7851 = vmatpush1.bf16.msra.mxu0 %v9976_v54  ;;  %v10044_v8 = vld [vmem:[#allocation8 + $0x54c] ss:$16 sps:$4 sm:$0xff]   ;;  %v10042_v62 = vld [vmem:[#allocation8 + $0x548] ss:$16 sps:$4 sm:$0xff]  }
 0x3e0   : > { %7852 = vmatprep.subr.bf16.mxu0 %v9984_v7  ;;  %v10047_v10 = vld [vmem:[#allocation8 + $0x74c] ss:$16 sps:$4 sm:$0xff]   ;;  %v10045_v19 = vld [vmem:[#allocation8 + $0x748] ss:$16 sps:$4 sm:$0xff]  }
 0x3e1   : > { %7892 = vmatpush1.bf16.msra.mxu1 %v9979_v4  ;;  %v10050_v54 = vld [vmem:[#allocation8 + $0x52c] ss:$16 sps:$4 sm:$0xff]   ;;  %v10048_v4 = vld [vmem:[#allocation8 + $0x528] ss:$16 sps:$4 sm:$0xff]  }
 0x3e2   : > { %7893 = vmatprep.subr.bf16.mxu1 %v9987_v59  ;;  %v10053_v28 = vld [vmem:[#allocation8 + $0x72c] ss:$16 sps:$4 sm:$0xff]   ;;  %v10051_v7 = vld [vmem:[#allocation8 + $0x728] ss:$16 sps:$4 sm:$0xff]  }
 0x3e3   : > { %7853 = vmatpush1.bf16.msra.mxu0 %v9982_v53  ;;  %v10056_v60 = vld [vmem:[#allocation8 + $0x50c] ss:$16 sps:$4 sm:$0xff]   ;;  %v10054_v53 = vld [vmem:[#allocation8 + $0x508] ss:$16 sps:$4 sm:$0xff]  }
 0x3e4   : > { %7854 = vmatprep.subr.bf16.mxu0 %v9990_v5  ;;  %v10059_v59 = vld [vmem:[#allocation8 + $0x70c] ss:$16 sps:$4 sm:$0xff]  }
 0x3e5   : > { %7894 = vmatpush1.bf16.msra.mxu1 %v9985_v38  ;;  %v10057_v38 = vld [vmem:[#allocation8 + $0x708] ss:$16 sps:$4 sm:$0xff]   ;;  %v10062_v5 = vld [vmem:[#allocation8 + $0x8ec] ss:$16 sps:$4 sm:$0xff]  }
 0x3e6   : > { %7895 = vmatprep.subr.bf16.mxu1 %v9993_v12  ;;  %v10065_v12 = vld [vmem:[#allocation8 + $0xaec] ss:$16 sps:$4 sm:$0xff]  }
 0x3e7   : > { %7855 = vmatpush1.bf16.msra.mxu0 %v9988_v3  ;;  %v10060_v3 = vld [vmem:[#allocation8 + $0x8e8] ss:$16 sps:$4 sm:$0xff]  }
 0x3e8   : > { %7856 = vmatprep.subr.bf16.mxu0 %v9996_v18  ;;  %v10068_v18 = vld [vmem:[#allocation8 + $0x8cc] ss:$16 sps:$4 sm:$0xff]  }
 0x3e9   : > { %7896 = vmatpush1.bf16.msra.mxu1 %v9991_v15  ;;  %v10063_v15 = vld [vmem:[#allocation8 + $0xae8] ss:$16 sps:$4 sm:$0xff]  }
 0x3ea   : > { %7897 = vmatprep.subr.bf16.mxu1 %v9999_v20 }
 0x3eb   : > { %7857 = vmatpush1.bf16.msra.mxu0 %v9994_v26  ;;  %v10071_v26 = vld [vmem:[#allocation8 + $0xacc] ss:$16 sps:$4 sm:$0xff]  }
 0x3ec   : > { %7858 = vmatprep.subr.bf16.mxu0 %v10002_v31 }
 0x3ed   : > { %7898 = vmatpush1.bf16.msra.mxu1 %v9997_v29 }
 0x3ee   : > { %7899 = vmatprep.subr.bf16.mxu1 %v10005_v46  ;;  %v10066_v46 = vld [vmem:[#allocation8 + $0x8c8] ss:$16 sps:$4 sm:$0xff]  }
 0x3ef   : > { %7859 = vmatpush1.bf16.msra.mxu0 %v10000_v52 }
 0x3f0   : > { %7860 = vmatprep.subr.bf16.mxu0 %v10008_v6  ;;  %v10074_v6 = vld [vmem:[#allocation8 + $0x8ac] ss:$16 sps:$4 sm:$0xff]  }
 0x3f1   : > { %7900 = vmatpush1.bf16.msra.mxu1 %v10003_v42  ;;  %v10069_v42 = vld [vmem:[#allocation8 + $0xac8] ss:$16 sps:$4 sm:$0xff]  }
 0x3f2   : > { %7901 = vmatprep.subr.bf16.mxu1 %v10011_v45 }
 0x3f3   : > { %7861 = vmatpush1.bf16.msra.mxu0 %v10006_v63 }
 0x3f4   : > { %7862 = vmatprep.subr.bf16.mxu0 %v10014_v49 }
 0x3f5   : > { %7902 = vmatpush1.bf16.msra.mxu1 %v10009_v30 }
 0x3f6   : > { %7903 = vmatprep.subr.bf16.mxu1 %v10017_v2 }
 0x3f7   : > { %7863 = vmatpush2.bf16.msra.mxu0 %v10012_v35  ;;  %v10075_v35 = vld [vmem:[#allocation8 + $0xaa8] ss:$16 sps:$4 sm:$0xff]  }
 0x3f8   : > { %7864 = vmatprep.subr.bf16.mxu0 %v10020_v13 }
 0x3f9   : > { %7904 = vmatpush2.bf16.msra.mxu1 %v10015_v36  ;;  %v10080_v36 = vld [vmem:[#allocation8 + $0x88c] ss:$16 sps:$4 sm:$0xff]  }
 0x3fa   : > { %7905 = vmatprep.subr.bf16.mxu1 %v10023_v37  ;;  %v10081_v37 = vld [vmem:[#allocation8 + $0xa88] ss:$16 sps:$4 sm:$0xff]  }
 0x3fb   : > { %7865 = vmatpush2.bf16.msra.mxu0 %v10018_v39  ;;  %v10086_v39 = vld [vmem:[#allocation8 + $0x86c] ss:$16 sps:$4 sm:$0xff]  }
 0x3fc   : > { %7866 = vmatprep.subr.bf16.mxu0 %v10026_v51  ;;  %v10084_v51 = vld [vmem:[#allocation8 + $0x868] ss:$16 sps:$4 sm:$0xff]  }
 0x3fd   : > { %7906 = vmatpush2.bf16.msra.mxu1 %v10021_v48  ;;  %v10089_v48 = vld [vmem:[#allocation8 + $0xa6c] ss:$16 sps:$4 sm:$0xff]  }
 0x3fe   : > { %7907 = vmatprep.subr.bf16.mxu1 %v10029_v16  ;;  %v10087_v16 = vld [vmem:[#allocation8 + $0xa68] ss:$16 sps:$4 sm:$0xff]  }
 0x3ff   : > { %7867 = vmatpush2.bf16.msra.mxu0 %v10024_v24  ;;  %v10092_v24 = vld [vmem:[#allocation8 + $0x84c] ss:$16 sps:$4 sm:$0xff]  }
 0x400   : > { %7868 = vmatprep.subr.bf16.mxu0 %v10032_v57  ;;  %v10090_v57 = vld [vmem:[#allocation8 + $0x848] ss:$16 sps:$4 sm:$0xff]  }
 0x401   : > { %7908 = vmatpush2.bf16.msra.mxu1 %v10027_v55  ;;  %v10095_v55 = vld [vmem:[#allocation8 + $0xa4c] ss:$16 sps:$4 sm:$0xff]  }
 0x402   : > { %7909 = vmatprep.subr.bf16.mxu1 %v10035_v50  ;;  %v10093_v50 = vld [vmem:[#allocation8 + $0xa48] ss:$16 sps:$4 sm:$0xff]  }
 0x403   : > { %7869 = vmatpush2.bf16.msra.mxu0 %v10030_v33  ;;  %v10098_v33 = vld [vmem:[#allocation8 + $0x82c] ss:$16 sps:$4 sm:$0xff]  }
 0x404   : > { %7870 = vmatprep.subr.bf16.mxu0 %v10038_v22  ;;  %v10096_v22 = vld [vmem:[#allocation8 + $0x828] ss:$16 sps:$4 sm:$0xff]  }
 0x405   : > { %7910 = vmatpush2.bf16.msra.mxu1 %v10033_v21  ;;  %v10101_v21 = vld [vmem:[#allocation8 + $0xa2c] ss:$16 sps:$4 sm:$0xff]  }
 0x406   : > { %7911 = vmatprep.subr.bf16.mxu1 %v10041_v58  ;;  %v10099_v58 = vld [vmem:[#allocation8 + $0xa28] ss:$16 sps:$4 sm:$0xff]  }
 0x407   : > { %7871 = vmatpush2.bf16.msra.mxu0 %v10036_v9  ;;  %v10104_v9 = vld [vmem:[#allocation8 + $0x80c] ss:$16 sps:$4 sm:$0xff]  }
 0x408   : > { %7872 = vmatprep.subr.bf16.mxu0 %v10044_v8  ;;  %v10102_v8 = vld [vmem:[#allocation8 + $0x808] ss:$16 sps:$4 sm:$0xff]  }
 0x409   : > { %7912 = vmatpush2.bf16.msra.mxu1 %v10039_v56  ;;  %v10107_v56 = vld [vmem:[#allocation8 + $0xa0c] ss:$16 sps:$4 sm:$0xff]  }
 0x40a   : > { %7913 = vmatprep.subr.bf16.mxu1 %v10047_v10  ;;  %v10105_v10 = vld [vmem:[#allocation8 + $0xa08] ss:$16 sps:$4 sm:$0xff]  }
 0x40b   : > { %7873 = vmatpush2.bf16.msra.mxu0 %v10042_v62  ;;  %v10110_v62 = vld [vmem:[#allocation8 + $0x9ec] ss:$16 sps:$4 sm:$0xff]  }
 0x40c   : > { %7874 = vmatprep.subr.bf16.mxu0 %v10050_v54  ;;  %v10108_v54 = vld [vmem:[#allocation8 + $0x9e8] ss:$16 sps:$4 sm:$0xff]  }
 0x40d   : > { %7914 = vmatpush2.bf16.msra.mxu1 %v10045_v19  ;;  %v10113_v19 = vld [vmem:[#allocation8 + $0xbec] ss:$16 sps:$4 sm:$0xff]  }
 0x40e   : > { %7915 = vmatprep.subr.bf16.mxu1 %v10053_v28  ;;  %v10111_v28 = vld [vmem:[#allocation8 + $0xbe8] ss:$16 sps:$4 sm:$0xff]  }
 0x40f   : > { %7875 = vmatpush2.bf16.msra.mxu0 %v10048_v4  ;;  %v10116_v4 = vld [vmem:[#allocation8 + $0x9cc] ss:$16 sps:$4 sm:$0xff]  }
 0x410   : > { %7876 = vmatprep.subr.bf16.mxu0 %v10056_v60  ;;  %v10114_v60 = vld [vmem:[#allocation8 + $0x9c8] ss:$16 sps:$4 sm:$0xff]  }
 0x411   : > { %7916 = vmatpush2.bf16.msra.mxu1 %v10051_v7  ;;  %v10119_v7 = vld [vmem:[#allocation8 + $0xbcc] ss:$16 sps:$4 sm:$0xff]  }
 0x412   : > { %7917 = vmatprep.subr.bf16.mxu1 %v10059_v59  ;;  %v10117_v59 = vld [vmem:[#allocation8 + $0xbc8] ss:$16 sps:$4 sm:$0xff]  }
 0x413   : > { %7877 = vmatpush2.bf16.msra.mxu0 %v10054_v53  ;;  %v10122_v53 = vld [vmem:[#allocation8 + $0x9ac] ss:$16 sps:$4 sm:$0xff]  }
 0x414   : > { %7928 = vmatprep.subr.bf16.mxu0 %v10062_v5  ;;  %v10120_v5 = vld [vmem:[#allocation8 + $0x9a8] ss:$16 sps:$4 sm:$0xff]  }
 0x415   : > { %7918 = vmatpush2.bf16.msra.mxu1 %v10057_v38  ;;  %v10125_v38 = vld [vmem:[#allocation8 + $0xbac] ss:$16 sps:$4 sm:$0xff]  }
 0x416   : > { %7969 = vmatprep.subr.bf16.mxu1 %v10065_v12  ;;  %v7634_v20 = vpop.f32.mrf.mxu0  ;;  %7879 = vmatmul.mubr.bf16.vlgmr.msra.gmra.mxu0 %v11008_v27  ;;  %v10123_v12 = vld [vmem:[#allocation8 + $0xba8] ss:$16 sps:$4 sm:$0xff]  }
 0x417   : > { %v7635_v29 = vadd.f32 %v7634_v20, %v11103_v25  ;;  %7929 = vmatpush1.bf16.msra.mxu0 %v10060_v3  ;;  %7960 = vmatprep.mubr.bf16.mxu0 %v11015_v34  ;;  %v10077_v25 = vld [vmem:[#allocation8 + $0xaac] ss:$16 sps:$4 sm:$0xff]   ;;  %v10072_v34 = vld [vmem:[#allocation8 + $0x8a8] ss:$16 sps:$4 sm:$0xff]  }
 0x418   : > { %v7675_v31 = vpop.f32.mrf.mxu1  ;;  %7920 = vmatmul.mubr.bf16.vlgmr.msra.gmra.mxu1 %v11011_v32  ;;  %v7636_v52 = vpop.f32.mrf.mxu0  ;;  %7930 = vmatprep.subr.bf16.mxu0 %v10068_v18  ;;  %v10128_v3 = vld [vmem:[#allocation8 + $0x98c] ss:$16 sps:$4 sm:$0xff]   ;;  %v10126_v18 = vld [vmem:[#allocation8 + $0x988] ss:$16 sps:$4 sm:$0xff]  }
 0x419   : > { %7970 = vmatpush1.bf16.msra.mxu1 %v10063_v15  ;;  %v11113_v45 = vadd.f32 %v7675_v31, %v7635_v29  ;;  %8001 = vmatprep.mubr.bf16.mxu1 %v11018_v44  ;;  %v7637_v27 = vadd.f32 %v7636_v52, %v11107_v61  ;;  %v10083_v44 = vld [vmem:[#allocation8 + $0xa8c] ss:$16 sps:$4 sm:$0xff]   ;;  %v10078_v61 = vld [vmem:[#allocation8 + $0x888] ss:$16 sps:$4 sm:$0xff]  }
 0x41a   : > { %v7677_v63 = vpop.f32.mrf.mxu1  ;;  %v7638_v30 = vpop.f32.mrf.mxu0  ;;  %7971 = vmatprep.subr.bf16.mxu1 %v10071_v26  ;;  %v10131_v15 = vld [vmem:[#allocation8 + $0xb8c] ss:$16 sps:$4 sm:$0xff]   ;;  %v10129_v20 = vld [vmem:[#allocation8 + $0xb88] ss:$16 sps:$4 sm:$0xff]  }
 0x41b   : > { %v11117_v32 = vadd.f32 %v7677_v63, %v7637_v27  ;;  %7931 = vmatpush1.bf16.msra.mxu0 %v10066_v46  ;;  %v10134_v26 = vld [vmem:[#allocation8 + $0x96c] ss:$16 sps:$4 sm:$0xff]   ;;  %v10132_v31 = vld [vmem:[#allocation8 + $0x968] ss:$16 sps:$4 sm:$0xff]  }
 0x41c   : > { %v7679_v49 = vpop.f32.mrf.mxu1  ;;  %v7639_v2 = vpop.f32.mrf.mxu0  ;;  %7932 = vmatprep.subr.bf16.mxu0 %v10074_v6  ;;  %v10137_v29 = vld [vmem:[#allocation8 + $0xb6c] ss:$16 sps:$4 sm:$0xff]   ;;  %v10135_v46 = vld [vmem:[#allocation8 + $0xb68] ss:$16 sps:$4 sm:$0xff]  }
 0x41d   : > { %7972 = vmatpush1.bf16.msra.mxu1 %v10069_v42  ;;  %v10140_v52 = vld [vmem:[#allocation8 + $0x94c] ss:$16 sps:$4 sm:$0xff]   ;;  %v10138_v6 = vld [vmem:[#allocation8 + $0x948] ss:$16 sps:$4 sm:$0xff]  }
 0x41e   : > { %v7680_v13 = vpop.f32.mrf.mxu1  ;;  %7973 = vmatprep.subr.bf16.mxu1 %v10077_v25  ;;  %v10143_v42 = vld [vmem:[#allocation8 + $0xb4c] ss:$16 sps:$4 sm:$0xff]   ;;  %v10141_v27 = vld [vmem:[#allocation8 + $0xb48] ss:$16 sps:$4 sm:$0xff]  }
 0x41f   : > { %7933 = vmatpush1.bf16.msra.mxu0 %v10072_v34  ;;  %v10146_v63 = vld [vmem:[#allocation8 + $0x92c] ss:$16 sps:$4 sm:$0xff]   ;;  %v10144_v30 = vld [vmem:[#allocation8 + $0x928] ss:$16 sps:$4 sm:$0xff]  }
 0x420   : > { %7934 = vmatprep.subr.bf16.mxu0 %v10080_v36  ;;  %v10149_v25 = vld [vmem:[#allocation8 + $0xb2c] ss:$16 sps:$4 sm:$0xff]   ;;  %v10147_v49 = vld [vmem:[#allocation8 + $0xb28] ss:$16 sps:$4 sm:$0xff]  }
 0x421   : > { %7974 = vmatpush1.bf16.msra.mxu1 %v10075_v35  ;;  %v10152_v34 = vld [vmem:[#allocation8 + $0x90c] ss:$16 sps:$4 sm:$0xff]   ;;  %v10150_v35 = vld [vmem:[#allocation8 + $0x908] ss:$16 sps:$4 sm:$0xff]  }
 0x422   : > { %7975 = vmatprep.subr.bf16.mxu1 %v10083_v44  ;;  %v10155_v2 = vld [vmem:[#allocation8 + $0xb0c] ss:$16 sps:$4 sm:$0xff]   ;;  %v10153_v36 = vld [vmem:[#allocation8 + $0xb08] ss:$16 sps:$4 sm:$0xff]  }
 0x423   : > { %7935 = vmatpush1.bf16.msra.mxu0 %v10078_v61  ;;  %v10158_v13 = vld [vmem:[#allocation8 + $0xcec] ss:$16 sps:$4 sm:$0xff]   ;;  %v10156_v61 = vld [vmem:[#allocation8 + $0xce8] ss:$16 sps:$4 sm:$0xff]  }
 0x424   : > { %7936 = vmatprep.subr.bf16.mxu0 %v10086_v39  ;;  %v10161_v44 = vld [vmem:[#allocation8 + $0xeec] ss:$16 sps:$4 sm:$0xff]  }
 0x425   : > { %7976 = vmatpush1.bf16.msra.mxu1 %v10081_v37  ;;  %v10159_v37 = vld [vmem:[#allocation8 + $0xee8] ss:$16 sps:$4 sm:$0xff]   ;;  %v10164_v39 = vld [vmem:[#allocation8 + $0xccc] ss:$16 sps:$4 sm:$0xff]  }
 0x426   : > { %7977 = vmatprep.subr.bf16.mxu1 %v10089_v48 }
 0x427   : > { %7937 = vmatpush1.bf16.msra.mxu0 %v10084_v51  ;;  %v10167_v51 = vld [vmem:[#allocation8 + $0xecc] ss:$16 sps:$4 sm:$0xff]  }
 0x428   : > { %7938 = vmatprep.subr.bf16.mxu0 %v10092_v24 }
 0x429   : > { %7978 = vmatpush1.bf16.msra.mxu1 %v10087_v16 }
 0x42a   : > { %7979 = vmatprep.subr.bf16.mxu1 %v10095_v55  ;;  %v10162_v55 = vld [vmem:[#allocation8 + $0xcc8] ss:$16 sps:$4 sm:$0xff]  }
 0x42b   : > { %7939 = vmatpush1.bf16.msra.mxu0 %v10090_v57 }
 0x42c   : > { %7940 = vmatprep.subr.bf16.mxu0 %v10098_v33  ;;  %v10170_v33 = vld [vmem:[#allocation8 + $0xcac] ss:$16 sps:$4 sm:$0xff]  }
 0x42d   : > { %7980 = vmatpush1.bf16.msra.mxu1 %v10093_v50  ;;  %v10165_v50 = vld [vmem:[#allocation8 + $0xec8] ss:$16 sps:$4 sm:$0xff]  }
 0x42e   : > { %7981 = vmatprep.subr.bf16.mxu1 %v10101_v21 }
 0x42f   : > { %7941 = vmatpush1.bf16.msra.mxu0 %v10096_v22 }
 0x430   : > { %7942 = vmatprep.subr.bf16.mxu0 %v10104_v9 }
 0x431   : > { %7982 = vmatpush1.bf16.msra.mxu1 %v10099_v58 }
 0x432   : > { %7983 = vmatprep.subr.bf16.mxu1 %v10107_v56 }
 0x433   : > { %7943 = vmatpush1.bf16.msra.mxu0 %v10102_v8  ;;  %v10171_v8 = vld [vmem:[#allocation8 + $0xea8] ss:$16 sps:$4 sm:$0xff]  }
 0x434   : > { %7944 = vmatprep.subr.bf16.mxu0 %v10110_v62 }
 0x435   : > { %7984 = vmatpush1.bf16.msra.mxu1 %v10105_v10  ;;  %v10176_v10 = vld [vmem:[#allocation8 + $0xc8c] ss:$16 sps:$4 sm:$0xff]  }
 0x436   : > { %7985 = vmatprep.subr.bf16.mxu1 %v10113_v19  ;;  %v10177_v19 = vld [vmem:[#allocation8 + $0xe88] ss:$16 sps:$4 sm:$0xff]  }
 0x437   : > { %7945 = vmatpush2.bf16.msra.mxu0 %v10108_v54  ;;  %v10182_v54 = vld [vmem:[#allocation8 + $0xc6c] ss:$16 sps:$4 sm:$0xff]  }
 0x438   : > { %7946 = vmatprep.subr.bf16.mxu0 %v10116_v4  ;;  %v10180_v4 = vld [vmem:[#allocation8 + $0xc68] ss:$16 sps:$4 sm:$0xff]  }
 0x439   : > { %7986 = vmatpush2.bf16.msra.mxu1 %v10111_v28  ;;  %v10185_v28 = vld [vmem:[#allocation8 + $0xe6c] ss:$16 sps:$4 sm:$0xff]  }
 0x43a   : > { %7987 = vmatprep.subr.bf16.mxu1 %v10119_v7  ;;  %v10183_v7 = vld [vmem:[#allocation8 + $0xe68] ss:$16 sps:$4 sm:$0xff]  }
 0x43b   : > { %7947 = vmatpush2.bf16.msra.mxu0 %v10114_v60  ;;  %v10188_v60 = vld [vmem:[#allocation8 + $0xc4c] ss:$16 sps:$4 sm:$0xff]  }
 0x43c   : > { %7948 = vmatprep.subr.bf16.mxu0 %v10122_v53  ;;  %v10186_v53 = vld [vmem:[#allocation8 + $0xc48] ss:$16 sps:$4 sm:$0xff]  }
 0x43d   : > { %7988 = vmatpush2.bf16.msra.mxu1 %v10117_v59  ;;  %v10191_v59 = vld [vmem:[#allocation8 + $0xe4c] ss:$16 sps:$4 sm:$0xff]  }
 0x43e   : > { %7989 = vmatprep.subr.bf16.mxu1 %v10125_v38  ;;  %v10189_v38 = vld [vmem:[#allocation8 + $0xe48] ss:$16 sps:$4 sm:$0xff]  }
 0x43f   : > { %7949 = vmatpush2.bf16.msra.mxu0 %v10120_v5  ;;  %v10194_v5 = vld [vmem:[#allocation8 + $0xc2c] ss:$16 sps:$4 sm:$0xff]  }
 0x440   : > { %7950 = vmatprep.subr.bf16.mxu0 %v10128_v3  ;;  %v10192_v3 = vld [vmem:[#allocation8 + $0xc28] ss:$16 sps:$4 sm:$0xff]  }
 0x441   : > { %7990 = vmatpush2.bf16.msra.mxu1 %v10123_v12  ;;  %v10197_v12 = vld [vmem:[#allocation8 + $0xe2c] ss:$16 sps:$4 sm:$0xff]  }
 0x442   : > { %7991 = vmatprep.subr.bf16.mxu1 %v10131_v15  ;;  %v10195_v15 = vld [vmem:[#allocation8 + $0xe28] ss:$16 sps:$4 sm:$0xff]  }
 0x443   : > { %7951 = vmatpush2.bf16.msra.mxu0 %v10126_v18  ;;  %v10200_v18 = vld [vmem:[#allocation8 + $0xc0c] ss:$16 sps:$4 sm:$0xff]  }
 0x444   : > { %7952 = vmatprep.subr.bf16.mxu0 %v10134_v26  ;;  %v10198_v26 = vld [vmem:[#allocation8 + $0xc08] ss:$16 sps:$4 sm:$0xff]  }
 0x445   : > { %7992 = vmatpush2.bf16.msra.mxu1 %v10129_v20  ;;  %v10203_v20 = vld [vmem:[#allocation8 + $0xe0c] ss:$16 sps:$4 sm:$0xff]  }
 0x446   : > { %7993 = vmatprep.subr.bf16.mxu1 %v10137_v29  ;;  %v10201_v29 = vld [vmem:[#allocation8 + $0xe08] ss:$16 sps:$4 sm:$0xff]  }
 0x447   : > { %7953 = vmatpush2.bf16.msra.mxu0 %v10132_v31  ;;  %v10206_v31 = vld [vmem:[#allocation8 + $0xdec] ss:$16 sps:$4 sm:$0xff]  }
 0x448   : > { %7954 = vmatprep.subr.bf16.mxu0 %v10140_v52  ;;  %v10204_v52 = vld [vmem:[#allocation8 + $0xde8] ss:$16 sps:$4 sm:$0xff]  }
 0x449   : > { %7994 = vmatpush2.bf16.msra.mxu1 %v10135_v46  ;;  %v10209_v46 = vld [vmem:[#allocation8 + $0xfec] ss:$16 sps:$4 sm:$0xff]  }
 0x44a   : > { %7995 = vmatprep.subr.bf16.mxu1 %v10143_v42  ;;  %v10207_v42 = vld [vmem:[#allocation8 + $0xfe8] ss:$16 sps:$4 sm:$0xff]  }
 0x44b   : > { %7955 = vmatpush2.bf16.msra.mxu0 %v10138_v6  ;;  %v10212_v6 = vld [vmem:[#allocation8 + $0xdcc] ss:$16 sps:$4 sm:$0xff]  }
 0x44c   : > { %7956 = vmatprep.subr.bf16.mxu0 %v10146_v63  ;;  %v10210_v63 = vld [vmem:[#allocation8 + $0xdc8] ss:$16 sps:$4 sm:$0xff]  }
 0x44d   : > { %7996 = vmatpush2.bf16.msra.mxu1 %v10141_v27  ;;  %v10215_v27 = vld [vmem:[#allocation8 + $0xfcc] ss:$16 sps:$4 sm:$0xff]  }
 0x44e   : > { %7997 = vmatprep.subr.bf16.mxu1 %v10149_v25  ;;  %v10213_v25 = vld [vmem:[#allocation8 + $0xfc8] ss:$16 sps:$4 sm:$0xff]  }
 0x44f   : > { %7957 = vmatpush2.bf16.msra.mxu0 %v10144_v30  ;;  %v10218_v30 = vld [vmem:[#allocation8 + $0xdac] ss:$16 sps:$4 sm:$0xff]  }
 0x450   : > { %7958 = vmatprep.subr.bf16.mxu0 %v10152_v34  ;;  %v10216_v34 = vld [vmem:[#allocation8 + $0xda8] ss:$16 sps:$4 sm:$0xff]  }
 0x451   : > { %7998 = vmatpush2.bf16.msra.mxu1 %v10147_v49  ;;  %v10221_v49 = vld [vmem:[#allocation8 + $0xfac] ss:$16 sps:$4 sm:$0xff]  }
 0x452   : > { %7999 = vmatprep.subr.bf16.mxu1 %v10155_v2  ;;  %v10219_v2 = vld [vmem:[#allocation8 + $0xfa8] ss:$16 sps:$4 sm:$0xff]  }
 0x453   : > { %7959 = vmatpush2.bf16.msra.mxu0 %v10150_v35  ;;  %v10224_v35 = vld [vmem:[#allocation8 + $0xd8c] ss:$16 sps:$4 sm:$0xff]  }
 0x454   : > { %8010 = vmatprep.subr.bf16.mxu0 %v10158_v13  ;;  %v10222_v13 = vld [vmem:[#allocation8 + $0xd88] ss:$16 sps:$4 sm:$0xff]  }
 0x455   : > { %8000 = vmatpush2.bf16.msra.mxu1 %v10153_v36  ;;  %v10227_v36 = vld [vmem:[#allocation8 + $0xf8c] ss:$16 sps:$4 sm:$0xff]  }
 0x456   : > { %8051 = vmatprep.subr.bf16.mxu1 %v10161_v44  ;;  %v7716_v48 = vpop.f32.mrf.mxu0  ;;  %7961 = vmatmul.mubr.bf16.vlgmr.msra.gmra.mxu0 %v11048_v43  ;;  %v10225_v44 = vld [vmem:[#allocation8 + $0xf88] ss:$16 sps:$4 sm:$0xff]  }
 0x457   : > { %v7717_v16 = vadd.f32 %v7716_v48, %v11113_v45  ;;  %8011 = vmatpush1.bf16.msra.mxu0 %v10156_v61  ;;  %8042 = vmatprep.mubr.bf16.mxu0 %v11056_v17  ;;  %v10173_v45 = vld [vmem:[#allocation8 + $0xeac] ss:$16 sps:$4 sm:$0xff]   ;;  %v10168_v17 = vld [vmem:[#allocation8 + $0xca8] ss:$16 sps:$4 sm:$0xff]  }
 0x458   : > { %v7757_v24 = vpop.f32.mrf.mxu1  ;;  %8002 = vmatmul.mubr.bf16.vlgmr.msra.gmra.mxu1 %v11051_v41  ;;  %v7718_v57 = vpop.f32.mrf.mxu0  ;;  %8012 = vmatprep.subr.bf16.mxu0 %v10164_v39  ;;  %v10230_v61 = vld [vmem:[#allocation8 + $0xd6c] ss:$16 sps:$4 sm:$0xff]   ;;  %v10228_v39 = vld [vmem:[#allocation8 + $0xd68] ss:$16 sps:$4 sm:$0xff]  }
 0x459   : > { %8052 = vmatpush1.bf16.msra.mxu1 %v10159_v37  ;;  %v11123_v21 = vadd.f32 %v7757_v24, %v7717_v16  ;;  %8083 = vmatprep.mubr.bf16.mxu1 %v11078_v11  ;;  %v7719_v43 = vadd.f32 %v7718_v57, %v11117_v32  ;;  %v10179_v11 = vld [vmem:[#allocation8 + $0xe8c] ss:$16 sps:$4 sm:$0xff]   ;;  %v10174_v32 = vld [vmem:[#allocation8 + $0xc88] ss:$16 sps:$4 sm:$0xff]  }
 0x45a   : > { %v7759_v22 = vpop.f32.mrf.mxu1  ;;  %v7720_v58 = vpop.f32.mrf.mxu0  ;;  %8053 = vmatprep.subr.bf16.mxu1 %v10167_v51  ;;  %v10233_v37 = vld [vmem:[#allocation8 + $0xf6c] ss:$16 sps:$4 sm:$0xff]   ;;  %v10231_v48 = vld [vmem:[#allocation8 + $0xf68] ss:$16 sps:$4 sm:$0xff]  }
 0x45b   : > { %v11127_v41 = vadd.f32 %v7759_v22, %v7719_v43  ;;  %8013 = vmatpush1.bf16.msra.mxu0 %v10162_v55  ;;  %v10236_v51 = vld [vmem:[#allocation8 + $0xd4c] ss:$16 sps:$4 sm:$0xff]   ;;  %v10234_v24 = vld [vmem:[#allocation8 + $0xd48] ss:$16 sps:$4 sm:$0xff]  }
 0x45c   : > { %v7761_v9 = vpop.f32.mrf.mxu1  ;;  %v7721_v56 = vpop.f32.mrf.mxu0  ;;  %8014 = vmatprep.subr.bf16.mxu0 %v10170_v33  ;;  %v10239_v16 = vld [vmem:[#allocation8 + $0xf4c] ss:$16 sps:$4 sm:$0xff]   ;;  %v10237_v55 = vld [vmem:[#allocation8 + $0xf48] ss:$16 sps:$4 sm:$0xff]  }
 0x45d   : > { %8054 = vmatpush1.bf16.msra.mxu1 %v10165_v50  ;;  %v10242_v57 = vld [vmem:[#allocation8 + $0xd2c] ss:$16 sps:$4 sm:$0xff]   ;;  %v10240_v33 = vld [vmem:[#allocation8 + $0xd28] ss:$16 sps:$4 sm:$0xff]  }
 0x45e   : > { %v7762_v62 = vpop.f32.mrf.mxu1  ;;  %8055 = vmatprep.subr.bf16.mxu1 %v10173_v45  ;;  %v10245_v50 = vld [vmem:[#allocation8 + $0xf2c] ss:$16 sps:$4 sm:$0xff]   ;;  %v10243_v43 = vld [vmem:[#allocation8 + $0xf28] ss:$16 sps:$4 sm:$0xff]  }
 0x45f   : > { %8015 = vmatpush1.bf16.msra.mxu0 %v10168_v17  ;;  %v10248_v22 = vld [vmem:[#allocation8 + $0xd0c] ss:$16 sps:$4 sm:$0xff]   ;;  %v10246_v58 = vld [vmem:[#allocation8 + $0xd08] ss:$16 sps:$4 sm:$0xff]   ;;  %v10288_v17 = vld [vmem:[#allocation10] sm:$0xf] }
 0x460   : > { %8016 = vmatprep.subr.bf16.mxu0 %v10176_v10  ;;  %v10251_v45 = vld [vmem:[#allocation8 + $0xf0c] ss:$16 sps:$4 sm:$0xff]   ;;  %v10249_v9 = vld [vmem:[#allocation8 + $0xf08] ss:$16 sps:$4 sm:$0xff]   ;;  %v4867_v56 = vrot.slane %v10288_v17, %v10842_v14 }
 0x461   : > { %8056 = vmatpush1.bf16.msra.mxu1 %v10171_v8  ;;  %v4871_v8 = vrot.slane %v10288_v17, %v10845_v23 }
 0x462   : > { %8057 = vmatprep.subr.bf16.mxu1 %v10179_v11 }
 0x463   : > { %8017 = vmatpush1.bf16.msra.mxu0 %v10174_v32 }
 0x464   : > { %8018 = vmatprep.subr.bf16.mxu0 %v10182_v54 }
 0x465   : > { %8058 = vmatpush1.bf16.msra.mxu1 %v10177_v19 }
 0x466   : > { %8059 = vmatprep.subr.bf16.mxu1 %v10185_v28 }
 0x467   : > { %8019 = vmatpush1.bf16.msra.mxu0 %v10180_v4 }
 0x468   : > { %8020 = vmatprep.subr.bf16.mxu0 %v10188_v60 }
 0x469   : > { %8060 = vmatpush1.bf16.msra.mxu1 %v10183_v7 }
 0x46a   : > { %8061 = vmatprep.subr.bf16.mxu1 %v10191_v59 }
 0x46b   : > { %8021 = vmatpush1.bf16.msra.mxu0 %v10186_v53 }
 0x46c   : > { %8022 = vmatprep.subr.bf16.mxu0 %v10194_v5 }
 0x46d   : > { %8062 = vmatpush1.bf16.msra.mxu1 %v10189_v38 }
 0x46e   : > { %8063 = vmatprep.subr.bf16.mxu1 %v10197_v12 }
 0x46f   : > { %8023 = vmatpush1.bf16.msra.mxu0 %v10192_v3 }
 0x470   : > { %8024 = vmatprep.subr.bf16.mxu0 %v10200_v18 }
 0x471   : > { %8064 = vmatpush1.bf16.msra.mxu1 %v10195_v15 }
 0x472   : > { %8065 = vmatprep.subr.bf16.mxu1 %v10203_v20 }
 0x473   : > { %8025 = vmatpush1.bf16.msra.mxu0 %v10198_v26 }
 0x474   : > { %8026 = vmatprep.subr.bf16.mxu0 %v10206_v31 }
 0x475   : > { %8066 = vmatpush1.bf16.msra.mxu1 %v10201_v29 }
 0x476   : > { %8067 = vmatprep.subr.bf16.mxu1 %v10209_v46 }
 0x477   : > { %8027 = vmatpush2.bf16.msra.mxu0 %v10204_v52 }
 0x478   : > { %8028 = vmatprep.subr.bf16.mxu0 %v10212_v6 }
 0x479   : > { %8068 = vmatpush2.bf16.msra.mxu1 %v10207_v42 }
 0x47a   : > { %8069 = vmatprep.subr.bf16.mxu1 %v10215_v27 }
 0x47b   : > { %8029 = vmatpush2.bf16.msra.mxu0 %v10210_v63 }
 0x47c   : > { %8030 = vmatprep.subr.bf16.mxu0 %v10218_v30 }
 0x47d   : > { %8070 = vmatpush2.bf16.msra.mxu1 %v10213_v25 }
 0x47e   : > { %8071 = vmatprep.subr.bf16.mxu1 %v10221_v49 }
 0x47f   : > { %8031 = vmatpush2.bf16.msra.mxu0 %v10216_v34 }
 0x480   : > { %8032 = vmatprep.subr.bf16.mxu0 %v10224_v35 }
 0x481   : > { %8072 = vmatpush2.bf16.msra.mxu1 %v10219_v2 }
 0x482   : > { %8073 = vmatprep.subr.bf16.mxu1 %v10227_v36  ;;  %v10289_v36 = vld [vmem:[%s10775_s2 + $0x8] sm:$0xff] }
 0x483   : > { %8033 = vmatpush2.bf16.msra.mxu0 %v10222_v13  ;;  %v8093_v13 = vadd.f32 %v10289_v36, %v11127_v41  ;;  %v10292_v41 = vld [vmem:[%s10775_s2 + $0x18] sm:$0xff] }
 0x484   : > { %8034 = vmatprep.subr.bf16.mxu0 %v10230_v61 }
 0x485   : > { %8074 = vmatpush2.bf16.msra.mxu1 %v10225_v44 }
 0x486   : > { %8075 = vmatprep.subr.bf16.mxu1 %v10233_v37 }
 0x487   : > { %8035 = vmatpush2.bf16.msra.mxu0 %v10228_v39 }
 0x488   : > { %8036 = vmatprep.subr.bf16.mxu0 %v10236_v51 }
 0x489   : > { %8076 = vmatpush2.bf16.msra.mxu1 %v10231_v48  ;;  %v10290_v48 = vld [vmem:[%s10775_s2] sm:$0xff] }
 0x48a   : > { %8077 = vmatprep.subr.bf16.mxu1 %v10239_v16  ;;  %v8092_v51 = vadd.f32 %v10290_v48, %v11123_v21 }
 0x48b   : > { %8037 = vmatpush2.bf16.msra.mxu0 %v10234_v24 }
 0x48c   : > { %8038 = vmatprep.subr.bf16.mxu0 %v10242_v57 }
 0x48d   : > { %8078 = vmatpush2.bf16.msra.mxu1 %v10237_v55 }
 0x48e   : > { %8079 = vmatprep.subr.bf16.mxu1 %v10245_v50  ;;  %v10291_v50 = vld [vmem:[%s10775_s2 + $0x10] sm:$0xff] }
 0x48f   : > { %8039 = vmatpush2.bf16.msra.mxu0 %v10240_v33 }
 0x490   : > { %8040 = vmatprep.subr.bf16.mxu0 %v10248_v22 }
 0x491   : > { %8080 = vmatpush2.bf16.msra.mxu1 %v10243_v43 }
 0x492   : > { %8081 = vmatprep.subr.bf16.mxu1 %v10251_v45  ;;  %v8096_v45 = vadd.f32 %v8093_v13, %v8092_v51 }
 0x493   : > { %8041 = vmatpush2.bf16.msra.mxu0 %v10246_v58 }
 0x495   : > { %8082 = vmatpush2.bf16.msra.mxu1 %v10249_v9 }
 0x496   : > { %v7798_v10 = vpop.f32.mrf.mxu0  ;;  %8043 = vmatmul.mubr.bf16.vlgmr.msra.gmra.mxu0 %v11086_v0 }
 0x497   : > { %v7799_v62 = vadd.f32 %v7798_v10, %v4867_v56 }
 0x498   : > { %v7839_v11 = vpop.f32.mrf.mxu1  ;;  %8084 = vmatmul.mubr.bf16.vlgmr.msra.gmra.mxu1 %v11088_v1  ;;  %v7800_v32 = vpop.f32.mrf.mxu0 }
 0x499   : > { %v7840_v19 = vadd.f32 %v7839_v11, %v7799_v62  ;;  %v7801_v54 = vadd.f32 %v7800_v32, %v4871_v8 }
 0x49a   : > { %v7841_v28 = vpop.f32.mrf.mxu1  ;;  %v7802_v4 = vpop.f32.mrf.mxu0 }
 0x49b   : > { %v7842_v7 = vadd.f32 %v7841_v28, %v7801_v54 }
 0x49c   : > { %v7843_v60 = vpop.f32.mrf.mxu1  ;;  %v7803_v59 = vpop.f32.mrf.mxu0 }
 0x49e   : > { %v7844_v53 = vpop.f32.mrf.mxu1 }
 0x4d6   : > { %v7880_v38 = vpop.f32.mrf.mxu0 }
 0x4d7   : > { %v7881_v5 = vadd.f32 %v7880_v38, %v7840_v19 }
 0x4d8   : > { %v7921_v12 = vpop.f32.mrf.mxu1  ;;  %v7882_v3 = vpop.f32.mrf.mxu0 }
 0x4d9   : > { %v7922_v15 = vadd.f32 %v7921_v12, %v7881_v5  ;;  %v7883_v18 = vadd.f32 %v7882_v3, %v7842_v7  ;;  %v8123_v3 = vld [vmem:[#allocation11] sm:$0xf] }
 0x4da   : > { %v7923_v0 = vpop.f32.mrf.mxu1  ;;  %v7884_v20 = vpop.f32.mrf.mxu0 }
 0x4db   : > { %v7924_v26 = vadd.f32 %v7923_v0, %v7883_v18  ;;  %v8128_v18 = vrot.slane %v8123_v3, %v10824_v40  ;;  %v8132_v0 = vrot.slane %v8123_v3, %v10827_v47  ;;  %v8136_v20 = vrot.slane %v8123_v3, %v10842_v14 }
 0x4dc   : > { %v7925_v1 = vpop.f32.mrf.mxu1  ;;  %v7885_v29 = vpop.f32.mrf.mxu0 }
 0x4de   : > { %v7926_v31 = vpop.f32.mrf.mxu1 }
 0x516   : > { %v7962_v46 = vpop.f32.mrf.mxu0 }
 0x517   : > { %v7963_v49 = vadd.f32 %v7962_v46, %v7922_v15  ;;  %v8149_v15 = vld [vmem:[#allocation13] sm:$0xf] }
 0x518   : > { %v8003_v52 = vpop.f32.mrf.mxu1  ;;  %v7964_v42 = vpop.f32.mrf.mxu0  ;;  %v8154_v29 = vrot.slane %v8149_v15, %v10824_v40  ;;  %v8158_v31 = vrot.slane %v8149_v15, %v10827_v47  ;;  %v8162_v46 = vrot.slane %v8149_v15, %v10842_v14 }
 0x519   : > { %v7965_v34 = vadd.f32 %v7964_v42, %v7924_v26  ;;  %v8004_v2 = vadd.f32 %v8003_v52, %v7963_v49  ;;  %v8140_v26 = vrot.slane %v8123_v3, %v10845_v23  ;;  %v8166_v52 = vrot.slane %v8149_v15, %v10845_v23 }
 0x51a   : > { %v8005_v6 = vpop.f32.mrf.mxu1  ;;  %v7966_v27 = vpop.f32.mrf.mxu0 }
 0x51b   : > { %v8006_v44 = vadd.f32 %v8005_v6, %v7965_v34 }
 0x51c   : > { %v8007_v63 = vpop.f32.mrf.mxu1  ;;  %v7967_v25 = vpop.f32.mrf.mxu0 }
 0x51e   : > { %v8008_v30 = vpop.f32.mrf.mxu1 }
 0x556   : > { %v8044_v35 = vpop.f32.mrf.mxu0 }
 0x557   : > { %v8045_v61 = vadd.f32 %v8044_v35, %v8004_v2 }
 0x558   : > { %v8085_v37 = vpop.f32.mrf.mxu1  ;;  %v8046_v39 = vpop.f32.mrf.mxu0 }
 0x559   : > { %v8086_v16 = vadd.f32 %v8085_v37, %v8045_v61  ;;  %v8047_v24 = vadd.f32 %v8046_v39, %v8006_v44 }
 0x55a   : > { %v8087_v55 = vpop.f32.mrf.mxu1  ;;  %v8048_v57 = vpop.f32.mrf.mxu0 }
 0x55b   : > { %v8094_v33 = vadd.f32 %v10291_v50, %v8086_v16  ;;  %v8088_v43 = vadd.f32 %v8087_v55, %v8047_v24 }
 0x55c   : > { %v8089_v22 = vpop.f32.mrf.mxu1  ;;  %v8049_v58 = vpop.f32.mrf.mxu0 }
 0x55d   : > { %v8095_v17 = vadd.f32 %v10292_v41, %v8088_v43  ;;  %v8097_v56 = vadd.f32 %v8096_v45, %v8094_v33 }
 0x55e   : > { %v8090_v9 = vpop.f32.mrf.mxu1 }
 0x55f   : > { %v8098_v8 = vadd.f32 %v8097_v56, %v8095_v17 }
 0x561   : > { %8099 = vadd.xlane.f32.xlu0 %v8098_v8 }
 0x5ea   : > { %v8100_v10 = vpop.xlane.xlu0 %8099 }
 0x5eb   : > { %v8102_v62 = vmul.f32 0.001953125, %v8100_v10 }
 0x5ed   : > { %v8103_v11 = vsub.f32 %v8092_v51, %v8102_v62  ;;  %v8104_v21 = vsub.f32 %v8093_v13, %v8102_v62  ;;  %v8105_v32 = vsub.f32 %v8094_v33, %v8102_v62  ;;  %v8106_v19 = vsub.f32 %v8095_v17, %v8102_v62 }
 0x5ef   : > { %v8107_v54 = vmul.f32 %v8103_v11, %v8103_v11  ;;  %v8108_v28 = vmul.f32 %v8104_v21, %v8104_v21  ;;  %v8109_v4 = vmul.f32 %v8105_v32, %v8105_v32  ;;  %v8110_v60 = vmul.f32 %v8106_v19, %v8106_v19 }
 0x5f1   : > { %v8111_v7 = vadd.f32 %v8108_v28, %v8107_v54 }
 0x5f3   : > { %v8112_v59 = vadd.f32 %v8111_v7, %v8109_v4 }
 0x5f5   : > { %v8113_v53 = vadd.f32 %v8112_v59, %v8110_v60 }
 0x5f7   : > { %8114 = vadd.xlane.f32.xlu0 %v8113_v53 }
 0x680   : > { %v8115_v38 = vpop.xlane.xlu0 %8114 }
 0x681   : > { %v8116_v5 = vmul.f32 0.001953125, %v8115_v38 }
 0x683   : > { %v8117_v12 = vadd.f32 1e-05, %v8116_v5 }
 0x685   : > { %10284 = vrsqrt.f32 %v8117_v12 }
 0x692   : > { %v10285_v1 = vpop.eup %10284 }
 0x693   : > { %v8119_v42 = vmul.f32 %v10285_v1, %v8103_v11  ;;  %v8120_v6 = vmul.f32 %v10285_v1, %v8104_v21  ;;  %v8121_v27 = vmul.f32 %v10285_v1, %v8105_v32  ;;  %v8122_v63 = vmul.f32 %v10285_v1, %v8106_v19 }
 0x695   : > { %v8145_v25 = vmul.f32 %v8128_v18, %v8119_v42  ;;  %v8146_v30 = vmul.f32 %v8132_v0, %v8120_v6  ;;  %v8147_v49 = vmul.f32 %v8136_v20, %v8121_v27  ;;  %v8148_v40 = vmul.f32 %v8140_v26, %v8122_v63 }
 0x697   : > { %v8171_v34 = vadd.f32 %v8154_v29, %v8145_v25  ;;  %v8172_v47 = vadd.f32 %v8158_v31, %v8146_v30  ;;  %v8173_v2 = vadd.f32 %v8162_v46, %v8147_v49  ;;  %v8174_v14 = vadd.f32 %v8166_v52, %v8148_v40 }
 0x699   : > { %8175 = vst [vmem:[%s373_s18] sm:$0xff] %v8171_v34  ;;  %8176 = vst [vmem:[%s373_s18 + $0x8] sm:$0xff] %v8172_v47 }
 0x69a   : > { %8177 = vst [vmem:[%s373_s18 + $0x10] sm:$0xff] %v8173_v2  ;;  %8178 = vst [vmem:[%s373_s18 + $0x18] sm:$0xff] %v8174_v14 }
 0x69b   : > { %10490 = shalt.err (!%p10487_p6)
}
 0x69c   : > { %s10491_s17 = scalar_lea.hbm %s11153_s15, 512  ;;  %s10495_s22 = scalar_lea.hbm %s11203_s7, 1024 }
 0x69d   : > { %p10492_p5 = scmp.ne.s32.totalorder %s11153_s15, %s10491_s17  ;;  %p10496_p3 = scmp.lt.s32.totalorder %s11153_s15, %s11203_s7 }
 0x69e   : > { %p10497_p10 = scmp.lt.s32.totalorder %s10495_s22, %s10491_s17 }
 0x69f   : > { %p10493_p8 = pnand %p10492_p5, %p11229_p13 }
 0x6a0   : > { %p10498_p11 = por %p10497_p10, %p10496_p3 }
 0x6a1   : > { %p10494_p9 = pneg %p10493_p8 }
 0x6a3   : > { %p10499_p12 = pnand %p10498_p11, %p10494_p9 }
 0x6a5   : > { %10502 = shalt.err (!%p10499_p12)
}
 0x6a6   : > { %9399 = dma.vmem_to_hbm [thread:$0]  (%p11229_p13), %s11155_s29, 512, %s11153_s15, %s8180_s30  }
 0x6a7 PF: > { %s8206_s8 = sand.u32 1, %s10541_s24   ;;  %p11230_p0 = scmp.ne.s32.totalorder %s11219_s13, 0 }
 0x6a8   : > { %p11231_p2 = scmp.ge.s32.totalorder %s10553_s27, 2  ;;  %s8207_s18 = scalar_lea.sflag [#allocation4], %s8206_s8 }
 0x6aa   : > { %p9425_p1 = pnand %p11231_p2, %p11230_p0 }
 0x6ac   : > { %p9426_p4 = pneg %p9425_p1 }
 0x6ae   : > { %10536 = dma.done.wait (%p9426_p4), %s8207_s18, 512  }
 0x6af   : > { %10538 = vsyncadd (%p9426_p4), %s8207_s18, 4294966784  ;;  %p23_p7 = scmp.ge.s32.totalorder %s10706_s11, 4   ;;  %s11232_s24 = smov %s10545_s25 }
 0x6b0   : > { %s11233_s25 = smov %s10549_s26  ;;  %s11234_s26 = smov %s10717_s16 }
 0x6b1   : > { %s11235_s27 = smov %s10706_s11  ;;  %25 = sbr.rel (!%p23_p7) target bundleno = 11 (0xb), region = 117 }
 0x6b6   :  { %8212 = vsyncpa [#allocation3], 1 }
 0x6b7   :  { %8214 = vsyncpa [#allocation3 + $0x1], 1 }
 0x6b8   :  { %8215 = vsyncpa [#allocation6], 1 }
 0x6b9   :  { %8216 = vsyncpa [#allocation9], 1 }
 0x6ba   :  { %8217 = vsyncpa [#allocation12], 1 }
 0x6bb   :  { %8218 = vsyncpa [#allocation4], 1 }
 0x6bc   :  { %8220 = vsyncpa [#allocation4 + $0x1], 1 }

// kernel: tpu_custom_call.1
= control target key start
LH: loop header
LB: loop body
LE: loop exit
PB: predicated region body
PF: predicated region fallthrough
CT: control target
= control target key end

     0   :  { %s11196_s0 = inlined_call_operand.hbm [shape: f32[16,512], index: 0, kind: input, shape index: {}]   ;;  %s11197_s1 = inlined_call_operand.hbm [shape: bf16[512,2048], index: 1, kind: input, shape index: {}]   ;;  %s11198_s2 = inlined_call_operand.hbm [shape: f32[1,2048], index: 2, kind: input, shape index: {}]   ;;  %s11199_s3 = inlined_call_operand.hbm [shape: bf16[2048,512], index: 3, kind: input, shape index: {}]   ;;  %s11200_s4 = inlined_call_operand.hbm [shape: f32[1,512], index: 4, kind: input, shape index: {}]   ;;  %s11201_s5 = inlined_call_operand.hbm [shape: f32[1,512], index: 5, kind: input, shape index: {}]   ;;  %s11202_s6 = inlined_call_operand.hbm [shape: f32[1,512], index: 6, kind: input, shape index: {}]   ;;  %s11203_s7 = inlined_call_operand.hbm [shape: f32[16,512], index: 7, kind: output, shape index: {}]  }
   0x1   :  { %11208 = sst [smem:[#allocation20_spill]] %s11197_s1 }
   0x2   :  { %11209 = sst [smem:[#allocation21_spill]] %s11198_s2 }
   0x3   :  { %12 = vsyncpa [#allocation3], 0 }
   0x4   :  { %14 = vsyncpa [#allocation3 + $0x1], 0 }
   0x5   :  { %15 = vsyncpa [#allocation6], 0 }
   0x6   :  { %16 = vsyncpa [#allocation9], 0 }
   0x7   :  { %17 = vsyncpa [#allocation12], 0 }
   0x8   :  { %18 = vsyncpa [#allocation4], 0 }
   0x9   :  { %20 = vsyncpa [#allocation4 + $0x1], 0  ;;  %s10607_s24 = smov 0   ;;  %s10609_s25 = smov 0  }
   0xa   :  { %s10611_s26 = smov 0   ;;  %s10613_s27 = smov 0  }
   0xb LB: > { %s10555_s28 = smov [#allocation5]   ;;  %s10628_s30 = sadd.s32 4294967295, %s10553_s27   ;;  %s10553_s27 = sphi %s10613_s27, %s11235_s27   ;;  %s10549_s26 = sphi %s10611_s26, %s11234_s26   ;;  %s10545_s25 = sphi %s10609_s25, %s11233_s25   ;;  %s10541_s24 = sphi %s10607_s24, %s11232_s24  }
   0xc   : > { %s221_s29 = sshll.u32 %s10555_s28, 4  ;;  %p8322_p0 = scmp.ge.s32.totalorder %s10553_s27, 1  ;;  %s222_s29 = int_to_ptr.vmem [resolvable:$true] %s221_s29 }
   0xd   : > { %p11204_p1 = scmp.eq.s32.totalorder %s10628_s30, 0  ;;  %p209_p2 = scmp.lt.s32.totalorder %s10553_s27, 3 }
   0xe   : > { %s10556_s9 = smov [#allocation8]   ;;  %s10557_s12 = smov [#allocation11]  }
   0xf   : > { %p10633_p3 = pnand %p8322_p0, %p209_p2  ;;  %s245_s10 = sshll.u32 %s10556_s9, 4  ;;  %s10646_s10 = int_to_ptr.vmem [resolvable:$true] %s245_s10 }
  0x10   : > { %s10648_s13 = sshll.u32 %s10557_s12, 4  ;;  %s10304_s15 = scalar_lea.vmem %s222_s29, 65536  ;;  %s271_s13 = int_to_ptr.vmem [resolvable:$true] %s10648_s13 }
  0x11   : > { %s11210_s8 = scalar_select %p10633_p3, 1, 0 }
  0x12   : > { %p9401_p5 = pneg %p10633_p3  ;;  %p10305_p8 = scmp.ne.s32.totalorder %s222_s29, %s10304_s15 }
  0x13   : > { %p10312_p11 = scmp.lt.s32.totalorder %s222_s29, %s222_s29  ;;  %p10313_p12 = scmp.lt.s32.totalorder %s10304_s15, %s10304_s15 }
  0x14   : > { %p10642_p6 = pnand %p9401_p5, %p11204_p1 }
  0x15   : > { %p10314_p13 = por %p10313_p12, %p10312_p11 }
  0x16   : > { %p10652_p7 = pneg %p10642_p6 }
  0x18   : > { %p10307_p9 = pnand %p10305_p8, %p10652_p7 }
  0x1a   : > { %p10308_p10 = pneg %p10307_p9 }
  0x1c   : > { %p10315_p0 = pnand %p10314_p13, %p10308_p10 }
  0x1e   : > { %10318 = shalt.err (!%p10315_p0)
}
  0x1f   : > { %s10558_s16 = smov 1024   ;;  %s10559_s17 = smov 64  }
  0x20   : > { %s11213_s1 = sld [smem:[#allocation20_spill]]  ;;  %s10330_s20 = scalar_lea.vmem %s10646_s10, 65536 }
  0x21   : > { %p10331_p2 = scmp.ne.s32.totalorder %s10646_s10, %s10330_s20  ;;  %p10338_p9 = scmp.lt.s32.totalorder %s10646_s10, %s10646_s10 }
  0x22   : > { %p10339_p10 = scmp.lt.s32.totalorder %s10330_s20, %s10330_s20 }
  0x23   : > { %p10333_p5 = pnand %p10331_p2, %p10652_p7 }
  0x24   : > { %p10340_p11 = por %p10339_p10, %p10338_p9 }
  0x25   : > { %p10334_p8 = pneg %p10333_p5 }
  0x26   : > { %9404 = dma.hbm_to_vmem [thread:$0]  (!%p10642_p6), %s11213_s1, 65536, %s222_s29, [#allocation6], %s10558_s16, %s10558_s16, %s10559_s17  }
  0x27   : > { %p10341_p12 = pnand %p10340_p11, %p10334_p8 }
  0x29   : > { %10344 = shalt.err (!%p10341_p12)
}
  0x2a   : > { %s10560_s21 = smov 256   ;;  %s10561_s22 = smov 16  }
  0x2b   : > { %9410 = dma.hbm_to_vmem [thread:$0]  (!%p10642_p6), %s11199_s3, 65536, %s10646_s10, [#allocation9], %s10560_s21, %s10560_s21, %s10561_s22  }
  0x2c   : > { %s10356_s29 = scalar_lea.vmem %s271_s13, 64  ;;  %p10364_p5 = scmp.lt.s32.totalorder %s271_s13, %s271_s13 }
  0x2d   : > { %p10357_p13 = scmp.ne.s32.totalorder %s271_s13, %s10356_s29  ;;  %p10365_p8 = scmp.lt.s32.totalorder %s10356_s29, %s10356_s29 }
  0x2f   : > { %p10359_p0 = pnand %p10357_p13, %p10652_p7  ;;  %p10366_p9 = por %p10365_p8, %p10364_p5 }
  0x31   : > { %p10360_p2 = pneg %p10359_p0 }
  0x33   : > { %p10367_p10 = pnand %p10366_p9, %p10360_p2 }
  0x35   : > { %10370 = shalt.err (!%p10367_p10)
}
  0x36   : > { %9416 = dma.hbm_to_vmem [thread:$0]  (!%p10642_p6), %s11201_s5, 64, %s271_s13, [#allocation12]  }
  0x37   : > { %s10562_s15 = smov [#allocation7]   ;;  %s10563_s16 = smov [#allocation10]  }
  0x38   : > { %s235_s10 = sshll.u32 %s10562_s15, 4  ;;  %s259_s17 = sshll.u32 %s10563_s16, 4  ;;  %s236_s10 = int_to_ptr.vmem [resolvable:$true] %s235_s10  ;;  %s260_s17 = int_to_ptr.vmem [resolvable:$true] %s259_s17 }
  0x39   : > { %s10382_s18 = scalar_lea.vmem %s236_s10, 256  ;;  %p10390_p0 = scmp.lt.s32.totalorder %s236_s10, %s236_s10 }
  0x3a   : > { %p10383_p11 = scmp.ne.s32.totalorder %s236_s10, %s10382_s18  ;;  %p10391_p2 = scmp.lt.s32.totalorder %s10382_s18, %s10382_s18 }
  0x3c   : > { %p10385_p12 = pnand %p10383_p11, %p10652_p7  ;;  %p10392_p5 = por %p10391_p2, %p10390_p0 }
  0x3e   : > { %p10386_p13 = pneg %p10385_p12 }
  0x40   : > { %p10393_p8 = pnand %p10392_p5, %p10386_p13 }
  0x42   : > { %10396 = shalt.err (!%p10393_p8)
}
  0x43   : > { %s11214_s2 = sld [smem:[#allocation21_spill]]  ;;  %s10408_s13 = scalar_lea.vmem %s260_s17, 64 }
  0x44   : > { %p10409_p9 = scmp.ne.s32.totalorder %s260_s17, %s10408_s13  ;;  %p10416_p11 = scmp.lt.s32.totalorder %s260_s17, %s260_s17 }
  0x45   : > { %p10417_p12 = scmp.lt.s32.totalorder %s10408_s13, %s10408_s13 }
  0x46   : > { %p10411_p10 = pnand %p10409_p9, %p10652_p7 }
  0x47   : > { %p10418_p1 = por %p10417_p12, %p10416_p11 }
  0x48   : > { %p10412_p4 = pneg %p10411_p10 }
  0x49   : > { %9407 = dma.hbm_to_vmem [thread:$0]  (!%p10642_p6), %s11214_s2, 256, %s236_s10, [#allocation6]  }
  0x4a   : > { %p10419_p3 = pnand %p10418_p1, %p10412_p4 }
  0x4c   : > { %10422 = shalt.err (!%p10419_p3)
}
  0x4d   : > { %9413 = dma.hbm_to_vmem [thread:$0]  (!%p10642_p6), %s11200_s4, 64, %s260_s17, [#allocation9]  }
  0x4e   : > { %s10564_s23 = smov [#allocation13]  }
  0x4f   : > { %s281_s28 = sshll.u32 %s10564_s23, 4  ;;  %s282_s28 = int_to_ptr.vmem [resolvable:$true] %s281_s28 }
  0x50   : > { %s10434_s29 = scalar_lea.vmem %s282_s28, 64  ;;  %p10442_p5 = scmp.lt.s32.totalorder %s282_s28, %s282_s28 }
  0x51   : > { %p10435_p13 = scmp.ne.s32.totalorder %s282_s28, %s10434_s29  ;;  %p10443_p8 = scmp.lt.s32.totalorder %s10434_s29, %s10434_s29 }
  0x53   : > { %p10437_p0 = pnand %p10435_p13, %p10652_p7  ;;  %p10444_p9 = por %p10443_p8, %p10442_p5 }
  0x55   : > { %p10438_p2 = pneg %p10437_p0 }
  0x57   : > { %p10445_p1 = pnand %p10444_p9, %p10438_p2 }
  0x59   : > { %10448 = shalt.err (!%p10445_p1)
}
  0x5a   : > { %9419 = dma.hbm_to_vmem [thread:$0]  (!%p10642_p6), %s11202_s6, 64, %s282_s28, [#allocation12]  }
  0x5b   : > { %s8321_s14 = sadd.s32 4294967294, %s10553_s27   ;;  %s10706_s11 = sadd.s32 1, %s10553_s27  }
  0x5c   : > { %s30_s15 = ssub.s32 %s10553_s27, %s10706_s11  ;;  %s33_s10 = sadd.s32 1, %s10549_s26 }
  0x5d   : > { %p31_p3 = scmp.eq.s32.totalorder %s30_s15, 0  ;;  %p40_p4 = scmp.ne.s32.totalorder %s10549_s26, %s10545_s25 }
  0x5e   : > { %p41_p7 = scmp.eq.s32.totalorder %s10553_s27, 0  ;;  %p46_p10 = scmp.ne.s32.totalorder %s10545_s25, %s10541_s24 }
  0x5f   : > { %s10717_s16 = scalar_select %p31_p3, %s10549_s26, %s33_s10  }
  0x60   : > { %p10719_p11 = por %p41_p7, %p40_p4  ;;  %p11216_p12 = scmp.eq.s32.totalorder %s10628_s30, 0 }
  0x61   : > { %p196_p13 = scmp.eq.s32.totalorder %s10628_s30, 1  ;;  %p202_p0 = scmp.eq.s32.totalorder %s8321_s14, 1 }
  0x62   : > { %p10725_p6 = por %p11216_p12, %p46_p10  ;;  %p9434_p2 = scmp.lt.s32.totalorder %s10553_s27, 2 }
  0x63   : > { %s292_s19 = sand.u32 1, %s10549_s26   ;;  %p10732_p5 = por %p196_p13, %p40_p4 }
  0x64   : > { %s11217_s18 = scalar_select %p10725_p6, 1, 0 }
  0x65   : > { %s11218_s20 = scalar_select %p10732_p5, 1, 0 }
  0x66   : > { %p10736_p8 = por %p202_p0, %p46_p10  ;;  %s8330_s21 = sshll.u32 %s292_s19, 5 }
  0x67   : > { %s9371_s22 = sshll.u32 %s10553_s27, 9  ;;  %s296_s9 = scalar_lea.vmem [#allocation2], %s8330_s21 }
  0x68   : > { %s11219_s13 = scalar_select %p10736_p8, 1, 0 }
  0x69   : > { %s10744_s29 = scalar_lea.hbm %s11196_s0, %s9371_s22  ;;  %s304_s12 = sshll.u32 %s296_s9, 4  ;;  %s305_s12 = int_to_ptr.vmem [resolvable:$true] %s304_s12 }
  0x6a   : > { %p10748_p9 = pnand %p9434_p2, %p10719_p11  ;;  %s293_s15 = scalar_lea.sflag [#allocation3], %s292_s19 }
  0x6b   : > { %s10449_s10 = scalar_lea.hbm %s10744_s29, 512  ;;  %s10454_s28 = scalar_lea.hbm %s11196_s0, 1024 }
  0x6c   : > { %p10450_p1 = scmp.ne.s32.totalorder %s10744_s29, %s10449_s10  ;;  %p10451_p3 = pneg %p10748_p9 }
  0x6d   : > { %p10455_p10 = scmp.lt.s32.totalorder %s10744_s29, %s11196_s0  ;;  %p10456_p11 = scmp.lt.s32.totalorder %s10454_s28, %s10449_s10 }
  0x6e   : > { %p10452_p4 = pnand %p10451_p3, %p10450_p1 }
  0x6f   : > { %p10457_p12 = por %p10456_p11, %p10455_p10 }
  0x70   : > { %p10453_p7 = pneg %p10452_p4 }
  0x72   : > { %p10458_p13 = pnand %p10457_p12, %p10453_p7 }
  0x74   : > { %10461 = shalt.err (!%p10458_p13)
}
  0x75   : > { %s10462_s17 = scalar_lea.vmem %s305_s12, 512  ;;  %s10565_s19 = smov [#allocation2]  }
  0x76   : > { %p10463_p0 = scmp.ne.s32.totalorder %s305_s12, %s10462_s17  ;;  %s10467_s1 = sshll.u32 %s10565_s19, 4  ;;  %s10468_s1 = int_to_ptr.vmem [resolvable:$false] %s10467_s1 }
  0x77   : > { %s10469_s2 = scalar_lea.vmem %s10468_s1, 1024  ;;  %p10470_p1 = scmp.lt.s32.totalorder %s305_s12, %s10468_s1 }
  0x78   : > { %p10465_p2 = pnand %p10463_p0, %p10451_p3  ;;  %p10471_p4 = scmp.lt.s32.totalorder %s10469_s2, %s10462_s17 }
  0x7a   : > { %p10466_p8 = pneg %p10465_p2  ;;  %p10472_p5 = por %p10471_p4, %p10470_p1 }
  0x7c   : > { %p10473_p6 = pnand %p10472_p5, %p10466_p8 }
  0x7e   : > { %10476 = shalt.err (!%p10473_p6)
}
  0x7f   : > { %9423 = dma.hbm_to_vmem [thread:$0]  (!%p10748_p9), %s10744_s29, 512, %s305_s12, %s293_s15  }
  0x80   : > { %p11221_p7 = scmp.ne.s32.totalorder %s11210_s8, 0 }
  0x81   : > { %s10769_s10 = sand.u32 (!%p11221_p7), 1, %s10545_s25   ;;  %p11222_p6 = scmp.ne.s32.totalorder (!%p11221_p7), %s11217_s18, 0 }
  0x82   : > { %313 = sbr.rel (%p11221_p7) target bundleno = 1703 (0x6a7), region = 48  ;;  %s8334_s22 = sshll.u32 (!%p11221_p7), %s10769_s10, 5 }
  0x83   : > { %s316_s1 = scalar_lea.sflag (!%p11221_p7), [#allocation3], %s10769_s10  ;;  %s10775_s2 = scalar_lea.vmem (!%p11221_p7), [#allocation2], %s8334_s22 }
  0x87   : > { %10520 = dma.done.wait (%p11222_p6), %s316_s1, 512  }
  0x88   : > { %10522 = vsyncadd (%p11222_p6), %s316_s1, 4294966784  ;;  %p11223_p5 = scmp.eq.s32.totalorder %s10628_s30, 0 }
  0x8a   : > { %10524 = dma.done.wait (%p11223_p5), [#allocation6], 65792   ;;  %p11224_p8 = pmov %p11223_p5 }
  0x8b   : > { %p11225_p9 = pmov %p11223_p5 }
  0x8c   : > { %10526 = vsyncadd (%p11224_p8), [#allocation6], 4294901504 }
  0x8d   : > { %10528 = dma.done.wait (%p11225_p9), [#allocation9], 65600   ;;  %p11226_p3 = pmov %p11223_p5 }
  0x8f   : > { %10530 = vsyncadd (%p11226_p3), [#allocation9], 4294901696  ;;  %p11227_p10 = pmov %p11226_p3 }
  0x90   : > { %p11228_p11 = pmov %p11226_p3 }
  0x91   : > { %10532 = dma.done.wait (%p11227_p10), [#allocation12], 128  }
  0x92   : > { %10534 = vsyncadd (%p11228_p11), [#allocation12], 4294967168  ;;  %v498_v0 = vld [vmem:[#allocation5 + $0x380] sm:$0xff]  ;;  %v379_v53 = vld [vmem:[%s10775_s2 + $0x8] sm:$0xff]  ;;  %s9372_s8 = sshll.u32 %s10628_s30, 9  ;;  %s373_s18 = scalar_lea.vmem [#allocation14], %s8334_s22 }
  0x93   : > { %v506_v1 = vld [vmem:[#allocation5 + $0x3c0] sm:$0xff]  ;;  %v381_v54 = vld [vmem:[%s10775_s2 + $0x18] sm:$0xff]  ;;  %v10795_v58 = vpack.c.bf16 %v379_v53, %v379_v53  ;;  %s8194_s29 = sshll.u32 %s373_s18, 4  ;;  %s11153_s15 = scalar_lea.hbm %s11203_s7, %s9372_s8  ;;  %s11155_s29 = int_to_ptr.vmem [resolvable:$true] %s8194_s29 }
  0x94   : > { %v754_v2 = vld [vmem:[#allocation5 + $0xb80] sm:$0xff]  ;;  %v8455_v3 = vcombine.high %v498_v0, %v506_v1  ;;  %v8454_v5 = vcombine.low %v498_v0, %v506_v1  ;;  %v10797_v59 = vpack.c.bf16 %v381_v54, %v381_v54  ;;  %s8180_s30 = scalar_lea.sflag [#allocation4], %s10769_s10  ;;  %s10477_s23 = scalar_lea.vmem %s11155_s29, 512 }
  0x95   : > { %v762_v4 = vld [vmem:[#allocation5 + $0xbc0] sm:$0xff]  ;;  %3574 = vmatprep.mubr.bf16.mxu0 %v10795_v58  ;;  %p10478_p12 = scmp.ne.s32.totalorder %s11155_s29, %s10477_s23  ;;  %p11229_p13 = scmp.ne.s32.totalorder %s11218_s20, 0 }
  0x96   : > { %v482_v6 = vld [vmem:[#allocation5 + $0x300] sm:$0xff]  ;;  %v8711_v8 = vcombine.high %v754_v2, %v762_v4  ;;  %v8710_v9 = vcombine.low %v754_v2, %v762_v4  ;;  %3542 = vmatprep.subr.bf16.mxu0 %v8455_v3  ;;  %3615 = vmatprep.mubr.bf16.mxu1 %v10797_v59  ;;  %s10566_s28 = smov [#allocation14]  }
  0x97   : > { %v490_v7 = vld [vmem:[#allocation5 + $0x340] sm:$0xff]  ;;  %3543 = vmatpush1.bf16.msra.mxu0 %v8454_v5  ;;  %p10479_p0 = pnand %p10478_p12, %p11229_p13  ;;  %s10481_s21 = sshll.u32 %s10566_s28, 4  ;;  %s10482_s21 = int_to_ptr.vmem [resolvable:$false] %s10481_s21 }
  0x98   : > { %v8439_v10 = vcombine.high %v482_v6, %v490_v7  ;;  %v738_v11 = vld [vmem:[#allocation5 + $0xb00] sm:$0xff]  ;;  %3583 = vmatprep.subr.bf16.mxu1 %v8711_v8  ;;  %v8438_v18 = vcombine.low %v482_v6, %v490_v7  ;;  %s10483_s9 = scalar_lea.vmem %s10482_s21, 1024  ;;  %p10484_p1 = scmp.lt.s32.totalorder %s11155_s29, %s10482_s21 }
  0x99   : > { %v746_v12 = vld [vmem:[#allocation5 + $0xb40] sm:$0xff]  ;;  %3584 = vmatpush1.bf16.msra.mxu1 %v8710_v9  ;;  %p10480_p2 = pneg %p10479_p0  ;;  %p10485_p4 = scmp.lt.s32.totalorder %s10483_s9, %s10477_s23 }
  0x9a   : > { %v466_v13 = vld [vmem:[#allocation5 + $0x280] sm:$0xff]  ;;  %v8695_v14 = vcombine.high %v738_v11, %v746_v12  ;;  %3544 = vmatprep.subr.bf16.mxu0 %v8439_v10  ;;  %v8694_v19 = vcombine.low %v738_v11, %v746_v12 }
  0x9b   : > { %v474_v15 = vld [vmem:[#allocation5 + $0x2c0] sm:$0xff]  ;;  %3545 = vmatpush1.bf16.msra.mxu0 %v8438_v18  ;;  %p10486_p7 = por %p10485_p4, %p10484_p1 }
  0x9c   : > { %v722_v16 = vld [vmem:[#allocation5 + $0xa80] sm:$0xff]  ;;  %v8423_v20 = vcombine.high %v466_v13, %v474_v15  ;;  %3585 = vmatprep.subr.bf16.mxu1 %v8695_v14  ;;  %v8422_v26 = vcombine.low %v466_v13, %v474_v15 }
  0x9d   : > { %v730_v17 = vld [vmem:[#allocation5 + $0xac0] sm:$0xff]  ;;  %3586 = vmatpush1.bf16.msra.mxu1 %v8694_v19  ;;  %p10487_p6 = pnand %p10486_p7, %p10480_p2 }
  0x9e   : > { %v8679_v21 = vcombine.high %v722_v16, %v730_v17  ;;  %v450_v22 = vld [vmem:[#allocation5 + $0x200] sm:$0xff]  ;;  %3546 = vmatprep.subr.bf16.mxu0 %v8423_v20  ;;  %v8678_v27 = vcombine.low %v722_v16, %v730_v17 }
  0x9f   : > { %v458_v23 = vld [vmem:[#allocation5 + $0x240] sm:$0xff]  ;;  %3547 = vmatpush1.bf16.msra.mxu0 %v8422_v26 }
  0xa0   : > { %v706_v24 = vld [vmem:[#allocation5 + $0xa00] sm:$0xff]  ;;  %v8407_v28 = vcombine.high %v450_v22, %v458_v23  ;;  %3587 = vmatprep.subr.bf16.mxu1 %v8679_v21  ;;  %v8406_v34 = vcombine.low %v450_v22, %v458_v23 }
  0xa1   : > { %v714_v25 = vld [vmem:[#allocation5 + $0xa40] sm:$0xff]  ;;  %3588 = vmatpush1.bf16.msra.mxu1 %v8678_v27 }
  0xa2   : > { %v8663_v29 = vcombine.high %v706_v24, %v714_v25  ;;  %v434_v30 = vld [vmem:[#allocation5 + $0x180] sm:$0xff]  ;;  %3548 = vmatprep.subr.bf16.mxu0 %v8407_v28  ;;  %v8662_v35 = vcombine.low %v706_v24, %v714_v25 }
  0xa3   : > { %v442_v31 = vld [vmem:[#allocation5 + $0x1c0] sm:$0xff]  ;;  %3549 = vmatpush1.bf16.msra.mxu0 %v8406_v34 }
  0xa4   : > { %v690_v32 = vld [vmem:[#allocation5 + $0x980] sm:$0xff]  ;;  %v8391_v36 = vcombine.high %v434_v30, %v442_v31  ;;  %3589 = vmatprep.subr.bf16.mxu1 %v8663_v29  ;;  %v8390_v42 = vcombine.low %v434_v30, %v442_v31 }
  0xa5   : > { %v698_v33 = vld [vmem:[#allocation5 + $0x9c0] sm:$0xff]  ;;  %3590 = vmatpush1.bf16.msra.mxu1 %v8662_v35 }
  0xa6   : > { %v8647_v37 = vcombine.high %v690_v32, %v698_v33  ;;  %v418_v38 = vld [vmem:[#allocation5 + $0x100] sm:$0xff]  ;;  %3550 = vmatprep.subr.bf16.mxu0 %v8391_v36  ;;  %v8646_v43 = vcombine.low %v690_v32, %v698_v33 }
  0xa7   : > { %v426_v39 = vld [vmem:[#allocation5 + $0x140] sm:$0xff]  ;;  %3551 = vmatpush1.bf16.msra.mxu0 %v8390_v42 }
  0xa8   : > { %v674_v40 = vld [vmem:[#allocation5 + $0x900] sm:$0xff]  ;;  %v8375_v44 = vcombine.high %v418_v38, %v426_v39  ;;  %3591 = vmatprep.subr.bf16.mxu1 %v8647_v37  ;;  %v8374_v50 = vcombine.low %v418_v38, %v426_v39 }
  0xa9   : > { %v682_v41 = vld [vmem:[#allocation5 + $0x940] sm:$0xff]  ;;  %3592 = vmatpush1.bf16.msra.mxu1 %v8646_v43 }
  0xaa   : > { %v8631_v45 = vcombine.high %v674_v40, %v682_v41  ;;  %v402_v46 = vld [vmem:[#allocation5 + $0x80] sm:$0xff]  ;;  %3552 = vmatprep.subr.bf16.mxu0 %v8375_v44  ;;  %v8630_v51 = vcombine.low %v674_v40, %v682_v41 }
  0xab   : > { %v410_v47 = vld [vmem:[#allocation5 + $0xc0] sm:$0xff]  ;;  %3553 = vmatpush1.bf16.msra.mxu0 %v8374_v50 }
  0xac   : > { %v658_v48 = vld [vmem:[#allocation5 + $0x880] sm:$0xff]  ;;  %v8359_v52 = vcombine.high %v402_v46, %v410_v47  ;;  %3593 = vmatprep.subr.bf16.mxu1 %v8631_v45  ;;  %v8358_v62 = vcombine.low %v402_v46, %v410_v47 }
  0xad   : > { %v666_v49 = vld [vmem:[#allocation5 + $0x8c0] sm:$0xff]  ;;  %3594 = vmatpush1.bf16.msra.mxu1 %v8630_v51 }
  0xae   : > { %v8615_v55 = vcombine.high %v658_v48, %v666_v49  ;;  %v386_v56 = vld [vmem:[#allocation5] sm:$0xff]  ;;  %3554 = vmatprep.subr.bf16.mxu0 %v8359_v52  ;;  %v8614_v63 = vcombine.low %v658_v48, %v666_v49 }
  0xaf   : > { %v394_v57 = vld [vmem:[#allocation5 + $0x40] sm:$0xff]  ;;  %3555 = vmatpush1.bf16.msra.mxu0 %v8358_v62 }
  0xb0   : > { %v642_v60 = vld [vmem:[#allocation5 + $0x800] sm:$0xff]  ;;  %v8343_v0 = vcombine.high %v386_v56, %v394_v57  ;;  %3595 = vmatprep.subr.bf16.mxu1 %v8615_v55  ;;  %v8342_v6 = vcombine.low %v386_v56, %v394_v57 }
  0xb1   : > { %v650_v61 = vld [vmem:[#allocation5 + $0x840] sm:$0xff]  ;;  %3596 = vmatpush1.bf16.msra.mxu1 %v8614_v63 }
  0xb2   : > { %v8599_v1 = vcombine.high %v642_v60, %v650_v61  ;;  %v626_v2 = vld [vmem:[#allocation5 + $0x780] sm:$0xff]  ;;  %3556 = vmatprep.subr.bf16.mxu0 %v8343_v0  ;;  %v8598_v7 = vcombine.low %v642_v60, %v650_v61 }
  0xb3   : > { %v634_v3 = vld [vmem:[#allocation5 + $0x7c0] sm:$0xff]  ;;  %3557 = vmatpush1.bf16.msra.mxu0 %v8342_v6  ;;  %v755_v6 = vld [vmem:[#allocation5 + $0xb88] sm:$0xff] }
  0xb4   : > { %v882_v4 = vld [vmem:[#allocation5 + $0xf80] sm:$0xff]  ;;  %v8583_v8 = vcombine.high %v626_v2, %v634_v3  ;;  %3597 = vmatprep.subr.bf16.mxu1 %v8599_v1  ;;  %v8582_v14 = vcombine.low %v626_v2, %v634_v3 }
  0xb5   : > { %v890_v5 = vld [vmem:[#allocation5 + $0xfc0] sm:$0xff]  ;;  %3598 = vmatpush1.bf16.msra.mxu1 %v8598_v7  ;;  %v763_v7 = vld [vmem:[#allocation5 + $0xbc8] sm:$0xff] }
  0xb6   : > { %v8839_v9 = vcombine.high %v882_v4, %v890_v5  ;;  %v610_v10 = vld [vmem:[#allocation5 + $0x700] sm:$0xff]  ;;  %3558 = vmatprep.subr.bf16.mxu0 %v8583_v8  ;;  %v8838_v15 = vcombine.low %v882_v4, %v890_v5  ;;  %v499_v4 = vld [vmem:[#allocation5 + $0x388] sm:$0xff] }
  0xb7   : > { %v618_v11 = vld [vmem:[#allocation5 + $0x740] sm:$0xff]  ;;  %3559 = vmatpush2.bf16.msra.mxu0 %v8582_v14  ;;  %v507_v5 = vld [vmem:[#allocation5 + $0x3c8] sm:$0xff] }
  0xb8   : > { %v866_v12 = vld [vmem:[#allocation5 + $0xf00] sm:$0xff]  ;;  %v8567_v16 = vcombine.high %v610_v10, %v618_v11  ;;  %3599 = vmatprep.subr.bf16.mxu1 %v8839_v9  ;;  %v8566_v22 = vcombine.low %v610_v10, %v618_v11  ;;  %v380_v11 = vld [vmem:[%s10775_s2 + $0x10] sm:$0xff]  ;;  %v483_v14 = vld [vmem:[#allocation5 + $0x308] sm:$0xff] }
  0xb9   : > { %v874_v13 = vld [vmem:[#allocation5 + $0xf40] sm:$0xff]  ;;  %3600 = vmatpush2.bf16.msra.mxu1 %v8838_v15  ;;  %v491_v15 = vld [vmem:[#allocation5 + $0x348] sm:$0xff] }
  0xba   : > { %v8823_v17 = vcombine.high %v866_v12, %v874_v13  ;;  %v594_v18 = vld [vmem:[#allocation5 + $0x680] sm:$0xff]  ;;  %3560 = vmatprep.subr.bf16.mxu0 %v8567_v16  ;;  %v8822_v23 = vcombine.low %v866_v12, %v874_v13  ;;  %v8457_v12 = vcombine.high %v499_v4, %v507_v5  ;;  %v8713_v13 = vcombine.high %v755_v6, %v763_v7 }
  0xbb   : > { %v602_v19 = vld [vmem:[#allocation5 + $0x6c0] sm:$0xff]  ;;  %3561 = vmatpush2.bf16.msra.mxu0 %v8566_v22  ;;  %v8441_v22 = vcombine.high %v483_v14, %v491_v15 }
  0xbc   : > { %v850_v20 = vld [vmem:[#allocation5 + $0xe80] sm:$0xff]  ;;  %v8551_v24 = vcombine.high %v594_v18, %v602_v19  ;;  %3601 = vmatprep.subr.bf16.mxu1 %v8823_v17  ;;  %v8550_v30 = vcombine.low %v594_v18, %v602_v19  ;;  %v739_v17 = vld [vmem:[#allocation5 + $0xb08] sm:$0xff]  ;;  %v10805_v19 = vpack.c.bf16 %v380_v11, %v380_v11 }
  0xbd   : > { %v858_v21 = vld [vmem:[#allocation5 + $0xec0] sm:$0xff]  ;;  %3602 = vmatpush2.bf16.msra.mxu1 %v8822_v23  ;;  %v747_v18 = vld [vmem:[#allocation5 + $0xb48] sm:$0xff] }
  0xbe   : > { %v8807_v25 = vcombine.high %v850_v20, %v858_v21  ;;  %v578_v26 = vld [vmem:[#allocation5 + $0x600] sm:$0xff]  ;;  %3562 = vmatprep.subr.bf16.mxu0 %v8551_v24  ;;  %v8806_v31 = vcombine.low %v850_v20, %v858_v21  ;;  %v8456_v20 = vcombine.low %v499_v4, %v507_v5  ;;  %v8712_v21 = vcombine.low %v755_v6, %v763_v7  ;;  %v467_v23 = vld [vmem:[#allocation5 + $0x288] sm:$0xff] }
  0xbf   : > { %v586_v27 = vld [vmem:[#allocation5 + $0x640] sm:$0xff]  ;;  %3563 = vmatpush2.bf16.msra.mxu0 %v8550_v30  ;;  %v475_v24 = vld [vmem:[#allocation5 + $0x2c8] sm:$0xff] }
  0xc0   : > { %v834_v28 = vld [vmem:[#allocation5 + $0xe00] sm:$0xff]  ;;  %v8535_v32 = vcombine.high %v578_v26, %v586_v27  ;;  %3603 = vmatprep.subr.bf16.mxu1 %v8807_v25  ;;  %v8534_v38 = vcombine.low %v578_v26, %v586_v27  ;;  %v8697_v25 = vcombine.high %v739_v17, %v747_v18  ;;  %v723_v26 = vld [vmem:[#allocation5 + $0xa88] sm:$0xff]  ;;  %v8425_v30 = vcombine.high %v467_v23, %v475_v24 }
  0xc1   : > { %v842_v29 = vld [vmem:[#allocation5 + $0xe40] sm:$0xff]  ;;  %3604 = vmatpush2.bf16.msra.mxu1 %v8806_v31  ;;  %v731_v27 = vld [vmem:[#allocation5 + $0xac8] sm:$0xff] }
  0xc2   : > { %v8791_v33 = vcombine.high %v834_v28, %v842_v29  ;;  %v562_v34 = vld [vmem:[#allocation5 + $0x580] sm:$0xff]  ;;  %3564 = vmatprep.subr.bf16.mxu0 %v8535_v32  ;;  %v8790_v39 = vcombine.low %v834_v28, %v842_v29  ;;  %v8440_v28 = vcombine.low %v483_v14, %v491_v15  ;;  %v8696_v29 = vcombine.low %v739_v17, %v747_v18  ;;  %v451_v31 = vld [vmem:[#allocation5 + $0x208] sm:$0xff] }
  0xc3   : > { %v570_v35 = vld [vmem:[#allocation5 + $0x5c0] sm:$0xff]  ;;  %3565 = vmatpush2.bf16.msra.mxu0 %v8534_v38  ;;  %v459_v32 = vld [vmem:[#allocation5 + $0x248] sm:$0xff] }
  0xc4   : > { %v818_v36 = vld [vmem:[#allocation5 + $0xd80] sm:$0xff]  ;;  %v8519_v40 = vcombine.high %v562_v34, %v570_v35  ;;  %3605 = vmatprep.subr.bf16.mxu1 %v8791_v33  ;;  %v8518_v46 = vcombine.low %v562_v34, %v570_v35  ;;  %v707_v33 = vld [vmem:[#allocation5 + $0xa08] sm:$0xff]  ;;  %v8681_v34 = vcombine.high %v723_v26, %v731_v27  ;;  %v8409_v38 = vcombine.high %v451_v31, %v459_v32 }
  0xc5   : > { %v826_v37 = vld [vmem:[#allocation5 + $0xdc0] sm:$0xff]  ;;  %3606 = vmatpush2.bf16.msra.mxu1 %v8790_v39  ;;  %v715_v35 = vld [vmem:[#allocation5 + $0xa48] sm:$0xff] }
  0xc6   : > { %v8775_v41 = vcombine.high %v818_v36, %v826_v37  ;;  %v546_v42 = vld [vmem:[#allocation5 + $0x500] sm:$0xff]  ;;  %3566 = vmatprep.subr.bf16.mxu0 %v8519_v40  ;;  %v8774_v47 = vcombine.low %v818_v36, %v826_v37  ;;  %v8424_v36 = vcombine.low %v467_v23, %v475_v24  ;;  %v8680_v37 = vcombine.low %v723_v26, %v731_v27  ;;  %v435_v39 = vld [vmem:[#allocation5 + $0x188] sm:$0xff] }
  0xc7   : > { %v554_v43 = vld [vmem:[#allocation5 + $0x540] sm:$0xff]  ;;  %3567 = vmatpush2.bf16.msra.mxu0 %v8518_v46  ;;  %v443_v40 = vld [vmem:[#allocation5 + $0x1c8] sm:$0xff] }
  0xc8   : > { %v802_v44 = vld [vmem:[#allocation5 + $0xd00] sm:$0xff]  ;;  %v8503_v48 = vcombine.high %v546_v42, %v554_v43  ;;  %3607 = vmatprep.subr.bf16.mxu1 %v8775_v41  ;;  %v8502_v54 = vcombine.low %v546_v42, %v554_v43  ;;  %v691_v41 = vld [vmem:[#allocation5 + $0x988] sm:$0xff]  ;;  %v8665_v42 = vcombine.high %v707_v33, %v715_v35  ;;  %v8393_v46 = vcombine.high %v435_v39, %v443_v40 }
  0xc9   : > { %v810_v45 = vld [vmem:[#allocation5 + $0xd40] sm:$0xff]  ;;  %3608 = vmatpush2.bf16.msra.mxu1 %v8774_v47  ;;  %v699_v43 = vld [vmem:[#allocation5 + $0x9c8] sm:$0xff] }
  0xca   : > { %v8759_v49 = vcombine.high %v802_v44, %v810_v45  ;;  %v530_v50 = vld [vmem:[#allocation5 + $0x480] sm:$0xff]  ;;  %3568 = vmatprep.subr.bf16.mxu0 %v8503_v48  ;;  %v8758_v55 = vcombine.low %v802_v44, %v810_v45  ;;  %v8408_v44 = vcombine.low %v451_v31, %v459_v32  ;;  %v8664_v45 = vcombine.low %v707_v33, %v715_v35  ;;  %v419_v47 = vld [vmem:[#allocation5 + $0x108] sm:$0xff] }
  0xcb   : > { %v538_v51 = vld [vmem:[#allocation5 + $0x4c0] sm:$0xff]  ;;  %3569 = vmatpush2.bf16.msra.mxu0 %v8502_v54  ;;  %v427_v48 = vld [vmem:[#allocation5 + $0x148] sm:$0xff] }
  0xcc   : > { %v786_v52 = vld [vmem:[#allocation5 + $0xc80] sm:$0xff]  ;;  %v8487_v56 = vcombine.high %v530_v50, %v538_v51  ;;  %3609 = vmatprep.subr.bf16.mxu1 %v8759_v49  ;;  %v8486_v0 = vcombine.low %v530_v50, %v538_v51  ;;  %v675_v49 = vld [vmem:[#allocation5 + $0x908] sm:$0xff]  ;;  %v8649_v50 = vcombine.high %v691_v41, %v699_v43  ;;  %v8377_v54 = vcombine.high %v419_v47, %v427_v48 }
  0xcd   : > { %v794_v53 = vld [vmem:[#allocation5 + $0xcc0] sm:$0xff]  ;;  %3610 = vmatpush2.bf16.msra.mxu1 %v8758_v55  ;;  %v683_v51 = vld [vmem:[#allocation5 + $0x948] sm:$0xff] }
  0xce   : > { %v8743_v57 = vcombine.high %v786_v52, %v794_v53  ;;  %v514_v60 = vld [vmem:[#allocation5 + $0x400] sm:$0xff]  ;;  %3570 = vmatprep.subr.bf16.mxu0 %v8487_v56  ;;  %v8742_v1 = vcombine.low %v786_v52, %v794_v53  ;;  %v8392_v52 = vcombine.low %v435_v39, %v443_v40  ;;  %v8648_v53 = vcombine.low %v691_v41, %v699_v43  ;;  %v403_v55 = vld [vmem:[#allocation5 + $0x88] sm:$0xff] }
  0xcf   : > { %v522_v61 = vld [vmem:[#allocation5 + $0x440] sm:$0xff]  ;;  %3571 = vmatpush2.bf16.msra.mxu0 %v8486_v0  ;;  %v411_v56 = vld [vmem:[#allocation5 + $0xc8] sm:$0xff] }
  0xd0   : > { %v770_v62 = vld [vmem:[#allocation5 + $0xc00] sm:$0xff]  ;;  %v8471_v2 = vcombine.high %v514_v60, %v522_v61  ;;  %3611 = vmatprep.subr.bf16.mxu1 %v8743_v57  ;;  %v8470_v8 = vcombine.low %v514_v60, %v522_v61  ;;  %v659_v57 = vld [vmem:[#allocation5 + $0x888] sm:$0xff]  ;;  %v8633_v60 = vcombine.high %v675_v49, %v683_v51  ;;  %v8361_v0 = vcombine.high %v403_v55, %v411_v56 }
  0xd1   : > { %v778_v63 = vld [vmem:[#allocation5 + $0xc40] sm:$0xff]  ;;  %3612 = vmatpush2.bf16.msra.mxu1 %v8742_v1  ;;  %v667_v61 = vld [vmem:[#allocation5 + $0x8c8] sm:$0xff]  ;;  %v8360_v6 = vcombine.low %v403_v55, %v411_v56 }
  0xd2   : > { %v8727_v3 = vcombine.high %v770_v62, %v778_v63  ;;  %v378_v9 = vld [vmem:[%s10775_s2] sm:$0xff]  ;;  %3572 = vmatprep.subr.bf16.mxu0 %v8471_v2  ;;  %v8726_v10 = vcombine.low %v770_v62, %v778_v63  ;;  %v8376_v62 = vcombine.low %v419_v47, %v427_v48  ;;  %v8632_v63 = vcombine.low %v675_v49, %v683_v51  ;;  %v387_v1 = vld [vmem:[#allocation5 + $0x8] sm:$0xff] }
  0xd3   : > { %v10803_v16 = vpack.c.bf16 %v378_v9, %v378_v9  ;;  %3573 = vmatpush2.bf16.msra.mxu0 %v8470_v8  ;;  %v395_v2 = vld [vmem:[#allocation5 + $0x48] sm:$0xff]  ;;  %v8617_v4 = vcombine.high %v659_v57, %v667_v61  ;;  %v8616_v7 = vcombine.low %v659_v57, %v667_v61 }
  0xd4   : > { %3613 = vmatprep.subr.bf16.mxu1 %v8727_v3  ;;  %3624 = vmatprep.subr.bf16.mxu0 %v8457_v12  ;;  %v643_v3 = vld [vmem:[#allocation5 + $0x808] sm:$0xff]  ;;  %v8345_v8 = vcombine.high %v387_v1, %v395_v2  ;;  %v8344_v14 = vcombine.low %v387_v1, %v395_v2 }
  0xd5   : > { %3614 = vmatpush2.bf16.msra.mxu1 %v8726_v10  ;;  %v651_v5 = vld [vmem:[#allocation5 + $0x848] sm:$0xff] }
  0xd6   : > { %3665 = vmatprep.subr.bf16.mxu1 %v8713_v13  ;;  %3575 = vmatmul.mubr.bf16.vlgmr.msra.gmra.mxu0 %v10803_v16  ;;  %v627_v9 = vld [vmem:[#allocation5 + $0x788] sm:$0xff]  ;;  %v8601_v12 = vcombine.high %v643_v3, %v651_v5  ;;  %v8600_v15 = vcombine.low %v643_v3, %v651_v5 }
  0xd7   : > { %3625 = vmatpush1.bf16.msra.mxu0 %v8456_v20  ;;  %3656 = vmatprep.mubr.bf16.mxu0 %v10795_v58  ;;  %v635_v10 = vld [vmem:[#allocation5 + $0x7c8] sm:$0xff] }
  0xd8   : > { %3616 = vmatmul.mubr.bf16.vlgmr.msra.gmra.mxu1 %v10805_v19  ;;  %3626 = vmatprep.subr.bf16.mxu0 %v8441_v22  ;;  %v883_v11 = vld [vmem:[#allocation5 + $0xf88] sm:$0xff]  ;;  %v8585_v17 = vcombine.high %v627_v9, %v635_v10  ;;  %v8584_v24 = vcombine.low %v627_v9, %v635_v10 }
  0xd9   : > { %3666 = vmatpush1.bf16.msra.mxu1 %v8712_v21  ;;  %3697 = vmatprep.mubr.bf16.mxu1 %v10797_v59  ;;  %v891_v13 = vld [vmem:[#allocation5 + $0xfc8] sm:$0xff] }
  0xda   : > { %3667 = vmatprep.subr.bf16.mxu1 %v8697_v25  ;;  %v611_v18 = vld [vmem:[#allocation5 + $0x708] sm:$0xff]  ;;  %v8841_v22 = vcombine.high %v883_v11, %v891_v13  ;;  %v8840_v25 = vcombine.low %v883_v11, %v891_v13  ;;  %v500_v13 = vld [vmem:[#allocation5 + $0x390] sm:$0xff] }
  0xdb   : > { %3627 = vmatpush1.bf16.msra.mxu0 %v8440_v28  ;;  %v619_v20 = vld [vmem:[#allocation5 + $0x748] sm:$0xff] }
  0xdc   : > { %3628 = vmatprep.subr.bf16.mxu0 %v8425_v30  ;;  %v867_v21 = vld [vmem:[#allocation5 + $0xf08] sm:$0xff]  ;;  %v8569_v26 = vcombine.high %v611_v18, %v619_v20  ;;  %v8568_v32 = vcombine.low %v611_v18, %v619_v20  ;;  %v764_v18 = vld [vmem:[#allocation5 + $0xbd0] sm:$0xff] }
  0xdd   : > { %3668 = vmatpush1.bf16.msra.mxu1 %v8696_v29  ;;  %v875_v23 = vld [vmem:[#allocation5 + $0xf48] sm:$0xff] }
  0xde   : > { %3669 = vmatprep.subr.bf16.mxu1 %v8681_v34  ;;  %v595_v27 = vld [vmem:[#allocation5 + $0x688] sm:$0xff]  ;;  %v8825_v30 = vcombine.high %v867_v21, %v875_v23  ;;  %v8824_v33 = vcombine.low %v867_v21, %v875_v23  ;;  %v484_v23 = vld [vmem:[#allocation5 + $0x310] sm:$0xff] }
  0xdf   : > { %3629 = vmatpush1.bf16.msra.mxu0 %v8424_v36  ;;  %v603_v28 = vld [vmem:[#allocation5 + $0x6c8] sm:$0xff] }
  0xe0   : > { %3630 = vmatprep.subr.bf16.mxu0 %v8409_v38  ;;  %v851_v29 = vld [vmem:[#allocation5 + $0xe88] sm:$0xff]  ;;  %v8553_v34 = vcombine.high %v595_v27, %v603_v28  ;;  %v8552_v40 = vcombine.low %v595_v27, %v603_v28  ;;  %v748_v27 = vld [vmem:[#allocation5 + $0xb50] sm:$0xff] }
  0xe1   : > { %3670 = vmatpush1.bf16.msra.mxu1 %v8680_v37  ;;  %v859_v31 = vld [vmem:[#allocation5 + $0xec8] sm:$0xff] }
  0xe2   : > { %3671 = vmatprep.subr.bf16.mxu1 %v8665_v42  ;;  %v579_v35 = vld [vmem:[#allocation5 + $0x608] sm:$0xff]  ;;  %v8809_v38 = vcombine.high %v851_v29, %v859_v31  ;;  %v8808_v41 = vcombine.low %v851_v29, %v859_v31  ;;  %v468_v31 = vld [vmem:[#allocation5 + $0x290] sm:$0xff] }
  0xe3   : > { %3631 = vmatpush1.bf16.msra.mxu0 %v8408_v44  ;;  %v587_v36 = vld [vmem:[#allocation5 + $0x648] sm:$0xff] }
  0xe4   : > { %3632 = vmatprep.subr.bf16.mxu0 %v8393_v46  ;;  %v835_v37 = vld [vmem:[#allocation5 + $0xe08] sm:$0xff]  ;;  %v8537_v42 = vcombine.high %v579_v35, %v587_v36  ;;  %v8536_v48 = vcombine.low %v579_v35, %v587_v36  ;;  %v732_v35 = vld [vmem:[#allocation5 + $0xad0] sm:$0xff] }
  0xe5   : > { %3672 = vmatpush1.bf16.msra.mxu1 %v8664_v45  ;;  %v843_v39 = vld [vmem:[#allocation5 + $0xe48] sm:$0xff] }
  0xe6   : > { %3673 = vmatprep.subr.bf16.mxu1 %v8649_v50  ;;  %v563_v43 = vld [vmem:[#allocation5 + $0x588] sm:$0xff]  ;;  %v8793_v46 = vcombine.high %v835_v37, %v843_v39  ;;  %v8792_v49 = vcombine.low %v835_v37, %v843_v39  ;;  %v452_v39 = vld [vmem:[#allocation5 + $0x210] sm:$0xff] }
  0xe7   : > { %3633 = vmatpush1.bf16.msra.mxu0 %v8392_v52  ;;  %v571_v44 = vld [vmem:[#allocation5 + $0x5c8] sm:$0xff] }
  0xe8   : > { %3634 = vmatprep.subr.bf16.mxu0 %v8377_v54  ;;  %v819_v45 = vld [vmem:[#allocation5 + $0xd88] sm:$0xff]  ;;  %v8521_v50 = vcombine.high %v563_v43, %v571_v44  ;;  %v8520_v56 = vcombine.low %v563_v43, %v571_v44  ;;  %v716_v43 = vld [vmem:[#allocation5 + $0xa50] sm:$0xff] }
  0xe9   : > { %3674 = vmatpush1.bf16.msra.mxu1 %v8648_v53  ;;  %v827_v47 = vld [vmem:[#allocation5 + $0xdc8] sm:$0xff] }
  0xea   : > { %3675 = vmatprep.subr.bf16.mxu1 %v8633_v60  ;;  %v547_v51 = vld [vmem:[#allocation5 + $0x508] sm:$0xff]  ;;  %v8777_v54 = vcombine.high %v819_v45, %v827_v47  ;;  %v8776_v57 = vcombine.low %v819_v45, %v827_v47  ;;  %v436_v47 = vld [vmem:[#allocation5 + $0x190] sm:$0xff] }
  0xeb   : > { %3635 = vmatpush1.bf16.msra.mxu0 %v8376_v62  ;;  %v555_v52 = vld [vmem:[#allocation5 + $0x548] sm:$0xff] }
  0xec   : > { %3636 = vmatprep.subr.bf16.mxu0 %v8361_v0  ;;  %v803_v53 = vld [vmem:[#allocation5 + $0xd08] sm:$0xff]  ;;  %v8505_v60 = vcombine.high %v547_v51, %v555_v52  ;;  %v8504_v2 = vcombine.low %v547_v51, %v555_v52  ;;  %v700_v51 = vld [vmem:[#allocation5 + $0x9d0] sm:$0xff] }
  0xed   : > { %3676 = vmatpush1.bf16.msra.mxu1 %v8632_v63  ;;  %v811_v55 = vld [vmem:[#allocation5 + $0xd48] sm:$0xff] }
  0xee   : > { %3677 = vmatprep.subr.bf16.mxu1 %v8617_v4  ;;  %v531_v61 = vld [vmem:[#allocation5 + $0x488] sm:$0xff]  ;;  %v8761_v0 = vcombine.high %v803_v53, %v811_v55  ;;  %v8760_v3 = vcombine.low %v803_v53, %v811_v55  ;;  %v420_v55 = vld [vmem:[#allocation5 + $0x110] sm:$0xff] }
  0xef   : > { %3637 = vmatpush1.bf16.msra.mxu0 %v8360_v6  ;;  %v539_v62 = vld [vmem:[#allocation5 + $0x4c8] sm:$0xff] }
  0xf0   : > { %3638 = vmatprep.subr.bf16.mxu0 %v8345_v8  ;;  %v787_v63 = vld [vmem:[#allocation5 + $0xc88] sm:$0xff]  ;;  %v8489_v4 = vcombine.high %v531_v61, %v539_v62  ;;  %v8488_v10 = vcombine.low %v531_v61, %v539_v62  ;;  %v684_v61 = vld [vmem:[#allocation5 + $0x950] sm:$0xff] }
  0xf1   : > { %3678 = vmatpush1.bf16.msra.mxu1 %v8616_v7  ;;  %v795_v1 = vld [vmem:[#allocation5 + $0xcc8] sm:$0xff] }
  0xf2   : > { %3679 = vmatprep.subr.bf16.mxu1 %v8601_v12  ;;  %v515_v5 = vld [vmem:[#allocation5 + $0x408] sm:$0xff]  ;;  %v8745_v8 = vcombine.high %v787_v63, %v795_v1  ;;  %v8744_v11 = vcombine.low %v787_v63, %v795_v1  ;;  %v404_v1 = vld [vmem:[#allocation5 + $0x90] sm:$0xff] }
  0xf3   : > { %3639 = vmatpush1.bf16.msra.mxu0 %v8344_v14  ;;  %v523_v6 = vld [vmem:[#allocation5 + $0x448] sm:$0xff]  ;;  %v508_v14 = vld [vmem:[#allocation5 + $0x3d0] sm:$0xff] }
  0xf4   : > { %3640 = vmatprep.subr.bf16.mxu0 %v8585_v17  ;;  %v771_v7 = vld [vmem:[#allocation5 + $0xc08] sm:$0xff]  ;;  %v8473_v12 = vcombine.high %v515_v5, %v523_v6  ;;  %v8472_v20 = vcombine.low %v515_v5, %v523_v6  ;;  %v8458_v28 = vcombine.low %v500_v13, %v508_v14  ;;  %v668_v5 = vld [vmem:[#allocation5 + $0x8d0] sm:$0xff] }
  0xf5   : > { %3680 = vmatpush1.bf16.msra.mxu1 %v8600_v15  ;;  %v779_v9 = vld [vmem:[#allocation5 + $0xc48] sm:$0xff]  ;;  %v756_v15 = vld [vmem:[#allocation5 + $0xb90] sm:$0xff] }
  0xf6   : > { %3681 = vmatprep.subr.bf16.mxu1 %v8841_v22  ;;  %v8729_v17 = vcombine.high %v771_v7, %v779_v9  ;;  %v8728_v21 = vcombine.low %v771_v7, %v779_v9  ;;  %v8459_v22 = vcombine.high %v500_v13, %v508_v14  ;;  %v8714_v29 = vcombine.low %v756_v15, %v764_v18  ;;  %v388_v9 = vld [vmem:[#allocation5 + $0x10] sm:$0xff] }
  0xf7   : > { %3641 = vmatpush2.bf16.msra.mxu0 %v8584_v24  ;;  %v492_v24 = vld [vmem:[#allocation5 + $0x350] sm:$0xff] }
  0xf8   : > { %3642 = vmatprep.subr.bf16.mxu0 %v8569_v26  ;;  %v8715_v26 = vcombine.high %v756_v15, %v764_v18  ;;  %v8442_v36 = vcombine.low %v484_v23, %v492_v24  ;;  %v652_v13 = vld [vmem:[#allocation5 + $0x850] sm:$0xff] }
  0xf9   : > { %3682 = vmatpush2.bf16.msra.mxu1 %v8840_v25  ;;  %v740_v25 = vld [vmem:[#allocation5 + $0xb10] sm:$0xff] }
  0xfa   : > { %3683 = vmatprep.subr.bf16.mxu1 %v8825_v30  ;;  %v8443_v30 = vcombine.high %v484_v23, %v492_v24  ;;  %v8698_v37 = vcombine.low %v740_v25, %v748_v27  ;;  %v628_v18 = vld [vmem:[#allocation5 + $0x790] sm:$0xff] }
  0xfb   : > { %3643 = vmatpush2.bf16.msra.mxu0 %v8568_v32  ;;  %v476_v32 = vld [vmem:[#allocation5 + $0x2d0] sm:$0xff] }
  0xfc   : > { %3644 = vmatprep.subr.bf16.mxu0 %v8553_v34  ;;  %v724_v34 = vld [vmem:[#allocation5 + $0xa90] sm:$0xff]  ;;  %v8426_v44 = vcombine.low %v468_v31, %v476_v32 }
  0xfd   : > { %3684 = vmatpush2.bf16.msra.mxu1 %v8824_v33  ;;  %v8699_v33 = vcombine.high %v740_v25, %v748_v27  ;;  %v8682_v45 = vcombine.low %v724_v34, %v732_v35  ;;  %v892_v23 = vld [vmem:[#allocation5 + $0xfd0] sm:$0xff] }
  0xfe   : > { %3685 = vmatprep.subr.bf16.mxu1 %v8809_v38  ;;  %v8427_v38 = vcombine.high %v468_v31, %v476_v32  ;;  %v612_v27 = vld [vmem:[#allocation5 + $0x710] sm:$0xff] }
  0xff   : > { %3645 = vmatpush2.bf16.msra.mxu0 %v8552_v40  ;;  %v460_v40 = vld [vmem:[#allocation5 + $0x250] sm:$0xff] }
 0x100   : > { %3646 = vmatprep.subr.bf16.mxu0 %v8537_v42  ;;  %v8683_v42 = vcombine.high %v724_v34, %v732_v35  ;;  %v8410_v52 = vcombine.low %v452_v39, %v460_v40  ;;  %v876_v31 = vld [vmem:[#allocation5 + $0xf50] sm:$0xff] }
 0x101   : > { %3686 = vmatpush2.bf16.msra.mxu1 %v8808_v41  ;;  %v708_v41 = vld [vmem:[#allocation5 + $0xa10] sm:$0xff] }
 0x102   : > { %3687 = vmatprep.subr.bf16.mxu1 %v8793_v46  ;;  %v8411_v46 = vcombine.high %v452_v39, %v460_v40  ;;  %v8666_v53 = vcombine.low %v708_v41, %v716_v43  ;;  %v596_v35 = vld [vmem:[#allocation5 + $0x690] sm:$0xff] }
 0x103   : > { %3647 = vmatpush2.bf16.msra.mxu0 %v8536_v48  ;;  %v444_v48 = vld [vmem:[#allocation5 + $0x1d0] sm:$0xff] }
 0x104   : > { %3648 = vmatprep.subr.bf16.mxu0 %v8521_v50  ;;  %v8667_v50 = vcombine.high %v708_v41, %v716_v43  ;;  %v8394_v62 = vcombine.low %v436_v47, %v444_v48  ;;  %v860_v39 = vld [vmem:[#allocation5 + $0xed0] sm:$0xff] }
 0x105   : > { %3688 = vmatpush2.bf16.msra.mxu1 %v8792_v49  ;;  %v692_v49 = vld [vmem:[#allocation5 + $0x990] sm:$0xff] }
 0x106   : > { %3689 = vmatprep.subr.bf16.mxu1 %v8777_v54  ;;  %v8395_v54 = vcombine.high %v436_v47, %v444_v48  ;;  %v8650_v63 = vcombine.low %v692_v49, %v700_v51  ;;  %v580_v43 = vld [vmem:[#allocation5 + $0x610] sm:$0xff] }
 0x107   : > { %3649 = vmatpush2.bf16.msra.mxu0 %v8520_v56  ;;  %v428_v56 = vld [vmem:[#allocation5 + $0x150] sm:$0xff] }
 0x108   : > { %3650 = vmatprep.subr.bf16.mxu0 %v8505_v60  ;;  %v8651_v60 = vcombine.high %v692_v49, %v700_v51  ;;  %v8378_v6 = vcombine.low %v420_v55, %v428_v56  ;;  %v844_v47 = vld [vmem:[#allocation5 + $0xe50] sm:$0xff] }
 0x109   : > { %3690 = vmatpush2.bf16.msra.mxu1 %v8776_v57  ;;  %v676_v57 = vld [vmem:[#allocation5 + $0x910] sm:$0xff] }
 0x10a   : > { %3691 = vmatprep.subr.bf16.mxu1 %v8761_v0  ;;  %v8379_v0 = vcombine.high %v420_v55, %v428_v56  ;;  %v8634_v7 = vcombine.low %v676_v57, %v684_v61  ;;  %v564_v51 = vld [vmem:[#allocation5 + $0x590] sm:$0xff] }
 0x10b   : > { %3651 = vmatpush2.bf16.msra.mxu0 %v8504_v2  ;;  %v412_v2 = vld [vmem:[#allocation5 + $0xd0] sm:$0xff] }
 0x10c   : > { %3652 = vmatprep.subr.bf16.mxu0 %v8489_v4  ;;  %v8635_v4 = vcombine.high %v676_v57, %v684_v61  ;;  %v8362_v14 = vcombine.low %v404_v1, %v412_v2  ;;  %v828_v55 = vld [vmem:[#allocation5 + $0xdd0] sm:$0xff] }
 0x10d   : > { %3692 = vmatpush2.bf16.msra.mxu1 %v8760_v3  ;;  %v660_v3 = vld [vmem:[#allocation5 + $0x890] sm:$0xff] }
 0x10e   : > { %3693 = vmatprep.subr.bf16.mxu1 %v8745_v8  ;;  %v8363_v8 = vcombine.high %v404_v1, %v412_v2  ;;  %v8618_v15 = vcombine.low %v660_v3, %v668_v5  ;;  %v548_v61 = vld [vmem:[#allocation5 + $0x510] sm:$0xff] }
 0x10f   : > { %3653 = vmatpush2.bf16.msra.mxu0 %v8488_v10  ;;  %v396_v10 = vld [vmem:[#allocation5 + $0x50] sm:$0xff] }
 0x110   : > { %3654 = vmatprep.subr.bf16.mxu0 %v8473_v12  ;;  %v8619_v12 = vcombine.high %v660_v3, %v668_v5  ;;  %v8346_v24 = vcombine.low %v388_v9, %v396_v10  ;;  %v812_v1 = vld [vmem:[#allocation5 + $0xd50] sm:$0xff] }
 0x111   : > { %3694 = vmatpush2.bf16.msra.mxu1 %v8744_v11  ;;  %v644_v11 = vld [vmem:[#allocation5 + $0x810] sm:$0xff] }
 0x112   : > { %3695 = vmatprep.subr.bf16.mxu1 %v8729_v17  ;;  %v8347_v17 = vcombine.high %v388_v9, %v396_v10  ;;  %v8602_v25 = vcombine.low %v644_v11, %v652_v13  ;;  %v532_v5 = vld [vmem:[#allocation5 + $0x490] sm:$0xff] }
 0x113   : > { %3655 = vmatpush2.bf16.msra.mxu0 %v8472_v20  ;;  %v636_v20 = vld [vmem:[#allocation5 + $0x7d0] sm:$0xff] }
 0x114   : > { %3706 = vmatprep.subr.bf16.mxu0 %v8459_v22  ;;  %v8603_v22 = vcombine.high %v644_v11, %v652_v13  ;;  %v8586_v32 = vcombine.low %v628_v18, %v636_v20  ;;  %v796_v9 = vld [vmem:[#allocation5 + $0xcd0] sm:$0xff] }
 0x115   : > { %3696 = vmatpush2.bf16.msra.mxu1 %v8728_v21  ;;  %v884_v21 = vld [vmem:[#allocation5 + $0xf90] sm:$0xff] }
 0x116   : > { %3747 = vmatprep.subr.bf16.mxu1 %v8715_v26  ;;  %3657 = vmatmul.mubr.bf16.vlgmr.msra.gmra.mxu0 %v10803_v16  ;;  %v8587_v26 = vcombine.high %v628_v18, %v636_v20  ;;  %v516_v13 = vld [vmem:[#allocation5 + $0x410] sm:$0xff] }
 0x117   : > { %3707 = vmatpush1.bf16.msra.mxu0 %v8458_v28  ;;  %3738 = vmatprep.mubr.bf16.mxu0 %v10795_v58  ;;  %v620_v28 = vld [vmem:[#allocation5 + $0x750] sm:$0xff] }
 0x118   : > { %3698 = vmatmul.mubr.bf16.vlgmr.msra.gmra.mxu1 %v10805_v19  ;;  %3708 = vmatprep.subr.bf16.mxu0 %v8443_v30  ;;  %v8843_v30 = vcombine.high %v884_v21, %v892_v23  ;;  %v8571_v34 = vcombine.high %v612_v27, %v620_v28  ;;  %v8570_v40 = vcombine.low %v612_v27, %v620_v28  ;;  %v780_v18 = vld [vmem:[#allocation5 + $0xc50] sm:$0xff]  ;;  %v765_v27 = vld [vmem:[#allocation5 + $0xbd8] sm:$0xff] }
 0x119   : > { %3748 = vmatpush1.bf16.msra.mxu1 %v8714_v29  ;;  %3779 = vmatprep.mubr.bf16.mxu1 %v10797_v59  ;;  %v868_v29 = vld [vmem:[#allocation5 + $0xf10] sm:$0xff] }
 0x11a   : > { %3749 = vmatprep.subr.bf16.mxu1 %v8699_v33  ;;  %v8842_v33 = vcombine.low %v884_v21, %v892_v23  ;;  %v8826_v41 = vcombine.low %v868_v29, %v876_v31  ;;  %v501_v23 = vld [vmem:[#allocation5 + $0x398] sm:$0xff] }
 0x11b   : > { %3709 = vmatpush1.bf16.msra.mxu0 %v8442_v36  ;;  %v604_v36 = vld [vmem:[#allocation5 + $0x6d0] sm:$0xff] }
 0x11c   : > { %3710 = vmatprep.subr.bf16.mxu0 %v8427_v38  ;;  %v8827_v38 = vcombine.high %v868_v29, %v876_v31  ;;  %v8554_v48 = vcombine.low %v596_v35, %v604_v36  ;;  %v485_v31 = vld [vmem:[#allocation5 + $0x318] sm:$0xff] }
 0x11d   : > { %3750 = vmatpush1.bf16.msra.mxu1 %v8698_v37  ;;  %v852_v37 = vld [vmem:[#allocation5 + $0xe90] sm:$0xff] }
 0x11e   : > { %3751 = vmatprep.subr.bf16.mxu1 %v8683_v42  ;;  %v8555_v42 = vcombine.high %v596_v35, %v604_v36  ;;  %v8810_v49 = vcombine.low %v852_v37, %v860_v39  ;;  %v749_v35 = vld [vmem:[#allocation5 + $0xb58] sm:$0xff] }
 0x11f   : > { %3711 = vmatpush1.bf16.msra.mxu0 %v8426_v44  ;;  %v588_v44 = vld [vmem:[#allocation5 + $0x650] sm:$0xff] }
 0x120   : > { %3712 = vmatprep.subr.bf16.mxu0 %v8411_v46  ;;  %v8811_v46 = vcombine.high %v852_v37, %v860_v39  ;;  %v8538_v56 = vcombine.low %v580_v43, %v588_v44  ;;  %v469_v39 = vld [vmem:[#allocation5 + $0x298] sm:$0xff] }
 0x121   : > { %3752 = vmatpush1.bf16.msra.mxu1 %v8682_v45  ;;  %v836_v45 = vld [vmem:[#allocation5 + $0xe10] sm:$0xff] }
 0x122   : > { %3753 = vmatprep.subr.bf16.mxu1 %v8667_v50  ;;  %v8539_v50 = vcombine.high %v580_v43, %v588_v44  ;;  %v8794_v57 = vcombine.low %v836_v45, %v844_v47  ;;  %v733_v43 = vld [vmem:[#allocation5 + $0xad8] sm:$0xff] }
 0x123   : > { %3713 = vmatpush1.bf16.msra.mxu0 %v8410_v52  ;;  %v572_v52 = vld [vmem:[#allocation5 + $0x5d0] sm:$0xff] }
 0x124   : > { %3714 = vmatprep.subr.bf16.mxu0 %v8395_v54  ;;  %v8795_v54 = vcombine.high %v836_v45, %v844_v47  ;;  %v8522_v2 = vcombine.low %v564_v51, %v572_v52  ;;  %v453_v47 = vld [vmem:[#allocation5 + $0x218] sm:$0xff] }
 0x125   : > { %3754 = vmatpush1.bf16.msra.mxu1 %v8666_v53  ;;  %v820_v53 = vld [vmem:[#allocation5 + $0xd90] sm:$0xff] }
 0x126   : > { %3755 = vmatprep.subr.bf16.mxu1 %v8651_v60  ;;  %v8523_v60 = vcombine.high %v564_v51, %v572_v52  ;;  %v8778_v3 = vcombine.low %v820_v53, %v828_v55  ;;  %v717_v51 = vld [vmem:[#allocation5 + $0xa58] sm:$0xff] }
 0x127   : > { %3715 = vmatpush1.bf16.msra.mxu0 %v8394_v62  ;;  %v556_v62 = vld [vmem:[#allocation5 + $0x550] sm:$0xff] }
 0x128   : > { %3716 = vmatprep.subr.bf16.mxu0 %v8379_v0  ;;  %v8779_v0 = vcombine.high %v820_v53, %v828_v55  ;;  %v8506_v10 = vcombine.low %v548_v61, %v556_v62  ;;  %v437_v55 = vld [vmem:[#allocation5 + $0x198] sm:$0xff] }
 0x129   : > { %3756 = vmatpush1.bf16.msra.mxu1 %v8650_v63  ;;  %v804_v63 = vld [vmem:[#allocation5 + $0xd10] sm:$0xff] }
 0x12a   : > { %3757 = vmatprep.subr.bf16.mxu1 %v8635_v4  ;;  %v8507_v4 = vcombine.high %v548_v61, %v556_v62  ;;  %v8762_v11 = vcombine.low %v804_v63, %v812_v1  ;;  %v701_v61 = vld [vmem:[#allocation5 + $0x9d8] sm:$0xff] }
 0x12b   : > { %3717 = vmatpush1.bf16.msra.mxu0 %v8378_v6  ;;  %v540_v6 = vld [vmem:[#allocation5 + $0x4d0] sm:$0xff] }
 0x12c   : > { %3718 = vmatprep.subr.bf16.mxu0 %v8363_v8  ;;  %v8763_v8 = vcombine.high %v804_v63, %v812_v1  ;;  %v8490_v20 = vcombine.low %v532_v5, %v540_v6  ;;  %v421_v1 = vld [vmem:[#allocation5 + $0x118] sm:$0xff] }
 0x12d   : > { %3758 = vmatpush1.bf16.msra.mxu1 %v8634_v7  ;;  %v788_v7 = vld [vmem:[#allocation5 + $0xc90] sm:$0xff] }
 0x12e   : > { %3759 = vmatprep.subr.bf16.mxu1 %v8619_v12  ;;  %v8491_v12 = vcombine.high %v532_v5, %v540_v6  ;;  %v8746_v21 = vcombine.low %v788_v7, %v796_v9  ;;  %v685_v5 = vld [vmem:[#allocation5 + $0x958] sm:$0xff] }
 0x12f   : > { %3719 = vmatpush1.bf16.msra.mxu0 %v8362_v14  ;;  %v524_v14 = vld [vmem:[#allocation5 + $0x450] sm:$0xff] }
 0x130   : > { %3720 = vmatprep.subr.bf16.mxu0 %v8347_v17  ;;  %v8747_v17 = vcombine.high %v788_v7, %v796_v9  ;;  %v8474_v28 = vcombine.low %v516_v13, %v524_v14  ;;  %v405_v9 = vld [vmem:[#allocation5 + $0x98] sm:$0xff] }
 0x131   : > { %3760 = vmatpush1.bf16.msra.mxu1 %v8618_v15  ;;  %v772_v15 = vld [vmem:[#allocation5 + $0xc10] sm:$0xff] }
 0x132   : > { %3761 = vmatprep.subr.bf16.mxu1 %v8603_v22  ;;  %v8475_v22 = vcombine.high %v516_v13, %v524_v14  ;;  %v8730_v29 = vcombine.low %v772_v15, %v780_v18  ;;  %v669_v13 = vld [vmem:[#allocation5 + $0x8d8] sm:$0xff] }
 0x133   : > { %3721 = vmatpush1.bf16.msra.mxu0 %v8346_v24  ;;  %v509_v24 = vld [vmem:[#allocation5 + $0x3d8] sm:$0xff] }
 0x134   : > { %3722 = vmatprep.subr.bf16.mxu0 %v8587_v26  ;;  %v8731_v26 = vcombine.high %v772_v15, %v780_v18  ;;  %v8460_v36 = vcombine.low %v501_v23, %v509_v24  ;;  %v389_v18 = vld [vmem:[#allocation5 + $0x18] sm:$0xff] }
 0x135   : > { %3762 = vmatpush1.bf16.msra.mxu1 %v8602_v25  ;;  %v757_v25 = vld [vmem:[#allocation5 + $0xb98] sm:$0xff] }
 0x136   : > { %3763 = vmatprep.subr.bf16.mxu1 %v8843_v30  ;;  %v8461_v30 = vcombine.high %v501_v23, %v509_v24  ;;  %v8716_v37 = vcombine.low %v757_v25, %v765_v27  ;;  %v653_v23 = vld [vmem:[#allocation5 + $0x858] sm:$0xff] }
 0x137   : > { %3723 = vmatpush2.bf16.msra.mxu0 %v8586_v32  ;;  %v493_v32 = vld [vmem:[#allocation5 + $0x358] sm:$0xff] }
 0x138   : > { %3724 = vmatprep.subr.bf16.mxu0 %v8571_v34  ;;  %v8717_v34 = vcombine.high %v757_v25, %v765_v27  ;;  %v8444_v44 = vcombine.low %v485_v31, %v493_v32  ;;  %v629_v27 = vld [vmem:[#allocation5 + $0x798] sm:$0xff] }
 0x139   : > { %3764 = vmatpush2.bf16.msra.mxu1 %v8842_v33  ;;  %v741_v33 = vld [vmem:[#allocation5 + $0xb18] sm:$0xff] }
 0x13a   : > { %3765 = vmatprep.subr.bf16.mxu1 %v8827_v38  ;;  %v8445_v38 = vcombine.high %v485_v31, %v493_v32  ;;  %v8700_v45 = vcombine.low %v741_v33, %v749_v35  ;;  %v893_v31 = vld [vmem:[#allocation5 + $0xfd8] sm:$0xff] }
 0x13b   : > { %3725 = vmatpush2.bf16.msra.mxu0 %v8570_v40  ;;  %v477_v40 = vld [vmem:[#allocation5 + $0x2d8] sm:$0xff] }
 0x13c   : > { %3726 = vmatprep.subr.bf16.mxu0 %v8555_v42  ;;  %v8701_v42 = vcombine.high %v741_v33, %v749_v35  ;;  %v8428_v52 = vcombine.low %v469_v39, %v477_v40  ;;  %v613_v35 = vld [vmem:[#allocation5 + $0x718] sm:$0xff] }
 0x13d   : > { %3766 = vmatpush2.bf16.msra.mxu1 %v8826_v41  ;;  %v725_v41 = vld [vmem:[#allocation5 + $0xa98] sm:$0xff] }
 0x13e   : > { %3767 = vmatprep.subr.bf16.mxu1 %v8811_v46  ;;  %v8429_v46 = vcombine.high %v469_v39, %v477_v40  ;;  %v8684_v53 = vcombine.low %v725_v41, %v733_v43  ;;  %v877_v39 = vld [vmem:[#allocation5 + $0xf58] sm:$0xff] }
 0x13f   : > { %3727 = vmatpush2.bf16.msra.mxu0 %v8554_v48  ;;  %v461_v48 = vld [vmem:[#allocation5 + $0x258] sm:$0xff] }
 0x140   : > { %3728 = vmatprep.subr.bf16.mxu0 %v8539_v50  ;;  %v8685_v50 = vcombine.high %v725_v41, %v733_v43  ;;  %v8412_v62 = vcombine.low %v453_v47, %v461_v48  ;;  %v597_v43 = vld [vmem:[#allocation5 + $0x698] sm:$0xff] }
 0x141   : > { %3768 = vmatpush2.bf16.msra.mxu1 %v8810_v49  ;;  %v709_v49 = vld [vmem:[#allocation5 + $0xa18] sm:$0xff] }
 0x142   : > { %3769 = vmatprep.subr.bf16.mxu1 %v8795_v54  ;;  %v8413_v54 = vcombine.high %v453_v47, %v461_v48  ;;  %v8668_v63 = vcombine.low %v709_v49, %v717_v51  ;;  %v861_v47 = vld [vmem:[#allocation5 + $0xed8] sm:$0xff] }
 0x143   : > { %3729 = vmatpush2.bf16.msra.mxu0 %v8538_v56  ;;  %v445_v56 = vld [vmem:[#allocation5 + $0x1d8] sm:$0xff] }
 0x144   : > { %3730 = vmatprep.subr.bf16.mxu0 %v8523_v60  ;;  %v8669_v60 = vcombine.high %v709_v49, %v717_v51  ;;  %v8396_v6 = vcombine.low %v437_v55, %v445_v56  ;;  %v581_v51 = vld [vmem:[#allocation5 + $0x618] sm:$0xff] }
 0x145   : > { %3770 = vmatpush2.bf16.msra.mxu1 %v8794_v57  ;;  %v693_v57 = vld [vmem:[#allocation5 + $0x998] sm:$0xff] }
 0x146   : > { %3771 = vmatprep.subr.bf16.mxu1 %v8779_v0  ;;  %v8397_v0 = vcombine.high %v437_v55, %v445_v56  ;;  %v8652_v7 = vcombine.low %v693_v57, %v701_v61  ;;  %v845_v55 = vld [vmem:[#allocation5 + $0xe58] sm:$0xff] }
 0x147   : > { %3731 = vmatpush2.bf16.msra.mxu0 %v8522_v2  ;;  %v429_v2 = vld [vmem:[#allocation5 + $0x158] sm:$0xff] }
 0x148   : > { %3732 = vmatprep.subr.bf16.mxu0 %v8507_v4  ;;  %v8653_v4 = vcombine.high %v693_v57, %v701_v61  ;;  %v8380_v14 = vcombine.low %v421_v1, %v429_v2  ;;  %v565_v61 = vld [vmem:[#allocation5 + $0x598] sm:$0xff] }
 0x149   : > { %3772 = vmatpush2.bf16.msra.mxu1 %v8778_v3  ;;  %v677_v3 = vld [vmem:[#allocation5 + $0x918] sm:$0xff] }
 0x14a   : > { %3773 = vmatprep.subr.bf16.mxu1 %v8763_v8  ;;  %v8381_v8 = vcombine.high %v421_v1, %v429_v2  ;;  %v8636_v15 = vcombine.low %v677_v3, %v685_v5  ;;  %v829_v1 = vld [vmem:[#allocation5 + $0xdd8] sm:$0xff] }
 0x14b   : > { %3733 = vmatpush2.bf16.msra.mxu0 %v8506_v10  ;;  %v413_v10 = vld [vmem:[#allocation5 + $0xd8] sm:$0xff] }
 0x14c   : > { %3734 = vmatprep.subr.bf16.mxu0 %v8491_v12  ;;  %v8637_v12 = vcombine.high %v677_v3, %v685_v5  ;;  %v8364_v24 = vcombine.low %v405_v9, %v413_v10  ;;  %v549_v5 = vld [vmem:[#allocation5 + $0x518] sm:$0xff] }
 0x14d   : > { %3774 = vmatpush2.bf16.msra.mxu1 %v8762_v11  ;;  %v661_v11 = vld [vmem:[#allocation5 + $0x898] sm:$0xff] }
 0x14e   : > { %3775 = vmatprep.subr.bf16.mxu1 %v8747_v17  ;;  %v8365_v17 = vcombine.high %v405_v9, %v413_v10  ;;  %v8620_v25 = vcombine.low %v661_v11, %v669_v13  ;;  %v813_v9 = vld [vmem:[#allocation5 + $0xd58] sm:$0xff] }
 0x14f   : > { %3735 = vmatpush2.bf16.msra.mxu0 %v8490_v20  ;;  %v397_v20 = vld [vmem:[#allocation5 + $0x58] sm:$0xff] }
 0x150   : > { %3736 = vmatprep.subr.bf16.mxu0 %v8475_v22  ;;  %v8621_v22 = vcombine.high %v661_v11, %v669_v13  ;;  %v8348_v32 = vcombine.low %v389_v18, %v397_v20  ;;  %v533_v13 = vld [vmem:[#allocation5 + $0x498] sm:$0xff] }
 0x151   : > { %3776 = vmatpush2.bf16.msra.mxu1 %v8746_v21  ;;  %v645_v21 = vld [vmem:[#allocation5 + $0x818] sm:$0xff] }
 0x152   : > { %3777 = vmatprep.subr.bf16.mxu1 %v8731_v26  ;;  %v8349_v26 = vcombine.high %v389_v18, %v397_v20  ;;  %v8604_v33 = vcombine.low %v645_v21, %v653_v23  ;;  %v797_v18 = vld [vmem:[#allocation5 + $0xcd8] sm:$0xff] }
 0x153   : > { %3737 = vmatpush2.bf16.msra.mxu0 %v8474_v28  ;;  %v637_v28 = vld [vmem:[#allocation5 + $0x7d8] sm:$0xff] }
 0x154   : > { %3788 = vmatprep.subr.bf16.mxu0 %v8461_v30  ;;  %v8605_v30 = vcombine.high %v645_v21, %v653_v23  ;;  %v8588_v40 = vcombine.low %v629_v27, %v637_v28  ;;  %v902_v21 = vlaneseq }
 0x155   : > { %3778 = vmatpush2.bf16.msra.mxu1 %v8730_v29  ;;  %v885_v29 = vld [vmem:[#allocation5 + $0xf98] sm:$0xff] }
 0x156   : > { %3829 = vmatprep.subr.bf16.mxu1 %v8717_v34  ;;  %3739 = vmatmul.mubr.bf16.vlgmr.msra.gmra.mxu0 %v10803_v16  ;;  %v8589_v34 = vcombine.high %v629_v27, %v637_v28  ;;  %v8844_v41 = vcombine.low %v885_v29, %v893_v31  ;;  %v781_v28 = vld [vmem:[#allocation5 + $0xc58] sm:$0xff] }
 0x157   : > { %3789 = vmatpush1.bf16.msra.mxu0 %v8460_v36  ;;  %3820 = vmatprep.mubr.bf16.mxu0 %v10795_v58  ;;  %v621_v36 = vld [vmem:[#allocation5 + $0x758] sm:$0xff] }
 0x158   : > { %3780 = vmatmul.mubr.bf16.vlgmr.msra.gmra.mxu1 %v10805_v19  ;;  %3790 = vmatprep.subr.bf16.mxu0 %v8445_v38  ;;  %v8845_v38 = vcombine.high %v885_v29, %v893_v31  ;;  %v8572_v48 = vcombine.low %v613_v35, %v621_v36 }
 0x159   : > { %3830 = vmatpush1.bf16.msra.mxu1 %v8716_v37  ;;  %3861 = vmatprep.mubr.bf16.mxu1 %v10797_v59  ;;  %v869_v37 = vld [vmem:[#allocation5 + $0xf18] sm:$0xff] }
 0x15a   : > { %3831 = vmatprep.subr.bf16.mxu1 %v8701_v42  ;;  %v8573_v42 = vcombine.high %v613_v35, %v621_v36  ;;  %v8828_v49 = vcombine.low %v869_v37, %v877_v39  ;;  %v758_v35 = vld [vmem:[#allocation5 + $0xba0] sm:$0xff] }
 0x15b   : > { %3791 = vmatpush1.bf16.msra.mxu0 %v8444_v44  ;;  %v605_v44 = vld [vmem:[#allocation5 + $0x6d8] sm:$0xff] }
 0x15c   : > { %3792 = vmatprep.subr.bf16.mxu0 %v8429_v46  ;;  %v8829_v46 = vcombine.high %v869_v37, %v877_v39  ;;  %v8556_v56 = vcombine.low %v597_v43, %v605_v44  ;;  %v766_v37 = vld [vmem:[#allocation5 + $0xbe0] sm:$0xff] }
 0x15d   : > { %3832 = vmatpush1.bf16.msra.mxu1 %v8700_v45  ;;  %v853_v45 = vld [vmem:[#allocation5 + $0xe98] sm:$0xff] }
 0x15e   : > { %3833 = vmatprep.subr.bf16.mxu1 %v8685_v50  ;;  %v8557_v50 = vcombine.high %v597_v43, %v605_v44  ;;  %v8812_v57 = vcombine.low %v853_v45, %v861_v47  ;;  %v486_v43 = vld [vmem:[#allocation5 + $0x320] sm:$0xff] }
 0x15f   : > { %3793 = vmatpush1.bf16.msra.mxu0 %v8428_v52  ;;  %v589_v52 = vld [vmem:[#allocation5 + $0x658] sm:$0xff]  ;;  %v494_v44 = vld [vmem:[#allocation5 + $0x360] sm:$0xff] }
 0x160   : > { %3794 = vmatprep.subr.bf16.mxu0 %v8413_v54  ;;  %v8813_v54 = vcombine.high %v853_v45, %v861_v47  ;;  %v8540_v2 = vcombine.low %v581_v51, %v589_v52  ;;  %v742_v45 = vld [vmem:[#allocation5 + $0xb20] sm:$0xff] }
 0x161   : > { %3834 = vmatpush1.bf16.msra.mxu1 %v8684_v53  ;;  %v837_v53 = vld [vmem:[#allocation5 + $0xe18] sm:$0xff] }
 0x162   : > { %3835 = vmatprep.subr.bf16.mxu1 %v8669_v60  ;;  %v8541_v60 = vcombine.high %v581_v51, %v589_v52  ;;  %v8796_v3 = vcombine.low %v837_v53, %v845_v55  ;;  %v8718_v51 = vcombine.low %v758_v35, %v766_v37  ;;  %v8447_v52 = vcombine.high %v486_v43, %v494_v44 }
 0x163   : > { %3795 = vmatpush1.bf16.msra.mxu0 %v8412_v62  ;;  %v573_v62 = vld [vmem:[#allocation5 + $0x5d8] sm:$0xff] }
 0x164   : > { %3796 = vmatprep.subr.bf16.mxu0 %v8397_v0  ;;  %v8797_v0 = vcombine.high %v837_v53, %v845_v55  ;;  %v8524_v10 = vcombine.low %v565_v61, %v573_v62  ;;  %v470_v53 = vld [vmem:[#allocation5 + $0x2a0] sm:$0xff] }
 0x165   : > { %3836 = vmatpush1.bf16.msra.mxu1 %v8668_v63  ;;  %v821_v63 = vld [vmem:[#allocation5 + $0xd98] sm:$0xff]  ;;  %v726_v55 = vld [vmem:[#allocation5 + $0xaa0] sm:$0xff] }
 0x166   : > { %3837 = vmatprep.subr.bf16.mxu1 %v8653_v4  ;;  %v8525_v4 = vcombine.high %v565_v61, %v573_v62  ;;  %v8780_v11 = vcombine.low %v821_v63, %v829_v1 }
 0x167   : > { %3797 = vmatpush1.bf16.msra.mxu0 %v8396_v6  ;;  %v557_v6 = vld [vmem:[#allocation5 + $0x558] sm:$0xff] }
 0x168   : > { %3798 = vmatprep.subr.bf16.mxu0 %v8381_v8  ;;  %v8781_v8 = vcombine.high %v821_v63, %v829_v1  ;;  %v8508_v20 = vcombine.low %v549_v5, %v557_v6 }
 0x169   : > { %3838 = vmatpush1.bf16.msra.mxu1 %v8652_v7  ;;  %v805_v7 = vld [vmem:[#allocation5 + $0xd18] sm:$0xff] }
 0x16a   : > { %3839 = vmatprep.subr.bf16.mxu1 %v8637_v12  ;;  %v8509_v12 = vcombine.high %v549_v5, %v557_v6  ;;  %v462_v5 = vld [vmem:[#allocation5 + $0x260] sm:$0xff] }
 0x16b   : > { %3799 = vmatpush1.bf16.msra.mxu0 %v8380_v14  ;;  %v541_v14 = vld [vmem:[#allocation5 + $0x4d8] sm:$0xff]  ;;  %v710_v6 = vld [vmem:[#allocation5 + $0xa20] sm:$0xff] }
 0x16c   : > { %3800 = vmatprep.subr.bf16.mxu0 %v8365_v17  ;;  %v8765_v17 = vcombine.high %v805_v7, %v813_v9  ;;  %v8493_v23 = vcombine.high %v533_v13, %v541_v14  ;;  %v8492_v29 = vcombine.low %v533_v13, %v541_v14 }
 0x16d   : > { %3840 = vmatpush1.bf16.msra.mxu1 %v8636_v15  ;;  %v789_v15 = vld [vmem:[#allocation5 + $0xc98] sm:$0xff] }
 0x16e   : > { %3841 = vmatprep.subr.bf16.mxu1 %v8621_v22  ;;  %v8764_v22 = vcombine.low %v805_v7, %v813_v9  ;;  %v8749_v27 = vcombine.high %v789_v15, %v797_v18  ;;  %v8748_v31 = vcombine.low %v789_v15, %v797_v18 }
 0x16f   : > { %3801 = vmatpush1.bf16.msra.mxu0 %v8364_v24  ;;  %v517_v24 = vld [vmem:[#allocation5 + $0x418] sm:$0xff] }
 0x170   : > { %3802 = vmatprep.subr.bf16.mxu0 %v8349_v26  ;;  %v773_v26 = vld [vmem:[#allocation5 + $0xc18] sm:$0xff] }
 0x171   : > { %3842 = vmatpush1.bf16.msra.mxu1 %v8620_v25  ;;  %v525_v25 = vld [vmem:[#allocation5 + $0x458] sm:$0xff]  ;;  %v8733_v36 = vcombine.high %v773_v26, %v781_v28 }
 0x172   : > { %3843 = vmatprep.subr.bf16.mxu1 %v8605_v30  ;;  %v10819_v30 = vshrl.u32 %v902_v21, 7  ;;  %v8476_v39 = vcombine.low %v517_v24, %v525_v25  ;;  %v438_v21 = vld [vmem:[#allocation5 + $0x1a0] sm:$0xff] }
 0x173   : > { %3803 = vmatpush1.bf16.msra.mxu0 %v8348_v32  ;;  %v8477_v32 = vcombine.high %v517_v24, %v525_v25  ;;  %v694_v25 = vld [vmem:[#allocation5 + $0x9a0] sm:$0xff] }
 0x174   : > { %3804 = vmatprep.subr.bf16.mxu0 %v8589_v34  ;;  %v510_v34 = vld [vmem:[#allocation5 + $0x3e0] sm:$0xff]  ;;  %v10827_v47 = vsub.s32 1, %v10819_v30 }
 0x175   : > { %3844 = vmatpush1.bf16.msra.mxu1 %v8604_v33  ;;  %v502_v33 = vld [vmem:[#allocation5 + $0x3a0] sm:$0xff] }
 0x176   : > { %3845 = vmatprep.subr.bf16.mxu1 %v8845_v38  ;;  %v10821_v38 = vld [vmem:[#allocation7] sm:$0xff] }
 0x177   : > { %3805 = vmatpush2.bf16.msra.mxu0 %v8588_v40  ;;  %v10824_v40 = vsub.s32 0, %v10819_v30 }
 0x178   : > { %3806 = vmatprep.subr.bf16.mxu0 %v8573_v42  ;;  %v8463_v42 = vcombine.high %v502_v33, %v510_v34 }
 0x179   : > { %3846 = vmatpush2.bf16.msra.mxu1 %v8844_v41  ;;  %v8732_v41 = vcombine.low %v773_v26, %v781_v28  ;;  %v702_v26 = vld [vmem:[#allocation5 + $0x9e0] sm:$0xff] }
 0x17a   : > { %3847 = vmatprep.subr.bf16.mxu1 %v8829_v46  ;;  %v8719_v46 = vcombine.high %v758_v35, %v766_v37  ;;  %v686_v35 = vld [vmem:[#allocation5 + $0x960] sm:$0xff]  ;;  %v8654_v37 = vcombine.low %v694_v25, %v702_v26 }
 0x17b   : > { %3807 = vmatpush2.bf16.msra.mxu0 %v8572_v48  ;;  %v750_v48 = vld [vmem:[#allocation5 + $0xb60] sm:$0xff] }
 0x17c   : > { %3808 = vmatprep.subr.bf16.mxu0 %v8557_v50  ;;  %v8462_v50 = vcombine.low %v502_v33, %v510_v34  ;;  %v678_v33 = vld [vmem:[#allocation5 + $0x920] sm:$0xff]  ;;  %v8655_v34 = vcombine.high %v694_v25, %v702_v26 }
 0x17d   : > { %3848 = vmatpush2.bf16.msra.mxu1 %v8828_v49  ;;  %v905_v49 = vrot.slane %v10821_v38, %v10824_v40  ;;  %v590_v25 = vld [vmem:[#allocation5 + $0x660] sm:$0xff] }
 0x17e   : > { %3849 = vmatprep.subr.bf16.mxu1 %v8813_v54  ;;  %v478_v54 = vld [vmem:[#allocation5 + $0x2e0] sm:$0xff] }
 0x17f   : > { %3809 = vmatpush2.bf16.msra.mxu0 %v8556_v56  ;;  %v909_v56 = vrot.slane %v10821_v38, %v10827_v47  ;;  %v8430_v15 = vcombine.low %v470_v53, %v478_v54  ;;  %v838_v26 = vld [vmem:[#allocation5 + $0xe20] sm:$0xff] }
 0x180   : > { %3810 = vmatprep.subr.bf16.mxu0 %v8541_v60  ;;  %v734_v60 = vld [vmem:[#allocation5 + $0xae0] sm:$0xff] }
 0x181   : > { %3850 = vmatpush2.bf16.msra.mxu1 %v8812_v57  ;;  %v8703_v57 = vcombine.high %v742_v45, %v750_v48  ;;  %v8686_v18 = vcombine.low %v726_v55, %v734_v60 }
 0x182   : > { %3851 = vmatprep.subr.bf16.mxu1 %v8797_v0  ;;  %v8446_v0 = vcombine.low %v486_v43, %v494_v44  ;;  %v662_v43 = vld [vmem:[#allocation5 + $0x8a0] sm:$0xff]  ;;  %v8639_v44 = vcombine.high %v678_v33, %v686_v35 }
 0x183   : > { %3811 = vmatpush2.bf16.msra.mxu0 %v8540_v2  ;;  %v8702_v2 = vcombine.low %v742_v45, %v750_v48  ;;  %v670_v45 = vld [vmem:[#allocation5 + $0x8e0] sm:$0xff]  ;;  %v8638_v48 = vcombine.low %v678_v33, %v686_v35 }
 0x184   : > { %3812 = vmatprep.subr.bf16.mxu0 %v8525_v4  ;;  %v454_v4 = vld [vmem:[#allocation5 + $0x220] sm:$0xff] }
 0x185   : > { %3852 = vmatpush2.bf16.msra.mxu1 %v8796_v3  ;;  %v8431_v3 = vcombine.high %v470_v53, %v478_v54  ;;  %v8623_v53 = vcombine.high %v662_v43, %v670_v45  ;;  %v654_v54 = vld [vmem:[#allocation5 + $0x860] sm:$0xff] }
 0x186   : > { %3853 = vmatprep.subr.bf16.mxu1 %v8781_v8  ;;  %v566_v33 = vld [vmem:[#allocation5 + $0x5a0] sm:$0xff] }
 0x187   : > { %3813 = vmatpush2.bf16.msra.mxu0 %v8524_v10  ;;  %v8687_v10 = vcombine.high %v726_v55, %v734_v60  ;;  %v630_v60 = vld [vmem:[#allocation5 + $0x7a0] sm:$0xff] }
 0x188   : > { %3814 = vmatprep.subr.bf16.mxu0 %v8509_v12  ;;  %v822_v35 = vld [vmem:[#allocation5 + $0xda0] sm:$0xff] }
 0x189   : > { %3854 = vmatpush2.bf16.msra.mxu1 %v8780_v11  ;;  %v718_v11 = vld [vmem:[#allocation5 + $0xa60] sm:$0xff] }
 0x18a   : > { %3855 = vmatprep.subr.bf16.mxu1 %v8765_v17  ;;  %v8671_v24 = vcombine.high %v710_v6, %v718_v11  ;;  %v8670_v28 = vcombine.low %v710_v6, %v718_v11  ;;  %v870_v6 = vld [vmem:[#allocation5 + $0xf20] sm:$0xff] }
 0x18b   : > { %3815 = vmatpush2.bf16.msra.mxu0 %v8508_v20  ;;  %v8415_v20 = vcombine.high %v454_v4, %v462_v5 }
 0x18c   : > { %3816 = vmatprep.subr.bf16.mxu0 %v8493_v23 }
 0x18d   : > { %3856 = vmatpush2.bf16.msra.mxu1 %v8764_v22  ;;  %v446_v22 = vld [vmem:[#allocation5 + $0x1e0] sm:$0xff] }
 0x18e   : > { %3857 = vmatprep.subr.bf16.mxu1 %v8749_v27  ;;  %v8414_v27 = vcombine.low %v454_v4, %v462_v5  ;;  %v614_v4 = vld [vmem:[#allocation5 + $0x720] sm:$0xff] }
 0x18f   : > { %3817 = vmatpush2.bf16.msra.mxu0 %v8492_v29  ;;  %v8399_v29 = vcombine.high %v438_v21, %v446_v22  ;;  %v622_v5 = vld [vmem:[#allocation5 + $0x760] sm:$0xff] }
 0x190   : > { %3818 = vmatprep.subr.bf16.mxu0 %v8477_v32  ;;  %v430_v32 = vld [vmem:[#allocation5 + $0x160] sm:$0xff] }
 0x191   : > { %3858 = vmatpush2.bf16.msra.mxu1 %v8748_v31  ;;  %v422_v31 = vld [vmem:[#allocation5 + $0x120] sm:$0xff] }
 0x192   : > { %3859 = vmatprep.subr.bf16.mxu1 %v8733_v36  ;;  %v8398_v36 = vcombine.low %v438_v21, %v446_v22  ;;  %v8574_v21 = vcombine.low %v614_v4, %v622_v5 }
 0x193   : > { %3819 = vmatpush2.bf16.msra.mxu0 %v8476_v39  ;;  %v8383_v39 = vcombine.high %v422_v31, %v430_v32 }
 0x194   : > { %3870 = vmatprep.subr.bf16.mxu0 %v8463_v42  ;;  %v414_v42 = vld [vmem:[#allocation5 + $0xe0] sm:$0xff] }
 0x195   : > { %3860 = vmatpush2.bf16.msra.mxu1 %v8732_v41  ;;  %v406_v41 = vld [vmem:[#allocation5 + $0xa0] sm:$0xff] }
 0x196   : > { %3911 = vmatprep.subr.bf16.mxu1 %v8719_v46  ;;  %v3576_v61 = vpop.f32.mrf.mxu0  ;;  %3821 = vmatmul.mubr.bf16.vlgmr.msra.gmra.mxu0 %v10803_v16  ;;  %v8382_v46 = vcombine.low %v422_v31, %v430_v32  ;;  %v8366_v55 = vcombine.low %v406_v41, %v414_v42 }
 0x197   : > { %v3577_v62 = vadd.f32 %v3576_v61, %v905_v49  ;;  %3871 = vmatpush1.bf16.msra.mxu0 %v8462_v50  ;;  %3902 = vmatprep.mubr.bf16.mxu0 %v10795_v58  ;;  %v8367_v49 = vcombine.high %v406_v41, %v414_v42  ;;  %v390_v50 = vld [vmem:[#allocation5 + $0x20] sm:$0xff] }
 0x198   : > { %v3617_v63 = vpop.f32.mrf.mxu1  ;;  %3862 = vmatmul.mubr.bf16.vlgmr.msra.gmra.mxu1 %v10805_v19  ;;  %v3578_v1 = vpop.f32.mrf.mxu0  ;;  %3872 = vmatprep.subr.bf16.mxu0 %v8447_v52  ;;  %v646_v52 = vld [vmem:[#allocation5 + $0x820] sm:$0xff] }
 0x199   : > { %3912 = vmatpush1.bf16.msra.mxu1 %v8718_v51  ;;  %v10835_v7 = vadd.f32 %v3617_v63, %v3577_v62  ;;  %v3579_v8 = vadd.f32 %v3578_v1, %v909_v56  ;;  %3943 = vmatprep.mubr.bf16.mxu1 %v10797_v59  ;;  %v398_v51 = vld [vmem:[#allocation5 + $0x60] sm:$0xff]  ;;  %v8622_v56 = vcombine.low %v662_v43, %v670_v45 }
 0x19a   : > { %v3619_v9 = vpop.f32.mrf.mxu1  ;;  %3913 = vmatprep.subr.bf16.mxu1 %v8703_v57  ;;  %v3580_v12 = vpop.f32.mrf.mxu0  ;;  %v8351_v57 = vcombine.high %v390_v50, %v398_v51  ;;  %v638_v61 = vld [vmem:[#allocation5 + $0x7e0] sm:$0xff]  ;;  %v8607_v63 = vcombine.high %v646_v52, %v654_v54  ;;  %v8350_v1 = vcombine.low %v390_v50, %v398_v51 }
 0x19b   : > { %v10839_v13 = vadd.f32 %v3619_v9, %v3579_v8  ;;  %3873 = vmatpush1.bf16.msra.mxu0 %v8446_v0  ;;  %v886_v62 = vld [vmem:[#allocation5 + $0xfa0] sm:$0xff]  ;;  %v8575_v12 = vcombine.high %v614_v4, %v622_v5 }
 0x19c   : > { %v3621_v14 = vpop.f32.mrf.mxu1  ;;  %v3581_v17 = vpop.f32.mrf.mxu0  ;;  %3874 = vmatprep.subr.bf16.mxu0 %v8431_v3  ;;  %v894_v0 = vld [vmem:[#allocation5 + $0xfe0] sm:$0xff]  ;;  %v8591_v3 = vcombine.high %v630_v60, %v638_v61 }
 0x19d   : > { %3914 = vmatpush1.bf16.msra.mxu1 %v8702_v2  ;;  %v8606_v2 = vcombine.low %v646_v52, %v654_v54  ;;  %v8847_v8 = vcombine.high %v886_v62, %v894_v0  ;;  %v878_v9 = vld [vmem:[#allocation5 + $0xf60] sm:$0xff]  ;;  %v8846_v11 = vcombine.low %v886_v62, %v894_v0 }
 0x19e   : > { %v3622_v23 = vpop.f32.mrf.mxu1  ;;  %3915 = vmatprep.subr.bf16.mxu1 %v8687_v10  ;;  %v8590_v10 = vcombine.low %v630_v60, %v638_v61  ;;  %v598_v14 = vld [vmem:[#allocation5 + $0x6a0] sm:$0xff]  ;;  %v8830_v22 = vcombine.low %v870_v6, %v878_v9 }
 0x19f   : > { %3875 = vmatpush1.bf16.msra.mxu0 %v8430_v15  ;;  %v606_v15 = vld [vmem:[#allocation5 + $0x6e0] sm:$0xff] }
 0x1a0   : > { %3876 = vmatprep.subr.bf16.mxu0 %v8415_v20  ;;  %v854_v17 = vld [vmem:[#allocation5 + $0xea0] sm:$0xff]  ;;  %v8559_v23 = vcombine.high %v598_v14, %v606_v15 }
 0x1a1   : > { %3916 = vmatpush1.bf16.msra.mxu1 %v8686_v18  ;;  %v8831_v18 = vcombine.high %v870_v6, %v878_v9  ;;  %v862_v20 = vld [vmem:[#allocation5 + $0xee0] sm:$0xff]  ;;  %v503_v6 = vld [vmem:[#allocation5 + $0x3a8] sm:$0xff] }
 0x1a2   : > { %3917 = vmatprep.subr.bf16.mxu1 %v8671_v24  ;;  %v582_v24 = vld [vmem:[#allocation5 + $0x620] sm:$0xff]  ;;  %v8814_v31 = vcombine.low %v854_v17, %v862_v20  ;;  %v759_v9 = vld [vmem:[#allocation5 + $0xba8] sm:$0xff] }
 0x1a3   : > { %3877 = vmatpush1.bf16.msra.mxu0 %v8414_v27  ;;  %v8815_v27 = vcombine.high %v854_v17, %v862_v20  ;;  %v8543_v32 = vcombine.high %v582_v24, %v590_v25  ;;  %v550_v43 = vld [vmem:[#allocation5 + $0x520] sm:$0xff]  ;;  %v495_v20 = vld [vmem:[#allocation5 + $0x368] sm:$0xff] }
 0x1a4   : > { %3878 = vmatprep.subr.bf16.mxu0 %v8399_v29  ;;  %v8558_v29 = vcombine.low %v598_v14, %v606_v15  ;;  %v806_v45 = vld [vmem:[#allocation5 + $0xd20] sm:$0xff]  ;;  %v10842_v14 = vsub.s32 2, %v10819_v30 }
 0x1a5   : > { %3918 = vmatpush1.bf16.msra.mxu1 %v8670_v28  ;;  %v846_v28 = vld [vmem:[#allocation5 + $0xe60] sm:$0xff] }
 0x1a6   : > { %3919 = vmatprep.subr.bf16.mxu1 %v8655_v34  ;;  %v574_v34 = vld [vmem:[#allocation5 + $0x5e0] sm:$0xff]  ;;  %v8798_v41 = vcombine.low %v838_v26, %v846_v28 }
 0x1a7   : > { %3879 = vmatpush1.bf16.msra.mxu0 %v8398_v36  ;;  %v8799_v36 = vcombine.high %v838_v26, %v846_v28  ;;  %v8527_v42 = vcombine.high %v566_v33, %v574_v34  ;;  %v534_v52 = vld [vmem:[#allocation5 + $0x4a0] sm:$0xff] }
 0x1a8   : > { %3880 = vmatprep.subr.bf16.mxu0 %v8383_v39  ;;  %v8542_v39 = vcombine.low %v582_v24, %v590_v25  ;;  %v790_v54 = vld [vmem:[#allocation5 + $0xca0] sm:$0xff]  ;;  %v751_v24 = vld [vmem:[#allocation5 + $0xb68] sm:$0xff]  ;;  %v913_v25 = vrot.slane %v10821_v38, %v10842_v14 }
 0x1a9   : > { %3920 = vmatpush1.bf16.msra.mxu1 %v8654_v37  ;;  %v830_v37 = vld [vmem:[#allocation5 + $0xde0] sm:$0xff] }
 0x1aa   : > { %3921 = vmatprep.subr.bf16.mxu1 %v8639_v44  ;;  %v558_v44 = vld [vmem:[#allocation5 + $0x560] sm:$0xff]  ;;  %v8782_v50 = vcombine.low %v822_v35, %v830_v37 }
 0x1ab   : > { %3881 = vmatpush1.bf16.msra.mxu0 %v8382_v46  ;;  %v8783_v46 = vcombine.high %v822_v35, %v830_v37  ;;  %v8511_v51 = vcombine.high %v550_v43, %v558_v44  ;;  %v518_v62 = vld [vmem:[#allocation5 + $0x420] sm:$0xff] }
 0x1ac   : > { %3882 = vmatprep.subr.bf16.mxu0 %v8367_v49  ;;  %v8526_v49 = vcombine.low %v566_v33, %v574_v34  ;;  %v774_v0 = vld [vmem:[#allocation5 + $0xc20] sm:$0xff]  ;;  %v727_v34 = vld [vmem:[#allocation5 + $0xaa8] sm:$0xff] }
 0x1ad   : > { %3922 = vmatpush1.bf16.msra.mxu1 %v8638_v48  ;;  %v814_v48 = vld [vmem:[#allocation5 + $0xd60] sm:$0xff] }
 0x1ae   : > { %3923 = vmatprep.subr.bf16.mxu1 %v8623_v53  ;;  %v542_v53 = vld [vmem:[#allocation5 + $0x4e0] sm:$0xff]  ;;  %v8766_v60 = vcombine.low %v806_v45, %v814_v48 }
 0x1af   : > { %3883 = vmatpush1.bf16.msra.mxu0 %v8366_v55  ;;  %v8767_v55 = vcombine.high %v806_v45, %v814_v48  ;;  %v8495_v61 = vcombine.high %v534_v52, %v542_v53 }
 0x1b0   : > { %3884 = vmatprep.subr.bf16.mxu0 %v8351_v57  ;;  %v8510_v57 = vcombine.low %v550_v43, %v558_v44 }
 0x1b1   : > { %3924 = vmatpush1.bf16.msra.mxu1 %v8622_v56  ;;  %v798_v56 = vld [vmem:[#allocation5 + $0xce0] sm:$0xff] }
 0x1b2   : > { %3925 = vmatprep.subr.bf16.mxu1 %v8607_v63  ;;  %v526_v63 = vld [vmem:[#allocation5 + $0x460] sm:$0xff]  ;;  %v8750_v4 = vcombine.low %v790_v54, %v798_v56 }
 0x1b3   : > { %3885 = vmatpush1.bf16.msra.mxu0 %v8350_v1  ;;  %v8751_v1 = vcombine.high %v790_v54, %v798_v56  ;;  %v8479_v5 = vcombine.high %v518_v62, %v526_v63 }
 0x1b4   : > { %3886 = vmatprep.subr.bf16.mxu0 %v8591_v3  ;;  %v8494_v3 = vcombine.low %v534_v52, %v542_v53  ;;  %v711_v52 = vld [vmem:[#allocation5 + $0xa28] sm:$0xff] }
 0x1b5   : > { %3926 = vmatpush1.bf16.msra.mxu1 %v8606_v2  ;;  %v782_v2 = vld [vmem:[#allocation5 + $0xc60] sm:$0xff]  ;;  %v719_v53 = vld [vmem:[#allocation5 + $0xa68] sm:$0xff] }
 0x1b6   : > { %3927 = vmatprep.subr.bf16.mxu1 %v8847_v8  ;;  %v511_v8 = vld [vmem:[#allocation5 + $0x3e8] sm:$0xff]  ;;  %v8734_v15 = vcombine.low %v774_v0, %v782_v2 }
 0x1b7   : > { %3887 = vmatpush2.bf16.msra.mxu0 %v8590_v10  ;;  %v8735_v10 = vcombine.high %v774_v0, %v782_v2  ;;  %v8465_v17 = vcombine.high %v503_v6, %v511_v8  ;;  %v8464_v26 = vcombine.low %v503_v6, %v511_v8  ;;  %v439_v0 = vld [vmem:[#allocation5 + $0x1a8] sm:$0xff] }
 0x1b8   : > { %3888 = vmatprep.subr.bf16.mxu0 %v8575_v12  ;;  %v8478_v12 = vcombine.low %v518_v62, %v526_v63  ;;  %v8673_v63 = vcombine.high %v711_v52, %v719_v53  ;;  %v695_v2 = vld [vmem:[#allocation5 + $0x9a8] sm:$0xff] }
 0x1b9   : > { %3928 = vmatpush2.bf16.msra.mxu1 %v8846_v11  ;;  %v767_v11 = vld [vmem:[#allocation5 + $0xbe8] sm:$0xff] }
 0x1ba   : > { %3929 = vmatprep.subr.bf16.mxu1 %v8831_v18  ;;  %v487_v18 = vld [vmem:[#allocation5 + $0x328] sm:$0xff] }
 0x1bb   : > { %3889 = vmatpush2.bf16.msra.mxu0 %v8574_v21  ;;  %v743_v21 = vld [vmem:[#allocation5 + $0xb28] sm:$0xff]  ;;  %v8449_v28 = vcombine.high %v487_v18, %v495_v20 }
 0x1bc   : > { %3890 = vmatprep.subr.bf16.mxu0 %v8559_v23  ;;  %v10845_v23 = vsub.s32 3, %v10819_v30  ;;  %v8705_v33 = vcombine.high %v743_v21, %v751_v24  ;;  %v8704_v43 = vcombine.low %v743_v21, %v751_v24  ;;  %v407_v21 = vld [vmem:[#allocation5 + $0xa8] sm:$0xff] }
 0x1bd   : > { %3930 = vmatpush2.bf16.msra.mxu1 %v8830_v22  ;;  %v8721_v22 = vcombine.high %v759_v9, %v767_v11  ;;  %v663_v24 = vld [vmem:[#allocation5 + $0x8a8] sm:$0xff] }
 0x1be   : > { %3931 = vmatprep.subr.bf16.mxu1 %v8815_v27  ;;  %v8720_v27 = vcombine.low %v759_v9, %v767_v11  ;;  %v423_v9 = vld [vmem:[#allocation5 + $0x128] sm:$0xff] }
 0x1bf   : > { %3891 = vmatpush2.bf16.msra.mxu0 %v8558_v29  ;;  %v471_v29 = vld [vmem:[#allocation5 + $0x2a8] sm:$0xff] }
 0x1c0   : > { %3892 = vmatprep.subr.bf16.mxu0 %v8543_v32  ;;  %v917_v32 = vrot.slane %v10821_v38, %v10845_v23  ;;  %v679_v11 = vld [vmem:[#allocation5 + $0x928] sm:$0xff] }
 0x1c1   : > { %3932 = vmatpush2.bf16.msra.mxu1 %v8814_v31  ;;  %v479_v31 = vld [vmem:[#allocation5 + $0x2e8] sm:$0xff] }
 0x1c2   : > { %3933 = vmatprep.subr.bf16.mxu1 %v8799_v36  ;;  %v735_v36 = vld [vmem:[#allocation5 + $0xae8] sm:$0xff]  ;;  %v8433_v44 = vcombine.high %v471_v29, %v479_v31  ;;  %v8432_v56 = vcombine.low %v471_v29, %v479_v31 }
 0x1c3   : > { %3893 = vmatpush2.bf16.msra.mxu0 %v8542_v39  ;;  %v8689_v48 = vcombine.high %v727_v34, %v735_v36  ;;  %v391_v31 = vld [vmem:[#allocation5 + $0x28] sm:$0xff] }
 0x1c4   : > { %3894 = vmatprep.subr.bf16.mxu0 %v8527_v42 }
 0x1c5   : > { %3934 = vmatpush2.bf16.msra.mxu1 %v8798_v41  ;;  %v8448_v41 = vcombine.low %v487_v18, %v495_v20 }
 0x1c6   : > { %3935 = vmatprep.subr.bf16.mxu1 %v8783_v46 }
 0x1c7   : > { %3895 = vmatpush2.bf16.msra.mxu0 %v8526_v49  ;;  %v455_v49 = vld [vmem:[#allocation5 + $0x228] sm:$0xff] }
 0x1c8   : > { %3896 = vmatprep.subr.bf16.mxu0 %v8511_v51 }
 0x1c9   : > { %3936 = vmatpush2.bf16.msra.mxu1 %v8782_v50  ;;  %v463_v50 = vld [vmem:[#allocation5 + $0x268] sm:$0xff] }
 0x1ca   : > { %3937 = vmatprep.subr.bf16.mxu1 %v8767_v55 }
 0x1cb   : > { %3897 = vmatpush2.bf16.msra.mxu0 %v8510_v57 }
 0x1cc   : > { %3898 = vmatprep.subr.bf16.mxu0 %v8495_v61  ;;  %v8417_v61 = vcombine.high %v455_v49, %v463_v50 }
 0x1cd   : > { %3938 = vmatpush2.bf16.msra.mxu1 %v8766_v60  ;;  %v8688_v60 = vcombine.low %v727_v34, %v735_v36  ;;  %v655_v34 = vld [vmem:[#allocation5 + $0x868] sm:$0xff] }
 0x1ce   : > { %3939 = vmatprep.subr.bf16.mxu1 %v8751_v1  ;;  %v447_v1 = vld [vmem:[#allocation5 + $0x1e8] sm:$0xff] }
 0x1cf   : > { %3899 = vmatpush2.bf16.msra.mxu0 %v8494_v3  ;;  %v703_v3 = vld [vmem:[#allocation5 + $0x9e8] sm:$0xff]  ;;  %v8401_v6 = vcombine.high %v439_v0, %v447_v1 }
 0x1d0   : > { %3900 = vmatprep.subr.bf16.mxu0 %v8479_v5  ;;  %v8672_v5 = vcombine.low %v711_v52, %v719_v53  ;;  %v8657_v8 = vcombine.high %v695_v2, %v703_v3  ;;  %v871_v52 = vld [vmem:[#allocation5 + $0xf28] sm:$0xff] }
 0x1d1   : > { %3940 = vmatpush2.bf16.msra.mxu1 %v8750_v4  ;;  %v8416_v4 = vcombine.low %v455_v49, %v463_v50  ;;  %v615_v50 = vld [vmem:[#allocation5 + $0x728] sm:$0xff] }
 0x1d2   : > { %3941 = vmatprep.subr.bf16.mxu1 %v8735_v10  ;;  %v431_v10 = vld [vmem:[#allocation5 + $0x168] sm:$0xff] }
 0x1d3   : > { %3901 = vmatpush2.bf16.msra.mxu0 %v8478_v12  ;;  %v687_v12 = vld [vmem:[#allocation5 + $0x968] sm:$0xff]  ;;  %v8385_v18 = vcombine.high %v423_v9, %v431_v10 }
 0x1d4   : > { %3952 = vmatprep.subr.bf16.mxu0 %v8465_v17  ;;  %v8656_v17 = vcombine.low %v695_v2, %v703_v3  ;;  %v8641_v20 = vcombine.high %v679_v11, %v687_v12  ;;  %v879_v53 = vld [vmem:[#allocation5 + $0xf68] sm:$0xff] }
 0x1d5   : > { %3942 = vmatpush2.bf16.msra.mxu1 %v8734_v15  ;;  %v8400_v15 = vcombine.low %v439_v0, %v447_v1  ;;  %v863_v0 = vld [vmem:[#allocation5 + $0xee8] sm:$0xff]  ;;  %v8832_v2 = vcombine.low %v871_v52, %v879_v53 }
 0x1d6   : > { %3993 = vmatprep.subr.bf16.mxu1 %v8721_v22  ;;  %v3658_v35 = vpop.f32.mrf.mxu0  ;;  %3903 = vmatmul.mubr.bf16.vlgmr.msra.gmra.mxu0 %v10803_v16  ;;  %v415_v22 = vld [vmem:[#allocation5 + $0xe8] sm:$0xff] }
 0x1d7   : > { %v3659_v37 = vadd.f32 %v3658_v35, %v913_v25  ;;  %3953 = vmatpush1.bf16.msra.mxu0 %v8464_v26  ;;  %3984 = vmatprep.mubr.bf16.mxu0 %v10795_v58  ;;  %v671_v25 = vld [vmem:[#allocation5 + $0x8e8] sm:$0xff]  ;;  %v8384_v26 = vcombine.low %v423_v9, %v431_v10  ;;  %v8368_v35 = vcombine.low %v407_v21, %v415_v22 }
 0x1d8   : > { %v3699_v39 = vpop.f32.mrf.mxu1  ;;  %3944 = vmatmul.mubr.bf16.vlgmr.msra.gmra.mxu1 %v10805_v19  ;;  %v3660_v42 = vpop.f32.mrf.mxu0  ;;  %3954 = vmatprep.subr.bf16.mxu0 %v8449_v28  ;;  %v8369_v28 = vcombine.high %v407_v21, %v415_v22  ;;  %v8625_v29 = vcombine.high %v663_v24, %v671_v25  ;;  %v8624_v36 = vcombine.low %v663_v24, %v671_v25  ;;  %v847_v9 = vld [vmem:[#allocation5 + $0xe68] sm:$0xff] }
 0x1d9   : > { %3994 = vmatpush1.bf16.msra.mxu1 %v8720_v27  ;;  %v10853_v45 = vadd.f32 %v3699_v39, %v3659_v37  ;;  %v3661_v38 = vadd.f32 %v3660_v42, %v917_v32  ;;  %4025 = vmatprep.mubr.bf16.mxu1 %v10797_v59  ;;  %v8640_v27 = vcombine.low %v679_v11, %v687_v12  ;;  %v399_v32 = vld [vmem:[#allocation5 + $0x68] sm:$0xff] }
 0x1da   : > { %v3701_v46 = vpop.f32.mrf.mxu1  ;;  %3995 = vmatprep.subr.bf16.mxu1 %v8705_v33  ;;  %v3662_v51 = vpop.f32.mrf.mxu0  ;;  %v647_v33 = vld [vmem:[#allocation5 + $0x828] sm:$0xff]  ;;  %v8353_v37 = vcombine.high %v391_v31, %v399_v32 }
 0x1db   : > { %v10857_v54 = vadd.f32 %v3701_v46, %v3661_v38  ;;  %3955 = vmatpush1.bf16.msra.mxu0 %v8448_v41  ;;  %v8609_v39 = vcombine.high %v647_v33, %v655_v34  ;;  %v631_v41 = vld [vmem:[#allocation5 + $0x7a8] sm:$0xff]  ;;  %v8352_v38 = vcombine.low %v391_v31, %v399_v32  ;;  %v8608_v46 = vcombine.low %v647_v33, %v655_v34 }
 0x1dc   : > { %v3703_v55 = vpop.f32.mrf.mxu1  ;;  %v3663_v57 = vpop.f32.mrf.mxu0  ;;  %3956 = vmatprep.subr.bf16.mxu0 %v8433_v44  ;;  %v639_v42 = vld [vmem:[#allocation5 + $0x7e8] sm:$0xff] }
 0x1dd   : > { %3996 = vmatpush1.bf16.msra.mxu1 %v8704_v43  ;;  %v887_v43 = vld [vmem:[#allocation5 + $0xfa8] sm:$0xff]  ;;  %v8592_v55 = vcombine.low %v631_v41, %v639_v42 }
 0x1de   : > { %v3704_v62 = vpop.f32.mrf.mxu1  ;;  %3997 = vmatprep.subr.bf16.mxu1 %v8689_v48  ;;  %v895_v44 = vld [vmem:[#allocation5 + $0xfe8] sm:$0xff]  ;;  %v8593_v48 = vcombine.high %v631_v41, %v639_v42 }
 0x1df   : > { %3957 = vmatpush1.bf16.msra.mxu0 %v8432_v56  ;;  %v8849_v49 = vcombine.high %v887_v43, %v895_v44  ;;  %v623_v51 = vld [vmem:[#allocation5 + $0x768] sm:$0xff]  ;;  %v8848_v56 = vcombine.low %v887_v43, %v895_v44 }
 0x1e0   : > { %3958 = vmatprep.subr.bf16.mxu0 %v8417_v61  ;;  %v8577_v57 = vcombine.high %v615_v50, %v623_v51  ;;  %v599_v61 = vld [vmem:[#allocation5 + $0x6a8] sm:$0xff]  ;;  %v8576_v1 = vcombine.low %v615_v50, %v623_v51 }
 0x1e1   : > { %3998 = vmatpush1.bf16.msra.mxu1 %v8688_v60  ;;  %v8833_v60 = vcombine.high %v871_v52, %v879_v53  ;;  %v607_v62 = vld [vmem:[#allocation5 + $0x6e8] sm:$0xff] }
 0x1e2   : > { %3999 = vmatprep.subr.bf16.mxu1 %v8673_v63  ;;  %v855_v63 = vld [vmem:[#allocation5 + $0xea8] sm:$0xff]  ;;  %v8561_v3 = vcombine.high %v599_v61, %v607_v62  ;;  %v8560_v10 = vcombine.low %v599_v61, %v607_v62  ;;  %v768_v61 = vld [vmem:[#allocation5 + $0xbf0] sm:$0xff] }
 0x1e3   : > { %3959 = vmatpush1.bf16.msra.mxu0 %v8416_v4  ;;  %v8817_v4 = vcombine.high %v855_v63, %v863_v0  ;;  %v8816_v11 = vcombine.low %v855_v63, %v863_v0  ;;  %v831_v21 = vld [vmem:[#allocation5 + $0xde8] sm:$0xff]  ;;  %v920_v63 = vsub.s32 4, %v10819_v30 }
 0x1e4   : > { %3960 = vmatprep.subr.bf16.mxu0 %v8401_v6  ;;  %v591_v6 = vld [vmem:[#allocation5 + $0x668] sm:$0xff] }
 0x1e5   : > { %4000 = vmatpush1.bf16.msra.mxu1 %v8672_v5  ;;  %v583_v5 = vld [vmem:[#allocation5 + $0x628] sm:$0xff] }
 0x1e6   : > { %4001 = vmatprep.subr.bf16.mxu1 %v8657_v8  ;;  %v839_v8 = vld [vmem:[#allocation5 + $0xe28] sm:$0xff]  ;;  %v8545_v12 = vcombine.high %v583_v5, %v591_v6  ;;  %v8544_v22 = vcombine.low %v583_v5, %v591_v6  ;;  %v496_v5 = vld [vmem:[#allocation5 + $0x370] sm:$0xff] }
 0x1e7   : > { %3961 = vmatpush1.bf16.msra.mxu0 %v8400_v15  ;;  %v8801_v15 = vcombine.high %v839_v8, %v847_v9  ;;  %v8800_v24 = vcombine.low %v839_v8, %v847_v9  ;;  %v815_v31 = vld [vmem:[#allocation5 + $0xd68] sm:$0xff]  ;;  %v744_v6 = vld [vmem:[#allocation5 + $0xb30] sm:$0xff]  ;;  %v10861_v9 = vld [vmem:[#allocation7] sm:$0xff] }
 0x1e8   : > { %3962 = vmatprep.subr.bf16.mxu0 %v8385_v18  ;;  %v575_v18 = vld [vmem:[#allocation5 + $0x5e8] sm:$0xff]  ;;  %v752_v8 = vld [vmem:[#allocation5 + $0xb70] sm:$0xff] }
 0x1e9   : > { %4002 = vmatpush1.bf16.msra.mxu1 %v8656_v17  ;;  %v567_v17 = vld [vmem:[#allocation5 + $0x5a8] sm:$0xff] }
 0x1ea   : > { %4003 = vmatprep.subr.bf16.mxu1 %v8641_v20  ;;  %v823_v20 = vld [vmem:[#allocation5 + $0xda8] sm:$0xff]  ;;  %v8529_v25 = vcombine.high %v567_v17, %v575_v18  ;;  %v8528_v32 = vcombine.low %v567_v17, %v575_v18  ;;  %v8707_v18 = vcombine.high %v744_v6, %v752_v8 }
 0x1eb   : > { %3963 = vmatpush1.bf16.msra.mxu0 %v8384_v26  ;;  %v8785_v26 = vcombine.high %v823_v20, %v831_v21  ;;  %v8784_v33 = vcombine.low %v823_v20, %v831_v21  ;;  %v799_v41 = vld [vmem:[#allocation5 + $0xce8] sm:$0xff]  ;;  %v472_v20 = vld [vmem:[#allocation5 + $0x2b0] sm:$0xff] }
 0x1ec   : > { %3964 = vmatprep.subr.bf16.mxu0 %v8369_v28  ;;  %v559_v28 = vld [vmem:[#allocation5 + $0x568] sm:$0xff]  ;;  %v480_v21 = vld [vmem:[#allocation5 + $0x2f0] sm:$0xff] }
 0x1ed   : > { %4004 = vmatpush1.bf16.msra.mxu1 %v8640_v27  ;;  %v551_v27 = vld [vmem:[#allocation5 + $0x528] sm:$0xff] }
 0x1ee   : > { %4005 = vmatprep.subr.bf16.mxu1 %v8625_v29  ;;  %v807_v29 = vld [vmem:[#allocation5 + $0xd28] sm:$0xff]  ;;  %v8513_v34 = vcombine.high %v551_v27, %v559_v28  ;;  %v8512_v42 = vcombine.low %v551_v27, %v559_v28 }
 0x1ef   : > { %3965 = vmatpush1.bf16.msra.mxu0 %v8368_v35  ;;  %v8769_v35 = vcombine.high %v807_v29, %v815_v31  ;;  %v8768_v43 = vcombine.low %v807_v29, %v815_v31  ;;  %v783_v50 = vld [vmem:[#allocation5 + $0xc68] sm:$0xff]  ;;  %v8706_v31 = vcombine.low %v744_v6, %v752_v8 }
 0x1f0   : > { %3966 = vmatprep.subr.bf16.mxu0 %v8353_v37  ;;  %v543_v37 = vld [vmem:[#allocation5 + $0x4e8] sm:$0xff] }
 0x1f1   : > { %4006 = vmatpush1.bf16.msra.mxu1 %v8624_v36  ;;  %v535_v36 = vld [vmem:[#allocation5 + $0x4a8] sm:$0xff] }
 0x1f2   : > { %4007 = vmatprep.subr.bf16.mxu1 %v8609_v39  ;;  %v791_v39 = vld [vmem:[#allocation5 + $0xca8] sm:$0xff]  ;;  %v8497_v44 = vcombine.high %v535_v36, %v543_v37  ;;  %v8496_v51 = vcombine.low %v535_v36, %v543_v37  ;;  %v456_v37 = vld [vmem:[#allocation5 + $0x230] sm:$0xff] }
 0x1f3   : > { %3967 = vmatpush1.bf16.msra.mxu0 %v8352_v38  ;;  %v8753_v38 = vcombine.high %v791_v39, %v799_v41  ;;  %v8752_v52 = vcombine.low %v791_v39, %v799_v41  ;;  %v464_v39 = vld [vmem:[#allocation5 + $0x270] sm:$0xff] }
 0x1f4   : > { %3968 = vmatprep.subr.bf16.mxu0 %v8593_v48  ;;  %v527_v48 = vld [vmem:[#allocation5 + $0x468] sm:$0xff] }
 0x1f5   : > { %4008 = vmatpush1.bf16.msra.mxu1 %v8608_v46  ;;  %v519_v46 = vld [vmem:[#allocation5 + $0x428] sm:$0xff] }
 0x1f6   : > { %4009 = vmatprep.subr.bf16.mxu1 %v8849_v49  ;;  %v775_v49 = vld [vmem:[#allocation5 + $0xc28] sm:$0xff]  ;;  %v8481_v53 = vcombine.high %v519_v46, %v527_v48  ;;  %v8480_v62 = vcombine.low %v519_v46, %v527_v48  ;;  %v8434_v46 = vcombine.low %v472_v20, %v480_v21 }
 0x1f7   : > { %3969 = vmatpush2.bf16.msra.mxu0 %v8592_v55  ;;  %v8737_v55 = vcombine.high %v775_v49, %v783_v50  ;;  %v8736_v0 = vcombine.low %v775_v49, %v783_v50  ;;  %v8419_v50 = vcombine.high %v456_v37, %v464_v39 }
 0x1f8   : > { %3970 = vmatprep.subr.bf16.mxu0 %v8577_v57  ;;  %v512_v57 = vld [vmem:[#allocation5 + $0x3f0] sm:$0xff] }
 0x1f9   : > { %4010 = vmatpush2.bf16.msra.mxu1 %v8848_v56  ;;  %v504_v56 = vld [vmem:[#allocation5 + $0x3b0] sm:$0xff] }
 0x1fa   : > { %4011 = vmatprep.subr.bf16.mxu1 %v8833_v60  ;;  %v760_v60 = vld [vmem:[#allocation5 + $0xbb0] sm:$0xff] }
 0x1fb   : > { %3971 = vmatpush2.bf16.msra.mxu0 %v8576_v1  ;;  %v8467_v1 = vcombine.high %v504_v56, %v512_v57 }
 0x1fc   : > { %3972 = vmatprep.subr.bf16.mxu0 %v8561_v3  ;;  %v924_v3 = vsub.s32 5, %v10819_v30 }
 0x1fd   : > { %4012 = vmatpush2.bf16.msra.mxu1 %v8832_v2  ;;  %v8723_v2 = vcombine.high %v760_v60, %v768_v61 }
 0x1fe   : > { %4013 = vmatprep.subr.bf16.mxu1 %v8817_v4  ;;  %v488_v4 = vld [vmem:[#allocation5 + $0x330] sm:$0xff]  ;;  %v925_v17 = vrot.slane %v10861_v9, %v924_v3 }
 0x1ff   : > { %3973 = vmatpush2.bf16.msra.mxu0 %v8560_v10  ;;  %v921_v10 = vrot.slane %v10861_v9, %v920_v63  ;;  %v8450_v28 = vcombine.low %v488_v4, %v496_v5 }
 0x200   : > { %3974 = vmatprep.subr.bf16.mxu0 %v8545_v12  ;;  %v8722_v12 = vcombine.low %v760_v60, %v768_v61  ;;  %v8418_v60 = vcombine.low %v456_v37, %v464_v39  ;;  %v888_v37 = vld [vmem:[#allocation5 + $0xfb0] sm:$0xff] }
 0x201   : > { %4014 = vmatpush2.bf16.msra.mxu1 %v8816_v11  ;;  %v8466_v11 = vcombine.low %v504_v56, %v512_v57  ;;  %v696_v56 = vld [vmem:[#allocation5 + $0x9b0] sm:$0xff] }
 0x202   : > { %4015 = vmatprep.subr.bf16.mxu1 %v8801_v15  ;;  %v8451_v15 = vcombine.high %v488_v4, %v496_v5  ;;  %v704_v57 = vld [vmem:[#allocation5 + $0x9f0] sm:$0xff] }
 0x203   : > { %3975 = vmatpush2.bf16.msra.mxu0 %v8544_v22  ;;  %v680_v4 = vld [vmem:[#allocation5 + $0x930] sm:$0xff]  ;;  %v8658_v8 = vcombine.low %v696_v56, %v704_v57 }
 0x204   : > { %3976 = vmatprep.subr.bf16.mxu0 %v8529_v25  ;;  %v736_v25 = vld [vmem:[#allocation5 + $0xaf0] sm:$0xff] }
 0x205   : > { %4016 = vmatpush2.bf16.msra.mxu1 %v8800_v24  ;;  %v728_v24 = vld [vmem:[#allocation5 + $0xab0] sm:$0xff] }
 0x206   : > { %4017 = vmatprep.subr.bf16.mxu1 %v8785_v26  ;;  %v8691_v36 = vcombine.high %v728_v24, %v736_v25  ;;  %v8690_v49 = vcombine.low %v728_v24, %v736_v25  ;;  %v688_v5 = vld [vmem:[#allocation5 + $0x970] sm:$0xff] }
 0x207   : > { %3977 = vmatpush2.bf16.msra.mxu0 %v8528_v32  ;;  %v8435_v32 = vcombine.high %v472_v20, %v480_v21  ;;  %v8642_v21 = vcombine.low %v680_v4, %v688_v5  ;;  %v392_v25 = vld [vmem:[#allocation5 + $0x30] sm:$0xff] }
 0x208   : > { %3978 = vmatprep.subr.bf16.mxu0 %v8513_v34  ;;  %v896_v39 = vld [vmem:[#allocation5 + $0xff0] sm:$0xff] }
 0x209   : > { %4018 = vmatpush2.bf16.msra.mxu1 %v8784_v33 }
 0x20a   : > { %4019 = vmatprep.subr.bf16.mxu1 %v8769_v35 }
 0x20b   : > { %3979 = vmatpush2.bf16.msra.mxu0 %v8512_v42  ;;  %v712_v42 = vld [vmem:[#allocation5 + $0xa30] sm:$0xff] }
 0x20c   : > { %3980 = vmatprep.subr.bf16.mxu0 %v8497_v44 }
 0x20d   : > { %4020 = vmatpush2.bf16.msra.mxu1 %v8768_v43  ;;  %v720_v43 = vld [vmem:[#allocation5 + $0xa70] sm:$0xff] }
 0x20e   : > { %4021 = vmatprep.subr.bf16.mxu1 %v8753_v38  ;;  %v8674_v61 = vcombine.low %v712_v42, %v720_v43 }
 0x20f   : > { %3981 = vmatpush2.bf16.msra.mxu0 %v8496_v51 }
 0x210   : > { %3982 = vmatprep.subr.bf16.mxu0 %v8481_v53  ;;  %v440_v53 = vld [vmem:[#allocation5 + $0x1b0] sm:$0xff] }
 0x211   : > { %4022 = vmatpush2.bf16.msra.mxu1 %v8752_v52  ;;  %v8675_v52 = vcombine.high %v712_v42, %v720_v43 }
 0x212   : > { %4023 = vmatprep.subr.bf16.mxu1 %v8737_v55  ;;  %v448_v55 = vld [vmem:[#allocation5 + $0x1f0] sm:$0xff] }
 0x213   : > { %3983 = vmatpush2.bf16.msra.mxu0 %v8480_v62  ;;  %v8403_v62 = vcombine.high %v440_v53, %v448_v55  ;;  %v8402_v6 = vcombine.low %v440_v53, %v448_v55 }
 0x214   : > { %4034 = vmatprep.subr.bf16.mxu0 %v8467_v1  ;;  %v424_v1 = vld [vmem:[#allocation5 + $0x130] sm:$0xff] }
 0x215   : > { %4024 = vmatpush2.bf16.msra.mxu1 %v8736_v0  ;;  %v8659_v0 = vcombine.high %v696_v56, %v704_v57  ;;  %v600_v56 = vld [vmem:[#allocation5 + $0x6b0] sm:$0xff] }
 0x216   : > { %4075 = vmatprep.subr.bf16.mxu1 %v8723_v2  ;;  %v3740_v22 = vpop.f32.mrf.mxu0  ;;  %3985 = vmatmul.mubr.bf16.vlgmr.msra.gmra.mxu0 %v10803_v16  ;;  %v432_v2 = vld [vmem:[#allocation5 + $0x170] sm:$0xff] }
 0x217   : > { %v3741_v26 = vadd.f32 %v3740_v22, %v921_v10  ;;  %4035 = vmatpush1.bf16.msra.mxu0 %v8466_v11  ;;  %4066 = vmatprep.mubr.bf16.mxu0 %v10795_v58  ;;  %v8387_v10 = vcombine.high %v424_v1, %v432_v2  ;;  %v8643_v11 = vcombine.high %v680_v4, %v688_v5  ;;  %v608_v57 = vld [vmem:[#allocation5 + $0x6f0] sm:$0xff] }
 0x218   : > { %v3781_v27 = vpop.f32.mrf.mxu1  ;;  %4026 = vmatmul.mubr.bf16.vlgmr.msra.gmra.mxu1 %v10805_v19  ;;  %v3742_v29 = vpop.f32.mrf.mxu0  ;;  %4036 = vmatprep.subr.bf16.mxu0 %v8451_v15  ;;  %v416_v15 = vld [vmem:[#allocation5 + $0xf0] sm:$0xff]  ;;  %v8386_v20 = vcombine.low %v424_v1, %v432_v2  ;;  %v8563_v1 = vcombine.high %v600_v56, %v608_v57 }
 0x219   : > { %4076 = vmatpush1.bf16.msra.mxu1 %v8722_v12  ;;  %v10871_v33 = vadd.f32 %v3781_v27, %v3741_v26  ;;  %v3743_v34 = vadd.f32 %v3742_v29, %v925_v17  ;;  %4107 = vmatprep.mubr.bf16.mxu1 %v10797_v59  ;;  %v408_v12 = vld [vmem:[#allocation5 + $0xb0] sm:$0xff] }
 0x21a   : > { %v3783_v35 = vpop.f32.mrf.mxu1  ;;  %4077 = vmatprep.subr.bf16.mxu1 %v8707_v18  ;;  %v3744_v41 = vpop.f32.mrf.mxu0  ;;  %v664_v17 = vld [vmem:[#allocation5 + $0x8b0] sm:$0xff]  ;;  %v8371_v22 = vcombine.high %v408_v12, %v416_v15  ;;  %v8370_v29 = vcombine.low %v408_v12, %v416_v15 }
 0x21b   : > { %v10875_v44 = vadd.f32 %v3783_v35, %v3743_v34  ;;  %4037 = vmatpush1.bf16.msra.mxu0 %v8450_v28  ;;  %v672_v18 = vld [vmem:[#allocation5 + $0x8f0] sm:$0xff] }
 0x21c   : > { %v3785_v38 = vpop.f32.mrf.mxu1  ;;  %v3745_v48 = vpop.f32.mrf.mxu0  ;;  %4038 = vmatprep.subr.bf16.mxu0 %v8435_v32  ;;  %v8627_v24 = vcombine.high %v664_v17, %v672_v18  ;;  %v400_v26 = vld [vmem:[#allocation5 + $0x70] sm:$0xff] }
 0x21d   : > { %4078 = vmatpush1.bf16.msra.mxu1 %v8706_v31  ;;  %v648_v27 = vld [vmem:[#allocation5 + $0x830] sm:$0xff]  ;;  %v8626_v31 = vcombine.low %v664_v17, %v672_v18  ;;  %v8355_v32 = vcombine.high %v392_v25, %v400_v26  ;;  %v8354_v41 = vcombine.low %v392_v25, %v400_v26  ;;  %v8851_v38 = vcombine.high %v888_v37, %v896_v39 }
 0x21e   : > { %v3786_v51 = vpop.f32.mrf.mxu1  ;;  %4079 = vmatprep.subr.bf16.mxu1 %v8691_v36  ;;  %v656_v28 = vld [vmem:[#allocation5 + $0x870] sm:$0xff] }
 0x21f   : > { %4039 = vmatpush1.bf16.msra.mxu0 %v8434_v46  ;;  %v8611_v34 = vcombine.high %v648_v27, %v656_v28  ;;  %v632_v35 = vld [vmem:[#allocation5 + $0x7b0] sm:$0xff]  ;;  %v8610_v42 = vcombine.low %v648_v27, %v656_v28 }
 0x220   : > { %4040 = vmatprep.subr.bf16.mxu0 %v8419_v50  ;;  %v640_v36 = vld [vmem:[#allocation5 + $0x7f0] sm:$0xff] }
 0x221   : > { %4080 = vmatpush1.bf16.msra.mxu1 %v8690_v49  ;;  %v8595_v43 = vcombine.high %v632_v35, %v640_v36  ;;  %v616_v46 = vld [vmem:[#allocation5 + $0x730] sm:$0xff]  ;;  %v8594_v51 = vcombine.low %v632_v35, %v640_v36 }
 0x222   : > { %4081 = vmatprep.subr.bf16.mxu1 %v8675_v52  ;;  %v624_v48 = vld [vmem:[#allocation5 + $0x770] sm:$0xff]  ;;  %v8850_v52 = vcombine.low %v888_v37, %v896_v39 }
 0x223   : > { %4041 = vmatpush1.bf16.msra.mxu0 %v8418_v60  ;;  %v872_v49 = vld [vmem:[#allocation5 + $0xf30] sm:$0xff]  ;;  %v8579_v53 = vcombine.high %v616_v46, %v624_v48 }
 0x224   : > { %4042 = vmatprep.subr.bf16.mxu0 %v8403_v62  ;;  %v880_v50 = vld [vmem:[#allocation5 + $0xf70] sm:$0xff]  ;;  %v8578_v62 = vcombine.low %v616_v46, %v624_v48 }
 0x225   : > { %4082 = vmatpush1.bf16.msra.mxu1 %v8674_v61  ;;  %v8835_v55 = vcombine.high %v872_v49, %v880_v50  ;;  %v856_v60 = vld [vmem:[#allocation5 + $0xeb0] sm:$0xff] }
 0x226   : > { %4083 = vmatprep.subr.bf16.mxu1 %v8659_v0  ;;  %v864_v61 = vld [vmem:[#allocation5 + $0xef0] sm:$0xff]  ;;  %v8834_v0 = vcombine.low %v872_v49, %v880_v50 }
 0x227   : > { %4043 = vmatpush1.bf16.msra.mxu0 %v8402_v6  ;;  %v8819_v2 = vcombine.high %v856_v60, %v864_v61  ;;  %v584_v4 = vld [vmem:[#allocation5 + $0x630] sm:$0xff] }
 0x228   : > { %4044 = vmatprep.subr.bf16.mxu0 %v8387_v10  ;;  %v592_v5 = vld [vmem:[#allocation5 + $0x670] sm:$0xff]  ;;  %v8562_v10 = vcombine.low %v600_v56, %v608_v57 }
 0x229   : > { %4084 = vmatpush1.bf16.msra.mxu1 %v8658_v8  ;;  %v840_v6 = vld [vmem:[#allocation5 + $0xe30] sm:$0xff]  ;;  %v8547_v12 = vcombine.high %v584_v4, %v592_v5 }
 0x22a   : > { %4085 = vmatprep.subr.bf16.mxu1 %v8643_v11  ;;  %v848_v8 = vld [vmem:[#allocation5 + $0xe70] sm:$0xff]  ;;  %v8818_v11 = vcombine.low %v856_v60, %v864_v61  ;;  %v505_v60 = vld [vmem:[#allocation5 + $0x3b8] sm:$0xff] }
 0x22b   : > { %4045 = vmatpush1.bf16.msra.mxu0 %v8386_v20  ;;  %v8803_v15 = vcombine.high %v840_v6, %v848_v8  ;;  %v568_v17 = vld [vmem:[#allocation5 + $0x5b0] sm:$0xff]  ;;  %v513_v61 = vld [vmem:[#allocation5 + $0x3f8] sm:$0xff] }
 0x22c   : > { %4046 = vmatprep.subr.bf16.mxu0 %v8371_v22  ;;  %v576_v18 = vld [vmem:[#allocation5 + $0x5f0] sm:$0xff]  ;;  %v8546_v22 = vcombine.low %v584_v4, %v592_v5  ;;  %v8469_v5 = vcombine.high %v505_v60, %v513_v61 }
 0x22d   : > { %4086 = vmatpush1.bf16.msra.mxu1 %v8642_v21  ;;  %v824_v20 = vld [vmem:[#allocation5 + $0xdb0] sm:$0xff]  ;;  %v8531_v25 = vcombine.high %v568_v17, %v576_v18 }
 0x22e   : > { %4087 = vmatprep.subr.bf16.mxu1 %v8627_v24  ;;  %v832_v21 = vld [vmem:[#allocation5 + $0xdf0] sm:$0xff]  ;;  %v8802_v24 = vcombine.low %v840_v6, %v848_v8  ;;  %v932_v8 = vsub.s32 7, %v10819_v30 }
 0x22f   : > { %4047 = vmatpush1.bf16.msra.mxu0 %v8370_v29  ;;  %v8787_v26 = vcombine.high %v824_v20, %v832_v21  ;;  %v552_v27 = vld [vmem:[#allocation5 + $0x530] sm:$0xff] }
 0x230   : > { %4048 = vmatprep.subr.bf16.mxu0 %v8355_v32  ;;  %v560_v28 = vld [vmem:[#allocation5 + $0x570] sm:$0xff]  ;;  %v8530_v32 = vcombine.low %v568_v17, %v576_v18  ;;  %v8468_v18 = vcombine.low %v505_v60, %v513_v61  ;;  %v441_v61 = vld [vmem:[#allocation5 + $0x1b8] sm:$0xff] }
 0x231   : > { %4088 = vmatpush1.bf16.msra.mxu1 %v8626_v31  ;;  %v808_v29 = vld [vmem:[#allocation5 + $0xd30] sm:$0xff]  ;;  %v8515_v35 = vcombine.high %v552_v27, %v560_v28 }
 0x232   : > { %4089 = vmatprep.subr.bf16.mxu1 %v8611_v34  ;;  %v816_v31 = vld [vmem:[#allocation5 + $0xd70] sm:$0xff]  ;;  %v8786_v34 = vcombine.low %v824_v20, %v832_v21 }
 0x233   : > { %4049 = vmatpush1.bf16.msra.mxu0 %v8354_v41  ;;  %v8771_v36 = vcombine.high %v808_v29, %v816_v31  ;;  %v536_v37 = vld [vmem:[#allocation5 + $0x4b0] sm:$0xff] }
 0x234   : > { %4050 = vmatprep.subr.bf16.mxu0 %v8595_v43  ;;  %v544_v39 = vld [vmem:[#allocation5 + $0x4f0] sm:$0xff]  ;;  %v8514_v43 = vcombine.low %v552_v27, %v560_v28  ;;  %v729_v28 = vld [vmem:[#allocation5 + $0xab8] sm:$0xff] }
 0x235   : > { %4090 = vmatpush1.bf16.msra.mxu1 %v8610_v42  ;;  %v792_v41 = vld [vmem:[#allocation5 + $0xcb0] sm:$0xff]  ;;  %v8499_v46 = vcombine.high %v536_v37, %v544_v39 }
 0x236   : > { %4091 = vmatprep.subr.bf16.mxu1 %v8851_v38  ;;  %v800_v42 = vld [vmem:[#allocation5 + $0xcf0] sm:$0xff]  ;;  %v8770_v38 = vcombine.low %v808_v29, %v816_v31  ;;  %v737_v29 = vld [vmem:[#allocation5 + $0xaf8] sm:$0xff] }
 0x237   : > { %4051 = vmatpush2.bf16.msra.mxu0 %v8594_v51  ;;  %v8755_v48 = vcombine.high %v792_v41, %v800_v42  ;;  %v520_v49 = vld [vmem:[#allocation5 + $0x430] sm:$0xff] }
 0x238   : > { %4052 = vmatprep.subr.bf16.mxu0 %v8579_v53  ;;  %v528_v50 = vld [vmem:[#allocation5 + $0x470] sm:$0xff]  ;;  %v8498_v53 = vcombine.low %v536_v37, %v544_v39 }
 0x239   : > { %4092 = vmatpush2.bf16.msra.mxu1 %v8850_v52  ;;  %v776_v51 = vld [vmem:[#allocation5 + $0xc30] sm:$0xff]  ;;  %v8483_v56 = vcombine.high %v520_v49, %v528_v50 }
 0x23a   : > { %4093 = vmatprep.subr.bf16.mxu1 %v8835_v55  ;;  %v784_v52 = vld [vmem:[#allocation5 + $0xc70] sm:$0xff]  ;;  %v8754_v55 = vcombine.low %v792_v41, %v800_v42  ;;  %v8693_v42 = vcombine.high %v729_v28, %v737_v29 }
 0x23b   : > { %4053 = vmatpush2.bf16.msra.mxu0 %v8578_v62  ;;  %v8739_v57 = vcombine.high %v776_v51, %v784_v52  ;;  %v761_v62 = vld [vmem:[#allocation5 + $0xbb8] sm:$0xff]  ;;  %v8738_v4 = vcombine.low %v776_v51, %v784_v52 }
 0x23c   : > { %4054 = vmatprep.subr.bf16.mxu0 %v8563_v1  ;;  %v8482_v1 = vcombine.low %v520_v49, %v528_v50  ;;  %v721_v49 = vld [vmem:[#allocation5 + $0xa78] sm:$0xff] }
 0x23d   : > { %4094 = vmatpush2.bf16.msra.mxu1 %v8834_v0  ;;  %v769_v0 = vld [vmem:[#allocation5 + $0xbf8] sm:$0xff] }
 0x23e   : > { %4095 = vmatprep.subr.bf16.mxu1 %v8819_v2  ;;  %v928_v2 = vsub.s32 6, %v10819_v30  ;;  %v8725_v6 = vcombine.high %v761_v62, %v769_v0  ;;  %v8724_v20 = vcombine.low %v761_v62, %v769_v0  ;;  %v697_v62 = vld [vmem:[#allocation5 + $0x9b8] sm:$0xff]  ;;  %v9807_v30 = vld [vmem:[#allocation8 + $0xe44] ss:$16 sps:$4 sm:$0xff]  }
 0x23f   : > { %4055 = vmatpush2.bf16.msra.mxu0 %v8562_v10  ;;  %v489_v10 = vld [vmem:[#allocation5 + $0x338] sm:$0xff] }
 0x240   : > { %4056 = vmatprep.subr.bf16.mxu0 %v8547_v12  ;;  %v745_v12 = vld [vmem:[#allocation5 + $0xb38] sm:$0xff]  ;;  %v929_v17 = vrot.slane %v10861_v9, %v928_v2 }
 0x241   : > { %4096 = vmatpush2.bf16.msra.mxu1 %v8818_v11  ;;  %v497_v11 = vld [vmem:[#allocation5 + $0x378] sm:$0xff] }
 0x242   : > { %4097 = vmatprep.subr.bf16.mxu1 %v8803_v15  ;;  %v753_v15 = vld [vmem:[#allocation5 + $0xb78] sm:$0xff]  ;;  %v8453_v21 = vcombine.high %v489_v10, %v497_v11 }
 0x243   : > { %4057 = vmatpush2.bf16.msra.mxu0 %v8546_v22  ;;  %v933_v22 = vrot.slane %v10861_v9, %v932_v8  ;;  %v705_v0 = vld [vmem:[#allocation5 + $0x9f8] sm:$0xff] }
 0x244   : > { %4058 = vmatprep.subr.bf16.mxu0 %v8531_v25  ;;  %v473_v25 = vld [vmem:[#allocation5 + $0x2b8] sm:$0xff] }
 0x245   : > { %4098 = vmatpush2.bf16.msra.mxu1 %v8802_v24  ;;  %v8709_v24 = vcombine.high %v745_v12, %v753_v15 }
 0x246   : > { %4099 = vmatprep.subr.bf16.mxu1 %v8787_v26  ;;  %v481_v26 = vld [vmem:[#allocation5 + $0x2f8] sm:$0xff] }
 0x247   : > { %4059 = vmatpush2.bf16.msra.mxu0 %v8530_v32  ;;  %v8437_v37 = vcombine.high %v473_v25, %v481_v26  ;;  %v8436_v52 = vcombine.low %v473_v25, %v481_v26  ;;  %v673_v25 = vld [vmem:[#allocation5 + $0x8f8] sm:$0xff] }
 0x248   : > { %4060 = vmatprep.subr.bf16.mxu0 %v8515_v35 }
 0x249   : > { %4100 = vmatpush2.bf16.msra.mxu1 %v8786_v34  ;;  %v8452_v34 = vcombine.low %v489_v10, %v497_v11  ;;  %v433_v10 = vld [vmem:[#allocation5 + $0x178] sm:$0xff] }
 0x24a   : > { %4101 = vmatprep.subr.bf16.mxu1 %v8771_v36  ;;  %v8708_v36 = vcombine.low %v745_v12, %v753_v15  ;;  %v681_v11 = vld [vmem:[#allocation5 + $0x938] sm:$0xff] }
 0x24b   : > { %4061 = vmatpush2.bf16.msra.mxu0 %v8514_v43  ;;  %v457_v43 = vld [vmem:[#allocation5 + $0x238] sm:$0xff] }
 0x24c   : > { %4062 = vmatprep.subr.bf16.mxu0 %v8499_v46  ;;  %v689_v12 = vld [vmem:[#allocation5 + $0x978] sm:$0xff] }
 0x24d   : > { %4102 = vmatpush2.bf16.msra.mxu1 %v8770_v38  ;;  %v465_v38 = vld [vmem:[#allocation5 + $0x278] sm:$0xff] }
 0x24e   : > { %4103 = vmatprep.subr.bf16.mxu1 %v8755_v48  ;;  %v713_v48 = vld [vmem:[#allocation5 + $0xa38] sm:$0xff] }
 0x24f   : > { %4063 = vmatpush2.bf16.msra.mxu0 %v8498_v53  ;;  %v8677_v60 = vcombine.high %v713_v48, %v721_v49 }
 0x250   : > { %4064 = vmatprep.subr.bf16.mxu0 %v8483_v56  ;;  %v8421_v56 = vcombine.high %v457_v43, %v465_v38 }
 0x251   : > { %4104 = vmatpush2.bf16.msra.mxu1 %v8754_v55  ;;  %v8692_v55 = vcombine.low %v729_v28, %v737_v29 }
 0x252   : > { %4105 = vmatprep.subr.bf16.mxu1 %v8739_v57 }
 0x253   : > { %4065 = vmatpush2.bf16.msra.mxu0 %v8482_v1  ;;  %v8420_v1 = vcombine.low %v457_v43, %v465_v38  ;;  %v633_v43 = vld [vmem:[#allocation5 + $0x7b8] sm:$0xff] }
 0x254   : > { %4116 = vmatprep.subr.bf16.mxu0 %v8469_v5  ;;  %v8661_v5 = vcombine.high %v697_v62, %v705_v0  ;;  %v641_v38 = vld [vmem:[#allocation5 + $0x7f8] sm:$0xff] }
 0x255   : > { %4106 = vmatpush2.bf16.msra.mxu1 %v8738_v4 }
 0x256   : > { %4157 = vmatprep.subr.bf16.mxu1 %v8725_v6  ;;  %v3822_v27 = vpop.f32.mrf.mxu0  ;;  %4067 = vmatmul.mubr.bf16.vlgmr.msra.gmra.mxu0 %v10803_v16  ;;  %v425_v6 = vld [vmem:[#allocation5 + $0x138] sm:$0xff] }
 0x257   : > { %v3823_v31 = vadd.f32 %v3822_v27, %v929_v17  ;;  %4117 = vmatpush1.bf16.msra.mxu0 %v8468_v18  ;;  %4148 = vmatprep.mubr.bf16.mxu0 %v10795_v58  ;;  %v449_v58 = vld [vmem:[#allocation5 + $0x1f8] sm:$0xff]  ;;  %v8660_v17 = vcombine.low %v697_v62, %v705_v0  ;;  %v8389_v18 = vcombine.high %v425_v6, %v433_v10 }
 0x258   : > { %v3863_v32 = vpop.f32.mrf.mxu1  ;;  %4108 = vmatmul.mubr.bf16.vlgmr.msra.gmra.mxu1 %v10805_v19  ;;  %v3824_v35 = vpop.f32.mrf.mxu0  ;;  %4118 = vmatprep.subr.bf16.mxu0 %v8453_v21  ;;  %v8405_v4 = vcombine.high %v441_v61, %v449_v58  ;;  %v8404_v15 = vcombine.low %v441_v61, %v449_v58  ;;  %v409_v21 = vld [vmem:[#allocation5 + $0xb8] sm:$0xff]  ;;  %v8388_v26 = vcombine.low %v425_v6, %v433_v10 }
 0x259   : > { %4158 = vmatpush1.bf16.msra.mxu1 %v8724_v20  ;;  %v10887_v9 = vadd.f32 %v3863_v32, %v3823_v31  ;;  %v3825_v39 = vadd.f32 %v3824_v35, %v933_v22  ;;  %4189 = vmatprep.mubr.bf16.mxu1 %v10797_v59  ;;  %v8676_v59 = vcombine.low %v713_v48, %v721_v49  ;;  %v417_v22 = vld [vmem:[#allocation5 + $0xf8] sm:$0xff] }
 0x25a   : > { %v3865_v41 = vpop.f32.mrf.mxu1  ;;  %4159 = vmatprep.subr.bf16.mxu1 %v8709_v24  ;;  %v3826_v46 = vpop.f32.mrf.mxu0  ;;  %v8645_v20 = vcombine.high %v681_v11, %v689_v12  ;;  %v665_v24 = vld [vmem:[#allocation5 + $0x8b8] sm:$0xff]  ;;  %v8644_v27 = vcombine.low %v681_v11, %v689_v12  ;;  %v8373_v28 = vcombine.high %v409_v21, %v417_v22 }
 0x25b   : > { %v10891_v50 = vadd.f32 %v3865_v41, %v3825_v39  ;;  %4119 = vmatpush1.bf16.msra.mxu0 %v8452_v34  ;;  %v8629_v29 = vcombine.high %v665_v24, %v673_v25  ;;  %v393_v31 = vld [vmem:[#allocation5 + $0x38] sm:$0xff]  ;;  %v10895_v41 = vpack.c.bf16 %v10839_v13, %v10839_v13  ;;  %v10899_v46 = vpack.c.bf16 %v10857_v54, %v10857_v54 }
 0x25c   : > { %v3867_v51 = vpop.f32.mrf.mxu1  ;;  %v3827_v53 = vpop.f32.mrf.mxu0  ;;  %4120 = vmatprep.subr.bf16.mxu0 %v8437_v37  ;;  %v401_v32 = vld [vmem:[#allocation5 + $0x78] sm:$0xff]  ;;  %v8628_v37 = vcombine.low %v665_v24, %v673_v25  ;;  %v8596_v54 = vcombine.low %v633_v43, %v641_v38 }
 0x25d   : > { %4160 = vmatpush1.bf16.msra.mxu1 %v8708_v36  ;;  %v649_v34 = vld [vmem:[#allocation5 + $0x838] sm:$0xff]  ;;  %v8372_v36 = vcombine.low %v409_v21, %v417_v22  ;;  %v8357_v39 = vcombine.high %v393_v31, %v401_v32  ;;  %v8356_v51 = vcombine.low %v393_v31, %v401_v32  ;;  %v8597_v53 = vcombine.high %v633_v43, %v641_v38 }
 0x25e   : > { %v3868_v57 = vpop.f32.mrf.mxu1  ;;  %4161 = vmatprep.subr.bf16.mxu1 %v8693_v42  ;;  %v657_v35 = vld [vmem:[#allocation5 + $0x878] sm:$0xff] }
 0x25f   : > { %4121 = vmatpush1.bf16.msra.mxu0 %v8436_v52  ;;  %v8613_v42 = vcombine.high %v649_v34, %v657_v35  ;;  %v889_v48 = vld [vmem:[#allocation5 + $0xfb8] sm:$0xff]  ;;  %v8612_v52 = vcombine.low %v649_v34, %v657_v35 }
 0x260   : > { %4122 = vmatprep.subr.bf16.mxu0 %v8421_v56  ;;  %v897_v49 = vld [vmem:[#allocation5 + $0xff8] sm:$0xff] }
 0x261   : > { %4162 = vmatpush1.bf16.msra.mxu1 %v8692_v55  ;;  %v4215_v55 = vmul.bf16 1024605458, %v10895_v41  ;;  %v8853_v13 = vcombine.high %v889_v48, %v897_v49  ;;  %v617_v56 = vld [vmem:[#allocation5 + $0x738] sm:$0xff]  ;;  %v8852_v62 = vcombine.low %v889_v48, %v897_v49 }
 0x262   : > { %4163 = vmatprep.subr.bf16.mxu1 %v8677_v60  ;;  %v625_v57 = vld [vmem:[#allocation5 + $0x778] sm:$0xff]  ;;  %v4217_v60 = vmul.bf16 1024605458, %v10899_v46 }
 0x263   : > { %4123 = vmatpush1.bf16.msra.mxu0 %v8420_v1  ;;  %v873_v61 = vld [vmem:[#allocation5 + $0xf38] sm:$0xff]  ;;  %v8581_v0 = vcombine.high %v617_v56, %v625_v57  ;;  %v4231_v1 = vmul.bf16 %v4215_v55, %v10895_v41  ;;  %v8580_v12 = vcombine.low %v617_v56, %v625_v57 }
 0x264   : > { %4124 = vmatprep.subr.bf16.mxu0 %v8405_v4  ;;  %v881_v58 = vld [vmem:[#allocation5 + $0xf78] sm:$0xff]  ;;  %v4233_v6 = vmul.bf16 %v4217_v60, %v10899_v46 }
 0x265   : > { %4164 = vmatpush1.bf16.msra.mxu1 %v8676_v59  ;;  %v8837_v59 = vcombine.high %v873_v61, %v881_v58  ;;  %v601_v4 = vld [vmem:[#allocation5 + $0x6b8] sm:$0xff] }
 0x266   : > { %4165 = vmatprep.subr.bf16.mxu1 %v8661_v5  ;;  %v609_v5 = vld [vmem:[#allocation5 + $0x6f8] sm:$0xff]  ;;  %v4249_v24 = vadd.bf16 1061961548, %v4233_v6 }
 0x267   : > { %4125 = vmatpush1.bf16.msra.mxu0 %v8404_v15  ;;  %v857_v10 = vld [vmem:[#allocation5 + $0xeb8] sm:$0xff]  ;;  %v8836_v15 = vcombine.low %v873_v61, %v881_v58 }
 0x268   : > { %4126 = vmatprep.subr.bf16.mxu0 %v8389_v18  ;;  %v865_v11 = vld [vmem:[#allocation5 + $0xef8] sm:$0xff]  ;;  %v4247_v18 = vadd.bf16 1061961548, %v4231_v1 }
 0x269   : > { %4166 = vmatpush1.bf16.msra.mxu1 %v8660_v17  ;;  %v8565_v17 = vcombine.high %v601_v4, %v609_v5  ;;  %v585_v21 = vld [vmem:[#allocation5 + $0x638] sm:$0xff] }
 0x26a   : > { %4167 = vmatprep.subr.bf16.mxu1 %v8645_v20  ;;  %v8821_v20 = vcombine.high %v857_v10, %v865_v11  ;;  %v593_v22 = vld [vmem:[#allocation5 + $0x678] sm:$0xff]  ;;  %v4263_v31 = vmul.bf16 %v4247_v18, %v10895_v41 }
 0x26b   : > { %4127 = vmatpush1.bf16.msra.mxu0 %v8388_v26  ;;  %v841_v25 = vld [vmem:[#allocation5 + $0xe38] sm:$0xff] }
 0x26c   : > { %4128 = vmatprep.subr.bf16.mxu0 %v8373_v28  ;;  %v849_v26 = vld [vmem:[#allocation5 + $0xe78] sm:$0xff]  ;;  %v8820_v28 = vcombine.low %v857_v10, %v865_v11  ;;  %10252 = vtanh.bf16 %v4263_v31 }
 0x26d   : > { %4168 = vmatpush1.bf16.msra.mxu1 %v8644_v27  ;;  %v8564_v27 = vcombine.low %v601_v4, %v609_v5  ;;  %v8805_v32 = vcombine.high %v841_v25, %v849_v26  ;;  %v569_v34 = vld [vmem:[#allocation5 + $0x5b8] sm:$0xff]  ;;  %v8804_v43 = vcombine.low %v841_v25, %v849_v26  ;;  %v9486_v25 = vld [vmem:[#allocation8 + $0xe4] ss:$16 sps:$4 sm:$0xff]  }
 0x26e   : > { %4169 = vmatprep.subr.bf16.mxu1 %v8629_v29  ;;  %v8549_v29 = vcombine.high %v585_v21, %v593_v22  ;;  %v577_v35 = vld [vmem:[#allocation5 + $0x5f8] sm:$0xff]  ;;  %v9489_v26 = vld [vmem:[#allocation8 + $0x2e4] ss:$16 sps:$4 sm:$0xff]  }
 0x26f   : > { %4129 = vmatpush1.bf16.msra.mxu0 %v8372_v36  ;;  %v4265_v36 = vmul.bf16 %v4249_v24, %v10899_v46  ;;  %v8533_v38 = vcombine.high %v569_v34, %v577_v35  ;;  %v553_v49 = vld [vmem:[#allocation5 + $0x538] sm:$0xff]  ;;  %v8532_v55 = vcombine.low %v569_v34, %v577_v35  ;;  %v10907_v24 = vld [vmem:[#allocation7 + $0x8] sm:$0xff]  ;;  %v4279_v34 = vmul.bf16 1056980736, %v10895_v41  ;;  %v9490_v41 = vld [vmem:[#allocation8 + $0xc0] ss:$16 sps:$4 sm:$0xff]  }
 0x270   : > { %4130 = vmatprep.subr.bf16.mxu0 %v8357_v39  ;;  %v833_v39 = vld [vmem:[#allocation5 + $0xdf8] sm:$0xff]  ;;  %v4281_v35 = vmul.bf16 1056980736, %v10899_v46 }
 0x271   : > { %4170 = vmatpush1.bf16.msra.mxu1 %v8628_v37  ;;  %v825_v37 = vld [vmem:[#allocation5 + $0xdb8] sm:$0xff]  ;;  %10254 = vtanh.bf16 %v4265_v36  ;;  %v941_v36 = vrot.slane %v10907_v24, %v10827_v47 }
 0x272   : > { %4171 = vmatprep.subr.bf16.mxu1 %v8613_v42  ;;  %v8548_v42 = vcombine.low %v585_v21, %v593_v22  ;;  %v8789_v48 = vcombine.high %v825_v37, %v833_v39  ;;  %v537_v60 = vld [vmem:[#allocation5 + $0x4b8] sm:$0xff] }
 0x273   : > { %4131 = vmatpush1.bf16.msra.mxu0 %v8356_v51  ;;  %v561_v51 = vld [vmem:[#allocation5 + $0x578] sm:$0xff] }
 0x274   : > { %4132 = vmatprep.subr.bf16.mxu0 %v8597_v53  ;;  %v817_v53 = vld [vmem:[#allocation5 + $0xd78] sm:$0xff]  ;;  %v8517_v56 = vcombine.high %v553_v49, %v561_v51 }
 0x275   : > { %4172 = vmatpush1.bf16.msra.mxu1 %v8612_v52  ;;  %v809_v52 = vld [vmem:[#allocation5 + $0xd38] sm:$0xff] }
 0x276   : > { %4173 = vmatprep.subr.bf16.mxu1 %v8853_v13  ;;  %v8788_v13 = vcombine.low %v825_v37, %v833_v39  ;;  %v8773_v57 = vcombine.high %v809_v52, %v817_v53  ;;  %v545_v61 = vld [vmem:[#allocation5 + $0x4f8] sm:$0xff]  ;;  %v9492_v37 = vld [vmem:[#allocation8 + $0xc4] ss:$16 sps:$4 sm:$0xff]  }
 0x277   : > { %4133 = vmatpush2.bf16.msra.mxu0 %v8596_v54  ;;  %v793_v58 = vld [vmem:[#allocation5 + $0xcb8] sm:$0xff]  ;;  %v8501_v1 = vcombine.high %v537_v60, %v545_v61  ;;  %v8500_v11 = vcombine.low %v537_v60, %v545_v61  ;;  %v9496_v60 = vld [vmem:[#allocation8 + $0xa0] ss:$16 sps:$4 sm:$0xff]  }
 0x278   : > { %4134 = vmatprep.subr.bf16.mxu0 %v8581_v0  ;;  %v801_v54 = vld [vmem:[#allocation5 + $0xcf8] sm:$0xff]  ;;  %v8772_v0 = vcombine.low %v809_v52, %v817_v53  ;;  %v9498_v52 = vld [vmem:[#allocation8 + $0xa4] ss:$16 sps:$4 sm:$0xff]  }
 0x279   : > { %4174 = vmatpush2.bf16.msra.mxu1 %v8852_v62  ;;  %v8516_v62 = vcombine.low %v553_v49, %v561_v51  ;;  %v521_v4 = vld [vmem:[#allocation5 + $0x438] sm:$0xff]  ;;  %v9493_v51 = vld [vmem:[#allocation8 + $0x2c0] ss:$16 sps:$4 sm:$0xff]  }
 0x27a   : > { %4175 = vmatprep.subr.bf16.mxu1 %v8837_v59  ;;  %v8757_v59 = vcombine.high %v793_v58, %v801_v54  ;;  %v529_v5 = vld [vmem:[#allocation5 + $0x478] sm:$0xff]  ;;  %v10253_v18 = vpop.eup %10252 }
 0x27b   : > { %4135 = vmatpush2.bf16.msra.mxu0 %v8580_v12  ;;  %v777_v6 = vld [vmem:[#allocation5 + $0xc38] sm:$0xff]  ;;  %v8756_v12 = vcombine.low %v793_v58, %v801_v54  ;;  %v9499_v58 = vld [vmem:[#allocation8 + $0x2a0] ss:$16 sps:$4 sm:$0xff]   ;;  %v9504_v54 = vld [vmem:[#allocation8 + $0x84] ss:$16 sps:$4 sm:$0xff]  }
 0x27c   : > { %4136 = vmatprep.subr.bf16.mxu0 %v8565_v17  ;;  %v785_v10 = vld [vmem:[#allocation5 + $0xc78] sm:$0xff] }
 0x27d   : > { %4176 = vmatpush2.bf16.msra.mxu1 %v8836_v15  ;;  %v8485_v15 = vcombine.high %v521_v4, %v529_v5  ;;  %v8741_v17 = vcombine.high %v777_v6, %v785_v10  ;;  %v8740_v22 = vcombine.low %v777_v6, %v785_v10  ;;  %v9508_v6 = vld [vmem:[#allocation8 + $0x60] ss:$16 sps:$4 sm:$0xff]  }
 0x27e   : > { %4177 = vmatprep.subr.bf16.mxu1 %v8821_v20  ;;  %v8484_v20 = vcombine.low %v521_v4, %v529_v5  ;;  %v9510_v4 = vld [vmem:[#allocation8 + $0x64] ss:$16 sps:$4 sm:$0xff]   ;;  %v9511_v10 = vld [vmem:[#allocation8 + $0x260] ss:$16 sps:$4 sm:$0xff]  }
 0x27f   : > { %4137 = vmatpush2.bf16.msra.mxu0 %v8564_v27  ;;  %v10255_v21 = vpop.eup %10254  ;;  %v4311_v27 = vadd.bf16 1065369472, %v10253_v18  ;;  %v9513_v5 = vld [vmem:[#allocation8 + $0x264] ss:$16 sps:$4 sm:$0xff]  }
 0x280   : > { %4138 = vmatprep.subr.bf16.mxu0 %v8549_v29  ;;  %v9484_v29 = vld [vmem:[#allocation8 + $0xe0] ss:$16 sps:$4 sm:$0xff]   ;;  %v4313_v31 = vadd.bf16 1065369472, %v10255_v21  ;;  %v9522_v18 = vld [vmem:[#allocation8 + $0x24] ss:$16 sps:$4 sm:$0xff]   ;;  %v10929_v21 = vpack.c.bf16 %v10835_v7, %v10835_v7  ;;  %v10941_v7 = vpack.c.bf16 %v10891_v50, %v10891_v50 }
 0x281   : > { %4178 = vmatpush2.bf16.msra.mxu1 %v8820_v28  ;;  %v937_v28 = vrot.slane %v10907_v24, %v10824_v40  ;;  %v9532_v50 = vld [vmem:[#allocation8 + $0x1e0] ss:$16 sps:$4 sm:$0xff]  }
 0x282   : > { %4179 = vmatprep.subr.bf16.mxu1 %v8805_v32  ;;  %v9487_v32 = vld [vmem:[#allocation8 + $0x2e0] ss:$16 sps:$4 sm:$0xff]   ;;  %v10919_v49 = vmul.bf16 %v4313_v31, %v4281_v35  ;;  %v4214_v31 = vmul.bf16 1024605458, %v10929_v21  ;;  %v9534_v35 = vld [vmem:[#allocation8 + $0x1e4] ss:$16 sps:$4 sm:$0xff]  }
 0x283   : > { %4139 = vmatpush2.bf16.msra.mxu0 %v8548_v42  ;;  %v10916_v42 = vmul.bf16 %v4311_v27, %v4279_v34  ;;  %v9528_v27 = vld [vmem:[#allocation8 + $0x4] ss:$16 sps:$4 sm:$0xff]   ;;  %v9529_v34 = vld [vmem:[#allocation8 + $0x200] ss:$16 sps:$4 sm:$0xff]  }
 0x284   : > { %4140 = vmatprep.subr.bf16.mxu0 %v8533_v38 }
 0x285   : > { %4180 = vmatpush2.bf16.msra.mxu1 %v8804_v43  ;;  %v9495_v43 = vld [vmem:[#allocation8 + $0x2c4] ss:$16 sps:$4 sm:$0xff]  }
 0x286   : > { %4181 = vmatprep.subr.bf16.mxu1 %v8789_v48 }
 0x287   : > { %4141 = vmatpush2.bf16.msra.mxu0 %v8532_v55 }
 0x288   : > { %4142 = vmatprep.subr.bf16.mxu0 %v8517_v56 }
 0x289   : > { %4182 = vmatpush2.bf16.msra.mxu1 %v8788_v13  ;;  %v9501_v13 = vld [vmem:[#allocation8 + $0x2a4] ss:$16 sps:$4 sm:$0xff]  }
 0x28a   : > { %4183 = vmatprep.subr.bf16.mxu1 %v8773_v57 }
 0x28b   : > { %4143 = vmatpush2.bf16.msra.mxu0 %v8516_v62 }
 0x28c   : > { %4144 = vmatprep.subr.bf16.mxu0 %v8501_v1  ;;  %v9502_v1 = vld [vmem:[#allocation8 + $0x80] ss:$16 sps:$4 sm:$0xff]  }
 0x28d   : > { %4184 = vmatpush2.bf16.msra.mxu1 %v8772_v0  ;;  %v9507_v0 = vld [vmem:[#allocation8 + $0x284] ss:$16 sps:$4 sm:$0xff]  }
 0x28e   : > { %4185 = vmatprep.subr.bf16.mxu1 %v8757_v59  ;;  %v9505_v59 = vld [vmem:[#allocation8 + $0x280] ss:$16 sps:$4 sm:$0xff]  }
 0x28f   : > { %4145 = vmatpush2.bf16.msra.mxu0 %v8500_v11  ;;  %v9516_v11 = vld [vmem:[#allocation8 + $0x44] ss:$16 sps:$4 sm:$0xff]  }
 0x290   : > { %4146 = vmatprep.subr.bf16.mxu0 %v8485_v15  ;;  %v9514_v15 = vld [vmem:[#allocation8 + $0x40] ss:$16 sps:$4 sm:$0xff]  }
 0x291   : > { %4186 = vmatpush2.bf16.msra.mxu1 %v8756_v12  ;;  %v9519_v12 = vld [vmem:[#allocation8 + $0x244] ss:$16 sps:$4 sm:$0xff]  }
 0x292   : > { %4187 = vmatprep.subr.bf16.mxu1 %v8741_v17  ;;  %v9517_v17 = vld [vmem:[#allocation8 + $0x240] ss:$16 sps:$4 sm:$0xff]  }
 0x293   : > { %4147 = vmatpush2.bf16.msra.mxu0 %v8484_v20  ;;  %v9525_v20 = vld [vmem:[#allocation8 + $0x224] ss:$16 sps:$4 sm:$0xff]  }
 0x294   : > { %7436 = vmatprep.subr.bf16.mxu0 %v9486_v25  ;;  %v10933_v25 = vpack.c.bf16 %v10853_v45, %v10853_v45 }
 0x295   : > { %4188 = vmatpush2.bf16.msra.mxu1 %v8740_v22  ;;  %v9520_v22 = vld [vmem:[#allocation8 + $0x20] ss:$16 sps:$4 sm:$0xff]  }
 0x296   : > { %7477 = vmatprep.subr.bf16.mxu1 %v9489_v26  ;;  %v3904_v39 = vpop.f32.mrf.mxu0  ;;  %4149 = vmatmul.mubr.bf16.vlgmr.msra.gmra.mxu0 %v10803_v16  ;;  %v9523_v26 = vld [vmem:[#allocation8 + $0x220] ss:$16 sps:$4 sm:$0xff]   ;;  %v4216_v45 = vmul.bf16 1024605458, %v10933_v25 }
 0x297   : > { %v3905_v38 = vadd.f32 %v3904_v39, %v937_v28  ;;  %7437 = vmatpush1.bf16.msra.mxu0 %v9484_v29  ;;  %7468 = vmatprep.mubr.bf16.mxu0 %v10916_v42  ;;  %v10937_v28 = vpack.c.bf16 %v10875_v44, %v10875_v44  ;;  %v9531_v29 = vld [vmem:[#allocation8 + $0x204] ss:$16 sps:$4 sm:$0xff]   ;;  %v4230_v39 = vmul.bf16 %v4214_v31, %v10929_v21  ;;  %v9568_v31 = vld [vmem:[#allocation8 + $0x120] ss:$16 sps:$4 sm:$0xff]  }
 0x298   : > { %v3945_v48 = vpop.f32.mrf.mxu1  ;;  %4190 = vmatmul.mubr.bf16.vlgmr.msra.gmra.mxu1 %v10805_v19  ;;  %v3906_v46 = vpop.f32.mrf.mxu0  ;;  %7438 = vmatprep.subr.bf16.mxu0 %v9492_v37  ;;  %v9537_v44 = vld [vmem:[#allocation8 + $0x3e4] ss:$16 sps:$4 sm:$0xff]   ;;  %v4221_v37 = vmul.bf16 1024605458, %v10941_v7 }
 0x299   : > { %7478 = vmatpush1.bf16.msra.mxu1 %v9487_v32  ;;  %v10922_v53 = vadd.f32 %v3945_v48, %v3905_v38  ;;  %7509 = vmatprep.mubr.bf16.mxu1 %v10919_v49  ;;  %v3907_v16 = vadd.f32 %v3906_v46, %v941_v36  ;;  %v9526_v32 = vld [vmem:[#allocation8] ss:$16 sps:$4 sm:$0xff]   ;;  %v4219_v36 = vmul.bf16 1024605458, %v10937_v28  ;;  %v9540_v48 = vld [vmem:[#allocation8 + $0x1c4] ss:$16 sps:$4 sm:$0xff]  }
 0x29a   : > { %v3947_v55 = vpop.f32.mrf.mxu1  ;;  %v3908_v56 = vpop.f32.mrf.mxu0  ;;  %7479 = vmatprep.subr.bf16.mxu1 %v9495_v43  ;;  %v4232_v43 = vmul.bf16 %v4216_v45, %v10933_v25  ;;  %v9535_v38 = vld [vmem:[#allocation8 + $0x3e0] ss:$16 sps:$4 sm:$0xff]   ;;  %v9543_v46 = vld [vmem:[#allocation8 + $0x3c4] ss:$16 sps:$4 sm:$0xff]  }
 0x29b   : > { %v10925_v19 = vadd.f32 %v3947_v55, %v3907_v16  ;;  %7439 = vmatpush1.bf16.msra.mxu0 %v9490_v41  ;;  %v4235_v41 = vmul.bf16 %v4219_v36, %v10937_v28  ;;  %v9538_v16 = vld [vmem:[#allocation8 + $0x1c0] ss:$16 sps:$4 sm:$0xff]   ;;  %v9546_v56 = vld [vmem:[#allocation8 + $0x1a4] ss:$16 sps:$4 sm:$0xff]  }
 0x29c   : > { %v3949_v57 = vpop.f32.mrf.mxu1  ;;  %v3909_v61 = vpop.f32.mrf.mxu0  ;;  %7440 = vmatprep.subr.bf16.mxu0 %v9498_v52  ;;  %v4246_v52 = vadd.bf16 1061961548, %v4230_v39  ;;  %v4248_v55 = vadd.bf16 1061961548, %v4232_v43  ;;  %v9576_v45 = vld [vmem:[#allocation8 + $0x104] ss:$16 sps:$4 sm:$0xff]  }
 0x29d   : > { %7480 = vmatpush1.bf16.msra.mxu1 %v9493_v51  ;;  %v4237_v51 = vmul.bf16 %v4221_v37, %v10941_v7  ;;  %v4251_v57 = vadd.bf16 1061961548, %v4235_v41  ;;  %v9574_v37 = vld [vmem:[#allocation8 + $0x100] ss:$16 sps:$4 sm:$0xff]   ;;  %v9585_v41 = vld [vmem:[#allocation8 + $0x6e4] ss:$16 sps:$4 sm:$0xff]  }
 0x29e   : > { %v3950_v62 = vpop.f32.mrf.mxu1  ;;  %7481 = vmatprep.subr.bf16.mxu1 %v9501_v13  ;;  %v9541_v13 = vld [vmem:[#allocation8 + $0x3c0] ss:$16 sps:$4 sm:$0xff]  }
 0x29f   : > { %7441 = vmatpush1.bf16.msra.mxu0 %v9496_v60  ;;  %v9549_v60 = vld [vmem:[#allocation8 + $0x3a4] ss:$16 sps:$4 sm:$0xff]   ;;  %v4253_v61 = vadd.bf16 1061961548, %v4237_v51  ;;  %v4264_v62 = vmul.bf16 %v4248_v55, %v10933_v25  ;;  %v9580_v55 = vld [vmem:[#allocation8 + $0x4e0] ss:$16 sps:$4 sm:$0xff]  }
 0x2a0   : > { %7442 = vmatprep.subr.bf16.mxu0 %v9504_v54  ;;  %v9544_v54 = vld [vmem:[#allocation8 + $0x1a0] ss:$16 sps:$4 sm:$0xff]  }
 0x2a1   : > { %7482 = vmatpush1.bf16.msra.mxu1 %v9499_v58  ;;  %v4262_v58 = vmul.bf16 %v4246_v52, %v10929_v21  ;;  %v4280_v52 = vmul.bf16 1056980736, %v10933_v25 }
 0x2a2   : > { %7483 = vmatprep.subr.bf16.mxu1 %v9507_v0  ;;  %v9547_v0 = vld [vmem:[#allocation8 + $0x3a0] ss:$16 sps:$4 sm:$0xff]  }
 0x2a3   : > { %7443 = vmatpush1.bf16.msra.mxu0 %v9502_v1  ;;  %v9552_v1 = vld [vmem:[#allocation8 + $0x184] ss:$16 sps:$4 sm:$0xff]   ;;  %10256 = vtanh.bf16 %v4262_v58 }
 0x2a4   : > { %7444 = vmatprep.subr.bf16.mxu0 %v9510_v4  ;;  %v9555_v4 = vld [vmem:[#allocation8 + $0x384] ss:$16 sps:$4 sm:$0xff]   ;;  %10258 = vtanh.bf16 %v4264_v62 }
 0x2a5   : > { %7484 = vmatpush1.bf16.msra.mxu1 %v9505_v59  ;;  %v4267_v59 = vmul.bf16 %v4251_v57, %v10937_v28  ;;  %v9583_v57 = vld [vmem:[#allocation8 + $0x6e0] ss:$16 sps:$4 sm:$0xff]   ;;  %v9588_v58 = vld [vmem:[#allocation8 + $0x4c4] ss:$16 sps:$4 sm:$0xff]  }
 0x2a6   : > { %7485 = vmatprep.subr.bf16.mxu1 %v9513_v5  ;;  %v4269_v5 = vmul.bf16 %v4253_v61, %v10941_v7  ;;  %v9591_v62 = vld [vmem:[#allocation8 + $0x6c4] ss:$16 sps:$4 sm:$0xff]  }
 0x2a7   : > { %7445 = vmatpush1.bf16.msra.mxu0 %v9508_v6  ;;  %v9550_v6 = vld [vmem:[#allocation8 + $0x180] ss:$16 sps:$4 sm:$0xff]   ;;  %10260 = vtanh.bf16 %v4267_v59 }
 0x2a8   : > { %7446 = vmatprep.subr.bf16.mxu0 %v9516_v11  ;;  %v9558_v11 = vld [vmem:[#allocation8 + $0x164] ss:$16 sps:$4 sm:$0xff]   ;;  %10262 = vtanh.bf16 %v4269_v5 }
 0x2a9   : > { %7486 = vmatpush1.bf16.msra.mxu1 %v9511_v10  ;;  %v9553_v10 = vld [vmem:[#allocation8 + $0x380] ss:$16 sps:$4 sm:$0xff]   ;;  %v9594_v5 = vld [vmem:[#allocation8 + $0x4a4] ss:$16 sps:$4 sm:$0xff]  }
 0x2aa   : > { %7487 = vmatprep.subr.bf16.mxu1 %v9519_v12  ;;  %v9561_v12 = vld [vmem:[#allocation8 + $0x364] ss:$16 sps:$4 sm:$0xff]  }
 0x2ab   : > { %7447 = vmatpush1.bf16.msra.mxu0 %v9514_v15  ;;  %v9556_v15 = vld [vmem:[#allocation8 + $0x160] ss:$16 sps:$4 sm:$0xff]  }
 0x2ac   : > { %7448 = vmatprep.subr.bf16.mxu0 %v9522_v18  ;;  %v9564_v18 = vld [vmem:[#allocation8 + $0x144] ss:$16 sps:$4 sm:$0xff]  }
 0x2ad   : > { %7488 = vmatpush1.bf16.msra.mxu1 %v9517_v17  ;;  %v9559_v17 = vld [vmem:[#allocation8 + $0x360] ss:$16 sps:$4 sm:$0xff]  }
 0x2ae   : > { %7489 = vmatprep.subr.bf16.mxu1 %v9525_v20  ;;  %v9567_v20 = vld [vmem:[#allocation8 + $0x344] ss:$16 sps:$4 sm:$0xff]  }
 0x2af   : > { %7449 = vmatpush1.bf16.msra.mxu0 %v9520_v22  ;;  %v9562_v22 = vld [vmem:[#allocation8 + $0x140] ss:$16 sps:$4 sm:$0xff]  }
 0x2b0   : > { %7450 = vmatprep.subr.bf16.mxu0 %v9528_v27  ;;  %v9570_v27 = vld [vmem:[#allocation8 + $0x124] ss:$16 sps:$4 sm:$0xff]  }
 0x2b1   : > { %7490 = vmatpush1.bf16.msra.mxu1 %v9523_v26  ;;  %v9565_v26 = vld [vmem:[#allocation8 + $0x340] ss:$16 sps:$4 sm:$0xff]  }
 0x2b2   : > { %7491 = vmatprep.subr.bf16.mxu1 %v9531_v29  ;;  %v9573_v29 = vld [vmem:[#allocation8 + $0x324] ss:$16 sps:$4 sm:$0xff]  }
 0x2b3   : > { %7451 = vmatpush1.bf16.msra.mxu0 %v9526_v32  ;;  %v9571_v32 = vld [vmem:[#allocation8 + $0x320] ss:$16 sps:$4 sm:$0xff]  }
 0x2b4   : > { %7452 = vmatprep.subr.bf16.mxu0 %v9534_v35  ;;  %v9579_v35 = vld [vmem:[#allocation8 + $0x304] ss:$16 sps:$4 sm:$0xff]  }
 0x2b5   : > { %7492 = vmatpush1.bf16.msra.mxu1 %v9529_v34  ;;  %v10257_v34 = vpop.eup %10256 }
 0x2b6   : > { %7493 = vmatprep.subr.bf16.mxu1 %v9537_v44  ;;  %v10259_v36 = vpop.eup %10258  ;;  %v4310_v43 = vadd.bf16 1065369472, %v10257_v34  ;;  %v949_v34 = vrot.slane %v10907_v24, %v10845_v23 }
 0x2b7   : > { %7453 = vmatpush2.bf16.msra.mxu0 %v9532_v50  ;;  %v10261_v44 = vpop.eup %10260  ;;  %v9577_v50 = vld [vmem:[#allocation8 + $0x300] ss:$16 sps:$4 sm:$0xff]  }
 0x2b8   : > { %7454 = vmatprep.subr.bf16.mxu0 %v9540_v48  ;;  %v10263_v39 = vpop.eup %10262  ;;  %v4312_v48 = vadd.bf16 1065369472, %v10259_v36  ;;  %v4315_v51 = vadd.bf16 1065369472, %v10261_v44  ;;  %v9607_v36 = vld [vmem:[#allocation8 + $0x660] ss:$16 sps:$4 sm:$0xff]  }
 0x2b9   : > { %7494 = vmatpush2.bf16.msra.mxu1 %v9535_v38  ;;  %v9582_v38 = vld [vmem:[#allocation8 + $0x4e4] ss:$16 sps:$4 sm:$0xff]  }
 0x2ba   : > { %7495 = vmatprep.subr.bf16.mxu1 %v9543_v46  ;;  %v4278_v46 = vmul.bf16 1056980736, %v10929_v21  ;;  %v10962_v61 = vmul.bf16 %v4312_v48, %v4280_v52  ;;  %v4285_v21 = vmul.bf16 1056980736, %v10941_v7  ;;  %v9589_v7 = vld [vmem:[#allocation8 + $0x6c0] ss:$16 sps:$4 sm:$0xff]   ;;  %v10983_v52 = vpack.c.bf16 %v10887_v9, %v10887_v9 }
 0x2bb   : > { %7455 = vmatpush2.bf16.msra.mxu0 %v9538_v16  ;;  %v945_v16 = vrot.slane %v10907_v24, %v10842_v14  ;;  %v9612_v44 = vld [vmem:[#allocation8 + $0x444] ss:$16 sps:$4 sm:$0xff]   ;;  %v9625_v9 = vld [vmem:[#allocation8 + $0x600] ss:$16 sps:$4 sm:$0xff]  }
 0x2bc   : > { %7456 = vmatprep.subr.bf16.mxu0 %v9546_v56  ;;  %v10959_v56 = vmul.bf16 %v4310_v43, %v4278_v46  ;;  %v9613_v43 = vld [vmem:[#allocation8 + $0x640] ss:$16 sps:$4 sm:$0xff]   ;;  %v9621_v48 = vld [vmem:[#allocation8 + $0x624] ss:$16 sps:$4 sm:$0xff]   ;;  %v10979_v46 = vpack.c.bf16 %v10871_v33, %v10871_v33 }
 0x2bd   : > { %7496 = vmatpush2.bf16.msra.mxu1 %v9541_v13  ;;  %v4317_v13 = vadd.bf16 1065369472, %v10263_v39 }
 0x2be   : > { %7497 = vmatprep.subr.bf16.mxu1 %v9549_v60  ;;  %v4283_v60 = vmul.bf16 1056980736, %v10937_v28  ;;  %v9586_v28 = vld [vmem:[#allocation8 + $0x4c0] ss:$16 sps:$4 sm:$0xff]   ;;  %v4218_v33 = vmul.bf16 1024605458, %v10979_v46 }
 0x2bf   : > { %7457 = vmatpush2.bf16.msra.mxu0 %v9544_v54  ;;  %v10969_v59 = vmul.bf16 %v4317_v13, %v4285_v21  ;;  %v10987_v13 = vpack.c.bf16 %v10925_v19, %v10925_v19  ;;  %v9622_v21 = vld [vmem:[#allocation8 + $0x400] ss:$16 sps:$4 sm:$0xff]  }
 0x2c0   : > { %7458 = vmatprep.subr.bf16.mxu0 %v9552_v1  ;;  %v10966_v54 = vmul.bf16 %v4315_v51, %v4283_v60  ;;  %v9616_v51 = vld [vmem:[#allocation8 + $0x420] ss:$16 sps:$4 sm:$0xff]  }
 0x2c1   : > { %7498 = vmatpush2.bf16.msra.mxu1 %v9547_v0 }
 0x2c2   : > { %7499 = vmatprep.subr.bf16.mxu1 %v9555_v4 }
 0x2c3   : > { %7459 = vmatpush2.bf16.msra.mxu0 %v9550_v6 }
 0x2c4   : > { %7460 = vmatprep.subr.bf16.mxu0 %v9558_v11  ;;  %v9597_v11 = vld [vmem:[#allocation8 + $0x6a4] ss:$16 sps:$4 sm:$0xff]  }
 0x2c5   : > { %7500 = vmatpush2.bf16.msra.mxu1 %v9553_v10 }
 0x2c6   : > { %7501 = vmatprep.subr.bf16.mxu1 %v9561_v12 }
 0x2c7   : > { %7461 = vmatpush2.bf16.msra.mxu0 %v9556_v15 }
 0x2c8   : > { %7462 = vmatprep.subr.bf16.mxu0 %v9564_v18 }
 0x2c9   : > { %7502 = vmatpush2.bf16.msra.mxu1 %v9559_v17  ;;  %v9592_v17 = vld [vmem:[#allocation8 + $0x4a0] ss:$16 sps:$4 sm:$0xff]  }
 0x2ca   : > { %7503 = vmatprep.subr.bf16.mxu1 %v9567_v20  ;;  %v9595_v20 = vld [vmem:[#allocation8 + $0x6a0] ss:$16 sps:$4 sm:$0xff]  }
 0x2cb   : > { %7463 = vmatpush2.bf16.msra.mxu0 %v9562_v22  ;;  %v9600_v22 = vld [vmem:[#allocation8 + $0x484] ss:$16 sps:$4 sm:$0xff]  }
 0x2cc   : > { %7464 = vmatprep.subr.bf16.mxu0 %v9570_v27  ;;  %v9603_v27 = vld [vmem:[#allocation8 + $0x684] ss:$16 sps:$4 sm:$0xff]  }
 0x2cd   : > { %7504 = vmatpush2.bf16.msra.mxu1 %v9565_v26 }
 0x2ce   : > { %7505 = vmatprep.subr.bf16.mxu1 %v9573_v29  ;;  %v9598_v29 = vld [vmem:[#allocation8 + $0x480] ss:$16 sps:$4 sm:$0xff]  }
 0x2cf   : > { %7465 = vmatpush2.bf16.msra.mxu0 %v9568_v31  ;;  %v9601_v31 = vld [vmem:[#allocation8 + $0x680] ss:$16 sps:$4 sm:$0xff]  }
 0x2d0   : > { %7466 = vmatprep.subr.bf16.mxu0 %v9576_v45  ;;  %v9609_v45 = vld [vmem:[#allocation8 + $0x664] ss:$16 sps:$4 sm:$0xff]  }
 0x2d1   : > { %7506 = vmatpush2.bf16.msra.mxu1 %v9571_v32  ;;  %v9606_v32 = vld [vmem:[#allocation8 + $0x464] ss:$16 sps:$4 sm:$0xff]  }
 0x2d2   : > { %7507 = vmatprep.subr.bf16.mxu1 %v9579_v35  ;;  %v9604_v35 = vld [vmem:[#allocation8 + $0x460] ss:$16 sps:$4 sm:$0xff]  }
 0x2d3   : > { %7467 = vmatpush2.bf16.msra.mxu0 %v9574_v37  ;;  %v9615_v37 = vld [vmem:[#allocation8 + $0x644] ss:$16 sps:$4 sm:$0xff]  }
 0x2d4   : > { %7518 = vmatprep.subr.bf16.mxu0 %v9582_v38  ;;  %v9618_v38 = vld [vmem:[#allocation8 + $0x424] ss:$16 sps:$4 sm:$0xff]  }
 0x2d5   : > { %7508 = vmatpush2.bf16.msra.mxu1 %v9577_v50  ;;  %v9610_v50 = vld [vmem:[#allocation8 + $0x440] ss:$16 sps:$4 sm:$0xff]  }
 0x2d6   : > { %7559 = vmatprep.subr.bf16.mxu1 %v9585_v41  ;;  %v3986_v25 = vpop.f32.mrf.mxu0  ;;  %7469 = vmatmul.mubr.bf16.vlgmr.msra.gmra.mxu0 %v10959_v56 }
 0x2d7   : > { %v3987_v0 = vadd.f32 %v3986_v25, %v945_v16  ;;  %7519 = vmatpush1.bf16.msra.mxu0 %v9580_v55  ;;  %7550 = vmatprep.mubr.bf16.mxu0 %v10966_v54  ;;  %v9619_v16 = vld [vmem:[#allocation8 + $0x620] ss:$16 sps:$4 sm:$0xff]   ;;  %v9624_v55 = vld [vmem:[#allocation8 + $0x404] ss:$16 sps:$4 sm:$0xff]  }
 0x2d8   : > { %v4027_v1 = vpop.f32.mrf.mxu1  ;;  %7510 = vmatmul.mubr.bf16.vlgmr.msra.gmra.mxu1 %v10962_v61  ;;  %v3988_v4 = vpop.f32.mrf.mxu0  ;;  %7520 = vmatprep.subr.bf16.mxu0 %v9588_v58  ;;  %v4220_v58 = vmul.bf16 1024605458, %v10983_v52  ;;  %v9630_v25 = vld [vmem:[#allocation8 + $0x5e4] ss:$16 sps:$4 sm:$0xff]  }
 0x2d9   : > { %7560 = vmatpush1.bf16.msra.mxu1 %v9583_v57  ;;  %v10972_v6 = vadd.f32 %v4027_v1, %v3987_v0  ;;  %7591 = vmatprep.mubr.bf16.mxu1 %v10969_v59  ;;  %v3989_v39 = vadd.f32 %v3988_v4, %v949_v34  ;;  %v9627_v57 = vld [vmem:[#allocation8 + $0x604] ss:$16 sps:$4 sm:$0xff]   ;;  %v4234_v1 = vmul.bf16 %v4218_v33, %v10979_v46  ;;  %v9643_v34 = vld [vmem:[#allocation8 + $0x7a0] ss:$16 sps:$4 sm:$0xff]  }
 0x2da   : > { %v4029_v10 = vpop.f32.mrf.mxu1  ;;  %v3990_v12 = vpop.f32.mrf.mxu0  ;;  %7561 = vmatprep.subr.bf16.mxu1 %v9591_v62  ;;  %v4223_v62 = vmul.bf16 1024605458, %v10987_v13  ;;  %v9633_v0 = vld [vmem:[#allocation8 + $0x7e4] ss:$16 sps:$4 sm:$0xff]   ;;  %v4236_v4 = vmul.bf16 %v4220_v58, %v10983_v52  ;;  %v9664_v58 = vld [vmem:[#allocation8 + $0x520] ss:$16 sps:$4 sm:$0xff]  }
 0x2db   : > { %7521 = vmatpush1.bf16.msra.mxu0 %v9586_v28  ;;  %v4030_v41 = vadd.f32 %v4029_v10, %v3989_v39  ;;  %v9628_v28 = vld [vmem:[#allocation8 + $0x5e0] ss:$16 sps:$4 sm:$0xff]   ;;  %v9666_v33 = vld [vmem:[#allocation8 + $0x524] ss:$16 sps:$4 sm:$0xff]  }
 0x2dc   : > { %v4031_v15 = vpop.f32.mrf.mxu1  ;;  %v3991_v18 = vpop.f32.mrf.mxu0  ;;  %7522 = vmatprep.subr.bf16.mxu0 %v9594_v5  ;;  %v9636_v5 = vld [vmem:[#allocation8 + $0x5c4] ss:$16 sps:$4 sm:$0xff]   ;;  %v4239_v10 = vmul.bf16 %v4223_v62, %v10987_v13  ;;  %v9646_v39 = vld [vmem:[#allocation8 + $0x580] ss:$16 sps:$4 sm:$0xff]  }
 0x2dd   : > { %7562 = vmatpush1.bf16.msra.mxu1 %v9589_v7  ;;  %v10989_v60 = vpack.c.bf16 %v4030_v41, %v4030_v41  ;;  %v9631_v7 = vld [vmem:[#allocation8 + $0x7e0] ss:$16 sps:$4 sm:$0xff]   ;;  %v4250_v15 = vadd.bf16 1061961548, %v4234_v1  ;;  %v4252_v18 = vadd.bf16 1061961548, %v4236_v4 }
 0x2de   : > { %v4032_v26 = vpop.f32.mrf.mxu1  ;;  %7563 = vmatprep.subr.bf16.mxu1 %v9597_v11  ;;  %v9639_v11 = vld [vmem:[#allocation8 + $0x7c4] ss:$16 sps:$4 sm:$0xff]   ;;  %v9655_v41 = vld [vmem:[#allocation8 + $0x760] ss:$16 sps:$4 sm:$0xff]  }
 0x2df   : > { %7523 = vmatpush1.bf16.msra.mxu0 %v9592_v17  ;;  %v4225_v19 = vmul.bf16 1024605458, %v10989_v60  ;;  %v9634_v17 = vld [vmem:[#allocation8 + $0x5c0] ss:$16 sps:$4 sm:$0xff]   ;;  %v4255_v26 = vadd.bf16 1061961548, %v4239_v10 }
 0x2e0   : > { %7524 = vmatprep.subr.bf16.mxu0 %v9600_v22  ;;  %v9642_v22 = vld [vmem:[#allocation8 + $0x5a4] ss:$16 sps:$4 sm:$0xff]  }
 0x2e1   : > { %7564 = vmatpush1.bf16.msra.mxu1 %v9595_v20  ;;  %v4241_v12 = vmul.bf16 %v4225_v19, %v10989_v60  ;;  %v9637_v20 = vld [vmem:[#allocation8 + $0x7c0] ss:$16 sps:$4 sm:$0xff]   ;;  %v9678_v10 = vld [vmem:[#allocation8 + $0x8e4] ss:$16 sps:$4 sm:$0xff]  }
 0x2e2   : > { %7565 = vmatprep.subr.bf16.mxu1 %v9603_v27  ;;  %v9645_v27 = vld [vmem:[#allocation8 + $0x7a4] ss:$16 sps:$4 sm:$0xff]  }
 0x2e3   : > { %7525 = vmatpush1.bf16.msra.mxu0 %v9598_v29  ;;  %v4257_v29 = vadd.bf16 1061961548, %v4241_v12  ;;  %v9681_v12 = vld [vmem:[#allocation8 + $0xae4] ss:$16 sps:$4 sm:$0xff]  }
 0x2e4   : > { %7526 = vmatprep.subr.bf16.mxu0 %v9606_v32  ;;  %v9640_v32 = vld [vmem:[#allocation8 + $0x5a0] ss:$16 sps:$4 sm:$0xff]  }
 0x2e5   : > { %7566 = vmatpush1.bf16.msra.mxu1 %v9601_v31  ;;  %v4266_v31 = vmul.bf16 %v4250_v15, %v10979_v46  ;;  %v4282_v15 = vmul.bf16 1056980736, %v10979_v46  ;;  %v4289_v46 = vmul.bf16 1056980736, %v10989_v60 }
 0x2e6   : > { %7567 = vmatprep.subr.bf16.mxu1 %v9609_v45  ;;  %v4268_v45 = vmul.bf16 %v4252_v18, %v10983_v52  ;;  %v4284_v18 = vmul.bf16 1056980736, %v10983_v52  ;;  %v9684_v52 = vld [vmem:[#allocation8 + $0x8c4] ss:$16 sps:$4 sm:$0xff]  }
 0x2e7   : > { %7527 = vmatpush1.bf16.msra.mxu0 %v9604_v35  ;;  %v9648_v35 = vld [vmem:[#allocation8 + $0x584] ss:$16 sps:$4 sm:$0xff]   ;;  %10264 = vtanh.bf16 %v4266_v31  ;;  %v4287_v31 = vmul.bf16 1056980736, %v10987_v13 }
 0x2e8   : > { %7528 = vmatprep.subr.bf16.mxu0 %v9612_v44  ;;  %v9651_v44 = vld [vmem:[#allocation8 + $0x784] ss:$16 sps:$4 sm:$0xff]   ;;  %10266 = vtanh.bf16 %v4268_v45 }
 0x2e9   : > { %7568 = vmatpush1.bf16.msra.mxu1 %v9607_v36  ;;  %v4271_v36 = vmul.bf16 %v4255_v26, %v10987_v13  ;;  %v9682_v13 = vld [vmem:[#allocation8 + $0x8c0] ss:$16 sps:$4 sm:$0xff]  }
 0x2ea   : > { %7569 = vmatprep.subr.bf16.mxu1 %v9615_v37  ;;  %v4273_v37 = vmul.bf16 %v4257_v29, %v10989_v60  ;;  %v9679_v29 = vld [vmem:[#allocation8 + $0xae0] ss:$16 sps:$4 sm:$0xff]  }
 0x2eb   : > { %7529 = vmatpush1.bf16.msra.mxu0 %v9610_v50  ;;  %v9649_v50 = vld [vmem:[#allocation8 + $0x780] ss:$16 sps:$4 sm:$0xff]   ;;  %10268 = vtanh.bf16 %v4271_v36 }
 0x2ec   : > { %7530 = vmatprep.subr.bf16.mxu0 %v9618_v38  ;;  %v9657_v38 = vld [vmem:[#allocation8 + $0x764] ss:$16 sps:$4 sm:$0xff]   ;;  %10270 = vtanh.bf16 %v4273_v37  ;;  %v9685_v60 = vld [vmem:[#allocation8 + $0xac0] ss:$16 sps:$4 sm:$0xff]  }
 0x2ed   : > { %7570 = vmatpush1.bf16.msra.mxu1 %v9613_v43  ;;  %v9654_v43 = vld [vmem:[#allocation8 + $0x564] ss:$16 sps:$4 sm:$0xff]  }
 0x2ee   : > { %7571 = vmatprep.subr.bf16.mxu1 %v9621_v48  ;;  %v9652_v48 = vld [vmem:[#allocation8 + $0x560] ss:$16 sps:$4 sm:$0xff]  }
 0x2ef   : > { %7531 = vmatpush1.bf16.msra.mxu0 %v9616_v51  ;;  %v9660_v51 = vld [vmem:[#allocation8 + $0x544] ss:$16 sps:$4 sm:$0xff]  }
 0x2f0   : > { %7532 = vmatprep.subr.bf16.mxu0 %v9624_v55  ;;  %v9658_v55 = vld [vmem:[#allocation8 + $0x540] ss:$16 sps:$4 sm:$0xff]  }
 0x2f1   : > { %7572 = vmatpush1.bf16.msra.mxu1 %v9619_v16  ;;  %v9663_v16 = vld [vmem:[#allocation8 + $0x744] ss:$16 sps:$4 sm:$0xff]  }
 0x2f2   : > { %7573 = vmatprep.subr.bf16.mxu1 %v9627_v57  ;;  %v9661_v57 = vld [vmem:[#allocation8 + $0x740] ss:$16 sps:$4 sm:$0xff]  }
 0x2f3   : > { %7533 = vmatpush1.bf16.msra.mxu0 %v9622_v21  ;;  %v9669_v21 = vld [vmem:[#allocation8 + $0x724] ss:$16 sps:$4 sm:$0xff]  }
 0x2f4   : > { %7534 = vmatprep.subr.bf16.mxu0 %v9630_v25  ;;  %v9672_v25 = vld [vmem:[#allocation8 + $0x504] ss:$16 sps:$4 sm:$0xff]  }
 0x2f5   : > { %7574 = vmatpush1.bf16.msra.mxu1 %v9625_v9  ;;  %v9667_v9 = vld [vmem:[#allocation8 + $0x720] ss:$16 sps:$4 sm:$0xff]   ;;  %v10265_v62 = vpop.eup %10264 }
 0x2f6   : > { %7575 = vmatprep.subr.bf16.mxu1 %v9633_v0  ;;  %v9675_v0 = vld [vmem:[#allocation8 + $0x704] ss:$16 sps:$4 sm:$0xff]   ;;  %v10267_v19 = vpop.eup %10266 }
 0x2f7   : > { %7535 = vmatpush2.bf16.msra.mxu0 %v9628_v28  ;;  %v9670_v28 = vld [vmem:[#allocation8 + $0x500] ss:$16 sps:$4 sm:$0xff]  }
 0x2f8   : > { %7536 = vmatprep.subr.bf16.mxu0 %v9636_v5  ;;  %v4314_v5 = vadd.bf16 1065369472, %v10265_v62  ;;  %v957_v62 = vrot.slane %v10907_v24, %v924_v3  ;;  %v9717_v3 = vld [vmem:[#allocation8 + $0xa24] ss:$16 sps:$4 sm:$0xff]  }
 0x2f9   : > { %7576 = vmatpush2.bf16.msra.mxu1 %v9631_v7  ;;  %v10269_v1 = vpop.eup %10268  ;;  %v9673_v7 = vld [vmem:[#allocation8 + $0x700] ss:$16 sps:$4 sm:$0xff]  }
 0x2fa   : > { %7577 = vmatprep.subr.bf16.mxu1 %v9639_v11  ;;  %v10271_v4 = vpop.eup %10270  ;;  %v4316_v11 = vadd.bf16 1065369472, %v10267_v19  ;;  %v9700_v19 = vld [vmem:[#allocation8 + $0x860] ss:$16 sps:$4 sm:$0xff]  }
 0x2fb   : > { %7537 = vmatpush2.bf16.msra.mxu0 %v9634_v17  ;;  %v4319_v17 = vadd.bf16 1065369472, %v10269_v1  ;;  %v4321_v26 = vadd.bf16 1065369472, %v10271_v4  ;;  %v9703_v1 = vld [vmem:[#allocation8 + $0xa60] ss:$16 sps:$4 sm:$0xff]  }
 0x2fc   : > { %7538 = vmatprep.subr.bf16.mxu0 %v9642_v22  ;;  %v9676_v22 = vld [vmem:[#allocation8 + $0x8e0] ss:$16 sps:$4 sm:$0xff]  }
 0x2fd   : > { %7578 = vmatpush2.bf16.msra.mxu1 %v9637_v20  ;;  %v953_v20 = vrot.slane %v10907_v24, %v920_v63  ;;  %v9687_v63 = vld [vmem:[#allocation8 + $0xac4] ss:$16 sps:$4 sm:$0xff]   ;;  %v11029_v24 = vpack.c.bf16 %v10922_v53, %v10922_v53 }
 0x2fe   : > { %7579 = vmatprep.subr.bf16.mxu1 %v9645_v27  ;;  %v11008_v27 = vmul.bf16 %v4314_v5, %v4282_v15  ;;  %v9706_v5 = vld [vmem:[#allocation8 + $0x840] ss:$16 sps:$4 sm:$0xff]  }
 0x2ff   : > { %7539 = vmatpush2.bf16.msra.mxu0 %v9640_v32  ;;  %v11011_v32 = vmul.bf16 %v4316_v11, %v4284_v18  ;;  %v9714_v11 = vld [vmem:[#allocation8 + $0x824] ss:$16 sps:$4 sm:$0xff]   ;;  %v9712_v15 = vld [vmem:[#allocation8 + $0x820] ss:$16 sps:$4 sm:$0xff]  }
 0x300   : > { %7540 = vmatprep.subr.bf16.mxu0 %v9648_v35  ;;  %v9715_v18 = vld [vmem:[#allocation8 + $0xa20] ss:$16 sps:$4 sm:$0xff]  }
 0x301   : > { %7580 = vmatpush2.bf16.msra.mxu1 %v9643_v34  ;;  %v11015_v34 = vmul.bf16 %v4319_v17, %v4287_v31  ;;  %v11033_v17 = vpack.c.bf16 %v10972_v6, %v10972_v6  ;;  %v9718_v31 = vld [vmem:[#allocation8 + $0x800] ss:$16 sps:$4 sm:$0xff]  }
 0x302   : > { %7581 = vmatprep.subr.bf16.mxu1 %v9651_v44  ;;  %v11018_v44 = vmul.bf16 %v4321_v26, %v4289_v46  ;;  %v9723_v26 = vld [vmem:[#allocation8 + $0xa04] ss:$16 sps:$4 sm:$0xff]   ;;  %v9721_v46 = vld [vmem:[#allocation8 + $0xa00] ss:$16 sps:$4 sm:$0xff]  }
 0x303   : > { %7541 = vmatpush2.bf16.msra.mxu0 %v9646_v39  ;;  %v9690_v39 = vld [vmem:[#allocation8 + $0x8a4] ss:$16 sps:$4 sm:$0xff]   ;;  %v4224_v53 = vmul.bf16 1024605458, %v11033_v17 }
 0x304   : > { %7542 = vmatprep.subr.bf16.mxu0 %v9654_v43 }
 0x305   : > { %7582 = vmatpush2.bf16.msra.mxu1 %v9649_v50 }
 0x306   : > { %7583 = vmatprep.subr.bf16.mxu1 %v9657_v38  ;;  %v9693_v38 = vld [vmem:[#allocation8 + $0xaa4] ss:$16 sps:$4 sm:$0xff]  }
 0x307   : > { %7543 = vmatpush2.bf16.msra.mxu0 %v9652_v48 }
 0x308   : > { %7544 = vmatprep.subr.bf16.mxu0 %v9660_v51  ;;  %v9688_v51 = vld [vmem:[#allocation8 + $0x8a0] ss:$16 sps:$4 sm:$0xff]  }
 0x309   : > { %7584 = vmatpush2.bf16.msra.mxu1 %v9655_v41 }
 0x30a   : > { %7585 = vmatprep.subr.bf16.mxu1 %v9663_v16 }
 0x30b   : > { %7545 = vmatpush2.bf16.msra.mxu0 %v9658_v55  ;;  %v9691_v55 = vld [vmem:[#allocation8 + $0xaa0] ss:$16 sps:$4 sm:$0xff]  }
 0x30c   : > { %7546 = vmatprep.subr.bf16.mxu0 %v9666_v33 }
 0x30d   : > { %7586 = vmatpush2.bf16.msra.mxu1 %v9661_v57  ;;  %v9696_v57 = vld [vmem:[#allocation8 + $0x884] ss:$16 sps:$4 sm:$0xff]  }
 0x30e   : > { %7587 = vmatprep.subr.bf16.mxu1 %v9669_v21  ;;  %v9699_v21 = vld [vmem:[#allocation8 + $0xa84] ss:$16 sps:$4 sm:$0xff]  }
 0x30f   : > { %7547 = vmatpush2.bf16.msra.mxu0 %v9664_v58  ;;  %v9694_v58 = vld [vmem:[#allocation8 + $0x880] ss:$16 sps:$4 sm:$0xff]  }
 0x310   : > { %7548 = vmatprep.subr.bf16.mxu0 %v9672_v25  ;;  %v9702_v25 = vld [vmem:[#allocation8 + $0x864] ss:$16 sps:$4 sm:$0xff]  }
 0x311   : > { %7588 = vmatpush2.bf16.msra.mxu1 %v9667_v9  ;;  %v9697_v9 = vld [vmem:[#allocation8 + $0xa80] ss:$16 sps:$4 sm:$0xff]  }
 0x312   : > { %7589 = vmatprep.subr.bf16.mxu1 %v9675_v0  ;;  %v9705_v0 = vld [vmem:[#allocation8 + $0xa64] ss:$16 sps:$4 sm:$0xff]  }
 0x313   : > { %7549 = vmatpush2.bf16.msra.mxu0 %v9670_v28  ;;  %v9708_v28 = vld [vmem:[#allocation8 + $0x844] ss:$16 sps:$4 sm:$0xff]  }
 0x314   : > { %7600 = vmatprep.subr.bf16.mxu0 %v9678_v10  ;;  %v9709_v10 = vld [vmem:[#allocation8 + $0xa40] ss:$16 sps:$4 sm:$0xff]  }
 0x315   : > { %7590 = vmatpush2.bf16.msra.mxu1 %v9673_v7  ;;  %v9711_v7 = vld [vmem:[#allocation8 + $0xa44] ss:$16 sps:$4 sm:$0xff]  }
 0x316   : > { %7641 = vmatprep.subr.bf16.mxu1 %v9681_v12  ;;  %v4068_v45 = vpop.f32.mrf.mxu0  ;;  %7551 = vmatmul.mubr.bf16.vlgmr.msra.gmra.mxu0 %v11008_v27 }
 0x317   : > { %v4069_v35 = vadd.f32 %v4068_v45, %v953_v20  ;;  %7601 = vmatpush1.bf16.msra.mxu0 %v9676_v22  ;;  %7632 = vmatprep.mubr.bf16.mxu0 %v11015_v34  ;;  %v9720_v20 = vld [vmem:[#allocation8 + $0x804] ss:$16 sps:$4 sm:$0xff]  }
 0x318   : > { %v4109_v36 = vpop.f32.mrf.mxu1  ;;  %7592 = vmatmul.mubr.bf16.vlgmr.msra.gmra.mxu1 %v11011_v32  ;;  %v4070_v37 = vpop.f32.mrf.mxu0  ;;  %7602 = vmatprep.subr.bf16.mxu0 %v9684_v52  ;;  %v9726_v52 = vld [vmem:[#allocation8 + $0x9e4] ss:$16 sps:$4 sm:$0xff]  }
 0x319   : > { %7642 = vmatpush1.bf16.msra.mxu1 %v9679_v29  ;;  %v11021_v50 = vadd.f32 %v4109_v36, %v4069_v35  ;;  %7673 = vmatprep.mubr.bf16.mxu1 %v11018_v44  ;;  %v4071_v4 = vadd.f32 %v4070_v37, %v957_v62  ;;  %v4222_v29 = vmul.bf16 1024605458, %v11029_v24  ;;  %v9729_v45 = vld [vmem:[#allocation8 + $0xbe4] ss:$16 sps:$4 sm:$0xff]   ;;  %v9724_v35 = vld [vmem:[#allocation8 + $0x9e0] ss:$16 sps:$4 sm:$0xff]   ;;  %v4240_v36 = vmul.bf16 %v4224_v53, %v11033_v17 }
 0x31a   : > { %v4111_v43 = vpop.f32.mrf.mxu1  ;;  %v4072_v48 = vpop.f32.mrf.mxu0  ;;  %7643 = vmatprep.subr.bf16.mxu1 %v9687_v63  ;;  %v9732_v37 = vld [vmem:[#allocation8 + $0x9c4] ss:$16 sps:$4 sm:$0xff]  }
 0x31b   : > { %7603 = vmatpush1.bf16.msra.mxu0 %v9682_v13  ;;  %v4112_v12 = vadd.f32 %v4111_v43, %v4071_v4  ;;  %v4238_v63 = vmul.bf16 %v4222_v29, %v11029_v24  ;;  %v9727_v13 = vld [vmem:[#allocation8 + $0xbe0] ss:$16 sps:$4 sm:$0xff]   ;;  %v4256_v48 = vadd.bf16 1061961548, %v4240_v36  ;;  %v9747_v62 = vld [vmem:[#allocation8 + $0xb84] ss:$16 sps:$4 sm:$0xff]  }
 0x31c   : > { %v4113_v41 = vpop.f32.mrf.mxu1  ;;  %v4073_v16 = vpop.f32.mrf.mxu0  ;;  %7604 = vmatprep.subr.bf16.mxu0 %v9690_v39  ;;  %v9735_v39 = vld [vmem:[#allocation8 + $0xbc4] ss:$16 sps:$4 sm:$0xff]   ;;  %v9748_v4 = vld [vmem:[#allocation8 + $0x960] ss:$16 sps:$4 sm:$0xff]  }
 0x31d   : > { %7644 = vmatpush1.bf16.msra.mxu1 %v9685_v60  ;;  %v11035_v22 = vpack.c.bf16 %v4112_v12, %v4112_v12  ;;  %v4254_v43 = vadd.bf16 1061961548, %v4238_v63  ;;  %v9733_v41 = vld [vmem:[#allocation8 + $0xbc0] ss:$16 sps:$4 sm:$0xff]   ;;  %v9774_v63 = vld [vmem:[#allocation8 + $0xce4] ss:$16 sps:$4 sm:$0xff]  }
 0x31e   : > { %v4114_v33 = vpop.f32.mrf.mxu1  ;;  %7645 = vmatprep.subr.bf16.mxu1 %v9693_v38  ;;  %v9730_v38 = vld [vmem:[#allocation8 + $0x9c0] ss:$16 sps:$4 sm:$0xff]   ;;  %v9777_v36 = vld [vmem:[#allocation8 + $0xee4] ss:$16 sps:$4 sm:$0xff]  }
 0x31f   : > { %7605 = vmatpush1.bf16.msra.mxu0 %v9688_v51  ;;  %v4227_v6 = vmul.bf16 1024605458, %v11035_v22  ;;  %v9738_v51 = vld [vmem:[#allocation8 + $0x9a4] ss:$16 sps:$4 sm:$0xff]   ;;  %v9736_v33 = vld [vmem:[#allocation8 + $0x9a0] ss:$16 sps:$4 sm:$0xff]  }
 0x320   : > { %7606 = vmatprep.subr.bf16.mxu0 %v9696_v57  ;;  %v4270_v57 = vmul.bf16 %v4254_v43, %v11029_v24  ;;  %v9757_v12 = vld [vmem:[#allocation8 + $0xb40] ss:$16 sps:$4 sm:$0xff]  }
 0x321   : > { %7646 = vmatpush1.bf16.msra.mxu1 %v9691_v55  ;;  %v4243_v60 = vmul.bf16 %v4227_v6, %v11035_v22  ;;  %v9741_v55 = vld [vmem:[#allocation8 + $0xba4] ss:$16 sps:$4 sm:$0xff]   ;;  %v9769_v6 = vld [vmem:[#allocation8 + $0xb00] ss:$16 sps:$4 sm:$0xff]  }
 0x322   : > { %7647 = vmatprep.subr.bf16.mxu1 %v9699_v21  ;;  %v4272_v21 = vmul.bf16 %v4256_v48, %v11033_v17  ;;  %10272 = vtanh.bf16 %v4270_v57  ;;  %v4291_v48 = vmul.bf16 1056980736, %v11035_v22 }
 0x323   : > { %7607 = vmatpush1.bf16.msra.mxu0 %v9694_v58  ;;  %v4259_v16 = vadd.bf16 1061961548, %v4243_v60  ;;  %v9739_v58 = vld [vmem:[#allocation8 + $0xba0] ss:$16 sps:$4 sm:$0xff]   ;;  %v4288_v60 = vmul.bf16 1056980736, %v11033_v17 }
 0x324   : > { %7608 = vmatprep.subr.bf16.mxu0 %v9702_v25  ;;  %10274 = vtanh.bf16 %v4272_v21  ;;  %v9778_v21 = vld [vmem:[#allocation8 + $0xcc0] ss:$16 sps:$4 sm:$0xff]  }
 0x325   : > { %7648 = vmatpush1.bf16.msra.mxu1 %v9697_v9  ;;  %v9744_v9 = vld [vmem:[#allocation8 + $0x984] ss:$16 sps:$4 sm:$0xff]   ;;  %v4275_v25 = vmul.bf16 %v4259_v16, %v11035_v22 }
 0x326   : > { %7649 = vmatprep.subr.bf16.mxu1 %v9705_v0  ;;  %v9742_v0 = vld [vmem:[#allocation8 + $0x980] ss:$16 sps:$4 sm:$0xff]  }
 0x327   : > { %7609 = vmatpush1.bf16.msra.mxu0 %v9700_v19  ;;  %v9745_v19 = vld [vmem:[#allocation8 + $0xb80] ss:$16 sps:$4 sm:$0xff]   ;;  %10276 = vtanh.bf16 %v4275_v25 }
 0x328   : > { %7610 = vmatprep.subr.bf16.mxu0 %v9708_v28  ;;  %v9753_v28 = vld [vmem:[#allocation8 + $0xb64] ss:$16 sps:$4 sm:$0xff]  }
 0x329   : > { %7650 = vmatpush1.bf16.msra.mxu1 %v9703_v1  ;;  %v9750_v1 = vld [vmem:[#allocation8 + $0x964] ss:$16 sps:$4 sm:$0xff]  }
 0x32a   : > { %7651 = vmatprep.subr.bf16.mxu1 %v9711_v7  ;;  %v9751_v7 = vld [vmem:[#allocation8 + $0xb60] ss:$16 sps:$4 sm:$0xff]  }
 0x32b   : > { %7611 = vmatpush1.bf16.msra.mxu0 %v9706_v5  ;;  %v9756_v5 = vld [vmem:[#allocation8 + $0x944] ss:$16 sps:$4 sm:$0xff]  }
 0x32c   : > { %7612 = vmatprep.subr.bf16.mxu0 %v9714_v11  ;;  %v9754_v11 = vld [vmem:[#allocation8 + $0x940] ss:$16 sps:$4 sm:$0xff]  }
 0x32d   : > { %7652 = vmatpush1.bf16.msra.mxu1 %v9709_v10  ;;  %v9759_v10 = vld [vmem:[#allocation8 + $0xb44] ss:$16 sps:$4 sm:$0xff]  }
 0x32e   : > { %7653 = vmatprep.subr.bf16.mxu1 %v9717_v3  ;;  %v9762_v3 = vld [vmem:[#allocation8 + $0x924] ss:$16 sps:$4 sm:$0xff]  }
 0x32f   : > { %7613 = vmatpush1.bf16.msra.mxu0 %v9712_v15  ;;  %v9765_v15 = vld [vmem:[#allocation8 + $0xb24] ss:$16 sps:$4 sm:$0xff]  }
 0x330   : > { %7614 = vmatprep.subr.bf16.mxu0 %v9720_v20  ;;  %v9763_v20 = vld [vmem:[#allocation8 + $0xb20] ss:$16 sps:$4 sm:$0xff]   ;;  %v10273_v29 = vpop.eup %10272 }
 0x331   : > { %7654 = vmatpush1.bf16.msra.mxu1 %v9715_v18  ;;  %v9760_v18 = vld [vmem:[#allocation8 + $0x920] ss:$16 sps:$4 sm:$0xff]  }
 0x332   : > { %7655 = vmatprep.subr.bf16.mxu1 %v9723_v26  ;;  %v9768_v26 = vld [vmem:[#allocation8 + $0x904] ss:$16 sps:$4 sm:$0xff]   ;;  %v10275_v53 = vpop.eup %10274 }
 0x333   : > { %7615 = vmatpush1.bf16.msra.mxu0 %v9718_v31  ;;  %v9771_v31 = vld [vmem:[#allocation8 + $0xb04] ss:$16 sps:$4 sm:$0xff]  }
 0x334   : > { %7616 = vmatprep.subr.bf16.mxu0 %v9726_v52  ;;  %v9766_v52 = vld [vmem:[#allocation8 + $0x900] ss:$16 sps:$4 sm:$0xff]  }
 0x335   : > { %7656 = vmatpush1.bf16.msra.mxu1 %v9721_v46  ;;  %v10277_v46 = vpop.eup %10276 }
 0x336   : > { %7657 = vmatprep.subr.bf16.mxu1 %v9729_v45  ;;  %v4318_v45 = vadd.bf16 1065369472, %v10273_v29 }
 0x337   : > { %7617 = vmatpush2.bf16.msra.mxu0 %v9724_v35  ;;  %v4320_v35 = vadd.bf16 1065369472, %v10275_v53 }
 0x338   : > { %7618 = vmatprep.subr.bf16.mxu0 %v9732_v37  ;;  %v4323_v37 = vadd.bf16 1065369472, %v10277_v46  ;;  %v9796_v46 = vld [vmem:[#allocation8 + $0xc60] ss:$16 sps:$4 sm:$0xff]  }
 0x339   : > { %7658 = vmatpush2.bf16.msra.mxu1 %v9727_v13  ;;  %v4286_v13 = vmul.bf16 1056980736, %v11029_v24  ;;  %v9780_v24 = vld [vmem:[#allocation8 + $0xcc4] ss:$16 sps:$4 sm:$0xff]  }
 0x33a   : > { %7659 = vmatprep.subr.bf16.mxu1 %v9735_v39  ;;  %v9772_v39 = vld [vmem:[#allocation8 + $0xce0] ss:$16 sps:$4 sm:$0xff]   ;;  %v11056_v17 = vmul.bf16 %v4323_v37, %v4291_v48  ;;  %v9813_v37 = vld [vmem:[#allocation8 + $0xe24] ss:$16 sps:$4 sm:$0xff]  }
 0x33b   : > { %7619 = vmatpush2.bf16.msra.mxu0 %v9730_v38  ;;  %v11048_v43 = vmul.bf16 %v4318_v45, %v4286_v13  ;;  %v9775_v38 = vld [vmem:[#allocation8 + $0xee0] ss:$16 sps:$4 sm:$0xff]   ;;  %v9804_v45 = vld [vmem:[#allocation8 + $0xc44] ss:$16 sps:$4 sm:$0xff]  }
 0x33c   : > { %7620 = vmatprep.subr.bf16.mxu0 %v9738_v51  ;;  %v10287_v51 = vld [vmem:[#allocation7 + $0x8] sm:$0xff]  ;;  %v9810_v13 = vld [vmem:[#allocation8 + $0xc24] ss:$16 sps:$4 sm:$0xff]   ;;  %v9811_v48 = vld [vmem:[#allocation8 + $0xe20] ss:$16 sps:$4 sm:$0xff]  }
 0x33d   : > { %7660 = vmatpush2.bf16.msra.mxu1 %v9733_v41  ;;  %v11051_v41 = vmul.bf16 %v4320_v35, %v4288_v60  ;;  %v965_v16 = vrot.slane %v10287_v51, %v932_v8  ;;  %v11069_v60 = vpack.c.bf16 %v11021_v50, %v11021_v50  ;;  %v9817_v50 = vld [vmem:[#allocation8 + $0xe00] ss:$16 sps:$4 sm:$0xff]  }
 0x33e   : > { %7661 = vmatprep.subr.bf16.mxu1 %v9741_v55  ;;  %v9783_v55 = vld [vmem:[#allocation8 + $0xec4] ss:$16 sps:$4 sm:$0xff]  }
 0x33f   : > { %7621 = vmatpush2.bf16.msra.mxu0 %v9736_v33 }
 0x340   : > { %7622 = vmatprep.subr.bf16.mxu0 %v9744_v9  ;;  %v9786_v9 = vld [vmem:[#allocation8 + $0xca4] ss:$16 sps:$4 sm:$0xff]  }
 0x341   : > { %7662 = vmatpush2.bf16.msra.mxu1 %v9739_v58  ;;  %v9781_v58 = vld [vmem:[#allocation8 + $0xec0] ss:$16 sps:$4 sm:$0xff]  }
 0x342   : > { %7663 = vmatprep.subr.bf16.mxu1 %v9747_v62  ;;  %v9789_v62 = vld [vmem:[#allocation8 + $0xea4] ss:$16 sps:$4 sm:$0xff]  }
 0x343   : > { %7623 = vmatpush2.bf16.msra.mxu0 %v9742_v0 }
 0x344   : > { %7624 = vmatprep.subr.bf16.mxu0 %v9750_v1 }
 0x345   : > { %7664 = vmatpush2.bf16.msra.mxu1 %v9745_v19 }
 0x346   : > { %7665 = vmatprep.subr.bf16.mxu1 %v9753_v28  ;;  %v9784_v28 = vld [vmem:[#allocation8 + $0xca0] ss:$16 sps:$4 sm:$0xff]  }
 0x347   : > { %7625 = vmatpush2.bf16.msra.mxu0 %v9748_v4 }
 0x348   : > { %7626 = vmatprep.subr.bf16.mxu0 %v9756_v5  ;;  %v9792_v5 = vld [vmem:[#allocation8 + $0xc84] ss:$16 sps:$4 sm:$0xff]  }
 0x349   : > { %7666 = vmatpush2.bf16.msra.mxu1 %v9751_v7  ;;  %v9787_v7 = vld [vmem:[#allocation8 + $0xea0] ss:$16 sps:$4 sm:$0xff]  }
 0x34a   : > { %7667 = vmatprep.subr.bf16.mxu1 %v9759_v10 }
 0x34b   : > { %7627 = vmatpush2.bf16.msra.mxu0 %v9754_v11 }
 0x34c   : > { %7628 = vmatprep.subr.bf16.mxu0 %v9762_v3 }
 0x34d   : > { %7668 = vmatpush2.bf16.msra.mxu1 %v9757_v12  ;;  %v9795_v12 = vld [vmem:[#allocation8 + $0xe84] ss:$16 sps:$4 sm:$0xff]  }
 0x34e   : > { %7669 = vmatprep.subr.bf16.mxu1 %v9765_v15  ;;  %v9790_v15 = vld [vmem:[#allocation8 + $0xc80] ss:$16 sps:$4 sm:$0xff]  }
 0x34f   : > { %7629 = vmatpush2.bf16.msra.mxu0 %v9760_v18  ;;  %v961_v18 = vrot.slane %v10287_v51, %v928_v2  ;;  %v9802_v2 = vld [vmem:[#allocation8 + $0xc40] ss:$16 sps:$4 sm:$0xff]   ;;  %v9816_v51 = vld [vmem:[#allocation8 + $0xc04] ss:$16 sps:$4 sm:$0xff]  }
 0x350   : > { %7630 = vmatprep.subr.bf16.mxu0 %v9768_v26  ;;  %v9798_v26 = vld [vmem:[#allocation8 + $0xc64] ss:$16 sps:$4 sm:$0xff]  }
 0x351   : > { %7670 = vmatpush2.bf16.msra.mxu1 %v9763_v20  ;;  %v9793_v20 = vld [vmem:[#allocation8 + $0xe80] ss:$16 sps:$4 sm:$0xff]  }
 0x352   : > { %7671 = vmatprep.subr.bf16.mxu1 %v9771_v31  ;;  %v9801_v31 = vld [vmem:[#allocation8 + $0xe64] ss:$16 sps:$4 sm:$0xff]  }
 0x353   : > { %7631 = vmatpush2.bf16.msra.mxu0 %v9766_v52 }
 0x354   : > { %7682 = vmatprep.subr.bf16.mxu0 %v9774_v63 }
 0x355   : > { %7672 = vmatpush2.bf16.msra.mxu1 %v9769_v6  ;;  %v9799_v6 = vld [vmem:[#allocation8 + $0xe60] ss:$16 sps:$4 sm:$0xff]  }
 0x356   : > { %7723 = vmatprep.subr.bf16.mxu1 %v9777_v36  ;;  %v4150_v57 = vpop.f32.mrf.mxu0  ;;  %7633 = vmatmul.mubr.bf16.vlgmr.msra.gmra.mxu0 %v11048_v43  ;;  %v9805_v36 = vld [vmem:[#allocation8 + $0xe40] ss:$16 sps:$4 sm:$0xff]  }
 0x357   : > { %7683 = vmatpush1.bf16.msra.mxu0 %v9772_v39  ;;  %7714 = vmatprep.mubr.bf16.mxu0 %v11056_v17  ;;  %v4151_v52 = vadd.f32 %v4150_v57, %v961_v18  ;;  %v9808_v39 = vld [vmem:[#allocation8 + $0xc20] ss:$16 sps:$4 sm:$0xff]  }
 0x358   : > { %v4191_v33 = vpop.f32.mrf.mxu1  ;;  %7674 = vmatmul.mubr.bf16.vlgmr.msra.gmra.mxu1 %v11051_v41  ;;  %v4152_v22 = vpop.f32.mrf.mxu0  ;;  %7684 = vmatprep.subr.bf16.mxu0 %v9780_v24  ;;  %v4226_v24 = vmul.bf16 1024605458, %v11069_v60  ;;  %v9832_v18 = vld [vmem:[#allocation8 + $0xda0] ss:$16 sps:$4 sm:$0xff]  }
 0x359   : > { %7724 = vmatpush1.bf16.msra.mxu1 %v9775_v38  ;;  %v4153_v25 = vadd.f32 %v4152_v22, %v965_v16  ;;  %v4192_v35 = vadd.f32 %v4191_v33, %v4151_v52  ;;  %v9819_v16 = vld [vmem:[#allocation8 + $0xe04] ss:$16 sps:$4 sm:$0xff]  }
 0x35a   : > { %v4193_v8 = vpop.f32.mrf.mxu1  ;;  %7725 = vmatprep.subr.bf16.mxu1 %v9783_v55  ;;  %v4154_v0 = vpop.f32.mrf.mxu0  ;;  %v9814_v55 = vld [vmem:[#allocation8 + $0xc00] ss:$16 sps:$4 sm:$0xff]   ;;  %v9822_v33 = vld [vmem:[#allocation8 + $0xde4] ss:$16 sps:$4 sm:$0xff]   ;;  %v4242_v22 = vmul.bf16 %v4226_v24, %v11069_v60 }
 0x35b   : > { %v4194_v19 = vadd.f32 %v4193_v8, %v4153_v25  ;;  %7685 = vmatpush1.bf16.msra.mxu0 %v9778_v21  ;;  %v11071_v38 = vpack.c.bf16 %v4192_v35, %v4192_v35  ;;  %v9825_v21 = vld [vmem:[#allocation8 + $0xfe4] ss:$16 sps:$4 sm:$0xff]   ;;  %v9823_v25 = vld [vmem:[#allocation8 + $0xfe0] ss:$16 sps:$4 sm:$0xff]  }
 0x35c   : > { %v4195_v1 = vpop.f32.mrf.mxu1  ;;  %v4155_v4 = vpop.f32.mrf.mxu0  ;;  %7686 = vmatprep.subr.bf16.mxu0 %v9786_v9  ;;  %v9828_v8 = vld [vmem:[#allocation8 + $0xdc4] ss:$16 sps:$4 sm:$0xff]   ;;  %v9853_v35 = vld [vmem:[#allocation8 + $0xf40] ss:$16 sps:$4 sm:$0xff]  }
 0x35d   : > { %7726 = vmatpush1.bf16.msra.mxu1 %v9781_v58  ;;  %v11060_v10 = vpack.c.bf16 %v4194_v19, %v4194_v19  ;;  %v4228_v57 = vmul.bf16 1024605458, %v11071_v38  ;;  %v9820_v58 = vld [vmem:[#allocation8 + $0xde0] ss:$16 sps:$4 sm:$0xff]   ;;  %v9831_v0 = vld [vmem:[#allocation8 + $0xfc4] ss:$16 sps:$4 sm:$0xff]  }
 0x35e   : > { %v4196_v11 = vpop.f32.mrf.mxu1  ;;  %7727 = vmatprep.subr.bf16.mxu1 %v9789_v62  ;;  %v9826_v4 = vld [vmem:[#allocation8 + $0xdc0] ss:$16 sps:$4 sm:$0xff]   ;;  %v9849_v52 = vld [vmem:[#allocation8 + $0xf64] ss:$16 sps:$4 sm:$0xff]  }
 0x35f   : > { %v4229_v3 = vmul.bf16 1024605458, %v11060_v10  ;;  %7687 = vmatpush1.bf16.msra.mxu0 %v9784_v28  ;;  %v4244_v9 = vmul.bf16 %v4228_v57, %v11071_v38  ;;  %v4293_v19 = vmul.bf16 1056980736, %v11060_v10  ;;  %v4258_v28 = vadd.bf16 1061961548, %v4242_v22 }
 0x360   : > { %7688 = vmatprep.subr.bf16.mxu0 %v9792_v5  ;;  %v9829_v5 = vld [vmem:[#allocation8 + $0xfc0] ss:$16 sps:$4 sm:$0xff]  }
 0x361   : > { %7728 = vmatpush1.bf16.msra.mxu1 %v9787_v7  ;;  %v4245_v29 = vmul.bf16 %v4229_v3, %v11060_v10  ;;  %v4260_v7 = vadd.bf16 1061961548, %v4244_v9  ;;  %v9837_v3 = vld [vmem:[#allocation8 + $0xfa4] ss:$16 sps:$4 sm:$0xff]   ;;  %v9865_v57 = vld [vmem:[#allocation8 + $0xf00] ss:$16 sps:$4 sm:$0xff]  }
 0x362   : > { %7729 = vmatprep.subr.bf16.mxu1 %v9795_v12  ;;  %v9834_v12 = vld [vmem:[#allocation8 + $0xda4] ss:$16 sps:$4 sm:$0xff]   ;;  %v4290_v9 = vmul.bf16 1056980736, %v11069_v60 }
 0x363   : > { %v4261_v53 = vadd.bf16 1061961548, %v4245_v29  ;;  %7689 = vmatpush1.bf16.msra.mxu0 %v9790_v15  ;;  %v4274_v15 = vmul.bf16 %v4258_v28, %v11069_v60  ;;  %v9843_v29 = vld [vmem:[#allocation8 + $0xf84] ss:$16 sps:$4 sm:$0xff]   ;;  %v9879_v60 = vld [vmem:[#allocation8 + $0x2cc] ss:$16 sps:$4 sm:$0xff]  }
 0x364   : > { %7690 = vmatprep.subr.bf16.mxu0 %v9798_v26  ;;  %v9840_v26 = vld [vmem:[#allocation8 + $0xd84] ss:$16 sps:$4 sm:$0xff]  }
 0x365   : > { %7730 = vmatpush1.bf16.msra.mxu1 %v9793_v20  ;;  %v4277_v63 = vmul.bf16 %v4261_v53, %v11060_v10  ;;  %v4276_v10 = vmul.bf16 %v4260_v7, %v11071_v38  ;;  %v9835_v20 = vld [vmem:[#allocation8 + $0xfa0] ss:$16 sps:$4 sm:$0xff]  }
 0x366   : > { %7731 = vmatprep.subr.bf16.mxu1 %v9801_v31  ;;  %v9838_v31 = vld [vmem:[#allocation8 + $0xd80] ss:$16 sps:$4 sm:$0xff]  }
 0x367   : > { %10278 = vtanh.bf16 %v4277_v63  ;;  %7691 = vmatpush1.bf16.msra.mxu0 %v9796_v46  ;;  %v9841_v53 = vld [vmem:[#allocation8 + $0xf80] ss:$16 sps:$4 sm:$0xff]   ;;  %v9846_v46 = vld [vmem:[#allocation8 + $0xd64] ss:$16 sps:$4 sm:$0xff]  }
 0x368   : > { %7692 = vmatprep.subr.bf16.mxu0 %v9804_v45  ;;  %10280 = vtanh.bf16 %v4274_v15  ;;  %v9847_v45 = vld [vmem:[#allocation8 + $0xf60] ss:$16 sps:$4 sm:$0xff]   ;;  %v9852_v63 = vld [vmem:[#allocation8 + $0xd44] ss:$16 sps:$4 sm:$0xff]   ;;  %v9877_v15 = vld [vmem:[#allocation8 + $0x2c8] ss:$16 sps:$4 sm:$0xff]  }
 0x369   : > { %7732 = vmatpush1.bf16.msra.mxu1 %v9799_v6  ;;  %10282 = vtanh.bf16 %v4276_v10  ;;  %v9844_v6 = vld [vmem:[#allocation8 + $0xd60] ss:$16 sps:$4 sm:$0xff]  }
 0x36a   : > { %7733 = vmatprep.subr.bf16.mxu1 %v9807_v30  ;;  %v9855_v30 = vld [vmem:[#allocation8 + $0xf44] ss:$16 sps:$4 sm:$0xff]  }
 0x36b   : > { %7693 = vmatpush1.bf16.msra.mxu0 %v9802_v2  ;;  %v9850_v2 = vld [vmem:[#allocation8 + $0xd40] ss:$16 sps:$4 sm:$0xff]  }
 0x36c   : > { %7694 = vmatprep.subr.bf16.mxu0 %v9810_v13  ;;  %v9861_v13 = vld [vmem:[#allocation8 + $0xf24] ss:$16 sps:$4 sm:$0xff]  }
 0x36d   : > { %7734 = vmatpush1.bf16.msra.mxu1 %v9805_v36  ;;  %v9858_v36 = vld [vmem:[#allocation8 + $0xd24] ss:$16 sps:$4 sm:$0xff]  }
 0x36e   : > { %7735 = vmatprep.subr.bf16.mxu1 %v9813_v37  ;;  %v9856_v37 = vld [vmem:[#allocation8 + $0xd20] ss:$16 sps:$4 sm:$0xff]  }
 0x36f   : > { %7695 = vmatpush1.bf16.msra.mxu0 %v9808_v39  ;;  %v9859_v39 = vld [vmem:[#allocation8 + $0xf20] ss:$16 sps:$4 sm:$0xff]  }
 0x370   : > { %7696 = vmatprep.subr.bf16.mxu0 %v9816_v51 }
 0x371   : > { %7736 = vmatpush1.bf16.msra.mxu1 %v9811_v48  ;;  %v9864_v48 = vld [vmem:[#allocation8 + $0xd04] ss:$16 sps:$4 sm:$0xff]  }
 0x372   : > { %7737 = vmatprep.subr.bf16.mxu1 %v9819_v16  ;;  %v9867_v16 = vld [vmem:[#allocation8 + $0xf04] ss:$16 sps:$4 sm:$0xff]  }
 0x373   : > { %7697 = vmatpush1.bf16.msra.mxu0 %v9814_v55  ;;  %v9862_v55 = vld [vmem:[#allocation8 + $0xd00] ss:$16 sps:$4 sm:$0xff]  }
 0x374   : > { %7698 = vmatprep.subr.bf16.mxu0 %v9822_v33 }
 0x375   : > { %7738 = vmatpush1.bf16.msra.mxu1 %v9817_v50  ;;  %v10279_v62 = vpop.eup %10278  ;;  %v4854_v50 = vld [vmem:[#allocation10] sm:$0xf] }
 0x376   : > { %7739 = vmatprep.subr.bf16.mxu1 %v9825_v21  ;;  %v4325_v1 = vadd.bf16 1065369472, %v10279_v62  ;;  %v10281_v51 = vpop.eup %10280  ;;  %v9870_v21 = vld [vmem:[#allocation8 + $0xec] ss:$16 sps:$4 sm:$0xff]   ;;  %v9868_v62 = vld [vmem:[#allocation8 + $0xe8] ss:$16 sps:$4 sm:$0xff]   ;;  %v4863_v28 = vrot.slane %v4854_v50, %v10827_v47 }
 0x377   : > { %7699 = vmatpush2.bf16.msra.mxu0 %v9820_v58  ;;  %v10283_v24 = vpop.eup %10282  ;;  %v4322_v33 = vadd.bf16 1065369472, %v10281_v51  ;;  %v9873_v58 = vld [vmem:[#allocation8 + $0x2ec] ss:$16 sps:$4 sm:$0xff]   ;;  %v9898_v51 = vld [vmem:[#allocation8 + $0x48] ss:$16 sps:$4 sm:$0xff]  }
 0x378   : > { %7700 = vmatprep.subr.bf16.mxu0 %v9828_v8  ;;  %v11078_v11 = vmul.bf16 %v4325_v1, %v4293_v19  ;;  %v4324_v22 = vadd.bf16 1065369472, %v10283_v24  ;;  %v4859_v8 = vrot.slane %v4854_v50, %v10824_v40  ;;  %v9871_v19 = vld [vmem:[#allocation8 + $0x2e8] ss:$16 sps:$4 sm:$0xff]   ;;  %v9906_v24 = vld [vmem:[#allocation8 + $0x2c] ss:$16 sps:$4 sm:$0xff]  }
 0x379   : > { %7740 = vmatpush2.bf16.msra.mxu1 %v9823_v25  ;;  %v4292_v25 = vmul.bf16 1056980736, %v11071_v38  ;;  %v9907_v50 = vld [vmem:[#allocation8 + $0x228] ss:$16 sps:$4 sm:$0xff]  }
 0x37a   : > { %7741 = vmatprep.subr.bf16.mxu1 %v9831_v0  ;;  %7755 = vmatprep.mubr.bf16.mxu1 %v11078_v11  ;;  %v11086_v0 = vmul.bf16 %v4322_v33, %v4290_v9  ;;  %v9912_v33 = vld [vmem:[#allocation8 + $0xc] ss:$16 sps:$4 sm:$0xff]  }
 0x37b   : > { %7701 = vmatpush2.bf16.msra.mxu0 %v9826_v4  ;;  %v11088_v1 = vmul.bf16 %v4324_v22, %v4292_v25  ;;  %v9876_v4 = vld [vmem:[#allocation8 + $0xcc] ss:$16 sps:$4 sm:$0xff]   ;;  %v9910_v22 = vld [vmem:[#allocation8 + $0x8] ss:$16 sps:$4 sm:$0xff]  }
 0x37c   : > { %7702 = vmatprep.subr.bf16.mxu0 %v9834_v12  ;;  %v9874_v12 = vld [vmem:[#allocation8 + $0xc8] ss:$16 sps:$4 sm:$0xff]   ;;  %v9918_v9 = vld [vmem:[#allocation8 + $0x1ec] ss:$16 sps:$4 sm:$0xff]  }
 0x37d   : > { %7742 = vmatpush2.bf16.msra.mxu1 %v9829_v5  ;;  %v9921_v25 = vld [vmem:[#allocation8 + $0x3ec] ss:$16 sps:$4 sm:$0xff]  }
 0x37e   : > { %7743 = vmatprep.subr.bf16.mxu1 %v9837_v3 }
 0x37f   : > { %7703 = vmatpush2.bf16.msra.mxu0 %v9832_v18  ;;  %v9882_v18 = vld [vmem:[#allocation8 + $0xac] ss:$16 sps:$4 sm:$0xff]  }
 0x380   : > { %7704 = vmatprep.subr.bf16.mxu0 %v9840_v26 }
 0x381   : > { %7744 = vmatpush2.bf16.msra.mxu1 %v9835_v20 }
 0x382   : > { %7745 = vmatprep.subr.bf16.mxu1 %v9843_v29  ;;  %v9885_v29 = vld [vmem:[#allocation8 + $0x2ac] ss:$16 sps:$4 sm:$0xff]  }
 0x383   : > { %7705 = vmatpush2.bf16.msra.mxu0 %v9838_v31 }
 0x384   : > { %7706 = vmatprep.subr.bf16.mxu0 %v9846_v46 }
 0x385   : > { %7746 = vmatpush2.bf16.msra.mxu1 %v9841_v53 }
 0x386   : > { %7747 = vmatprep.subr.bf16.mxu1 %v9849_v52  ;;  %v9880_v52 = vld [vmem:[#allocation8 + $0xa8] ss:$16 sps:$4 sm:$0xff]  }
 0x387   : > { %7707 = vmatpush2.bf16.msra.mxu0 %v9844_v6  ;;  %v9883_v6 = vld [vmem:[#allocation8 + $0x2a8] ss:$16 sps:$4 sm:$0xff]  }
 0x388   : > { %7708 = vmatprep.subr.bf16.mxu0 %v9852_v63 }
 0x389   : > { %7748 = vmatpush2.bf16.msra.mxu1 %v9847_v45  ;;  %v9888_v45 = vld [vmem:[#allocation8 + $0x8c] ss:$16 sps:$4 sm:$0xff]  }
 0x38a   : > { %7749 = vmatprep.subr.bf16.mxu1 %v9855_v30  ;;  %v9891_v30 = vld [vmem:[#allocation8 + $0x28c] ss:$16 sps:$4 sm:$0xff]  }
 0x38b   : > { %7709 = vmatpush2.bf16.msra.mxu0 %v9850_v2  ;;  %v9889_v2 = vld [vmem:[#allocation8 + $0x288] ss:$16 sps:$4 sm:$0xff]  }
 0x38c   : > { %7710 = vmatprep.subr.bf16.mxu0 %v9858_v36  ;;  %v9897_v36 = vld [vmem:[#allocation8 + $0x26c] ss:$16 sps:$4 sm:$0xff]  }
 0x38d   : > { %7750 = vmatpush2.bf16.msra.mxu1 %v9853_v35  ;;  %v9894_v35 = vld [vmem:[#allocation8 + $0x6c] ss:$16 sps:$4 sm:$0xff]  }
 0x38e   : > { %7751 = vmatprep.subr.bf16.mxu1 %v9861_v13  ;;  %v9892_v13 = vld [vmem:[#allocation8 + $0x68] ss:$16 sps:$4 sm:$0xff]  }
 0x38f   : > { %7711 = vmatpush2.bf16.msra.mxu0 %v9856_v37  ;;  %v9895_v37 = vld [vmem:[#allocation8 + $0x268] ss:$16 sps:$4 sm:$0xff]  }
 0x390   : > { %7712 = vmatprep.subr.bf16.mxu0 %v9864_v48  ;;  %v9903_v48 = vld [vmem:[#allocation8 + $0x24c] ss:$16 sps:$4 sm:$0xff]  }
 0x391   : > { %7752 = vmatpush2.bf16.msra.mxu1 %v9859_v39  ;;  %v9900_v39 = vld [vmem:[#allocation8 + $0x4c] ss:$16 sps:$4 sm:$0xff]  }
 0x392   : > { %7753 = vmatprep.subr.bf16.mxu1 %v9867_v16  ;;  %v9901_v16 = vld [vmem:[#allocation8 + $0x248] ss:$16 sps:$4 sm:$0xff]  }
 0x393   : > { %7713 = vmatpush2.bf16.msra.mxu0 %v9862_v55  ;;  %v9909_v55 = vld [vmem:[#allocation8 + $0x22c] ss:$16 sps:$4 sm:$0xff]  }
 0x394   : > { %7764 = vmatprep.subr.bf16.mxu0 %v9870_v21  ;;  %v9915_v21 = vld [vmem:[#allocation8 + $0x20c] ss:$16 sps:$4 sm:$0xff]  }
 0x395   : > { %7754 = vmatpush2.bf16.msra.mxu1 %v9865_v57  ;;  %v9904_v57 = vld [vmem:[#allocation8 + $0x28] ss:$16 sps:$4 sm:$0xff]  }
 0x396   : > { %7805 = vmatprep.subr.bf16.mxu1 %v9873_v58  ;;  %v7470_v7 = vpop.f32.mrf.mxu0  ;;  %7715 = vmatmul.mubr.bf16.vlgmr.msra.gmra.mxu0 %v11086_v0  ;;  %v9913_v58 = vld [vmem:[#allocation8 + $0x208] ss:$16 sps:$4 sm:$0xff]  }
 0x397   : > { %v7471_v38 = vadd.f32 %v7470_v7, %v4859_v8  ;;  %7765 = vmatpush1.bf16.msra.mxu0 %v9868_v62  ;;  %7796 = vmatprep.mubr.bf16.mxu0 %v10916_v42  ;;  %v9916_v8 = vld [vmem:[#allocation8 + $0x1e8] ss:$16 sps:$4 sm:$0xff]  }
 0x398   : > { %v7511_v5 = vpop.f32.mrf.mxu1  ;;  %7756 = vmatmul.mubr.bf16.vlgmr.msra.gmra.mxu1 %v11088_v1  ;;  %v7472_v3 = vpop.f32.mrf.mxu0  ;;  %7766 = vmatprep.subr.bf16.mxu0 %v9876_v4  ;;  %v9919_v62 = vld [vmem:[#allocation8 + $0x3e8] ss:$16 sps:$4 sm:$0xff]  }
 0x399   : > { %7806 = vmatpush1.bf16.msra.mxu1 %v9871_v19  ;;  %v11094_v10 = vadd.f32 %v7511_v5, %v7471_v38  ;;  %7837 = vmatprep.mubr.bf16.mxu1 %v10919_v49  ;;  %v7473_v20 = vadd.f32 %v7472_v3, %v4863_v28  ;;  %v9886_v49 = vld [vmem:[#allocation8 + $0x88] ss:$16 sps:$4 sm:$0xff]   ;;  %v9924_v19 = vld [vmem:[#allocation8 + $0x1cc] ss:$16 sps:$4 sm:$0xff]  }
 0x39a   : > { %v7513_v26 = vpop.f32.mrf.mxu1  ;;  %v7474_v31 = vpop.f32.mrf.mxu0  ;;  %7807 = vmatprep.subr.bf16.mxu1 %v9879_v60  ;;  %v9927_v28 = vld [vmem:[#allocation8 + $0x3cc] ss:$16 sps:$4 sm:$0xff]   ;;  %v9922_v4 = vld [vmem:[#allocation8 + $0x1c8] ss:$16 sps:$4 sm:$0xff]  }
 0x39b   : > { %v11097_v53 = vadd.f32 %v7513_v26, %v7473_v20  ;;  %7767 = vmatpush1.bf16.msra.mxu0 %v9874_v12  ;;  %v9925_v7 = vld [vmem:[#allocation8 + $0x3c8] ss:$16 sps:$4 sm:$0xff]   ;;  %v9930_v60 = vld [vmem:[#allocation8 + $0x1ac] ss:$16 sps:$4 sm:$0xff]  }
 0x39c   : > { %v7515_v46 = vpop.f32.mrf.mxu1  ;;  %v7475_v42 = vpop.f32.mrf.mxu0  ;;  %7768 = vmatprep.subr.bf16.mxu0 %v9882_v18  ;;  %v9933_v38 = vld [vmem:[#allocation8 + $0x3ac] ss:$16 sps:$4 sm:$0xff]   ;;  %v9928_v5 = vld [vmem:[#allocation8 + $0x1a8] ss:$16 sps:$4 sm:$0xff]  }
 0x39d   : > { %7808 = vmatpush1.bf16.msra.mxu1 %v9877_v15  ;;  %v9931_v12 = vld [vmem:[#allocation8 + $0x3a8] ss:$16 sps:$4 sm:$0xff]   ;;  %v9936_v3 = vld [vmem:[#allocation8 + $0x18c] ss:$16 sps:$4 sm:$0xff]  }
 0x39e   : > { %v7516_v63 = vpop.f32.mrf.mxu1  ;;  %7809 = vmatprep.subr.bf16.mxu1 %v9885_v29  ;;  %v9939_v15 = vld [vmem:[#allocation8 + $0x38c] ss:$16 sps:$4 sm:$0xff]   ;;  %v9934_v18 = vld [vmem:[#allocation8 + $0x188] ss:$16 sps:$4 sm:$0xff]  }
 0x39f   : > { %7769 = vmatpush1.bf16.msra.mxu0 %v9880_v52  ;;  %v9937_v20 = vld [vmem:[#allocation8 + $0x388] ss:$16 sps:$4 sm:$0xff]   ;;  %v9942_v26 = vld [vmem:[#allocation8 + $0x16c] ss:$16 sps:$4 sm:$0xff]  }
 0x3a0   : > { %7770 = vmatprep.subr.bf16.mxu0 %v9888_v45  ;;  %v9945_v29 = vld [vmem:[#allocation8 + $0x36c] ss:$16 sps:$4 sm:$0xff]   ;;  %v9940_v31 = vld [vmem:[#allocation8 + $0x168] ss:$16 sps:$4 sm:$0xff]  }
 0x3a1   : > { %7810 = vmatpush1.bf16.msra.mxu1 %v9883_v6  ;;  %v9943_v46 = vld [vmem:[#allocation8 + $0x368] ss:$16 sps:$4 sm:$0xff]   ;;  %v9948_v52 = vld [vmem:[#allocation8 + $0x14c] ss:$16 sps:$4 sm:$0xff]  }
 0x3a2   : > { %7811 = vmatprep.subr.bf16.mxu1 %v9891_v30  ;;  %v9951_v42 = vld [vmem:[#allocation8 + $0x34c] ss:$16 sps:$4 sm:$0xff]   ;;  %v9946_v6 = vld [vmem:[#allocation8 + $0x148] ss:$16 sps:$4 sm:$0xff]  }
 0x3a3   : > { %7771 = vmatpush1.bf16.msra.mxu0 %v9886_v49  ;;  %v9949_v45 = vld [vmem:[#allocation8 + $0x348] ss:$16 sps:$4 sm:$0xff]   ;;  %v9954_v63 = vld [vmem:[#allocation8 + $0x12c] ss:$16 sps:$4 sm:$0xff]  }
 0x3a4   : > { %7772 = vmatprep.subr.bf16.mxu0 %v9894_v35  ;;  %v9957_v30 = vld [vmem:[#allocation8 + $0x32c] ss:$16 sps:$4 sm:$0xff]   ;;  %v9952_v49 = vld [vmem:[#allocation8 + $0x128] ss:$16 sps:$4 sm:$0xff]  }
 0x3a5   : > { %7812 = vmatpush1.bf16.msra.mxu1 %v9889_v2  ;;  %v9955_v2 = vld [vmem:[#allocation8 + $0x328] ss:$16 sps:$4 sm:$0xff]   ;;  %v9960_v35 = vld [vmem:[#allocation8 + $0x10c] ss:$16 sps:$4 sm:$0xff]  }
 0x3a6   : > { %7813 = vmatprep.subr.bf16.mxu1 %v9897_v36  ;;  %v9963_v36 = vld [vmem:[#allocation8 + $0x30c] ss:$16 sps:$4 sm:$0xff]  }
 0x3a7   : > { %7773 = vmatpush1.bf16.msra.mxu0 %v9892_v13  ;;  %v9958_v13 = vld [vmem:[#allocation8 + $0x108] ss:$16 sps:$4 sm:$0xff]  }
 0x3a8   : > { %7774 = vmatprep.subr.bf16.mxu0 %v9900_v39  ;;  %v9966_v39 = vld [vmem:[#allocation8 + $0x4ec] ss:$16 sps:$4 sm:$0xff]  }
 0x3a9   : > { %7814 = vmatpush1.bf16.msra.mxu1 %v9895_v37  ;;  %v9961_v37 = vld [vmem:[#allocation8 + $0x308] ss:$16 sps:$4 sm:$0xff]  }
 0x3aa   : > { %7815 = vmatprep.subr.bf16.mxu1 %v9903_v48  ;;  %v9969_v48 = vld [vmem:[#allocation8 + $0x6ec] ss:$16 sps:$4 sm:$0xff]  }
 0x3ab   : > { %7775 = vmatpush1.bf16.msra.mxu0 %v9898_v51  ;;  %v9964_v51 = vld [vmem:[#allocation8 + $0x4e8] ss:$16 sps:$4 sm:$0xff]  }
 0x3ac   : > { %7776 = vmatprep.subr.bf16.mxu0 %v9906_v24  ;;  %v9972_v24 = vld [vmem:[#allocation8 + $0x4cc] ss:$16 sps:$4 sm:$0xff]  }
 0x3ad   : > { %7816 = vmatpush1.bf16.msra.mxu1 %v9901_v16  ;;  %v9967_v16 = vld [vmem:[#allocation8 + $0x6e8] ss:$16 sps:$4 sm:$0xff]  }
 0x3ae   : > { %7817 = vmatprep.subr.bf16.mxu1 %v9909_v55 }
 0x3af   : > { %7777 = vmatpush1.bf16.msra.mxu0 %v9904_v57  ;;  %v9975_v57 = vld [vmem:[#allocation8 + $0x6cc] ss:$16 sps:$4 sm:$0xff]  }
 0x3b0   : > { %7778 = vmatprep.subr.bf16.mxu0 %v9912_v33 }
 0x3b1   : > { %7818 = vmatpush1.bf16.msra.mxu1 %v9907_v50 }
 0x3b2   : > { %7819 = vmatprep.subr.bf16.mxu1 %v9915_v21  ;;  %v9970_v21 = vld [vmem:[#allocation8 + $0x4c8] ss:$16 sps:$4 sm:$0xff]  }
 0x3b3   : > { %7779 = vmatpush1.bf16.msra.mxu0 %v9910_v22 }
 0x3b4   : > { %7780 = vmatprep.subr.bf16.mxu0 %v9918_v9  ;;  %v9978_v9 = vld [vmem:[#allocation8 + $0x4ac] ss:$16 sps:$4 sm:$0xff]  }
 0x3b5   : > { %7820 = vmatpush1.bf16.msra.mxu1 %v9913_v58  ;;  %v9973_v58 = vld [vmem:[#allocation8 + $0x6c8] ss:$16 sps:$4 sm:$0xff]  }
 0x3b6   : > { %7821 = vmatprep.subr.bf16.mxu1 %v9921_v25 }
 0x3b7   : > { %7781 = vmatpush2.bf16.msra.mxu0 %v9916_v8 }
 0x3b8   : > { %7782 = vmatprep.subr.bf16.mxu0 %v9924_v19 }
 0x3b9   : > { %7822 = vmatpush2.bf16.msra.mxu1 %v9919_v62 }
 0x3ba   : > { %7823 = vmatprep.subr.bf16.mxu1 %v9927_v28 }
 0x3bb   : > { %7783 = vmatpush2.bf16.msra.mxu0 %v9922_v4  ;;  %v9979_v4 = vld [vmem:[#allocation8 + $0x6a8] ss:$16 sps:$4 sm:$0xff]  }
 0x3bc   : > { %7784 = vmatprep.subr.bf16.mxu0 %v9930_v60 }
 0x3bd   : > { %7824 = vmatpush2.bf16.msra.mxu1 %v9925_v7  ;;  %v9984_v7 = vld [vmem:[#allocation8 + $0x48c] ss:$16 sps:$4 sm:$0xff]  }
 0x3be   : > { %7825 = vmatprep.subr.bf16.mxu1 %v9933_v38  ;;  %v9985_v38 = vld [vmem:[#allocation8 + $0x688] ss:$16 sps:$4 sm:$0xff]  }
 0x3bf   : > { %7785 = vmatpush2.bf16.msra.mxu0 %v9928_v5  ;;  %v9990_v5 = vld [vmem:[#allocation8 + $0x46c] ss:$16 sps:$4 sm:$0xff]  }
 0x3c0   : > { %7786 = vmatprep.subr.bf16.mxu0 %v9936_v3  ;;  %v9988_v3 = vld [vmem:[#allocation8 + $0x468] ss:$16 sps:$4 sm:$0xff]  }
 0x3c1   : > { %7826 = vmatpush2.bf16.msra.mxu1 %v9931_v12  ;;  %v9993_v12 = vld [vmem:[#allocation8 + $0x66c] ss:$16 sps:$4 sm:$0xff]  }
 0x3c2   : > { %7827 = vmatprep.subr.bf16.mxu1 %v9939_v15  ;;  %v9991_v15 = vld [vmem:[#allocation8 + $0x668] ss:$16 sps:$4 sm:$0xff]  }
 0x3c3   : > { %7787 = vmatpush2.bf16.msra.mxu0 %v9934_v18  ;;  %v9996_v18 = vld [vmem:[#allocation8 + $0x44c] ss:$16 sps:$4 sm:$0xff]  }
 0x3c4   : > { %7788 = vmatprep.subr.bf16.mxu0 %v9942_v26  ;;  %v9994_v26 = vld [vmem:[#allocation8 + $0x448] ss:$16 sps:$4 sm:$0xff]  }
 0x3c5   : > { %7828 = vmatpush2.bf16.msra.mxu1 %v9937_v20  ;;  %v9999_v20 = vld [vmem:[#allocation8 + $0x64c] ss:$16 sps:$4 sm:$0xff]  }
 0x3c6   : > { %7829 = vmatprep.subr.bf16.mxu1 %v9945_v29  ;;  %v9997_v29 = vld [vmem:[#allocation8 + $0x648] ss:$16 sps:$4 sm:$0xff]  }
 0x3c7   : > { %7789 = vmatpush2.bf16.msra.mxu0 %v9940_v31  ;;  %v10002_v31 = vld [vmem:[#allocation8 + $0x42c] ss:$16 sps:$4 sm:$0xff]  }
 0x3c8   : > { %7790 = vmatprep.subr.bf16.mxu0 %v9948_v52  ;;  %v10000_v52 = vld [vmem:[#allocation8 + $0x428] ss:$16 sps:$4 sm:$0xff]  }
 0x3c9   : > { %7830 = vmatpush2.bf16.msra.mxu1 %v9943_v46  ;;  %v10005_v46 = vld [vmem:[#allocation8 + $0x62c] ss:$16 sps:$4 sm:$0xff]  }
 0x3ca   : > { %7831 = vmatprep.subr.bf16.mxu1 %v9951_v42  ;;  %v10003_v42 = vld [vmem:[#allocation8 + $0x628] ss:$16 sps:$4 sm:$0xff]  }
 0x3cb   : > { %7791 = vmatpush2.bf16.msra.mxu0 %v9946_v6  ;;  %v10008_v6 = vld [vmem:[#allocation8 + $0x40c] ss:$16 sps:$4 sm:$0xff]  }
 0x3cc   : > { %7792 = vmatprep.subr.bf16.mxu0 %v9954_v63  ;;  %v10006_v63 = vld [vmem:[#allocation8 + $0x408] ss:$16 sps:$4 sm:$0xff]  }
 0x3cd   : > { %7832 = vmatpush2.bf16.msra.mxu1 %v9949_v45  ;;  %v10011_v45 = vld [vmem:[#allocation8 + $0x60c] ss:$16 sps:$4 sm:$0xff]  }
 0x3ce   : > { %7833 = vmatprep.subr.bf16.mxu1 %v9957_v30  ;;  %v10009_v30 = vld [vmem:[#allocation8 + $0x608] ss:$16 sps:$4 sm:$0xff]  }
 0x3cf   : > { %7793 = vmatpush2.bf16.msra.mxu0 %v9952_v49  ;;  %v10014_v49 = vld [vmem:[#allocation8 + $0x5ec] ss:$16 sps:$4 sm:$0xff]  }
 0x3d0   : > { %7794 = vmatprep.subr.bf16.mxu0 %v9960_v35  ;;  %v10012_v35 = vld [vmem:[#allocation8 + $0x5e8] ss:$16 sps:$4 sm:$0xff]  }
 0x3d1   : > { %7834 = vmatpush2.bf16.msra.mxu1 %v9955_v2  ;;  %v10017_v2 = vld [vmem:[#allocation8 + $0x7ec] ss:$16 sps:$4 sm:$0xff]  }
 0x3d2   : > { %7835 = vmatprep.subr.bf16.mxu1 %v9963_v36  ;;  %v10015_v36 = vld [vmem:[#allocation8 + $0x7e8] ss:$16 sps:$4 sm:$0xff]  }
 0x3d3   : > { %7795 = vmatpush2.bf16.msra.mxu0 %v9958_v13  ;;  %v10020_v13 = vld [vmem:[#allocation8 + $0x5cc] ss:$16 sps:$4 sm:$0xff]  }
 0x3d4   : > { %7846 = vmatprep.subr.bf16.mxu0 %v9966_v39  ;;  %v10018_v39 = vld [vmem:[#allocation8 + $0x5c8] ss:$16 sps:$4 sm:$0xff]  }
 0x3d5   : > { %7836 = vmatpush2.bf16.msra.mxu1 %v9961_v37  ;;  %v10023_v37 = vld [vmem:[#allocation8 + $0x7cc] ss:$16 sps:$4 sm:$0xff]  }
 0x3d6   : > { %7887 = vmatprep.subr.bf16.mxu1 %v9969_v48  ;;  %v7552_v55 = vpop.f32.mrf.mxu0  ;;  %7797 = vmatmul.mubr.bf16.vlgmr.msra.gmra.mxu0 %v10959_v56  ;;  %v10021_v48 = vld [vmem:[#allocation8 + $0x7c8] ss:$16 sps:$4 sm:$0xff]  }
 0x3d7   : > { %v7553_v50 = vadd.f32 %v7552_v55, %v11094_v10  ;;  %7847 = vmatpush1.bf16.msra.mxu0 %v9964_v51  ;;  %7878 = vmatprep.mubr.bf16.mxu0 %v10966_v54  ;;  %v9981_v10 = vld [vmem:[#allocation8 + $0x6ac] ss:$16 sps:$4 sm:$0xff]   ;;  %v9976_v54 = vld [vmem:[#allocation8 + $0x4a8] ss:$16 sps:$4 sm:$0xff]  }
 0x3d8   : > { %v7593_v33 = vpop.f32.mrf.mxu1  ;;  %7838 = vmatmul.mubr.bf16.vlgmr.msra.gmra.mxu1 %v10962_v61  ;;  %v7554_v22 = vpop.f32.mrf.mxu0  ;;  %7848 = vmatprep.subr.bf16.mxu0 %v9972_v24  ;;  %v10026_v51 = vld [vmem:[#allocation8 + $0x5ac] ss:$16 sps:$4 sm:$0xff]   ;;  %v10024_v24 = vld [vmem:[#allocation8 + $0x5a8] ss:$16 sps:$4 sm:$0xff]  }
 0x3d9   : > { %7888 = vmatpush1.bf16.msra.mxu1 %v9967_v16  ;;  %v11103_v25 = vadd.f32 %v7593_v33, %v7553_v50  ;;  %7919 = vmatprep.mubr.bf16.mxu1 %v10969_v59  ;;  %v7555_v56 = vadd.f32 %v7554_v22, %v11097_v53  ;;  %v9987_v59 = vld [vmem:[#allocation8 + $0x68c] ss:$16 sps:$4 sm:$0xff]   ;;  %v9982_v53 = vld [vmem:[#allocation8 + $0x488] ss:$16 sps:$4 sm:$0xff]  }
 0x3da   : > { %v7595_v8 = vpop.f32.mrf.mxu1  ;;  %v7556_v62 = vpop.f32.mrf.mxu0  ;;  %7889 = vmatprep.subr.bf16.mxu1 %v9975_v57  ;;  %v10029_v16 = vld [vmem:[#allocation8 + $0x7ac] ss:$16 sps:$4 sm:$0xff]   ;;  %v10027_v55 = vld [vmem:[#allocation8 + $0x7a8] ss:$16 sps:$4 sm:$0xff]  }
 0x3db   : > { %v11107_v61 = vadd.f32 %v7595_v8, %v7555_v56  ;;  %7849 = vmatpush1.bf16.msra.mxu0 %v9970_v21  ;;  %v10032_v57 = vld [vmem:[#allocation8 + $0x58c] ss:$16 sps:$4 sm:$0xff]   ;;  %v10030_v33 = vld [vmem:[#allocation8 + $0x588] ss:$16 sps:$4 sm:$0xff]  }
 0x3dc   : > { %v7597_v19 = vpop.f32.mrf.mxu1  ;;  %v7557_v28 = vpop.f32.mrf.mxu0  ;;  %7850 = vmatprep.subr.bf16.mxu0 %v9978_v9  ;;  %v10035_v50 = vld [vmem:[#allocation8 + $0x78c] ss:$16 sps:$4 sm:$0xff]   ;;  %v10033_v21 = vld [vmem:[#allocation8 + $0x788] ss:$16 sps:$4 sm:$0xff]  }
 0x3dd   : > { %7890 = vmatpush1.bf16.msra.mxu1 %v9973_v58  ;;  %v10038_v22 = vld [vmem:[#allocation8 + $0x56c] ss:$16 sps:$4 sm:$0xff]   ;;  %v10036_v9 = vld [vmem:[#allocation8 + $0x568] ss:$16 sps:$4 sm:$0xff]  }
 0x3de   : > { %v7598_v60 = vpop.f32.mrf.mxu1  ;;  %7891 = vmatprep.subr.bf16.mxu1 %v9981_v10  ;;  %v10041_v58 = vld [vmem:[#allocation8 + $0x76c] ss:$16 sps:$4 sm:$0xff]   ;;  %v10039_v56 = vld [vmem:[#allocation8 + $0x768] ss:$16 sps:$4 sm:$0xff]  }
 0x3df   : > { %7851 = vmatpush1.bf16.msra.mxu0 %v9976_v54  ;;  %v10044_v8 = vld [vmem:[#allocation8 + $0x54c] ss:$16 sps:$4 sm:$0xff]   ;;  %v10042_v62 = vld [vmem:[#allocation8 + $0x548] ss:$16 sps:$4 sm:$0xff]  }
 0x3e0   : > { %7852 = vmatprep.subr.bf16.mxu0 %v9984_v7  ;;  %v10047_v10 = vld [vmem:[#allocation8 + $0x74c] ss:$16 sps:$4 sm:$0xff]   ;;  %v10045_v19 = vld [vmem:[#allocation8 + $0x748] ss:$16 sps:$4 sm:$0xff]  }
 0x3e1   : > { %7892 = vmatpush1.bf16.msra.mxu1 %v9979_v4  ;;  %v10050_v54 = vld [vmem:[#allocation8 + $0x52c] ss:$16 sps:$4 sm:$0xff]   ;;  %v10048_v4 = vld [vmem:[#allocation8 + $0x528] ss:$16 sps:$4 sm:$0xff]  }
 0x3e2   : > { %7893 = vmatprep.subr.bf16.mxu1 %v9987_v59  ;;  %v10053_v28 = vld [vmem:[#allocation8 + $0x72c] ss:$16 sps:$4 sm:$0xff]   ;;  %v10051_v7 = vld [vmem:[#allocation8 + $0x728] ss:$16 sps:$4 sm:$0xff]  }
 0x3e3   : > { %7853 = vmatpush1.bf16.msra.mxu0 %v9982_v53  ;;  %v10056_v60 = vld [vmem:[#allocation8 + $0x50c] ss:$16 sps:$4 sm:$0xff]   ;;  %v10054_v53 = vld [vmem:[#allocation8 + $0x508] ss:$16 sps:$4 sm:$0xff]  }
 0x3e4   : > { %7854 = vmatprep.subr.bf16.mxu0 %v9990_v5  ;;  %v10059_v59 = vld [vmem:[#allocation8 + $0x70c] ss:$16 sps:$4 sm:$0xff]  }
 0x3e5   : > { %7894 = vmatpush1.bf16.msra.mxu1 %v9985_v38  ;;  %v10057_v38 = vld [vmem:[#allocation8 + $0x708] ss:$16 sps:$4 sm:$0xff]   ;;  %v10062_v5 = vld [vmem:[#allocation8 + $0x8ec] ss:$16 sps:$4 sm:$0xff]  }
 0x3e6   : > { %7895 = vmatprep.subr.bf16.mxu1 %v9993_v12  ;;  %v10065_v12 = vld [vmem:[#allocation8 + $0xaec] ss:$16 sps:$4 sm:$0xff]  }
 0x3e7   : > { %7855 = vmatpush1.bf16.msra.mxu0 %v9988_v3  ;;  %v10060_v3 = vld [vmem:[#allocation8 + $0x8e8] ss:$16 sps:$4 sm:$0xff]  }
 0x3e8   : > { %7856 = vmatprep.subr.bf16.mxu0 %v9996_v18  ;;  %v10068_v18 = vld [vmem:[#allocation8 + $0x8cc] ss:$16 sps:$4 sm:$0xff]  }
 0x3e9   : > { %7896 = vmatpush1.bf16.msra.mxu1 %v9991_v15  ;;  %v10063_v15 = vld [vmem:[#allocation8 + $0xae8] ss:$16 sps:$4 sm:$0xff]  }
 0x3ea   : > { %7897 = vmatprep.subr.bf16.mxu1 %v9999_v20 }
 0x3eb   : > { %7857 = vmatpush1.bf16.msra.mxu0 %v9994_v26  ;;  %v10071_v26 = vld [vmem:[#allocation8 + $0xacc] ss:$16 sps:$4 sm:$0xff]  }
 0x3ec   : > { %7858 = vmatprep.subr.bf16.mxu0 %v10002_v31 }
 0x3ed   : > { %7898 = vmatpush1.bf16.msra.mxu1 %v9997_v29 }
 0x3ee   : > { %7899 = vmatprep.subr.bf16.mxu1 %v10005_v46  ;;  %v10066_v46 = vld [vmem:[#allocation8 + $0x8c8] ss:$16 sps:$4 sm:$0xff]  }
 0x3ef   : > { %7859 = vmatpush1.bf16.msra.mxu0 %v10000_v52 }
 0x3f0   : > { %7860 = vmatprep.subr.bf16.mxu0 %v10008_v6  ;;  %v10074_v6 = vld [vmem:[#allocation8 + $0x8ac] ss:$16 sps:$4 sm:$0xff]  }
 0x3f1   : > { %7900 = vmatpush1.bf16.msra.mxu1 %v10003_v42  ;;  %v10069_v42 = vld [vmem:[#allocation8 + $0xac8] ss:$16 sps:$4 sm:$0xff]  }
 0x3f2   : > { %7901 = vmatprep.subr.bf16.mxu1 %v10011_v45 }
 0x3f3   : > { %7861 = vmatpush1.bf16.msra.mxu0 %v10006_v63 }
 0x3f4   : > { %7862 = vmatprep.subr.bf16.mxu0 %v10014_v49 }
 0x3f5   : > { %7902 = vmatpush1.bf16.msra.mxu1 %v10009_v30 }
 0x3f6   : > { %7903 = vmatprep.subr.bf16.mxu1 %v10017_v2 }
 0x3f7   : > { %7863 = vmatpush2.bf16.msra.mxu0 %v10012_v35  ;;  %v10075_v35 = vld [vmem:[#allocation8 + $0xaa8] ss:$16 sps:$4 sm:$0xff]  }
 0x3f8   : > { %7864 = vmatprep.subr.bf16.mxu0 %v10020_v13 }
 0x3f9   : > { %7904 = vmatpush2.bf16.msra.mxu1 %v10015_v36  ;;  %v10080_v36 = vld [vmem:[#allocation8 + $0x88c] ss:$16 sps:$4 sm:$0xff]  }
 0x3fa   : > { %7905 = vmatprep.subr.bf16.mxu1 %v10023_v37  ;;  %v10081_v37 = vld [vmem:[#allocation8 + $0xa88] ss:$16 sps:$4 sm:$0xff]  }
 0x3fb   : > { %7865 = vmatpush2.bf16.msra.mxu0 %v10018_v39  ;;  %v10086_v39 = vld [vmem:[#allocation8 + $0x86c] ss:$16 sps:$4 sm:$0xff]  }
 0x3fc   : > { %7866 = vmatprep.subr.bf16.mxu0 %v10026_v51  ;;  %v10084_v51 = vld [vmem:[#allocation8 + $0x868] ss:$16 sps:$4 sm:$0xff]  }
 0x3fd   : > { %7906 = vmatpush2.bf16.msra.mxu1 %v10021_v48  ;;  %v10089_v48 = vld [vmem:[#allocation8 + $0xa6c] ss:$16 sps:$4 sm:$0xff]  }
 0x3fe   : > { %7907 = vmatprep.subr.bf16.mxu1 %v10029_v16  ;;  %v10087_v16 = vld [vmem:[#allocation8 + $0xa68] ss:$16 sps:$4 sm:$0xff]  }
 0x3ff   : > { %7867 = vmatpush2.bf16.msra.mxu0 %v10024_v24  ;;  %v10092_v24 = vld [vmem:[#allocation8 + $0x84c] ss:$16 sps:$4 sm:$0xff]  }
 0x400   : > { %7868 = vmatprep.subr.bf16.mxu0 %v10032_v57  ;;  %v10090_v57 = vld [vmem:[#allocation8 + $0x848] ss:$16 sps:$4 sm:$0xff]  }
 0x401   : > { %7908 = vmatpush2.bf16.msra.mxu1 %v10027_v55  ;;  %v10095_v55 = vld [vmem:[#allocation8 + $0xa4c] ss:$16 sps:$4 sm:$0xff]  }
 0x402   : > { %7909 = vmatprep.subr.bf16.mxu1 %v10035_v50  ;;  %v10093_v50 = vld [vmem:[#allocation8 + $0xa48] ss:$16 sps:$4 sm:$0xff]  }
 0x403   : > { %7869 = vmatpush2.bf16.msra.mxu0 %v10030_v33  ;;  %v10098_v33 = vld [vmem:[#allocation8 + $0x82c] ss:$16 sps:$4 sm:$0xff]  }
 0x404   : > { %7870 = vmatprep.subr.bf16.mxu0 %v10038_v22  ;;  %v10096_v22 = vld [vmem:[#allocation8 + $0x828] ss:$16 sps:$4 sm:$0xff]  }
 0x405   : > { %7910 = vmatpush2.bf16.msra.mxu1 %v10033_v21  ;;  %v10101_v21 = vld [vmem:[#allocation8 + $0xa2c] ss:$16 sps:$4 sm:$0xff]  }
 0x406   : > { %7911 = vmatprep.subr.bf16.mxu1 %v10041_v58  ;;  %v10099_v58 = vld [vmem:[#allocation8 + $0xa28] ss:$16 sps:$4 sm:$0xff]  }
 0x407   : > { %7871 = vmatpush2.bf16.msra.mxu0 %v10036_v9  ;;  %v10104_v9 = vld [vmem:[#allocation8 + $0x80c] ss:$16 sps:$4 sm:$0xff]  }
 0x408   : > { %7872 = vmatprep.subr.bf16.mxu0 %v10044_v8  ;;  %v10102_v8 = vld [vmem:[#allocation8 + $0x808] ss:$16 sps:$4 sm:$0xff]  }
 0x409   : > { %7912 = vmatpush2.bf16.msra.mxu1 %v10039_v56  ;;  %v10107_v56 = vld [vmem:[#allocation8 + $0xa0c] ss:$16 sps:$4 sm:$0xff]  }
 0x40a   : > { %7913 = vmatprep.subr.bf16.mxu1 %v10047_v10  ;;  %v10105_v10 = vld [vmem:[#allocation8 + $0xa08] ss:$16 sps:$4 sm:$0xff]  }
 0x40b   : > { %7873 = vmatpush2.bf16.msra.mxu0 %v10042_v62  ;;  %v10110_v62 = vld [vmem:[#allocation8 + $0x9ec] ss:$16 sps:$4 sm:$0xff]  }
 0x40c   : > { %7874 = vmatprep.subr.bf16.mxu0 %v10050_v54  ;;  %v10108_v54 = vld [vmem:[#allocation8 + $0x9e8] ss:$16 sps:$4 sm:$0xff]  }
 0x40d   : > { %7914 = vmatpush2.bf16.msra.mxu1 %v10045_v19  ;;  %v10113_v19 = vld [vmem:[#allocation8 + $0xbec] ss:$16 sps:$4 sm:$0xff]  }
 0x40e   : > { %7915 = vmatprep.subr.bf16.mxu1 %v10053_v28  ;;  %v10111_v28 = vld [vmem:[#allocation8 + $0xbe8] ss:$16 sps:$4 sm:$0xff]  }
 0x40f   : > { %7875 = vmatpush2.bf16.msra.mxu0 %v10048_v4  ;;  %v10116_v4 = vld [vmem:[#allocation8 + $0x9cc] ss:$16 sps:$4 sm:$0xff]  }
 0x410   : > { %7876 = vmatprep.subr.bf16.mxu0 %v10056_v60  ;;  %v10114_v60 = vld [vmem:[#allocation8 + $0x9c8] ss:$16 sps:$4 sm:$0xff]  }
 0x411   : > { %7916 = vmatpush2.bf16.msra.mxu1 %v10051_v7  ;;  %v10119_v7 = vld [vmem:[#allocation8 + $0xbcc] ss:$16 sps:$4 sm:$0xff]  }
 0x412   : > { %7917 = vmatprep.subr.bf16.mxu1 %v10059_v59  ;;  %v10117_v59 = vld [vmem:[#allocation8 + $0xbc8] ss:$16 sps:$4 sm:$0xff]  }
 0x413   : > { %7877 = vmatpush2.bf16.msra.mxu0 %v10054_v53  ;;  %v10122_v53 = vld [vmem:[#allocation8 + $0x9ac] ss:$16 sps:$4 sm:$0xff]  }
 0x414   : > { %7928 = vmatprep.subr.bf16.mxu0 %v10062_v5  ;;  %v10120_v5 = vld [vmem:[#allocation8 + $0x9a8] ss:$16 sps:$4 sm:$0xff]  }
 0x415   : > { %7918 = vmatpush2.bf16.msra.mxu1 %v10057_v38  ;;  %v10125_v38 = vld [vmem:[#allocation8 + $0xbac] ss:$16 sps:$4 sm:$0xff]  }
 0x416   : > { %7969 = vmatprep.subr.bf16.mxu1 %v10065_v12  ;;  %v7634_v20 = vpop.f32.mrf.mxu0  ;;  %7879 = vmatmul.mubr.bf16.vlgmr.msra.gmra.mxu0 %v11008_v27  ;;  %v10123_v12 = vld [vmem:[#allocation8 + $0xba8] ss:$16 sps:$4 sm:$0xff]  }
 0x417   : > { %v7635_v29 = vadd.f32 %v7634_v20, %v11103_v25  ;;  %7929 = vmatpush1.bf16.msra.mxu0 %v10060_v3  ;;  %7960 = vmatprep.mubr.bf16.mxu0 %v11015_v34  ;;  %v10077_v25 = vld [vmem:[#allocation8 + $0xaac] ss:$16 sps:$4 sm:$0xff]   ;;  %v10072_v34 = vld [vmem:[#allocation8 + $0x8a8] ss:$16 sps:$4 sm:$0xff]  }
 0x418   : > { %v7675_v31 = vpop.f32.mrf.mxu1  ;;  %7920 = vmatmul.mubr.bf16.vlgmr.msra.gmra.mxu1 %v11011_v32  ;;  %v7636_v52 = vpop.f32.mrf.mxu0  ;;  %7930 = vmatprep.subr.bf16.mxu0 %v10068_v18  ;;  %v10128_v3 = vld [vmem:[#allocation8 + $0x98c] ss:$16 sps:$4 sm:$0xff]   ;;  %v10126_v18 = vld [vmem:[#allocation8 + $0x988] ss:$16 sps:$4 sm:$0xff]  }
 0x419   : > { %7970 = vmatpush1.bf16.msra.mxu1 %v10063_v15  ;;  %v11113_v45 = vadd.f32 %v7675_v31, %v7635_v29  ;;  %8001 = vmatprep.mubr.bf16.mxu1 %v11018_v44  ;;  %v7637_v27 = vadd.f32 %v7636_v52, %v11107_v61  ;;  %v10083_v44 = vld [vmem:[#allocation8 + $0xa8c] ss:$16 sps:$4 sm:$0xff]   ;;  %v10078_v61 = vld [vmem:[#allocation8 + $0x888] ss:$16 sps:$4 sm:$0xff]  }
 0x41a   : > { %v7677_v63 = vpop.f32.mrf.mxu1  ;;  %v7638_v30 = vpop.f32.mrf.mxu0  ;;  %7971 = vmatprep.subr.bf16.mxu1 %v10071_v26  ;;  %v10131_v15 = vld [vmem:[#allocation8 + $0xb8c] ss:$16 sps:$4 sm:$0xff]   ;;  %v10129_v20 = vld [vmem:[#allocation8 + $0xb88] ss:$16 sps:$4 sm:$0xff]  }
 0x41b   : > { %v11117_v32 = vadd.f32 %v7677_v63, %v7637_v27  ;;  %7931 = vmatpush1.bf16.msra.mxu0 %v10066_v46  ;;  %v10134_v26 = vld [vmem:[#allocation8 + $0x96c] ss:$16 sps:$4 sm:$0xff]   ;;  %v10132_v31 = vld [vmem:[#allocation8 + $0x968] ss:$16 sps:$4 sm:$0xff]  }
 0x41c   : > { %v7679_v49 = vpop.f32.mrf.mxu1  ;;  %v7639_v2 = vpop.f32.mrf.mxu0  ;;  %7932 = vmatprep.subr.bf16.mxu0 %v10074_v6  ;;  %v10137_v29 = vld [vmem:[#allocation8 + $0xb6c] ss:$16 sps:$4 sm:$0xff]   ;;  %v10135_v46 = vld [vmem:[#allocation8 + $0xb68] ss:$16 sps:$4 sm:$0xff]  }
 0x41d   : > { %7972 = vmatpush1.bf16.msra.mxu1 %v10069_v42  ;;  %v10140_v52 = vld [vmem:[#allocation8 + $0x94c] ss:$16 sps:$4 sm:$0xff]   ;;  %v10138_v6 = vld [vmem:[#allocation8 + $0x948] ss:$16 sps:$4 sm:$0xff]  }
 0x41e   : > { %v7680_v13 = vpop.f32.mrf.mxu1  ;;  %7973 = vmatprep.subr.bf16.mxu1 %v10077_v25  ;;  %v10143_v42 = vld [vmem:[#allocation8 + $0xb4c] ss:$16 sps:$4 sm:$0xff]   ;;  %v10141_v27 = vld [vmem:[#allocation8 + $0xb48] ss:$16 sps:$4 sm:$0xff]  }
 0x41f   : > { %7933 = vmatpush1.bf16.msra.mxu0 %v10072_v34  ;;  %v10146_v63 = vld [vmem:[#allocation8 + $0x92c] ss:$16 sps:$4 sm:$0xff]   ;;  %v10144_v30 = vld [vmem:[#allocation8 + $0x928] ss:$16 sps:$4 sm:$0xff]  }
 0x420   : > { %7934 = vmatprep.subr.bf16.mxu0 %v10080_v36  ;;  %v10149_v25 = vld [vmem:[#allocation8 + $0xb2c] ss:$16 sps:$4 sm:$0xff]   ;;  %v10147_v49 = vld [vmem:[#allocation8 + $0xb28] ss:$16 sps:$4 sm:$0xff]  }
 0x421   : > { %7974 = vmatpush1.bf16.msra.mxu1 %v10075_v35  ;;  %v10152_v34 = vld [vmem:[#allocation8 + $0x90c] ss:$16 sps:$4 sm:$0xff]   ;;  %v10150_v35 = vld [vmem:[#allocation8 + $0x908] ss:$16 sps:$4 sm:$0xff]  }
 0x422   : > { %7975 = vmatprep.subr.bf16.mxu1 %v10083_v44  ;;  %v10155_v2 = vld [vmem:[#allocation8 + $0xb0c] ss:$16 sps:$4 sm:$0xff]   ;;  %v10153_v36 = vld [vmem:[#allocation8 + $0xb08] ss:$16 sps:$4 sm:$0xff]  }
 0x423   : > { %7935 = vmatpush1.bf16.msra.mxu0 %v10078_v61  ;;  %v10158_v13 = vld [vmem:[#allocation8 + $0xcec] ss:$16 sps:$4 sm:$0xff]   ;;  %v10156_v61 = vld [vmem:[#allocation8 + $0xce8] ss:$16 sps:$4 sm:$0xff]  }
 0x424   : > { %7936 = vmatprep.subr.bf16.mxu0 %v10086_v39  ;;  %v10161_v44 = vld [vmem:[#allocation8 + $0xeec] ss:$16 sps:$4 sm:$0xff]  }
 0x425   : > { %7976 = vmatpush1.bf16.msra.mxu1 %v10081_v37  ;;  %v10159_v37 = vld [vmem:[#allocation8 + $0xee8] ss:$16 sps:$4 sm:$0xff]   ;;  %v10164_v39 = vld [vmem:[#allocation8 + $0xccc] ss:$16 sps:$4 sm:$0xff]  }
 0x426   : > { %7977 = vmatprep.subr.bf16.mxu1 %v10089_v48 }
 0x427   : > { %7937 = vmatpush1.bf16.msra.mxu0 %v10084_v51  ;;  %v10167_v51 = vld [vmem:[#allocation8 + $0xecc] ss:$16 sps:$4 sm:$0xff]  }
 0x428   : > { %7938 = vmatprep.subr.bf16.mxu0 %v10092_v24 }
 0x429   : > { %7978 = vmatpush1.bf16.msra.mxu1 %v10087_v16 }
 0x42a   : > { %7979 = vmatprep.subr.bf16.mxu1 %v10095_v55  ;;  %v10162_v55 = vld [vmem:[#allocation8 + $0xcc8] ss:$16 sps:$4 sm:$0xff]  }
 0x42b   : > { %7939 = vmatpush1.bf16.msra.mxu0 %v10090_v57 }
 0x42c   : > { %7940 = vmatprep.subr.bf16.mxu0 %v10098_v33  ;;  %v10170_v33 = vld [vmem:[#allocation8 + $0xcac] ss:$16 sps:$4 sm:$0xff]  }
 0x42d   : > { %7980 = vmatpush1.bf16.msra.mxu1 %v10093_v50  ;;  %v10165_v50 = vld [vmem:[#allocation8 + $0xec8] ss:$16 sps:$4 sm:$0xff]  }
 0x42e   : > { %7981 = vmatprep.subr.bf16.mxu1 %v10101_v21 }
 0x42f   : > { %7941 = vmatpush1.bf16.msra.mxu0 %v10096_v22 }
 0x430   : > { %7942 = vmatprep.subr.bf16.mxu0 %v10104_v9 }
 0x431   : > { %7982 = vmatpush1.bf16.msra.mxu1 %v10099_v58 }
 0x432   : > { %7983 = vmatprep.subr.bf16.mxu1 %v10107_v56 }
 0x433   : > { %7943 = vmatpush1.bf16.msra.mxu0 %v10102_v8  ;;  %v10171_v8 = vld [vmem:[#allocation8 + $0xea8] ss:$16 sps:$4 sm:$0xff]  }
 0x434   : > { %7944 = vmatprep.subr.bf16.mxu0 %v10110_v62 }
 0x435   : > { %7984 = vmatpush1.bf16.msra.mxu1 %v10105_v10  ;;  %v10176_v10 = vld [vmem:[#allocation8 + $0xc8c] ss:$16 sps:$4 sm:$0xff]  }
 0x436   : > { %7985 = vmatprep.subr.bf16.mxu1 %v10113_v19  ;;  %v10177_v19 = vld [vmem:[#allocation8 + $0xe88] ss:$16 sps:$4 sm:$0xff]  }
 0x437   : > { %7945 = vmatpush2.bf16.msra.mxu0 %v10108_v54  ;;  %v10182_v54 = vld [vmem:[#allocation8 + $0xc6c] ss:$16 sps:$4 sm:$0xff]  }
 0x438   : > { %7946 = vmatprep.subr.bf16.mxu0 %v10116_v4  ;;  %v10180_v4 = vld [vmem:[#allocation8 + $0xc68] ss:$16 sps:$4 sm:$0xff]  }
 0x439   : > { %7986 = vmatpush2.bf16.msra.mxu1 %v10111_v28  ;;  %v10185_v28 = vld [vmem:[#allocation8 + $0xe6c] ss:$16 sps:$4 sm:$0xff]  }
 0x43a   : > { %7987 = vmatprep.subr.bf16.mxu1 %v10119_v7  ;;  %v10183_v7 = vld [vmem:[#allocation8 + $0xe68] ss:$16 sps:$4 sm:$0xff]  }
 0x43b   : > { %7947 = vmatpush2.bf16.msra.mxu0 %v10114_v60  ;;  %v10188_v60 = vld [vmem:[#allocation8 + $0xc4c] ss:$16 sps:$4 sm:$0xff]  }
 0x43c   : > { %7948 = vmatprep.subr.bf16.mxu0 %v10122_v53  ;;  %v10186_v53 = vld [vmem:[#allocation8 + $0xc48] ss:$16 sps:$4 sm:$0xff]  }
 0x43d   : > { %7988 = vmatpush2.bf16.msra.mxu1 %v10117_v59  ;;  %v10191_v59 = vld [vmem:[#allocation8 + $0xe4c] ss:$16 sps:$4 sm:$0xff]  }
 0x43e   : > { %7989 = vmatprep.subr.bf16.mxu1 %v10125_v38  ;;  %v10189_v38 = vld [vmem:[#allocation8 + $0xe48] ss:$16 sps:$4 sm:$0xff]  }
 0x43f   : > { %7949 = vmatpush2.bf16.msra.mxu0 %v10120_v5  ;;  %v10194_v5 = vld [vmem:[#allocation8 + $0xc2c] ss:$16 sps:$4 sm:$0xff]  }
 0x440   : > { %7950 = vmatprep.subr.bf16.mxu0 %v10128_v3  ;;  %v10192_v3 = vld [vmem:[#allocation8 + $0xc28] ss:$16 sps:$4 sm:$0xff]  }
 0x441   : > { %7990 = vmatpush2.bf16.msra.mxu1 %v10123_v12  ;;  %v10197_v12 = vld [vmem:[#allocation8 + $0xe2c] ss:$16 sps:$4 sm:$0xff]  }
 0x442   : > { %7991 = vmatprep.subr.bf16.mxu1 %v10131_v15  ;;  %v10195_v15 = vld [vmem:[#allocation8 + $0xe28] ss:$16 sps:$4 sm:$0xff]  }
 0x443   : > { %7951 = vmatpush2.bf16.msra.mxu0 %v10126_v18  ;;  %v10200_v18 = vld [vmem:[#allocation8 + $0xc0c] ss:$16 sps:$4 sm:$0xff]  }
 0x444   : > { %7952 = vmatprep.subr.bf16.mxu0 %v10134_v26  ;;  %v10198_v26 = vld [vmem:[#allocation8 + $0xc08] ss:$16 sps:$4 sm:$0xff]  }
 0x445   : > { %7992 = vmatpush2.bf16.msra.mxu1 %v10129_v20  ;;  %v10203_v20 = vld [vmem:[#allocation8 + $0xe0c] ss:$16 sps:$4 sm:$0xff]  }
 0x446   : > { %7993 = vmatprep.subr.bf16.mxu1 %v10137_v29  ;;  %v10201_v29 = vld [vmem:[#allocation8 + $0xe08] ss:$16 sps:$4 sm:$0xff]  }
 0x447   : > { %7953 = vmatpush2.bf16.msra.mxu0 %v10132_v31  ;;  %v10206_v31 = vld [vmem:[#allocation8 + $0xdec] ss:$16 sps:$4 sm:$0xff]  }
 0x448   : > { %7954 = vmatprep.subr.bf16.mxu0 %v10140_v52  ;;  %v10204_v52 = vld [vmem:[#allocation8 + $0xde8] ss:$16 sps:$4 sm:$0xff]  }
 0x449   : > { %7994 = vmatpush2.bf16.msra.mxu1 %v10135_v46  ;;  %v10209_v46 = vld [vmem:[#allocation8 + $0xfec] ss:$16 sps:$4 sm:$0xff]  }
 0x44a   : > { %7995 = vmatprep.subr.bf16.mxu1 %v10143_v42  ;;  %v10207_v42 = vld [vmem:[#allocation8 + $0xfe8] ss:$16 sps:$4 sm:$0xff]  }
 0x44b   : > { %7955 = vmatpush2.bf16.msra.mxu0 %v10138_v6  ;;  %v10212_v6 = vld [vmem:[#allocation8 + $0xdcc] ss:$16 sps:$4 sm:$0xff]  }
 0x44c   : > { %7956 = vmatprep.subr.bf16.mxu0 %v10146_v63  ;;  %v10210_v63 = vld [vmem:[#allocation8 + $0xdc8] ss:$16 sps:$4 sm:$0xff]  }
 0x44d   : > { %7996 = vmatpush2.bf16.msra.mxu1 %v10141_v27  ;;  %v10215_v27 = vld [vmem:[#allocation8 + $0xfcc] ss:$16 sps:$4 sm:$0xff]  }
 0x44e   : > { %7997 = vmatprep.subr.bf16.mxu1 %v10149_v25  ;;  %v10213_v25 = vld [vmem:[#allocation8 + $0xfc8] ss:$16 sps:$4 sm:$0xff]  }
 0x44f   : > { %7957 = vmatpush2.bf16.msra.mxu0 %v10144_v30  ;;  %v10218_v30 = vld [vmem:[#allocation8 + $0xdac] ss:$16 sps:$4 sm:$0xff]  }
 0x450   : > { %7958 = vmatprep.subr.bf16.mxu0 %v10152_v34  ;;  %v10216_v34 = vld [vmem:[#allocation8 + $0xda8] ss:$16 sps:$4 sm:$0xff]  }
 0x451   : > { %7998 = vmatpush2.bf16.msra.mxu1 %v10147_v49  ;;  %v10221_v49 = vld [vmem:[#allocation8 + $0xfac] ss:$16 sps:$4 sm:$0xff]  }
 0x452   : > { %7999 = vmatprep.subr.bf16.mxu1 %v10155_v2  ;;  %v10219_v2 = vld [vmem:[#allocation8 + $0xfa8] ss:$16 sps:$4 sm:$0xff]  }
 0x453   : > { %7959 = vmatpush2.bf16.msra.mxu0 %v10150_v35  ;;  %v10224_v35 = vld [vmem:[#allocation8 + $0xd8c] ss:$16 sps:$4 sm:$0xff]  }
 0x454   : > { %8010 = vmatprep.subr.bf16.mxu0 %v10158_v13  ;;  %v10222_v13 = vld [vmem:[#allocation8 + $0xd88] ss:$16 sps:$4 sm:$0xff]  }
 0x455   : > { %8000 = vmatpush2.bf16.msra.mxu1 %v10153_v36  ;;  %v10227_v36 = vld [vmem:[#allocation8 + $0xf8c] ss:$16 sps:$4 sm:$0xff]  }
 0x456   : > { %8051 = vmatprep.subr.bf16.mxu1 %v10161_v44  ;;  %v7716_v48 = vpop.f32.mrf.mxu0  ;;  %7961 = vmatmul.mubr.bf16.vlgmr.msra.gmra.mxu0 %v11048_v43  ;;  %v10225_v44 = vld [vmem:[#allocation8 + $0xf88] ss:$16 sps:$4 sm:$0xff]  }
 0x457   : > { %v7717_v16 = vadd.f32 %v7716_v48, %v11113_v45  ;;  %8011 = vmatpush1.bf16.msra.mxu0 %v10156_v61  ;;  %8042 = vmatprep.mubr.bf16.mxu0 %v11056_v17  ;;  %v10173_v45 = vld [vmem:[#allocation8 + $0xeac] ss:$16 sps:$4 sm:$0xff]   ;;  %v10168_v17 = vld [vmem:[#allocation8 + $0xca8] ss:$16 sps:$4 sm:$0xff]  }
 0x458   : > { %v7757_v24 = vpop.f32.mrf.mxu1  ;;  %8002 = vmatmul.mubr.bf16.vlgmr.msra.gmra.mxu1 %v11051_v41  ;;  %v7718_v57 = vpop.f32.mrf.mxu0  ;;  %8012 = vmatprep.subr.bf16.mxu0 %v10164_v39  ;;  %v10230_v61 = vld [vmem:[#allocation8 + $0xd6c] ss:$16 sps:$4 sm:$0xff]   ;;  %v10228_v39 = vld [vmem:[#allocation8 + $0xd68] ss:$16 sps:$4 sm:$0xff]  }
 0x459   : > { %8052 = vmatpush1.bf16.msra.mxu1 %v10159_v37  ;;  %v11123_v21 = vadd.f32 %v7757_v24, %v7717_v16  ;;  %8083 = vmatprep.mubr.bf16.mxu1 %v11078_v11  ;;  %v7719_v43 = vadd.f32 %v7718_v57, %v11117_v32  ;;  %v10179_v11 = vld [vmem:[#allocation8 + $0xe8c] ss:$16 sps:$4 sm:$0xff]   ;;  %v10174_v32 = vld [vmem:[#allocation8 + $0xc88] ss:$16 sps:$4 sm:$0xff]  }
 0x45a   : > { %v7759_v22 = vpop.f32.mrf.mxu1  ;;  %v7720_v58 = vpop.f32.mrf.mxu0  ;;  %8053 = vmatprep.subr.bf16.mxu1 %v10167_v51  ;;  %v10233_v37 = vld [vmem:[#allocation8 + $0xf6c] ss:$16 sps:$4 sm:$0xff]   ;;  %v10231_v48 = vld [vmem:[#allocation8 + $0xf68] ss:$16 sps:$4 sm:$0xff]  }
 0x45b   : > { %v11127_v41 = vadd.f32 %v7759_v22, %v7719_v43  ;;  %8013 = vmatpush1.bf16.msra.mxu0 %v10162_v55  ;;  %v10236_v51 = vld [vmem:[#allocation8 + $0xd4c] ss:$16 sps:$4 sm:$0xff]   ;;  %v10234_v24 = vld [vmem:[#allocation8 + $0xd48] ss:$16 sps:$4 sm:$0xff]  }
 0x45c   : > { %v7761_v9 = vpop.f32.mrf.mxu1  ;;  %v7721_v56 = vpop.f32.mrf.mxu0  ;;  %8014 = vmatprep.subr.bf16.mxu0 %v10170_v33  ;;  %v10239_v16 = vld [vmem:[#allocation8 + $0xf4c] ss:$16 sps:$4 sm:$0xff]   ;;  %v10237_v55 = vld [vmem:[#allocation8 + $0xf48] ss:$16 sps:$4 sm:$0xff]  }
 0x45d   : > { %8054 = vmatpush1.bf16.msra.mxu1 %v10165_v50  ;;  %v10242_v57 = vld [vmem:[#allocation8 + $0xd2c] ss:$16 sps:$4 sm:$0xff]   ;;  %v10240_v33 = vld [vmem:[#allocation8 + $0xd28] ss:$16 sps:$4 sm:$0xff]  }
 0x45e   : > { %v7762_v62 = vpop.f32.mrf.mxu1  ;;  %8055 = vmatprep.subr.bf16.mxu1 %v10173_v45  ;;  %v10245_v50 = vld [vmem:[#allocation8 + $0xf2c] ss:$16 sps:$4 sm:$0xff]   ;;  %v10243_v43 = vld [vmem:[#allocation8 + $0xf28] ss:$16 sps:$4 sm:$0xff]  }
 0x45f   : > { %8015 = vmatpush1.bf16.msra.mxu0 %v10168_v17  ;;  %v10248_v22 = vld [vmem:[#allocation8 + $0xd0c] ss:$16 sps:$4 sm:$0xff]   ;;  %v10246_v58 = vld [vmem:[#allocation8 + $0xd08] ss:$16 sps:$4 sm:$0xff]   ;;  %v10288_v17 = vld [vmem:[#allocation10] sm:$0xf] }
 0x460   : > { %8016 = vmatprep.subr.bf16.mxu0 %v10176_v10  ;;  %v10251_v45 = vld [vmem:[#allocation8 + $0xf0c] ss:$16 sps:$4 sm:$0xff]   ;;  %v10249_v9 = vld [vmem:[#allocation8 + $0xf08] ss:$16 sps:$4 sm:$0xff]   ;;  %v4867_v56 = vrot.slane %v10288_v17, %v10842_v14 }
 0x461   : > { %8056 = vmatpush1.bf16.msra.mxu1 %v10171_v8  ;;  %v4871_v8 = vrot.slane %v10288_v17, %v10845_v23 }
 0x462   : > { %8057 = vmatprep.subr.bf16.mxu1 %v10179_v11 }
 0x463   : > { %8017 = vmatpush1.bf16.msra.mxu0 %v10174_v32 }
 0x464   : > { %8018 = vmatprep.subr.bf16.mxu0 %v10182_v54 }
 0x465   : > { %8058 = vmatpush1.bf16.msra.mxu1 %v10177_v19 }
 0x466   : > { %8059 = vmatprep.subr.bf16.mxu1 %v10185_v28 }
 0x467   : > { %8019 = vmatpush1.bf16.msra.mxu0 %v10180_v4 }
 0x468   : > { %8020 = vmatprep.subr.bf16.mxu0 %v10188_v60 }
 0x469   : > { %8060 = vmatpush1.bf16.msra.mxu1 %v10183_v7 }
 0x46a   : > { %8061 = vmatprep.subr.bf16.mxu1 %v10191_v59 }
 0x46b   : > { %8021 = vmatpush1.bf16.msra.mxu0 %v10186_v53 }
 0x46c   : > { %8022 = vmatprep.subr.bf16.mxu0 %v10194_v5 }
 0x46d   : > { %8062 = vmatpush1.bf16.msra.mxu1 %v10189_v38 }
 0x46e   : > { %8063 = vmatprep.subr.bf16.mxu1 %v10197_v12 }
 0x46f   : > { %8023 = vmatpush1.bf16.msra.mxu0 %v10192_v3 }
 0x470   : > { %8024 = vmatprep.subr.bf16.mxu0 %v10200_v18 }
 0x471   : > { %8064 = vmatpush1.bf16.msra.mxu1 %v10195_v15 }
 0x472   : > { %8065 = vmatprep.subr.bf16.mxu1 %v10203_v20 }
 0x473   : > { %8025 = vmatpush1.bf16.msra.mxu0 %v10198_v26 }
 0x474   : > { %8026 = vmatprep.subr.bf16.mxu0 %v10206_v31 }
 0x475   : > { %8066 = vmatpush1.bf16.msra.mxu1 %v10201_v29 }
 0x476   : > { %8067 = vmatprep.subr.bf16.mxu1 %v10209_v46 }
 0x477   : > { %8027 = vmatpush2.bf16.msra.mxu0 %v10204_v52 }
 0x478   : > { %8028 = vmatprep.subr.bf16.mxu0 %v10212_v6 }
 0x479   : > { %8068 = vmatpush2.bf16.msra.mxu1 %v10207_v42 }
 0x47a   : > { %8069 = vmatprep.subr.bf16.mxu1 %v10215_v27 }
 0x47b   : > { %8029 = vmatpush2.bf16.msra.mxu0 %v10210_v63 }
 0x47c   : > { %8030 = vmatprep.subr.bf16.mxu0 %v10218_v30 }
 0x47d   : > { %8070 = vmatpush2.bf16.msra.mxu1 %v10213_v25 }
 0x47e   : > { %8071 = vmatprep.subr.bf16.mxu1 %v10221_v49 }
 0x47f   : > { %8031 = vmatpush2.bf16.msra.mxu0 %v10216_v34 }
 0x480   : > { %8032 = vmatprep.subr.bf16.mxu0 %v10224_v35 }
 0x481   : > { %8072 = vmatpush2.bf16.msra.mxu1 %v10219_v2 }
 0x482   : > { %8073 = vmatprep.subr.bf16.mxu1 %v10227_v36  ;;  %v10289_v36 = vld [vmem:[%s10775_s2 + $0x8] sm:$0xff] }
 0x483   : > { %8033 = vmatpush2.bf16.msra.mxu0 %v10222_v13  ;;  %v8093_v13 = vadd.f32 %v10289_v36, %v11127_v41  ;;  %v10292_v41 = vld [vmem:[%s10775_s2 + $0x18] sm:$0xff] }
 0x484   : > { %8034 = vmatprep.subr.bf16.mxu0 %v10230_v61 }
 0x485   : > { %8074 = vmatpush2.bf16.msra.mxu1 %v10225_v44 }
 0x486   : > { %8075 = vmatprep.subr.bf16.mxu1 %v10233_v37 }
 0x487   : > { %8035 = vmatpush2.bf16.msra.mxu0 %v10228_v39 }
 0x488   : > { %8036 = vmatprep.subr.bf16.mxu0 %v10236_v51 }
 0x489   : > { %8076 = vmatpush2.bf16.msra.mxu1 %v10231_v48  ;;  %v10290_v48 = vld [vmem:[%s10775_s2] sm:$0xff] }
 0x48a   : > { %8077 = vmatprep.subr.bf16.mxu1 %v10239_v16  ;;  %v8092_v51 = vadd.f32 %v10290_v48, %v11123_v21 }
 0x48b   : > { %8037 = vmatpush2.bf16.msra.mxu0 %v10234_v24 }
 0x48c   : > { %8038 = vmatprep.subr.bf16.mxu0 %v10242_v57 }
 0x48d   : > { %8078 = vmatpush2.bf16.msra.mxu1 %v10237_v55 }
 0x48e   : > { %8079 = vmatprep.subr.bf16.mxu1 %v10245_v50  ;;  %v10291_v50 = vld [vmem:[%s10775_s2 + $0x10] sm:$0xff] }
 0x48f   : > { %8039 = vmatpush2.bf16.msra.mxu0 %v10240_v33 }
 0x490   : > { %8040 = vmatprep.subr.bf16.mxu0 %v10248_v22 }
 0x491   : > { %8080 = vmatpush2.bf16.msra.mxu1 %v10243_v43 }
 0x492   : > { %8081 = vmatprep.subr.bf16.mxu1 %v10251_v45  ;;  %v8096_v45 = vadd.f32 %v8093_v13, %v8092_v51 }
 0x493   : > { %8041 = vmatpush2.bf16.msra.mxu0 %v10246_v58 }
 0x495   : > { %8082 = vmatpush2.bf16.msra.mxu1 %v10249_v9 }
 0x496   : > { %v7798_v10 = vpop.f32.mrf.mxu0  ;;  %8043 = vmatmul.mubr.bf16.vlgmr.msra.gmra.mxu0 %v11086_v0 }
 0x497   : > { %v7799_v62 = vadd.f32 %v7798_v10, %v4867_v56 }
 0x498   : > { %v7839_v11 = vpop.f32.mrf.mxu1  ;;  %8084 = vmatmul.mubr.bf16.vlgmr.msra.gmra.mxu1 %v11088_v1  ;;  %v7800_v32 = vpop.f32.mrf.mxu0 }
 0x499   : > { %v7840_v19 = vadd.f32 %v7839_v11, %v7799_v62  ;;  %v7801_v54 = vadd.f32 %v7800_v32, %v4871_v8 }
 0x49a   : > { %v7841_v28 = vpop.f32.mrf.mxu1  ;;  %v7802_v4 = vpop.f32.mrf.mxu0 }
 0x49b   : > { %v7842_v7 = vadd.f32 %v7841_v28, %v7801_v54 }
 0x49c   : > { %v7843_v60 = vpop.f32.mrf.mxu1  ;;  %v7803_v59 = vpop.f32.mrf.mxu0 }
 0x49e   : > { %v7844_v53 = vpop.f32.mrf.mxu1 }
 0x4d6   : > { %v7880_v38 = vpop.f32.mrf.mxu0 }
 0x4d7   : > { %v7881_v5 = vadd.f32 %v7880_v38, %v7840_v19 }
 0x4d8   : > { %v7921_v12 = vpop.f32.mrf.mxu1  ;;  %v7882_v3 = vpop.f32.mrf.mxu0 }
 0x4d9   : > { %v7922_v15 = vadd.f32 %v7921_v12, %v7881_v5  ;;  %v7883_v18 = vadd.f32 %v7882_v3, %v7842_v7  ;;  %v8123_v3 = vld [vmem:[#allocation11] sm:$0xf] }
 0x4da   : > { %v7923_v0 = vpop.f32.mrf.mxu1  ;;  %v7884_v20 = vpop.f32.mrf.mxu0 }
 0x4db   : > { %v7924_v26 = vadd.f32 %v7923_v0, %v7883_v18  ;;  %v8128_v18 = vrot.slane %v8123_v3, %v10824_v40  ;;  %v8132_v0 = vrot.slane %v8123_v3, %v10827_v47  ;;  %v8136_v20 = vrot.slane %v8123_v3, %v10842_v14 }
 0x4dc   : > { %v7925_v1 = vpop.f32.mrf.mxu1  ;;  %v7885_v29 = vpop.f32.mrf.mxu0 }
 0x4de   : > { %v7926_v31 = vpop.f32.mrf.mxu1 }
 0x516   : > { %v7962_v46 = vpop.f32.mrf.mxu0 }
 0x517   : > { %v7963_v49 = vadd.f32 %v7962_v46, %v7922_v15  ;;  %v8149_v15 = vld [vmem:[#allocation13] sm:$0xf] }
 0x518   : > { %v8003_v52 = vpop.f32.mrf.mxu1  ;;  %v7964_v42 = vpop.f32.mrf.mxu0  ;;  %v8154_v29 = vrot.slane %v8149_v15, %v10824_v40  ;;  %v8158_v31 = vrot.slane %v8149_v15, %v10827_v47  ;;  %v8162_v46 = vrot.slane %v8149_v15, %v10842_v14 }
 0x519   : > { %v7965_v34 = vadd.f32 %v7964_v42, %v7924_v26  ;;  %v8004_v2 = vadd.f32 %v8003_v52, %v7963_v49  ;;  %v8140_v26 = vrot.slane %v8123_v3, %v10845_v23  ;;  %v8166_v52 = vrot.slane %v8149_v15, %v10845_v23 }
 0x51a   : > { %v8005_v6 = vpop.f32.mrf.mxu1  ;;  %v7966_v27 = vpop.f32.mrf.mxu0 }
 0x51b   : > { %v8006_v44 = vadd.f32 %v8005_v6, %v7965_v34 }
 0x51c   : > { %v8007_v63 = vpop.f32.mrf.mxu1  ;;  %v7967_v25 = vpop.f32.mrf.mxu0 }
 0x51e   : > { %v8008_v30 = vpop.f32.mrf.mxu1 }
 0x556   : > { %v8044_v35 = vpop.f32.mrf.mxu0 }
 0x557   : > { %v8045_v61 = vadd.f32 %v8044_v35, %v8004_v2 }
 0x558   : > { %v8085_v37 = vpop.f32.mrf.mxu1  ;;  %v8046_v39 = vpop.f32.mrf.mxu0 }
 0x559   : > { %v8086_v16 = vadd.f32 %v8085_v37, %v8045_v61  ;;  %v8047_v24 = vadd.f32 %v8046_v39, %v8006_v44 }
 0x55a   : > { %v8087_v55 = vpop.f32.mrf.mxu1  ;;  %v8048_v57 = vpop.f32.mrf.mxu0 }
 0x55b   : > { %v8094_v33 = vadd.f32 %v10291_v50, %v8086_v16  ;;  %v8088_v43 = vadd.f32 %v8087_v55, %v8047_v24 }
 0x55c   : > { %v8089_v22 = vpop.f32.mrf.mxu1  ;;  %v8049_v58 = vpop.f32.mrf.mxu0 }
 0x55d   : > { %v8095_v17 = vadd.f32 %v10292_v41, %v8088_v43  ;;  %v8097_v56 = vadd.f32 %v8096_v45, %v8094_v33 }
 0x55e   : > { %v8090_v9 = vpop.f32.mrf.mxu1 }
 0x55f   : > { %v8098_v8 = vadd.f32 %v8097_v56, %v8095_v17 }
 0x561   : > { %8099 = vadd.xlane.f32.xlu0 %v8098_v8 }
 0x5ea   : > { %v8100_v10 = vpop.xlane.xlu0 %8099 }
 0x5eb   : > { %v8102_v62 = vmul.f32 0.001953125, %v8100_v10 }
 0x5ed   : > { %v8103_v11 = vsub.f32 %v8092_v51, %v8102_v62  ;;  %v8104_v21 = vsub.f32 %v8093_v13, %v8102_v62  ;;  %v8105_v32 = vsub.f32 %v8094_v33, %v8102_v62  ;;  %v8106_v19 = vsub.f32 %v8095_v17, %v8102_v62 }
 0x5ef   : > { %v8107_v54 = vmul.f32 %v8103_v11, %v8103_v11  ;;  %v8108_v28 = vmul.f32 %v8104_v21, %v8104_v21  ;;  %v8109_v4 = vmul.f32 %v8105_v32, %v8105_v32  ;;  %v8110_v60 = vmul.f32 %v8106_v19, %v8106_v19 }
 0x5f1   : > { %v8111_v7 = vadd.f32 %v8108_v28, %v8107_v54 }
 0x5f3   : > { %v8112_v59 = vadd.f32 %v8111_v7, %v8109_v4 }
 0x5f5   : > { %v8113_v53 = vadd.f32 %v8112_v59, %v8110_v60 }
 0x5f7   : > { %8114 = vadd.xlane.f32.xlu0 %v8113_v53 }
 0x680   : > { %v8115_v38 = vpop.xlane.xlu0 %8114 }
 0x681   : > { %v8116_v5 = vmul.f32 0.001953125, %v8115_v38 }
 0x683   : > { %v8117_v12 = vadd.f32 1e-05, %v8116_v5 }
 0x685   : > { %10284 = vrsqrt.f32 %v8117_v12 }
 0x692   : > { %v10285_v1 = vpop.eup %10284 }
 0x693   : > { %v8119_v42 = vmul.f32 %v10285_v1, %v8103_v11  ;;  %v8120_v6 = vmul.f32 %v10285_v1, %v8104_v21  ;;  %v8121_v27 = vmul.f32 %v10285_v1, %v8105_v32  ;;  %v8122_v63 = vmul.f32 %v10285_v1, %v8106_v19 }
 0x695   : > { %v8145_v25 = vmul.f32 %v8128_v18, %v8119_v42  ;;  %v8146_v30 = vmul.f32 %v8132_v0, %v8120_v6  ;;  %v8147_v49 = vmul.f32 %v8136_v20, %v8121_v27  ;;  %v8148_v40 = vmul.f32 %v8140_v26, %v8122_v63 }
 0x697   : > { %v8171_v34 = vadd.f32 %v8154_v29, %v8145_v25  ;;  %v8172_v47 = vadd.f32 %v8158_v31, %v8146_v30  ;;  %v8173_v2 = vadd.f32 %v8162_v46, %v8147_v49  ;;  %v8174_v14 = vadd.f32 %v8166_v52, %v8148_v40 }
 0x699   : > { %8175 = vst [vmem:[%s373_s18] sm:$0xff] %v8171_v34  ;;  %8176 = vst [vmem:[%s373_s18 + $0x8] sm:$0xff] %v8172_v47 }
 0x69a   : > { %8177 = vst [vmem:[%s373_s18 + $0x10] sm:$0xff] %v8173_v2  ;;  %8178 = vst [vmem:[%s373_s18 + $0x18] sm:$0xff] %v8174_v14 }
 0x69b   : > { %10490 = shalt.err (!%p10487_p6)
}
 0x69c   : > { %s10491_s17 = scalar_lea.hbm %s11153_s15, 512  ;;  %s10495_s22 = scalar_lea.hbm %s11203_s7, 1024 }
 0x69d   : > { %p10492_p5 = scmp.ne.s32.totalorder %s11153_s15, %s10491_s17  ;;  %p10496_p3 = scmp.lt.s32.totalorder %s11153_s15, %s11203_s7 }
 0x69e   : > { %p10497_p10 = scmp.lt.s32.totalorder %s10495_s22, %s10491_s17 }
 0x69f   : > { %p10493_p8 = pnand %p10492_p5, %p11229_p13 }
 0x6a0   : > { %p10498_p11 = por %p10497_p10, %p10496_p3 }
 0x6a1   : > { %p10494_p9 = pneg %p10493_p8 }
 0x6a3   : > { %p10499_p12 = pnand %p10498_p11, %p10494_p9 }
 0x6a5   : > { %10502 = shalt.err (!%p10499_p12)
}
 0x6a6   : > { %9399 = dma.vmem_to_hbm [thread:$0]  (%p11229_p13), %s11155_s29, 512, %s11153_s15, %s8180_s30  }
 0x6a7 PF: > { %s8206_s8 = sand.u32 1, %s10541_s24   ;;  %p11230_p0 = scmp.ne.s32.totalorder %s11219_s13, 0 }
 0x6a8   : > { %p11231_p2 = scmp.ge.s32.totalorder %s10553_s27, 2  ;;  %s8207_s18 = scalar_lea.sflag [#allocation4], %s8206_s8 }
 0x6aa   : > { %p9425_p1 = pnand %p11231_p2, %p11230_p0 }
 0x6ac   : > { %p9426_p4 = pneg %p9425_p1 }
 0x6ae   : > { %10536 = dma.done.wait (%p9426_p4), %s8207_s18, 512  }
 0x6af   : > { %10538 = vsyncadd (%p9426_p4), %s8207_s18, 4294966784  ;;  %p23_p7 = scmp.ge.s32.totalorder %s10706_s11, 4   ;;  %s11232_s24 = smov %s10545_s25 }
 0x6b0   : > { %s11233_s25 = smov %s10549_s26  ;;  %s11234_s26 = smov %s10717_s16 }
 0x6b1   : > { %s11235_s27 = smov %s10706_s11  ;;  %25 = sbr.rel (!%p23_p7) target bundleno = 11 (0xb), region = 117 }
 0x6b6   :  { %8212 = vsyncpa [#allocation3], 1 }
 0x6b7   :  { %8214 = vsyncpa [#allocation3 + $0x1], 1 }
 0x6b8   :  { %8215 = vsyncpa [#allocation6], 1 }
 0x6b9   :  { %8216 = vsyncpa [#allocation9], 1 }
 0x6ba   :  { %8217 = vsyncpa [#allocation12], 1 }
 0x6bb   :  { %8218 = vsyncpa [#allocation4], 1 }
 0x6bc   :  { %8220 = vsyncpa [#allocation4 + $0x1], 1 }

</bundles_post_ra>
